<compile_context>
chip_gen: v5e
topology: v5e:2x2
jax: 0.10.0
libtpu: 0.0.40
codegen_flags: <defaults>
</compile_context>

<pallas_src>
import jax
import jax.numpy as jnp
from jax.experimental import pallas as pl
from jax.experimental.pallas import tpu as pltpu

N = 50
N_HALF = N // 2                  # 25
HALF_DIM = (N + 1) * N_HALF      # 51 * 25 = 1275
HALF_PAD = 1280                  # 10 * 128, lane-dense
LATENT = 10
PAD_LAT = 128                    # lane-dense padding for the 50/20/10-wide dims
LEAKY_SLOPE = 0.01
BN_EPS = 1e-5
SUBLANE = 8
MAX_TILE_B = 256                 # fills MXU-M (v6e/v7x); fits v5e's 16 MiB scoped VMEM


def _round_up(x, m):
    return ((x + m - 1) // m) * m


# ----------------------------------------------------------------------------
# rearange_to_half / rearange_to_full as single precomputed gathers (JAX glue)
# ----------------------------------------------------------------------------
def _half_gather_idx():
    """(51*25,) flat indices into an (N,N) matrix: H[i,j] = C[idx]."""
    i = jnp.arange(N + 1)[:, None]
    j = jnp.arange(N_HALF)[None, :]
    lower = (i >= 1) & (j <= i - 1)          # L1 branch; else flipped L2 branch
    r = jnp.where(lower, i - 1, N - 1 - i)
    c = jnp.where(lower, j, N - 1 - j)
    return (r * N + c).reshape(-1)


def _full_gather_idx():
    """(N*N,) flat indices into a (51,25) half matrix: X[r,c] = H[idx]
    (train_cholesky=False: symmetrized L + tril(.,-1)^T)."""
    r = jnp.arange(N)[:, None]
    c = jnp.arange(N)[None, :]
    hi = jnp.maximum(r, c)
    lo = jnp.minimum(r, c)
    left = lo < N_HALF
    src_i = jnp.where(left, hi + 1, N - 1 - hi)
    src_j = jnp.where(left, lo, N - 1 - lo)
    return (src_i * N_HALF + src_j).reshape(-1)


# ----------------------------------------------------------------------------
# Kernel math helpers
# ----------------------------------------------------------------------------
def _dense(v, w, b):
    # bf16 x bf16 on the MXU, f32 accumulation; f32 bias add.
    return jnp.dot(v.astype(jnp.bfloat16), w,
                   preferred_element_type=jnp.float32) + b


def _lrelu(v):
    return jnp.where(v > 0, v, LEAKY_SLOPE * v)


def _bn_apply(v, mean, rstd, gamma, beta):
    return (v - mean) * rstd * gamma + beta


# ----------------------------------------------------------------------------
# Pallas kernels (batch-tiled; weights resident via constant index_maps)
# ----------------------------------------------------------------------------
def enc_front_kernel(x_ref, ew1, eb1, ew2, eb2, ew3, eb3, ew4, eb4, h4_ref):
    """Encoder 1280 -> 750 -> 200 -> 50 -> 50(padded 128), pre-BN output."""
    h = _lrelu(_dense(x_ref[...], ew1[...], eb1[...]))        # (tb, 750)
    h = _lrelu(_dense(h, ew2[...], eb2[...]))                 # (tb, 200)
    h = _lrelu(_dense(h, ew3[...], eb3[...]))                 # (tb, 50)
    h4_ref[...] = _dense(h, ew4[...], eb4[...])               # (tb, 128) pre-BN


def latent_kernel(h4_ref, eps_ref, mean_ref, rstd_ref, g_ref, b_ref,
                  wmu, bmu, wvar, bvar, dw1, db1,
                  mu_ref, lv_ref, d1_ref):
    """Encoder BN + lrelu, mu/log_var heads, reparameterize, decoder h1 (pre-BN)."""
    h = _lrelu(_bn_apply(h4_ref[...], mean_ref[...], rstd_ref[...],
                         g_ref[...], b_ref[...]))             # (tb, 128)
    mu = jnp.maximum(_dense(h, wmu[...], bmu[...]), 0.0)      # (tb, 128), cols>=10 are 0
    lv = jnp.maximum(_dense(h, wvar[...], bvar[...]), 0.0)
    z = mu + eps_ref[...] * jnp.exp(0.5 * lv)                 # padded cols stay 0 (eps pad = 0)
    mu_ref[...] = mu
    lv_ref[...] = lv
    d1_ref[...] = _dense(z, dw1[...], db1[...])               # (tb, 128) pre-BN


def dec_back_kernel(d1_ref, mean_ref, rstd_ref, g_ref, b_ref,
                    dw2, db2, dw3, db3, dw4, db4, dwo, dbo, out_ref):
    """Decoder BN + lrelu, 50 -> 50 -> 200 -> 750 -> 1280."""
    d = _lrelu(_bn_apply(d1_ref[...], mean_ref[...], rstd_ref[...],
                         g_ref[...], b_ref[...]))             # (tb, 128)
    d = _lrelu(_dense(d, dw2[...], db2[...]))                 # (tb, 50)
    d = _lrelu(_dense(d, dw3[...], db3[...]))                 # (tb, 200)
    d = _lrelu(_dense(d, dw4[...], db4[...]))                 # (tb, 750)
    out_ref[...] = _dense(d, dwo[...], dbo[...])              # (tb, 1280)


# ----------------------------------------------------------------------------
# Parameter setup
# ----------------------------------------------------------------------------
def init_params(key):
    """PyTorch-style Linear init W:(in,out) ~ U(-1/sqrt(in), 1/sqrt(in));
    BatchNorm gamma=1, beta=0 (fresh-module defaults)."""
    layer_dims = [
        ("ew1", HALF_DIM, 750), ("ew2", 750, 200), ("ew3", 200, 50),
        ("ew4", 50, 50), ("wmu", 50, LATENT), ("wvar", 50, LATENT),
        ("dw1", LATENT, 50), ("dw2", 50, 50), ("dw3", 50, 200),
        ("dw4", 200, 750), ("dwo", 750, HALF_DIM),
    ]
    params = {}
    for name, fan_in, fan_out in layer_dims:
        key, kw, kb = jax.random.split(key, 3)
        bound = float(fan_in) ** -0.5
        params[name] = jax.random.uniform(kw, (fan_in, fan_out), jnp.float32,
                                          -bound, bound)
        params[name.replace("w", "b", 1)] = jax.random.uniform(
            kb, (1, fan_out), jnp.float32, -bound, bound)
    params["ebn_g"] = jnp.ones((1, 50), jnp.float32)
    params["ebn_b"] = jnp.zeros((1, 50), jnp.float32)
    params["dbn_g"] = jnp.ones((1, 50), jnp.float32)
    params["dbn_b"] = jnp.zeros((1, 50), jnp.float32)
    return params


def prepare_params(p):
    """One-time layout prep: zero-pad every HBM-touching feature dim to a
    lane-dense multiple of 128 and cast weight matrices to bf16."""
    bf = jnp.bfloat16

    def pad_to(a, rows, cols):
        return jnp.pad(a, ((0, rows - a.shape[0]), (0, cols - a.shape[1])))

    q = {}
    # Encoder front.
    q["ew1"] = pad_to(p["ew1"], HALF_PAD, 750).astype(bf)     # (1280, 750)
    q["eb1"] = p["eb1"]
    q["ew2"] = p["ew2"].astype(bf)
    q["eb2"] = p["eb2"]
    q["ew3"] = p["ew3"].astype(bf)
    q["eb3"] = p["eb3"]
    q["ew4"] = pad_to(p["ew4"], 50, PAD_LAT).astype(bf)       # (50, 128)
    q["eb4"] = pad_to(p["eb4"], 1, PAD_LAT)
    # Latent block (pads are zeros -> padded lanes stay exactly 0 end-to-end).
    q["ebn_g"] = pad_to(p["ebn_g"], 1, PAD_LAT)
    q["ebn_b"] = pad_to(p["ebn_b"], 1, PAD_LAT)
    q["wmu"] = pad_to(p["wmu"], PAD_LAT, PAD_LAT).astype(bf)  # (128, 128)
    q["bmu"] = pad_to(p["bmu"], 1, PAD_LAT)
    q["wvar"] = pad_to(p["wvar"], PAD_LAT, PAD_LAT).astype(bf)
    q["bvar"] = pad_to(p["bvar"], 1, PAD_LAT)
    q["dw1"] = pad_to(p["dw1"], PAD_LAT, PAD_LAT).astype(bf)  # (128, 128)
    q["db1"] = pad_to(p["db1"], 1, PAD_LAT)
    # Decoder back.
    q["dbn_g"] = pad_to(p["dbn_g"], 1, PAD_LAT)
    q["dbn_b"] = pad_to(p["dbn_b"], 1, PAD_LAT)
    q["dw2"] = pad_to(p["dw2"], PAD_LAT, 50).astype(bf)       # (128, 50)
    q["db2"] = p["db2"]
    q["dw3"] = p["dw3"].astype(bf)
    q["db3"] = p["db3"]
    q["dw4"] = p["dw4"].astype(bf)
    q["db4"] = p["db4"]
    q["dwo"] = pad_to(p["dwo"], 750, HALF_PAD).astype(bf)     # (750, 1280)
    q["dbo"] = pad_to(p["dbo"], 1, HALF_PAD)
    return q


# ----------------------------------------------------------------------------
# BlockSpec helpers
# ----------------------------------------------------------------------------
def _batch_spec(tile_b, width):
    return pl.BlockSpec((tile_b, width), lambda i: (i, 0))


def _resident_spec(arr):
    # Constant block index -> DMA'd once, VMEM-resident across all grid steps.
    return pl.BlockSpec(arr.shape, lambda i: (0, 0))


# ----------------------------------------------------------------------------
# Forward wrapper
# ----------------------------------------------------------------------------
def network_vae_quad_forward(prepared, X, eps):
    """X: (B, 50, 50) float32, eps: (B, 10) standard normal noise."""
    p = prepared
    B = X.shape[0]

    # Batch tiling: largest tile <= MAX_TILE_B, multiple of 8 sublanes, minimal pad.
    n_tiles = -(-B // MAX_TILE_B)
    tile_b = _round_up(-(-B // n_tiles), SUBLANE)
    B_pad = tile_b * n_tiles

    # rearange_to_half + flatten as a single gather (layout glue, plain JAX).
    x_flat = X.reshape(B, N * N)[:, _half_gather_idx()]         # (B, 1275)
    x_flat = jnp.pad(x_flat, ((0, B_pad - B), (0, HALF_PAD - HALF_DIM)))
    eps_p = jnp.pad(eps.astype(jnp.float32),
                    ((0, B_pad - B), (0, PAD_LAT - LATENT)))    # (B_pad, 128)

    parallel = pltpu.CompilerParams(dimension_semantics=("parallel",))

    # ---- Pass 1: encoder front (heavy matmuls), outputs pre-BN h4 ----
    enc_w = [p["ew1"], p["eb1"], p["ew2"], p["eb2"],
             p["ew3"], p["eb3"], p["ew4"], p["eb4"]]
    h4_pre = pl.pallas_call(
        enc_front_kernel,
        grid=(n_tiles,),
        in_specs=[_batch_spec(tile_b, HALF_PAD)]
                 + [_resident_spec(w) for w in enc_w],
        out_specs=_batch_spec(tile_b, PAD_LAT),
        out_shape=jax.ShapeDtypeStruct((B_pad, PAD_LAT), jnp.float32),
        compiler_params=parallel,
    )(x_flat, *enc_w)

    # Encoder BN stats over real rows only (training-mode, biased, centered var).
    enc_valid = h4_pre[:B]
    enc_mean = jnp.mean(enc_valid, axis=0, keepdims=True)
    enc_rstd = jax.lax.rsqrt(jnp.var(enc_valid, axis=0, keepdims=True) + BN_EPS)

    # ---- Pass 2: BN + heads + reparameterize + decoder h1 (pre-BN) ----
    mid_w = [p["ebn_g"], p["ebn_b"], p["wmu"], p["bmu"],
             p["wvar"], p["bvar"], p["dw1"], p["db1"]]
    mu_pad, lv_pad, d1_pre = pl.pallas_call(
        latent_kernel,
        grid=(n_tiles,),
        in_specs=[_batch_spec(tile_b, PAD_LAT), _batch_spec(tile_b, PAD_LAT),
                  _resident_spec(enc_mean), _resident_spec(enc_rstd)]
                 + [_resident_spec(w) for w in mid_w],
        out_specs=(_batch_spec(tile_b, PAD_LAT),) * 3,
        out_shape=(jax.ShapeDtypeStruct((B_pad, PAD_LAT), jnp.float32),) * 3,
        compiler_params=parallel,
    )(h4_pre, eps_p, enc_mean, enc_rstd, *mid_w)

    # Decoder BN stats.
    dec_valid = d1_pre[:B]
    dec_mean = jnp.mean(dec_valid, axis=0, keepdims=True)
    dec_rstd = jax.lax.rsqrt(jnp.var(dec_valid, axis=0, keepdims=True) + BN_EPS)

    # ---- Pass 3: decoder back (heavy matmuls) ----
    dec_w = [p["dbn_g"], p["dbn_b"], p["dw2"], p["db2"], p["dw3"], p["db3"],
             p["dw4"], p["db4"], p["dwo"], p["dbo"]]
    out_flat = pl.pallas_call(
        dec_back_kernel,
        grid=(n_tiles,),
        in_specs=[_batch_spec(tile_b, PAD_LAT),
                  _resident_spec(dec_mean), _resident_spec(dec_rstd)]
                 + [_resident_spec(w) for w in dec_w],
        out_specs=_batch_spec(tile_b, HALF_PAD),
        out_shape=jax.ShapeDtypeStruct((B_pad, HALF_PAD), jnp.float32),
        compiler_params=parallel,
    )(d1_pre, dec_mean, dec_rstd, *dec_w)

    # Drop padding; rearange_to_full as a single gather.
    mu = mu_pad[:B, :LATENT]
    log_var = lv_pad[:B, :LATENT]
    out_valid = out_flat[:B, :HALF_DIM]                         # (B, 1275)
    X_out = out_valid[:, _full_gather_idx()].reshape(B, N, N)   # (B, 50, 50)
    return X_out, mu, log_var


# ----------------------------------------------------------------------------
# Pure-JAX reference (same bf16-stored weights / same math) for verification
# ----------------------------------------------------------------------------
def reference_forward(prepared, X, eps):
    p = prepared
    B = X.shape[0]
    x = X.reshape(B, N * N)[:, _half_gather_idx()]
    x = jnp.pad(x, ((0, 0), (0, HALF_PAD - HALF_DIM)))
    eps_p = jnp.pad(eps.astype(jnp.float32), ((0, 0), (0, PAD_LAT - LATENT)))

    h = _lrelu(_dense(x, p["ew1"], p["eb1"]))
    h = _lrelu(_dense(h, p["ew2"], p["eb2"]))
    h = _lrelu(_dense(h, p["ew3"], p["eb3"]))
    h4 = _dense(h, p["ew4"], p["eb4"])
    mean = jnp.mean(h4, axis=0, keepdims=True)
    rstd = jax.lax.rsqrt(jnp.var(h4, axis=0, keepdims=True) + BN_EPS)
    h = _lrelu(_bn_apply(h4, mean, rstd, p["ebn_g"], p["ebn_b"]))

    mu = jnp.maximum(_dense(h, p["wmu"], p["bmu"]), 0.0)
    lv = jnp.maximum(_dense(h, p["wvar"], p["bvar"]), 0.0)
    z = mu + eps_p * jnp.exp(0.5 * lv)

    d1 = _dense(z, p["dw1"], p["db1"])
    mean = jnp.mean(d1, axis=0, keepdims=True)
    rstd = jax.lax.rsqrt(jnp.var(d1, axis=0, keepdims=True) + BN_EPS)
    d = _lrelu(_bn_apply(d1, mean, rstd, p["dbn_g"], p["dbn_b"]))
    d = _lrelu(_dense(d, p["dw2"], p["db2"]))
    d = _lrelu(_dense(d, p["dw3"], p["db3"]))
    d = _lrelu(_dense(d, p["dw4"], p["db4"]))
    out = _dense(d, p["dwo"], p["dbo"])[:, :HALF_DIM]
    X_out = out[:, _full_gather_idx()].reshape(B, N, N)
    return X_out, mu[:, :LATENT], lv[:, :LATENT]


if __name__ == "__main__":
    key = jax.random.PRNGKey(0)
    k_params, k_x, k_eps = jax.random.split(key, 3)

    B = 4
    params = init_params(k_params)
    prepared = prepare_params(params)

    # Symmetric covariance-like input, as the module expects.
    A = jax.random.normal(k_x, (B, N, N), jnp.float32)
    X = 0.5 * (A + jnp.transpose(A, (0, 2, 1)))
    eps = jax.random.normal(k_eps, (B, LATENT), jnp.float32)  # reparameterize noise

    fwd = jax.jit(network_vae_quad_forward)
    X_out, mu, log_var = fwd(prepared, X, eps)
    jax.block_until_ready((X_out, mu, log_var))

    # Verify the Pallas path against a pure-JAX reference that uses the SAME
    # prepared (bf16) weights -- checks kernel plumbing / two-pass BN / gathers.
    # (bf16-vs-f32 weight quantization vs the PyTorch module is a documented
    #  deliberate trade-off, not checked here.)
    X_ref, mu_ref, lv_ref = jax.jit(reference_forward)(prepared, X, eps)
    jax.block_until_ready((X_ref, mu_ref, lv_ref))

    assert X_out.shape == (B, N, N)
    assert mu.shape == (B, LATENT) and log_var.shape == (B, LATENT)
    assert not bool(jnp.any(jnp.isnan(X_out)))
    assert not bool(jnp.any(jnp.isnan(mu)))
    assert not bool(jnp.any(jnp.isnan(log_var)))
    assert bool(jnp.allclose(X_out, X_ref, atol=2e-2, rtol=2e-2))
    assert bool(jnp.allclose(mu, mu_ref, atol=2e-2, rtol=2e-2))
    assert bool(jnp.allclose(log_var, lv_ref, atol=2e-2, rtol=2e-2))
    print("KERNEL_OK")
</pallas_src>

<mosaic_0001>
module attributes {stable_mosaic.version = 11 : i64} {
  func.func @enc_front_kernel(%arg0: i32, %arg1: memref<8x1280xf32, #tpu.memory_space<vmem>>, %arg2: memref<1280x750xbf16, #tpu.memory_space<vmem>>, %arg3: memref<1x750xf32, #tpu.memory_space<vmem>>, %arg4: memref<750x200xbf16, #tpu.memory_space<vmem>>, %arg5: memref<1x200xf32, #tpu.memory_space<vmem>>, %arg6: memref<200x50xbf16, #tpu.memory_space<vmem>>, %arg7: memref<1x50xf32, #tpu.memory_space<vmem>>, %arg8: memref<50x128xbf16, #tpu.memory_space<vmem>>, %arg9: memref<1x128xf32, #tpu.memory_space<vmem>>, %arg10: memref<8x128xf32, #tpu.memory_space<vmem>>) attributes {dimension_semantics = [#tpu.dimension_semantics<parallel>], iteration_bounds = array<i64: 1>, scalar_prefetch = 0 : i64, scratch_operands = 0 : i64, tpu.core_type = #tpu.core_type<tc>, window_params = [{transform_indices = @transform_0, window_bounds = array<i64: 8, 1280>}, {pipeline_mode = #tpu.pipeline_mode<synchronous>, transform_indices = @transform_1, window_bounds = array<i64: 1280, 750>}, {pipeline_mode = #tpu.pipeline_mode<synchronous>, transform_indices = @transform_2, window_bounds = array<i64: 1, 750>}, {pipeline_mode = #tpu.pipeline_mode<synchronous>, transform_indices = @transform_3, window_bounds = array<i64: 750, 200>}, {pipeline_mode = #tpu.pipeline_mode<synchronous>, transform_indices = @transform_4, window_bounds = array<i64: 1, 200>}, {pipeline_mode = #tpu.pipeline_mode<synchronous>, transform_indices = @transform_5, window_bounds = array<i64: 200, 50>}, {pipeline_mode = #tpu.pipeline_mode<synchronous>, transform_indices = @transform_6, window_bounds = array<i64: 1, 50>}, {pipeline_mode = #tpu.pipeline_mode<synchronous>, transform_indices = @transform_7, window_bounds = array<i64: 50, 128>}, {pipeline_mode = #tpu.pipeline_mode<synchronous>, transform_indices = @transform_8, window_bounds = array<i64: 1, 128>}, {transform_indices = @transform_9, window_bounds = array<i64: 8, 128>}]} {
    %c0 = arith.constant 0 : index
    %c0_0 = arith.constant 0 : index
    %0 = vector.load %arg1[%c0, %c0_0] : memref<8x1280xf32, #tpu.memory_space<vmem>>, vector<8x1280xf32>
    %c0_1 = arith.constant 0 : index
    %c0_2 = arith.constant 0 : index
    %1 = vector.load %arg2[%c0_1, %c0_2] : memref<1280x750xbf16, #tpu.memory_space<vmem>>, vector<1280x750xbf16>
    %c0_3 = arith.constant 0 : index
    %c0_4 = arith.constant 0 : index
    %2 = vector.load %arg3[%c0_3, %c0_4] : memref<1x750xf32, #tpu.memory_space<vmem>>, vector<1x750xf32>
    %3 = arith.truncf %0 : vector<8x1280xf32> to vector<8x1280xbf16>
    %cst = arith.constant dense<0.000000e+00> : vector<8x750xf32>
    %4 = tpu.matmul %3, %1, %cst {dimension_numbers = #tpu.dot_dimension_numbers<[1], [0], [0], [1], [0, 0, 1, 1], [], []>} : vector<8x1280xbf16>, vector<1280x750xbf16>, vector<8x750xf32> -> vector<8x750xf32>
    %5 = vector.broadcast %2 : vector<1x750xf32> to vector<8x750xf32>
    %6 = arith.addf %4, %5 : vector<8x750xf32>
    %cst_5 = arith.constant 0.000000e+00 : f32
    %7 = vector.broadcast %cst_5 : f32 to vector<8x750xf32>
    %8 = arith.cmpf ogt, %6, %7 : vector<8x750xf32>
    %cst_6 = arith.constant 0.00999999977 : f32
    %9 = vector.broadcast %cst_6 : f32 to vector<8x750xf32>
    %10 = arith.mulf %9, %6 : vector<8x750xf32>
    %11 = arith.select %8, %6, %10 : vector<8x750xi1>, vector<8x750xf32>
    %c0_7 = arith.constant 0 : index
    %c0_8 = arith.constant 0 : index
    %12 = vector.load %arg4[%c0_7, %c0_8] : memref<750x200xbf16, #tpu.memory_space<vmem>>, vector<750x200xbf16>
    %c0_9 = arith.constant 0 : index
    %c0_10 = arith.constant 0 : index
    %13 = vector.load %arg5[%c0_9, %c0_10] : memref<1x200xf32, #tpu.memory_space<vmem>>, vector<1x200xf32>
    %14 = arith.truncf %11 : vector<8x750xf32> to vector<8x750xbf16>
    %cst_11 = arith.constant dense<0.000000e+00> : vector<8x200xf32>
    %15 = tpu.matmul %14, %12, %cst_11 {dimension_numbers = #tpu.dot_dimension_numbers<[1], [0], [0], [1], [0, 0, 1, 1], [], []>} : vector<8x750xbf16>, vector<750x200xbf16>, vector<8x200xf32> -> vector<8x200xf32>
    %16 = vector.broadcast %13 : vector<1x200xf32> to vector<8x200xf32>
    %17 = arith.addf %15, %16 : vector<8x200xf32>
    %cst_12 = arith.constant 0.000000e+00 : f32
    %18 = vector.broadcast %cst_12 : f32 to vector<8x200xf32>
    %19 = arith.cmpf ogt, %17, %18 : vector<8x200xf32>
    %cst_13 = arith.constant 0.00999999977 : f32
    %20 = vector.broadcast %cst_13 : f32 to vector<8x200xf32>
    %21 = arith.mulf %20, %17 : vector<8x200xf32>
    %22 = arith.select %19, %17, %21 : vector<8x200xi1>, vector<8x200xf32>
    %c0_14 = arith.constant 0 : index
    %c0_15 = arith.constant 0 : index
    %23 = vector.load %arg6[%c0_14, %c0_15] : memref<200x50xbf16, #tpu.memory_space<vmem>>, vector<200x50xbf16>
    %c0_16 = arith.constant 0 : index
    %c0_17 = arith.constant 0 : index
    %24 = vector.load %arg7[%c0_16, %c0_17] : memref<1x50xf32, #tpu.memory_space<vmem>>, vector<1x50xf32>
    %25 = arith.truncf %22 : vector<8x200xf32> to vector<8x200xbf16>
    %cst_18 = arith.constant dense<0.000000e+00> : vector<8x50xf32>
    %26 = tpu.matmul %25, %23, %cst_18 {dimension_numbers = #tpu.dot_dimension_numbers<[1], [0], [0], [1], [0, 0, 1, 1], [], []>} : vector<8x200xbf16>, vector<200x50xbf16>, vector<8x50xf32> -> vector<8x50xf32>
    %27 = vector.broadcast %24 : vector<1x50xf32> to vector<8x50xf32>
    %28 = arith.addf %26, %27 : vector<8x50xf32>
    %cst_19 = arith.constant 0.000000e+00 : f32
    %29 = vector.broadcast %cst_19 : f32 to vector<8x50xf32>
    %30 = arith.cmpf ogt, %28, %29 : vector<8x50xf32>
    %cst_20 = arith.constant 0.00999999977 : f32
    %31 = vector.broadcast %cst_20 : f32 to vector<8x50xf32>
    %32 = arith.mulf %31, %28 : vector<8x50xf32>
    %33 = arith.select %30, %28, %32 : vector<8x50xi1>, vector<8x50xf32>
    %c0_21 = arith.constant 0 : index
    %c0_22 = arith.constant 0 : index
    %34 = vector.load %arg8[%c0_21, %c0_22] : memref<50x128xbf16, #tpu.memory_space<vmem>>, vector<50x128xbf16>
    %c0_23 = arith.constant 0 : index
    %c0_24 = arith.constant 0 : index
    %35 = vector.load %arg9[%c0_23, %c0_24] : memref<1x128xf32, #tpu.memory_space<vmem>>, vector<1x128xf32>
    %36 = arith.truncf %33 : vector<8x50xf32> to vector<8x50xbf16>
    %cst_25 = arith.constant dense<0.000000e+00> : vector<8x128xf32>
    %37 = tpu.matmul %36, %34, %cst_25 {dimension_numbers = #tpu.dot_dimension_numbers<[1], [0], [0], [1], [0, 0, 1, 1], [], []>} : vector<8x50xbf16>, vector<50x128xbf16>, vector<8x128xf32> -> vector<8x128xf32>
    %38 = vector.broadcast %35 : vector<1x128xf32> to vector<8x128xf32>
    %39 = arith.addf %37, %38 : vector<8x128xf32>
    %c0_26 = arith.constant 0 : index
    %c0_27 = arith.constant 0 : index
    %40 = vector.load %arg10[%c0_26, %c0_27] : memref<8x128xf32, #tpu.memory_space<vmem>>, vector<8x128xf32>
    tpu.vector_store %arg10[%c0_26, %c0_27], %39 {strides = array<i32>} : memref<8x128xf32, #tpu.memory_space<vmem>>, vector<8x128xf32>,
    return
  }
  func.func @transform_0(%arg0: i32) -> (i32, i32) {
    %c0_i32 = arith.constant 0 : i32
    %c0_i32_0 = arith.constant 0 : i32
    return %arg0, %c0_i32 : i32, i32
  }
  func.func @transform_1(%arg0: i32) -> (i32, i32) {
    %c0_i32 = arith.constant 0 : i32
    %c0_i32_0 = arith.constant 0 : i32
    %c0_i32_1 = arith.constant 0 : i32
    return %c0_i32, %c0_i32_0 : i32, i32
  }
  func.func @transform_2(%arg0: i32) -> (i32, i32) {
    %c0_i32 = arith.constant 0 : i32
    %c0_i32_0 = arith.constant 0 : i32
    %c0_i32_1 = arith.constant 0 : i32
    return %c0_i32, %c0_i32_0 : i32, i32
  }
  func.func @transform_3(%arg0: i32) -> (i32, i32) {
    %c0_i32 = arith.constant 0 : i32
    %c0_i32_0 = arith.constant 0 : i32
    %c0_i32_1 = arith.constant 0 : i32
    return %c0_i32, %c0_i32_0 : i32, i32
  }
  func.func @transform_4(%arg0: i32) -> (i32, i32) {
    %c0_i32 = arith.constant 0 : i32
    %c0_i32_0 = arith.constant 0 : i32
    %c0_i32_1 = arith.constant 0 : i32
    return %c0_i32, %c0_i32_0 : i32, i32
  }
  func.func @transform_5(%arg0: i32) -> (i32, i32) {
    %c0_i32 = arith.constant 0 : i32
    %c0_i32_0 = arith.constant 0 : i32
    %c0_i32_1 = arith.constant 0 : i32
    return %c0_i32, %c0_i32_0 : i32, i32
  }
  func.func @transform_6(%arg0: i32) -> (i32, i32) {
    %c0_i32 = arith.constant 0 : i32
    %c0_i32_0 = arith.constant 0 : i32
    %c0_i32_1 = arith.constant 0 : i32
    return %c0_i32, %c0_i32_0 : i32, i32
  }
  func.func @transform_7(%arg0: i32) -> (i32, i32) {
    %c0_i32 = arith.constant 0 : i32
    %c0_i32_0 = arith.constant 0 : i32
    %c0_i32_1 = arith.constant 0 : i32
    return %c0_i32, %c0_i32_0 : i32, i32
  }
  func.func @transform_8(%arg0: i32) -> (i32, i32) {
    %c0_i32 = arith.constant 0 : i32
    %c0_i32_0 = arith.constant 0 : i32
    %c0_i32_1 = arith.constant 0 : i32
    return %c0_i32, %c0_i32_0 : i32, i32
  }
  func.func @transform_9(%arg0: i32) -> (i32, i32) {
    %c0_i32 = arith.constant 0 : i32
    %c0_i32_0 = arith.constant 0 : i32
    return %arg0, %c0_i32 : i32, i32
  }
}

module attributes {stable_mosaic.version = 11 : i64} {
  func.func @latent_kernel(%arg0: i32, %arg1: memref<8x128xf32, #tpu.memory_space<vmem>>, %arg2: memref<8x128xf32, #tpu.memory_space<vmem>>, %arg3: memref<1x128xf32, #tpu.memory_space<vmem>>, %arg4: memref<1x128xf32, #tpu.memory_space<vmem>>, %arg5: memref<1x128xf32, #tpu.memory_space<vmem>>, %arg6: memref<1x128xf32, #tpu.memory_space<vmem>>, %arg7: memref<128x128xbf16, #tpu.memory_space<vmem>>, %arg8: memref<1x128xf32, #tpu.memory_space<vmem>>, %arg9: memref<128x128xbf16, #tpu.memory_space<vmem>>, %arg10: memref<1x128xf32, #tpu.memory_space<vmem>>, %arg11: memref<128x128xbf16, #tpu.memory_space<vmem>>, %arg12: memref<1x128xf32, #tpu.memory_space<vmem>>, %arg13: memref<8x128xf32, #tpu.memory_space<vmem>>, %arg14: memref<8x128xf32, #tpu.memory_space<vmem>>, %arg15: memref<8x128xf32, #tpu.memory_space<vmem>>) attributes {dimension_semantics = [#tpu.dimension_semantics<parallel>], iteration_bounds = array<i64: 1>, scalar_prefetch = 0 : i64, scratch_operands = 0 : i64, tpu.core_type = #tpu.core_type<tc>, window_params = [{transform_indices = @transform_0, window_bounds = array<i64: 8, 128>}, {transform_indices = @transform_1, window_bounds = array<i64: 8, 128>}, {pipeline_mode = #tpu.pipeline_mode<synchronous>, transform_indices = @transform_2, window_bounds = array<i64: 1, 128>}, {pipeline_mode = #tpu.pipeline_mode<synchronous>, transform_indices = @transform_3, window_bounds = array<i64: 1, 128>}, {pipeline_mode = #tpu.pipeline_mode<synchronous>, transform_indices = @transform_4, window_bounds = array<i64: 1, 128>}, {pipeline_mode = #tpu.pipeline_mode<synchronous>, transform_indices = @transform_5, window_bounds = array<i64: 1, 128>}, {pipeline_mode = #tpu.pipeline_mode<synchronous>, transform_indices = @transform_6, window_bounds = array<i64: 128, 128>}, {pipeline_mode = #tpu.pipeline_mode<synchronous>, transform_indices = @transform_7, window_bounds = array<i64: 1, 128>}, {pipeline_mode = #tpu.pipeline_mode<synchronous>, transform_indices = @transform_8, window_bounds = array<i64: 128, 128>}, {pipeline_mode = #tpu.pipeline_mode<synchronous>, transform_indices = @transform_9, window_bounds = array<i64: 1, 128>}, {pipeline_mode = #tpu.pipeline_mode<synchronous>, transform_indices = @transform_10, window_bounds = array<i64: 128, 128>}, {pipeline_mode = #tpu.pipeline_mode<synchronous>, transform_indices = @transform_11, window_bounds = array<i64: 1, 128>}, {transform_indices = @transform_12, window_bounds = array<i64: 8, 128>}, {transform_indices = @transform_13, window_bounds = array<i64: 8, 128>}, {transform_indices = @transform_14, window_bounds = array<i64: 8, 128>}]} {
    %c0 = arith.constant 0 : index
    %c0_0 = arith.constant 0 : index
    %0 = vector.load %arg1[%c0, %c0_0] : memref<8x128xf32, #tpu.memory_space<vmem>>, vector<8x128xf32>
    %c0_1 = arith.constant 0 : index
    %c0_2 = arith.constant 0 : index
    %1 = vector.load %arg3[%c0_1, %c0_2] : memref<1x128xf32, #tpu.memory_space<vmem>>, vector<1x128xf32>
    %c0_3 = arith.constant 0 : index
    %c0_4 = arith.constant 0 : index
    %2 = vector.load %arg4[%c0_3, %c0_4] : memref<1x128xf32, #tpu.memory_space<vmem>>, vector<1x128xf32>
    %c0_5 = arith.constant 0 : index
    %c0_6 = arith.constant 0 : index
    %3 = vector.load %arg5[%c0_5, %c0_6] : memref<1x128xf32, #tpu.memory_space<vmem>>, vector<1x128xf32>
    %c0_7 = arith.constant 0 : index
    %c0_8 = arith.constant 0 : index
    %4 = vector.load %arg6[%c0_7, %c0_8] : memref<1x128xf32, #tpu.memory_space<vmem>>, vector<1x128xf32>
    %5 = vector.broadcast %1 : vector<1x128xf32> to vector<8x128xf32>
    %6 = arith.subf %0, %5 : vector<8x128xf32>
    %7 = vector.broadcast %2 : vector<1x128xf32> to vector<8x128xf32>
    %8 = arith.mulf %6, %7 : vector<8x128xf32>
    %9 = vector.broadcast %3 : vector<1x128xf32> to vector<8x128xf32>
    %10 = arith.mulf %8, %9 : vector<8x128xf32>
    %11 = vector.broadcast %4 : vector<1x128xf32> to vector<8x128xf32>
    %12 = arith.addf %10, %11 : vector<8x128xf32>
    %cst = arith.constant 0.000000e+00 : f32
    %13 = vector.broadcast %cst : f32 to vector<8x128xf32>
    %14 = arith.cmpf ogt, %12, %13 : vector<8x128xf32>
    %cst_9 = arith.constant 0.00999999977 : f32
    %15 = vector.broadcast %cst_9 : f32 to vector<8x128xf32>
    %16 = arith.mulf %15, %12 : vector<8x128xf32>
    %17 = arith.select %14, %12, %16 : vector<8x128xi1>, vector<8x128xf32>
    %c0_10 = arith.constant 0 : index
    %c0_11 = arith.constant 0 : index
    %18 = vector.load %arg7[%c0_10, %c0_11] : memref<128x128xbf16, #tpu.memory_space<vmem>>, vector<128x128xbf16>
    %c0_12 = arith.constant 0 : index
    %c0_13 = arith.constant 0 : index
    %19 = vector.load %arg8[%c0_12, %c0_13] : memref<1x128xf32, #tpu.memory_space<vmem>>, vector<1x128xf32>
    %20 = arith.truncf %17 : vector<8x128xf32> to vector<8x128xbf16>
    %cst_14 = arith.constant dense<0.000000e+00> : vector<8x128xf32>
    %21 = tpu.matmul %20, %18, %cst_14 {dimension_numbers = #tpu.dot_dimension_numbers<[1], [0], [0], [1], [0, 0, 1, 1], [], []>} : vector<8x128xbf16>, vector<128x128xbf16>, vector<8x128xf32> -> vector<8x128xf32>
    %22 = vector.broadcast %19 : vector<1x128xf32> to vector<8x128xf32>
    %23 = arith.addf %21, %22 : vector<8x128xf32>
    %cst_15 = arith.constant 0.000000e+00 : f32
    %24 = vector.broadcast %cst_15 : f32 to vector<8x128xf32>
    %25 = arith.maximumf %23, %24 : vector<8x128xf32>
    %c0_16 = arith.constant 0 : index
    %c0_17 = arith.constant 0 : index
    %26 = vector.load %arg9[%c0_16, %c0_17] : memref<128x128xbf16, #tpu.memory_space<vmem>>, vector<128x128xbf16>
    %c0_18 = arith.constant 0 : index
    %c0_19 = arith.constant 0 : index
    %27 = vector.load %arg10[%c0_18, %c0_19] : memref<1x128xf32, #tpu.memory_space<vmem>>, vector<1x128xf32>
    %28 = arith.truncf %17 : vector<8x128xf32> to vector<8x128xbf16>
    %cst_20 = arith.constant dense<0.000000e+00> : vector<8x128xf32>
    %29 = tpu.matmul %28, %26, %cst_20 {dimension_numbers = #tpu.dot_dimension_numbers<[1], [0], [0], [1], [0, 0, 1, 1], [], []>} : vector<8x128xbf16>, vector<128x128xbf16>, vector<8x128xf32> -> vector<8x128xf32>
    %30 = vector.broadcast %27 : vector<1x128xf32> to vector<8x128xf32>
    %31 = arith.addf %29, %30 : vector<8x128xf32>
    %cst_21 = arith.constant 0.000000e+00 : f32
    %32 = vector.broadcast %cst_21 : f32 to vector<8x128xf32>
    %33 = arith.maximumf %31, %32 : vector<8x128xf32>
    %c0_22 = arith.constant 0 : index
    %c0_23 = arith.constant 0 : index
    %34 = vector.load %arg2[%c0_22, %c0_23] : memref<8x128xf32, #tpu.memory_space<vmem>>, vector<8x128xf32>
    %cst_24 = arith.constant 5.000000e-01 : f32
    %35 = vector.broadcast %cst_24 : f32 to vector<8x128xf32>
    %36 = arith.mulf %35, %33 : vector<8x128xf32>
    %37 = math.exp %36 : vector<8x128xf32>
    %38 = arith.mulf %34, %37 : vector<8x128xf32>
    %39 = arith.addf %25, %38 : vector<8x128xf32>
    %c0_25 = arith.constant 0 : index
    %c0_26 = arith.constant 0 : index
    %40 = vector.load %arg13[%c0_25, %c0_26] : memref<8x128xf32, #tpu.memory_space<vmem>>, vector<8x128xf32>
    tpu.vector_store %arg13[%c0_25, %c0_26], %25 {strides = array<i32>} : memref<8x128xf32, #tpu.memory_space<vmem>>, vector<8x128xf32>,
    %c0_27 = arith.constant 0 : index
    %c0_28 = arith.constant 0 : index
    %41 = vector.load %arg14[%c0_27, %c0_28] : memref<8x128xf32, #tpu.memory_space<vmem>>, vector<8x128xf32>
    tpu.vector_store %arg14[%c0_27, %c0_28], %33 {strides = array<i32>} : memref<8x128xf32, #tpu.memory_space<vmem>>, vector<8x128xf32>,
    %c0_29 = arith.constant 0 : index
    %c0_30 = arith.constant 0 : index
    %42 = vector.load %arg11[%c0_29, %c0_30] : memref<128x128xbf16, #tpu.memory_space<vmem>>, vector<128x128xbf16>
    %c0_31 = arith.constant 0 : index
    %c0_32 = arith.constant 0 : index
    %43 = vector.load %arg12[%c0_31, %c0_32] : memref<1x128xf32, #tpu.memory_space<vmem>>, vector<1x128xf32>
    %44 = arith.truncf %39 : vector<8x128xf32> to vector<8x128xbf16>
    %cst_33 = arith.constant dense<0.000000e+00> : vector<8x128xf32>
    %45 = tpu.matmul %44, %42, %cst_33 {dimension_numbers = #tpu.dot_dimension_numbers<[1], [0], [0], [1], [0, 0, 1, 1], [], []>} : vector<8x128xbf16>, vector<128x128xbf16>, vector<8x128xf32> -> vector<8x128xf32>
    %46 = vector.broadcast %43 : vector<1x128xf32> to vector<8x128xf32>
    %47 = arith.addf %45, %46 : vector<8x128xf32>
    %c0_34 = arith.constant 0 : index
    %c0_35 = arith.constant 0 : index
    %48 = vector.load %arg15[%c0_34, %c0_35] : memref<8x128xf32, #tpu.memory_space<vmem>>, vector<8x128xf32>
    tpu.vector_store %arg15[%c0_34, %c0_35], %47 {strides = array<i32>} : memref<8x128xf32, #tpu.memory_space<vmem>>, vector<8x128xf32>,
    return
  }
  func.func @transform_0(%arg0: i32) -> (i32, i32) {
    %c0_i32 = arith.constant 0 : i32
    %c0_i32_0 = arith.constant 0 : i32
    return %arg0, %c0_i32 : i32, i32
  }
  func.func @transform_1(%arg0: i32) -> (i32, i32) {
    %c0_i32 = arith.constant 0 : i32
    %c0_i32_0 = arith.constant 0 : i32
    return %arg0, %c0_i32 : i32, i32
  }
  func.func @transform_2(%arg0: i32) -> (i32, i32) {
    %c0_i32 = arith.constant 0 : i32
    %c0_i32_0 = arith.constant 0 : i32
    %c0_i32_1 = arith.constant 0 : i32
    return %c0_i32, %c0_i32_0 : i32, i32
  }
  func.func @transform_3(%arg0: i32) -> (i32, i32) {
    %c0_i32 = arith.constant 0 : i32
    %c0_i32_0 = arith.constant 0 : i32
    %c0_i32_1 = arith.constant 0 : i32
    return %c0_i32, %c0_i32_0 : i32, i32
  }
  func.func @transform_4(%arg0: i32) -> (i32, i32) {
    %c0_i32 = arith.constant 0 : i32
    %c0_i32_0 = arith.constant 0 : i32
    %c0_i32_1 = arith.constant 0 : i32
    return %c0_i32, %c0_i32_0 : i32, i32
  }
  func.func @transform_5(%arg0: i32) -> (i32, i32) {
    %c0_i32 = arith.constant 0 : i32
    %c0_i32_0 = arith.constant 0 : i32
    %c0_i32_1 = arith.constant 0 : i32
    return %c0_i32, %c0_i32_0 : i32, i32
  }
  func.func @transform_6(%arg0: i32) -> (i32, i32) {
    %c0_i32 = arith.constant 0 : i32
    %c0_i32_0 = arith.constant 0 : i32
    %c0_i32_1 = arith.constant 0 : i32
    return %c0_i32, %c0_i32_0 : i32, i32
  }
  func.func @transform_7(%arg0: i32) -> (i32, i32) {
    %c0_i32 = arith.constant 0 : i32
    %c0_i32_0 = arith.constant 0 : i32
    %c0_i32_1 = arith.constant 0 : i32
    return %c0_i32, %c0_i32_0 : i32, i32
  }
  func.func @transform_8(%arg0: i32) -> (i32, i32) {
    %c0_i32 = arith.constant 0 : i32
    %c0_i32_0 = arith.constant 0 : i32
    %c0_i32_1 = arith.constant 0 : i32
    return %c0_i32, %c0_i32_0 : i32, i32
  }
  func.func @transform_9(%arg0: i32) -> (i32, i32) {
    %c0_i32 = arith.constant 0 : i32
    %c0_i32_0 = arith.constant 0 : i32
    %c0_i32_1 = arith.constant 0 : i32
    return %c0_i32, %c0_i32_0 : i32, i32
  }
  func.func @transform_10(%arg0: i32) -> (i32, i32) {
    %c0_i32 = arith.constant 0 : i32
    %c0_i32_0 = arith.constant 0 : i32
    %c0_i32_1 = arith.constant 0 : i32
    return %c0_i32, %c0_i32_0 : i32, i32
  }
  func.func @transform_11(%arg0: i32) -> (i32, i32) {
    %c0_i32 = arith.constant 0 : i32
    %c0_i32_0 = arith.constant 0 : i32
    %c0_i32_1 = arith.constant 0 : i32
    return %c0_i32, %c0_i32_0 : i32, i32
  }
  func.func @transform_12(%arg0: i32) -> (i32, i32) {
    %c0_i32 = arith.constant 0 : i32
    %c0_i32_0 = arith.constant 0 : i32
    return %arg0, %c0_i32 : i32, i32
  }
  func.func @transform_13(%arg0: i32) -> (i32, i32) {
    %c0_i32 = arith.constant 0 : i32
    %c0_i32_0 = arith.constant 0 : i32
    return %arg0, %c0_i32 : i32, i32
  }
  func.func @transform_14(%arg0: i32) -> (i32, i32) {
    %c0_i32 = arith.constant 0 : i32
    %c0_i32_0 = arith.constant 0 : i32
    return %arg0, %c0_i32 : i32, i32
  }
}

module attributes {stable_mosaic.version = 11 : i64} {
  func.func @dec_back_kernel(%arg0: i32, %arg1: memref<8x128xf32, #tpu.memory_space<vmem>>, %arg2: memref<1x128xf32, #tpu.memory_space<vmem>>, %arg3: memref<1x128xf32, #tpu.memory_space<vmem>>, %arg4: memref<1x128xf32, #tpu.memory_space<vmem>>, %arg5: memref<1x128xf32, #tpu.memory_space<vmem>>, %arg6: memref<128x50xbf16, #tpu.memory_space<vmem>>, %arg7: memref<1x50xf32, #tpu.memory_space<vmem>>, %arg8: memref<50x200xbf16, #tpu.memory_space<vmem>>, %arg9: memref<1x200xf32, #tpu.memory_space<vmem>>, %arg10: memref<200x750xbf16, #tpu.memory_space<vmem>>, %arg11: memref<1x750xf32, #tpu.memory_space<vmem>>, %arg12: memref<750x1280xbf16, #tpu.memory_space<vmem>>, %arg13: memref<1x1280xf32, #tpu.memory_space<vmem>>, %arg14: memref<8x1280xf32, #tpu.memory_space<vmem>>) attributes {dimension_semantics = [#tpu.dimension_semantics<parallel>], iteration_bounds = array<i64: 1>, scalar_prefetch = 0 : i64, scratch_operands = 0 : i64, tpu.core_type = #tpu.core_type<tc>, window_params = [{transform_indices = @transform_0, window_bounds = array<i64: 8, 128>}, {pipeline_mode = #tpu.pipeline_mode<synchronous>, transform_indices = @transform_1, window_bounds = array<i64: 1, 128>}, {pipeline_mode = #tpu.pipeline_mode<synchronous>, transform_indices = @transform_2, window_bounds = array<i64: 1, 128>}, {pipeline_mode = #tpu.pipeline_mode<synchronous>, transform_indices = @transform_3, window_bounds = array<i64: 1, 128>}, {pipeline_mode = #tpu.pipeline_mode<synchronous>, transform_indices = @transform_4, window_bounds = array<i64: 1, 128>}, {pipeline_mode = #tpu.pipeline_mode<synchronous>, transform_indices = @transform_5, window_bounds = array<i64: 128, 50>}, {pipeline_mode = #tpu.pipeline_mode<synchronous>, transform_indices = @transform_6, window_bounds = array<i64: 1, 50>}, {pipeline_mode = #tpu.pipeline_mode<synchronous>, transform_indices = @transform_7, window_bounds = array<i64: 50, 200>}, {pipeline_mode = #tpu.pipeline_mode<synchronous>, transform_indices = @transform_8, window_bounds = array<i64: 1, 200>}, {pipeline_mode = #tpu.pipeline_mode<synchronous>, transform_indices = @transform_9, window_bounds = array<i64: 200, 750>}, {pipeline_mode = #tpu.pipeline_mode<synchronous>, transform_indices = @transform_10, window_bounds = array<i64: 1, 750>}, {pipeline_mode = #tpu.pipeline_mode<synchronous>, transform_indices = @transform_11, window_bounds = array<i64: 750, 1280>}, {pipeline_mode = #tpu.pipeline_mode<synchronous>, transform_indices = @transform_12, window_bounds = array<i64: 1, 1280>}, {transform_indices = @transform_13, window_bounds = array<i64: 8, 1280>}]} {
    %c0 = arith.constant 0 : index
    %c0_0 = arith.constant 0 : index
    %0 = vector.load %arg1[%c0, %c0_0] : memref<8x128xf32, #tpu.memory_space<vmem>>, vector<8x128xf32>
    %c0_1 = arith.constant 0 : index
    %c0_2 = arith.constant 0 : index
    %1 = vector.load %arg2[%c0_1, %c0_2] : memref<1x128xf32, #tpu.memory_space<vmem>>, vector<1x128xf32>
    %c0_3 = arith.constant 0 : index
    %c0_4 = arith.constant 0 : index
    %2 = vector.load %arg3[%c0_3, %c0_4] : memref<1x128xf32, #tpu.memory_space<vmem>>, vector<1x128xf32>
    %c0_5 = arith.constant 0 : index
    %c0_6 = arith.constant 0 : index
    %3 = vector.load %arg4[%c0_5, %c0_6] : memref<1x128xf32, #tpu.memory_space<vmem>>, vector<1x128xf32>
    %c0_7 = arith.constant 0 : index
    %c0_8 = arith.constant 0 : index
    %4 = vector.load %arg5[%c0_7, %c0_8] : memref<1x128xf32, #tpu.memory_space<vmem>>, vector<1x128xf32>
    %5 = vector.broadcast %1 : vector<1x128xf32> to vector<8x128xf32>
    %6 = arith.subf %0, %5 : vector<8x128xf32>
    %7 = vector.broadcast %2 : vector<1x128xf32> to vector<8x128xf32>
    %8 = arith.mulf %6, %7 : vector<8x128xf32>
    %9 = vector.broadcast %3 : vector<1x128xf32> to vector<8x128xf32>
    %10 = arith.mulf %8, %9 : vector<8x128xf32>
    %11 = vector.broadcast %4 : vector<1x128xf32> to vector<8x128xf32>
    %12 = arith.addf %10, %11 : vector<8x128xf32>
    %cst = arith.constant 0.000000e+00 : f32
    %13 = vector.broadcast %cst : f32 to vector<8x128xf32>
    %14 = arith.cmpf ogt, %12, %13 : vector<8x128xf32>
    %cst_9 = arith.constant 0.00999999977 : f32
    %15 = vector.broadcast %cst_9 : f32 to vector<8x128xf32>
    %16 = arith.mulf %15, %12 : vector<8x128xf32>
    %17 = arith.select %14, %12, %16 : vector<8x128xi1>, vector<8x128xf32>
    %c0_10 = arith.constant 0 : index
    %c0_11 = arith.constant 0 : index
    %18 = vector.load %arg6[%c0_10, %c0_11] : memref<128x50xbf16, #tpu.memory_space<vmem>>, vector<128x50xbf16>
    %c0_12 = arith.constant 0 : index
    %c0_13 = arith.constant 0 : index
    %19 = vector.load %arg7[%c0_12, %c0_13] : memref<1x50xf32, #tpu.memory_space<vmem>>, vector<1x50xf32>
    %20 = arith.truncf %17 : vector<8x128xf32> to vector<8x128xbf16>
    %cst_14 = arith.constant dense<0.000000e+00> : vector<8x50xf32>
    %21 = tpu.matmul %20, %18, %cst_14 {dimension_numbers = #tpu.dot_dimension_numbers<[1], [0], [0], [1], [0, 0, 1, 1], [], []>} : vector<8x128xbf16>, vector<128x50xbf16>, vector<8x50xf32> -> vector<8x50xf32>
    %22 = vector.broadcast %19 : vector<1x50xf32> to vector<8x50xf32>
    %23 = arith.addf %21, %22 : vector<8x50xf32>
    %cst_15 = arith.constant 0.000000e+00 : f32
    %24 = vector.broadcast %cst_15 : f32 to vector<8x50xf32>
    %25 = arith.cmpf ogt, %23, %24 : vector<8x50xf32>
    %cst_16 = arith.constant 0.00999999977 : f32
    %26 = vector.broadcast %cst_16 : f32 to vector<8x50xf32>
    %27 = arith.mulf %26, %23 : vector<8x50xf32>
    %28 = arith.select %25, %23, %27 : vector<8x50xi1>, vector<8x50xf32>
    %c0_17 = arith.constant 0 : index
    %c0_18 = arith.constant 0 : index
    %29 = vector.load %arg8[%c0_17, %c0_18] : memref<50x200xbf16, #tpu.memory_space<vmem>>, vector<50x200xbf16>
    %c0_19 = arith.constant 0 : index
    %c0_20 = arith.constant 0 : index
    %30 = vector.load %arg9[%c0_19, %c0_20] : memref<1x200xf32, #tpu.memory_space<vmem>>, vector<1x200xf32>
    %31 = arith.truncf %28 : vector<8x50xf32> to vector<8x50xbf16>
    %cst_21 = arith.constant dense<0.000000e+00> : vector<8x200xf32>
    %32 = tpu.matmul %31, %29, %cst_21 {dimension_numbers = #tpu.dot_dimension_numbers<[1], [0], [0], [1], [0, 0, 1, 1], [], []>} : vector<8x50xbf16>, vector<50x200xbf16>, vector<8x200xf32> -> vector<8x200xf32>
    %33 = vector.broadcast %30 : vector<1x200xf32> to vector<8x200xf32>
    %34 = arith.addf %32, %33 : vector<8x200xf32>
    %cst_22 = arith.constant 0.000000e+00 : f32
    %35 = vector.broadcast %cst_22 : f32 to vector<8x200xf32>
    %36 = arith.cmpf ogt, %34, %35 : vector<8x200xf32>
    %cst_23 = arith.constant 0.00999999977 : f32
    %37 = vector.broadcast %cst_23 : f32 to vector<8x200xf32>
    %38 = arith.mulf %37, %34 : vector<8x200xf32>
    %39 = arith.select %36, %34, %38 : vector<8x200xi1>, vector<8x200xf32>
    %c0_24 = arith.constant 0 : index
    %c0_25 = arith.constant 0 : index
    %40 = vector.load %arg10[%c0_24, %c0_25] : memref<200x750xbf16, #tpu.memory_space<vmem>>, vector<200x750xbf16>
    %c0_26 = arith.constant 0 : index
    %c0_27 = arith.constant 0 : index
    %41 = vector.load %arg11[%c0_26, %c0_27] : memref<1x750xf32, #tpu.memory_space<vmem>>, vector<1x750xf32>
    %42 = arith.truncf %39 : vector<8x200xf32> to vector<8x200xbf16>
    %cst_28 = arith.constant dense<0.000000e+00> : vector<8x750xf32>
    %43 = tpu.matmul %42, %40, %cst_28 {dimension_numbers = #tpu.dot_dimension_numbers<[1], [0], [0], [1], [0, 0, 1, 1], [], []>} : vector<8x200xbf16>, vector<200x750xbf16>, vector<8x750xf32> -> vector<8x750xf32>
    %44 = vector.broadcast %41 : vector<1x750xf32> to vector<8x750xf32>
    %45 = arith.addf %43, %44 : vector<8x750xf32>
    %cst_29 = arith.constant 0.000000e+00 : f32
    %46 = vector.broadcast %cst_29 : f32 to vector<8x750xf32>
    %47 = arith.cmpf ogt, %45, %46 : vector<8x750xf32>
    %cst_30 = arith.constant 0.00999999977 : f32
    %48 = vector.broadcast %cst_30 : f32 to vector<8x750xf32>
    %49 = arith.mulf %48, %45 : vector<8x750xf32>
    %50 = arith.select %47, %45, %49 : vector<8x750xi1>, vector<8x750xf32>
    %c0_31 = arith.constant 0 : index
    %c0_32 = arith.constant 0 : index
    %51 = vector.load %arg12[%c0_31, %c0_32] : memref<750x1280xbf16, #tpu.memory_space<vmem>>, vector<750x1280xbf16>
    %c0_33 = arith.constant 0 : index
    %c0_34 = arith.constant 0 : index
    %52 = vector.load %arg13[%c0_33, %c0_34] : memref<1x1280xf32, #tpu.memory_space<vmem>>, vector<1x1280xf32>
    %53 = arith.truncf %50 : vector<8x750xf32> to vector<8x750xbf16>
    %cst_35 = arith.constant dense<0.000000e+00> : vector<8x1280xf32>
    %54 = tpu.matmul %53, %51, %cst_35 {dimension_numbers = #tpu.dot_dimension_numbers<[1], [0], [0], [1], [0, 0, 1, 1], [], []>} : vector<8x750xbf16>, vector<750x1280xbf16>, vector<8x1280xf32> -> vector<8x1280xf32>
    %55 = vector.broadcast %52 : vector<1x1280xf32> to vector<8x1280xf32>
    %56 = arith.addf %54, %55 : vector<8x1280xf32>
    %c0_36 = arith.constant 0 : index
    %c0_37 = arith.constant 0 : index
    %57 = vector.load %arg14[%c0_36, %c0_37] : memref<8x1280xf32, #tpu.memory_space<vmem>>, vector<8x1280xf32>
    tpu.vector_store %arg14[%c0_36, %c0_37], %56 {strides = array<i32>} : memref<8x1280xf32, #tpu.memory_space<vmem>>, vector<8x1280xf32>,
    return
  }
  func.func @transform_0(%arg0: i32) -> (i32, i32) {
    %c0_i32 = arith.constant 0 : i32
    %c0_i32_0 = arith.constant 0 : i32
    return %arg0, %c0_i32 : i32, i32
  }
  func.func @transform_1(%arg0: i32) -> (i32, i32) {
    %c0_i32 = arith.constant 0 : i32
    %c0_i32_0 = arith.constant 0 : i32
    %c0_i32_1 = arith.constant 0 : i32
    return %c0_i32, %c0_i32_0 : i32, i32
  }
  func.func @transform_2(%arg0: i32) -> (i32, i32) {
    %c0_i32 = arith.constant 0 : i32
    %c0_i32_0 = arith.constant 0 : i32
    %c0_i32_1 = arith.constant 0 : i32
    return %c0_i32, %c0_i32_0 : i32, i32
  }
  func.func @transform_3(%arg0: i32) -> (i32, i32) {
    %c0_i32 = arith.constant 0 : i32
    %c0_i32_0 = arith.constant 0 : i32
    %c0_i32_1 = arith.constant 0 : i32
    return %c0_i32, %c0_i32_0 : i32, i32
  }
  func.func @transform_4(%arg0: i32) -> (i32, i32) {
    %c0_i32 = arith.constant 0 : i32
    %c0_i32_0 = arith.constant 0 : i32
    %c0_i32_1 = arith.constant 0 : i32
    return %c0_i32, %c0_i32_0 : i32, i32
  }
  func.func @transform_5(%arg0: i32) -> (i32, i32) {
    %c0_i32 = arith.constant 0 : i32
    %c0_i32_0 = arith.constant 0 : i32
    %c0_i32_1 = arith.constant 0 : i32
    return %c0_i32, %c0_i32_0 : i32, i32
  }
  func.func @transform_6(%arg0: i32) -> (i32, i32) {
    %c0_i32 = arith.constant 0 : i32
    %c0_i32_0 = arith.constant 0 : i32
    %c0_i32_1 = arith.constant 0 : i32
    return %c0_i32, %c0_i32_0 : i32, i32
  }
  func.func @transform_7(%arg0: i32) -> (i32, i32) {
    %c0_i32 = arith.constant 0 : i32
    %c0_i32_0 = arith.constant 0 : i32
    %c0_i32_1 = arith.constant 0 : i32
    return %c0_i32, %c0_i32_0 : i32, i32
  }
  func.func @transform_8(%arg0: i32) -> (i32, i32) {
    %c0_i32 = arith.constant 0 : i32
    %c0_i32_0 = arith.constant 0 : i32
    %c0_i32_1 = arith.constant 0 : i32
    return %c0_i32, %c0_i32_0 : i32, i32
  }
  func.func @transform_9(%arg0: i32) -> (i32, i32) {
    %c0_i32 = arith.constant 0 : i32
    %c0_i32_0 = arith.constant 0 : i32
    %c0_i32_1 = arith.constant 0 : i32
    return %c0_i32, %c0_i32_0 : i32, i32
  }
  func.func @transform_10(%arg0: i32) -> (i32, i32) {
    %c0_i32 = arith.constant 0 : i32
    %c0_i32_0 = arith.constant 0 : i32
    %c0_i32_1 = arith.constant 0 : i32
    return %c0_i32, %c0_i32_0 : i32, i32
  }
  func.func @transform_11(%arg0: i32) -> (i32, i32) {
    %c0_i32 = arith.constant 0 : i32
    %c0_i32_0 = arith.constant 0 : i32
    %c0_i32_1 = arith.constant 0 : i32
    return %c0_i32, %c0_i32_0 : i32, i32
  }
  func.func @transform_12(%arg0: i32) -> (i32, i32) {
    %c0_i32 = arith.constant 0 : i32
    %c0_i32_0 = arith.constant 0 : i32
    %c0_i32_1 = arith.constant 0 : i32
    return %c0_i32, %c0_i32_0 : i32, i32
  }
  func.func @transform_13(%arg0: i32) -> (i32, i32) {
    %c0_i32 = arith.constant 0 : i32
    %c0_i32_0 = arith.constant 0 : i32
    return %arg0, %c0_i32 : i32, i32
  }
}

</mosaic_0001>

<bundles_post_ra>
// kernel: network_vae_quad_forward.4
= control target key start
LH: loop header
LB: loop body
LE: loop exit
PB: predicated region body
PF: predicated region fallthrough
CT: control target
= control target key end

     0   :  { %s648_s8 = inlined_call_operand.vmem [shape: bf16[128,128], index: 8, kind: input, shape index: {}]   ;;  %s649_s6 = inlined_call_operand.vmem [shape: bf16[128,128], index: 6, kind: input, shape index: {}]   ;;  %s650_s0 = inlined_call_operand.vmem [shape: f32[8,128], index: 0, kind: input, shape index: {}]   ;;  %s651_s2 = inlined_call_operand.vmem [shape: f32[1,128], index: 2, kind: input, shape index: {}]   ;;  %s652_s3 = inlined_call_operand.vmem [shape: f32[1,128], index: 3, kind: input, shape index: {}]   ;;  %s653_s4 = inlined_call_operand.vmem [shape: f32[1,128], index: 4, kind: input, shape index: {}]   ;;  %s654_s5 = inlined_call_operand.vmem [shape: f32[1,128], index: 5, kind: input, shape index: {}]   ;;  %s655_s10 = inlined_call_operand.vmem [shape: bf16[128,128], index: 10, kind: input, shape index: {}]   ;;  %s656_s9 = inlined_call_operand.vmem [shape: f32[1,128], index: 9, kind: input, shape index: {}]   ;;  %s657_s7 = inlined_call_operand.vmem [shape: f32[1,128], index: 7, kind: input, shape index: {}]   ;;  %s658_s11 = inlined_call_operand.vmem [shape: f32[1,128], index: 11, kind: input, shape index: {}]   ;;  %s659_s13 = inlined_call_operand.vmem [shape: f32[8,128], index: 13, kind: output, shape index: {1}]   ;;  %s660_s12 = inlined_call_operand.vmem [shape: f32[8,128], index: 12, kind: output, shape index: {0}]   ;;  %s661_s1 = inlined_call_operand.vmem [shape: f32[8,128], index: 1, kind: input, shape index: {}]   ;;  %s662_s14 = inlined_call_operand.vmem [shape: f32[8,128], index: 14, kind: output, shape index: {2}]  }
   0x1   :  { %v447_v0 = vld [vmem:[%s648_s8 + $0x38] sm:$0xff]  ;;  %v446_v2 = vld [vmem:[%s648_s8 + $0x30] sm:$0xff]  ;;  %v445_v4 = vld [vmem:[%s648_s8 + $0x28] sm:$0xff] }
   0x2   :  { %v439_v1 = vld [vmem:[%s649_s6 + $0x38] sm:$0xff]  ;;  %219 = vmatpush.bf16.msra.mxu1 %v447_v0  ;;  %v438_v3 = vld [vmem:[%s649_s6 + $0x30] sm:$0xff]  ;;  %v437_v5 = vld [vmem:[%s649_s6 + $0x28] sm:$0xff] }
   0x3   :  { %137 = vmatpush.bf16.msra.mxu0 %v439_v1  ;;  %v44_v6 = vld [vmem:[%s650_s0] sm:$0xff]  ;;  %v455_v10 = vld [vmem:[%s655_s10 + $0x38] sm:$0xff]  ;;  %v454_v15 = vld [vmem:[%s655_s10 + $0x30] sm:$0xff] }
   0x4   :  { %v456_v7 = vld [vmem:[%s651_s2] ss:$0 sm:$0xff]  ;;  %310 = vmatpush.bf16.msra.mxu2 %v455_v10  ;;  %v443_v16 = vld [vmem:[%s648_s8 + $0x18] sm:$0xff]  ;;  %v453_v20 = vld [vmem:[%s655_s10 + $0x28] sm:$0xff] }
   0x5   :  { %v457_v8 = vld [vmem:[%s652_s3] ss:$0 sm:$0xff]  ;;  %v52_v9 = vsub.f32 %v44_v6, %v456_v7  ;;  %v435_v17 = vld [vmem:[%s649_s6 + $0x18] sm:$0xff]  ;;  %v442_v21 = vld [vmem:[%s648_s8 + $0x10] sm:$0xff] }
   0x6   :  { %220 = vmatpush.bf16.msra.mxu1 %v446_v2  ;;  %v444_v11 = vld [vmem:[%s648_s8 + $0x20] sm:$0xff]  ;;  %v434_v22 = vld [vmem:[%s649_s6 + $0x10] sm:$0xff]  ;;  %v441_v24 = vld [vmem:[%s648_s8 + $0x8] sm:$0xff] }
   0x7   :  { %138 = vmatpush.bf16.msra.mxu0 %v438_v3  ;;  %v436_v12 = vld [vmem:[%s649_s6 + $0x20] sm:$0xff]  ;;  %v56_v13 = vmul.f32 %v457_v8, %v52_v9  ;;  %v433_v25 = vld [vmem:[%s649_s6 + $0x8] sm:$0xff]  ;;  %v451_v32 = vld [vmem:[%s655_s10 + $0x18] sm:$0xff] }
   0x8   :  { %v458_v14 = vld [vmem:[%s653_s4] ss:$0 sm:$0xff]  ;;  %311 = vmatpush.bf16.msra.mxu2 %v454_v15  ;;  %v450_v33 = vld [vmem:[%s655_s10 + $0x10] sm:$0xff]  ;;  %v449_v34 = vld [vmem:[%s655_s10 + $0x8] sm:$0xff] }
   0x9   :  { %v60_v18 = vmul.f32 %v458_v14, %v56_v13  ;;  %v459_v19 = vld [vmem:[%s654_s5] ss:$0 sm:$0xff] }
   0xa   :  { %221 = vmatpush.bf16.msra.mxu1 %v445_v4  ;;  %v440_v27 = vld [vmem:[%s648_s8] sm:$0xff] }
   0xb   :  { %139 = vmatpush.bf16.msra.mxu0 %v437_v5  ;;  %v64_v23 = vadd.f32 %v459_v19, %v60_v18  ;;  %v432_v29 = vld [vmem:[%s649_s6] sm:$0xff] }
   0xc   :  { %312 = vmatpush.bf16.msra.mxu2 %v453_v20  ;;  %v452_v31 = vld [vmem:[%s655_s10 + $0x20] sm:$0xff] }
   0xd   :  { %v66_v26 = vmul.f32 0.01, %v64_v23  ;;  %vm65_vm0 = vcmp.gt.f32.partialorder %v64_v23, 0.0  ;;  %v448_v35 = vld [vmem:[%s655_s10] sm:$0xff] }
   0xe   :  { %222 = vmatpush.bf16.msra.mxu1 %v444_v11  ;;  %v460_v36 = vld [vmem:[%s656_s9] ss:$0 sm:$0xff] }
   0xf   :  { %140 = vmatpush.bf16.msra.mxu0 %v436_v12  ;;  %v67_v28 = vsel %vm65_vm0, %v64_v23, %v66_v26  ;;  %v461_v37 = vld [vmem:[%s657_s7] ss:$0 sm:$0xff] }
  0x10   :  { %v85_v30 = vpack.c.bf16 %v67_v28, %v67_v28  ;;  %313 = vmatpush.bf16.msra.mxu2 %v452_v31  ;;  %v233_v48 = vld [vmem:[%s661_s1] sm:$0xff] }
  0x11   :  { %v462_v53 = vld [vmem:[%s658_s11] ss:$0 sm:$0xff] }
  0x12   :  { %223 = vmatpush.bf16.msra.mxu1 %v443_v16 }
  0x13   :  { %141 = vmatpush.bf16.msra.mxu0 %v435_v17 }
  0x14   :  { %314 = vmatpush.bf16.msra.mxu2 %v451_v32 }
  0x16   :  { %224 = vmatpush.bf16.msra.mxu1 %v442_v21 }
  0x17   :  { %142 = vmatpush.bf16.msra.mxu0 %v434_v22 }
  0x18   :  { %315 = vmatpush.bf16.msra.mxu2 %v450_v33 }
  0x1a   :  { %225 = vmatpush.bf16.msra.mxu1 %v441_v24 }
  0x1b   :  { %143 = vmatpush.bf16.msra.mxu0 %v433_v25 }
  0x1c   :  { %316 = vmatpush.bf16.msra.mxu2 %v449_v34 }
  0x1e   :  { %226 = vmatpush.bf16.msra.mxu1 %v440_v27 }
  0x1f   :  { %144 = vmatpush.bf16.msra.mxu0 %v432_v29 }
  0x20   :  { %317 = vmatpush.bf16.msra.mxu2 %v448_v35 }
  0x21   :  { %227 = vmatmul.bf16.vlgmr.msra.gmra.mxu1 %v85_v30 }
  0x22   :  { %145 = vmatmul.bf16.vlgmr.msra.gmra.mxu0 %v85_v30 }
  0x9e   :  { %v228_v38 = vpop.f32.mrf.mxu1 }
  0x9f   :  { %v146_v39 = vpop.f32.mrf.mxu0  ;;  %v229_v40 = vadd.f32 %v460_v36, %v228_v38 }
  0xa0   :  { %v147_v41 = vadd.f32 %v461_v37, %v146_v39 }
  0xa1   :  { %v232_v42 = vmax.f32 %v229_v40, 0.0 }
  0xa2   :  { %v150_v43 = vmax.f32 %v147_v41, 0.0 }
  0xa3   :  { %v234_v44 = vmul.f32 0.5, %v232_v42  ;;  %240 = vst [vmem:[%s659_s13] sm:$0xff] %v232_v42 }
  0xa4   :  { %239 = vst [vmem:[%s660_s12] sm:$0xff] %v150_v43 }
  0xa5   :  { %v235_v45 = vmul.f32 1.442695, %v234_v44 }
  0xa6   :  { %v230_v46 = vpop.f32.mrf.mxu1 }
  0xa7   :  { %v148_v47 = vpop.f32.mrf.mxu0  ;;  %463 = vpow2.f32 %v235_v45 }
  0xad   :  { %v464_v49 = vpop.eup %463 }
  0xae   :  { %v237_v50 = vmul.f32 %v464_v49, %v233_v48 }
  0xb0   :  { %v238_v51 = vadd.f32 %v237_v50, %v150_v43 }
  0xb2   :  { %v258_v52 = vpack.c.bf16 %v238_v51, %v238_v51 }
  0xb4   :  { %318 = vmatmul.bf16.vlgmr.msra.gmra.mxu2 %v258_v52 }
 0x137   :  { %v319_v54 = vpop.f32.mrf.mxu2 }
 0x138   :  { %v320_v55 = vadd.f32 %v462_v53, %v319_v54 }
 0x13a   :  { %323 = vst [vmem:[%s662_s14] sm:$0xff] %v320_v55 }
 0x13f   :  { %v321_v56 = vpop.f32.mrf.mxu2 }

// kernel: network_vae_quad_forward.3
= control target key start
LH: loop header
LB: loop body
LE: loop exit
PB: predicated region body
PF: predicated region fallthrough
CT: control target
= control target key end

     0   :  { %vm4323_vm4 = vcmask 1046528   ;;  %vm4319_vm7 = vcmask 900096   ;;  %vm4602_vm8 = vcmask 1043456   ;;  %vm4598_vm11 = vcmask 588800   ;;  %s11444_s1 = inlined_call_operand.vmem [shape: bf16[1280,750], index: 1, kind: input, shape index: {}]   ;;  %s11445_s0 = inlined_call_operand.vmem [shape: f32[8,1280], index: 0, kind: input, shape index: {}]   ;;  %s11446_s2 = inlined_call_operand.vmem [shape: f32[1,750], index: 2, kind: input, shape index: {}]   ;;  %s11447_s3 = inlined_call_operand.vmem [shape: bf16[750,200], index: 3, kind: input, shape index: {}]   ;;  %s11448_s4 = inlined_call_operand.vmem [shape: f32[1,200], index: 4, kind: input, shape index: {}]   ;;  %s11449_s6 = inlined_call_operand.vmem [shape: f32[1,50], index: 6, kind: input, shape index: {}]   ;;  %s11450_s5 = inlined_call_operand.vmem [shape: bf16[200,50], index: 5, kind: input, shape index: {}]   ;;  %s11451_s8 = inlined_call_operand.vmem [shape: f32[1,128], index: 8, kind: input, shape index: {}]   ;;  %s11452_s7 = inlined_call_operand.vmem [shape: bf16[50,128], index: 7, kind: input, shape index: {}]   ;;  %s11453_s9 = inlined_call_operand.vmem [shape: f32[8,128], index: 9, kind: output, shape index: {}]  }
   0x1   :  { %v4864_v0 = vld [vmem:[%s11444_s1 + $0x150] sm:$0xf]  ;;  %v7099_v1 = vld [vmem:[%s11444_s1 + $0x164] sm:$0xf0]  ;;  %v4840_v11 = vld [vmem:[%s11444_s1 + $0x120] sm:$0xf] }
   0x2   :  { %v5056_v2 = vld [vmem:[%s11444_s1 + $0x2d0] sm:$0xf]  ;;  %v4865_v3 = vor.u32 %v7099_v1, %v4864_v0  ;;  %v7147_v4 = vld [vmem:[%s11444_s1 + $0x2e4] sm:$0xf0]  ;;  %v7093_v13 = vld [vmem:[%s11444_s1 + $0x134] sm:$0xf0] }
   0x3   :  { %v5248_v5 = vld [vmem:[%s11444_s1 + $0x450] sm:$0xf]  ;;  %v7195_v6 = vld [vmem:[%s11444_s1 + $0x464] sm:$0xf0]  ;;  %v5057_v7 = vor.u32 %v7147_v4, %v5056_v2  ;;  %v5032_v14 = vld [vmem:[%s11444_s1 + $0x2a0] sm:$0xf]  ;;  %v4841_v16 = vor.u32 %v7093_v13, %v4840_v11 }
   0x4   :  { %v5249_v8 = vor.u32 %v7195_v6, %v5248_v5  ;;  %v5440_v9 = vld [vmem:[%s11444_s1 + $0x5d0] sm:$0xf]  ;;  %v7243_v10 = vld [vmem:[%s11444_s1 + $0x5e4] sm:$0xf0]  ;;  %2947 = vmatpush.bf16.msra.mxu0 %v4865_v3  ;;  %v7141_v15 = vld [vmem:[%s11444_s1 + $0x2b4] sm:$0xf0] }
   0x5   :  { %v5441_v12 = vor.u32 %v7243_v10, %v5440_v9  ;;  %2960 = vmatpush.bf16.msra.mxu1 %v5057_v7  ;;  %v5033_v17 = vor.u32 %v7141_v15, %v5032_v14  ;;  %v5224_v18 = vld [vmem:[%s11444_s1 + $0x420] sm:$0xf]  ;;  %v7189_v19 = vld [vmem:[%s11444_s1 + $0x434] sm:$0xf0]  ;;  %v4816_v23 = vld [vmem:[%s11444_s1 + $0xf0] sm:$0xf] }
   0x6   :  { %2973 = vmatpush.bf16.msra.mxu2 %v5249_v8  ;;  %v5416_v20 = vld [vmem:[%s11444_s1 + $0x5a0] sm:$0xf]  ;;  %v5225_v21 = vor.u32 %v7189_v19, %v5224_v18  ;;  %v7237_v22 = vld [vmem:[%s11444_s1 + $0x5b4] sm:$0xf0]  ;;  %v7087_v24 = vld [vmem:[%s11444_s1 + $0x104] sm:$0xf0] }
   0x7   :  { %2986 = vmatpush.bf16.msra.mxu3 %v5441_v12  ;;  %v5417_v25 = vor.u32 %v7237_v22, %v5416_v20  ;;  %v5008_v26 = vld [vmem:[%s11444_s1 + $0x270] sm:$0xf]  ;;  %v7135_v27 = vld [vmem:[%s11444_s1 + $0x284] sm:$0xf0]  ;;  %v4817_v29 = vor.u32 %v7087_v24, %v4816_v23  ;;  %v4792_v35 = vld [vmem:[%s11444_s1 + $0xc0] sm:$0xf] }
   0x8   :  { %v5200_v28 = vld [vmem:[%s11444_s1 + $0x3f0] sm:$0xf]  ;;  %2948 = vmatpush.bf16.msra.mxu0 %v4841_v16  ;;  %v7183_v30 = vld [vmem:[%s11444_s1 + $0x404] sm:$0xf0]  ;;  %v5009_v33 = vor.u32 %v7135_v27, %v5008_v26  ;;  %v7081_v36 = vld [vmem:[%s11444_s1 + $0xd4] sm:$0xf0] }
   0x9   :  { %v5392_v31 = vld [vmem:[%s11444_s1 + $0x570] sm:$0xf]  ;;  %v7231_v32 = vld [vmem:[%s11444_s1 + $0x584] sm:$0xf0]  ;;  %2961 = vmatpush.bf16.msra.mxu1 %v5033_v17  ;;  %v5201_v34 = vor.u32 %v7183_v30, %v5200_v28  ;;  %v4984_v37 = vld [vmem:[%s11444_s1 + $0x240] sm:$0xf]  ;;  %v4793_v44 = vor.u32 %v7081_v36, %v4792_v35 }
   0xa   :  { %2974 = vmatpush.bf16.msra.mxu2 %v5225_v21  ;;  %v5393_v38 = vor.u32 %v7231_v32, %v5392_v31  ;;  %v7129_v39 = vld [vmem:[%s11444_s1 + $0x254] sm:$0xf0]  ;;  %v5176_v40 = vld [vmem:[%s11444_s1 + $0x3c0] sm:$0xf]  ;;  %v4768_v47 = vld [vmem:[%s11444_s1 + $0x90] sm:$0xf] }
   0xb   :  { %2987 = vmatpush.bf16.msra.mxu3 %v5417_v25  ;;  %v7177_v41 = vld [vmem:[%s11444_s1 + $0x3d4] sm:$0xf0]  ;;  %v5368_v42 = vld [vmem:[%s11444_s1 + $0x540] sm:$0xf]  ;;  %v4985_v45 = vor.u32 %v7129_v39, %v4984_v37  ;;  %v7075_v48 = vld [vmem:[%s11444_s1 + $0xa4] sm:$0xf0] }
   0xc   :  { %v7225_v43 = vld [vmem:[%s11444_s1 + $0x554] sm:$0xf0]  ;;  %2949 = vmatpush.bf16.msra.mxu0 %v4817_v29  ;;  %v5177_v46 = vor.u32 %v7177_v41, %v5176_v40  ;;  %v4960_v49 = vld [vmem:[%s11444_s1 + $0x210] sm:$0xf]  ;;  %v7123_v51 = vld [vmem:[%s11444_s1 + $0x224] sm:$0xf0]  ;;  %v4769_v56 = vor.u32 %v7075_v48, %v4768_v47 }
   0xd   :  { %2962 = vmatpush.bf16.msra.mxu1 %v5009_v33  ;;  %v5369_v50 = vor.u32 %v7225_v43, %v5368_v42  ;;  %v5152_v52 = vld [vmem:[%s11444_s1 + $0x390] sm:$0xf]  ;;  %v7171_v53 = vld [vmem:[%s11444_s1 + $0x3a4] sm:$0xf0]  ;;  %v4961_v57 = vor.u32 %v7123_v51, %v4960_v49  ;;  %v4744_v59 = vld [vmem:[%s11444_s1 + $0x60] sm:$0xf] }
   0xe   :  { %2975 = vmatpush.bf16.msra.mxu2 %v5201_v34  ;;  %v5344_v54 = vld [vmem:[%s11444_s1 + $0x510] sm:$0xf]  ;;  %v7219_v55 = vld [vmem:[%s11444_s1 + $0x524] sm:$0xf0]  ;;  %v5153_v58 = vor.u32 %v7171_v53, %v5152_v52  ;;  %v7069_v60 = vld [vmem:[%s11444_s1 + $0x74] sm:$0xf0] }
   0xf   :  { %2988 = vmatpush.bf16.msra.mxu3 %v5393_v38  ;;  %v4936_v61 = vld [vmem:[%s11444_s1 + $0x1e0] sm:$0xf]  ;;  %v5345_v62 = vor.u32 %v7219_v55, %v5344_v54  ;;  %v7117_v63 = vld [vmem:[%s11444_s1 + $0x1f4] sm:$0xf0]  ;;  %v4745_v4 = vor.u32 %v7069_v60, %v4744_v59  ;;  %v4720_v7 = vld [vmem:[%s11444_s1 + $0x30] sm:$0xf] }
  0x10   :  { %2950 = vmatpush.bf16.msra.mxu0 %v4793_v44  ;;  %v5128_v0 = vld [vmem:[%s11444_s1 + $0x360] sm:$0xf]  ;;  %v7165_v1 = vld [vmem:[%s11444_s1 + $0x374] sm:$0xf0]  ;;  %v4937_v5 = vor.u32 %v7117_v63, %v4936_v61  ;;  %v7063_v8 = vld [vmem:[%s11444_s1 + $0x44] sm:$0xf0] }
  0x11   :  { %2963 = vmatpush.bf16.msra.mxu1 %v4985_v45  ;;  %v5320_v2 = vld [vmem:[%s11444_s1 + $0x4e0] sm:$0xf]  ;;  %v7213_v3 = vld [vmem:[%s11444_s1 + $0x4f4] sm:$0xf0]  ;;  %v5129_v6 = vor.u32 %v7165_v1, %v5128_v0  ;;  %v4912_v9 = vld [vmem:[%s11444_s1 + $0x1b0] sm:$0xf]  ;;  %v4721_v16 = vor.u32 %v7063_v8, %v4720_v7 }
  0x12   :  { %2976 = vmatpush.bf16.msra.mxu2 %v5177_v46  ;;  %v5321_v10 = vor.u32 %v7213_v3, %v5320_v2  ;;  %v7111_v11 = vld [vmem:[%s11444_s1 + $0x1c4] sm:$0xf0]  ;;  %v5104_v12 = vld [vmem:[%s11444_s1 + $0x330] sm:$0xf]  ;;  %v4696_v17 = vld [vmem:[%s11444_s1] sm:$0xf] }
  0x13   :  { %2989 = vmatpush.bf16.msra.mxu3 %v5369_v50  ;;  %v7159_v13 = vld [vmem:[%s11444_s1 + $0x344] sm:$0xf0]  ;;  %v5296_v14 = vld [vmem:[%s11444_s1 + $0x4b0] sm:$0xf]  ;;  %v7057_v18 = vld [vmem:[%s11444_s1 + $0x14] sm:$0xf0]  ;;  %v4913_v19 = vor.u32 %v7111_v11, %v4912_v9 }
  0x14   :  { %2951 = vmatpush.bf16.msra.mxu0 %v4769_v56  ;;  %v7207_v15 = vld [vmem:[%s11444_s1 + $0x4c4] sm:$0xf0]  ;;  %v5105_v20 = vor.u32 %v7159_v13, %v5104_v12  ;;  %v4888_v21 = vld [vmem:[%s11444_s1 + $0x180] sm:$0xf]  ;;  %v7105_v22 = vld [vmem:[%s11444_s1 + $0x194] sm:$0xf0]  ;;  %v4697_v31 = vor.u32 %v7057_v18, %v4696_v17 }
  0x15   :  { %2964 = vmatpush.bf16.msra.mxu1 %v4961_v57  ;;  %v5080_v23 = vld [vmem:[%s11444_s1 + $0x300] sm:$0xf]  ;;  %v5297_v24 = vor.u32 %v7207_v15, %v5296_v14  ;;  %v7153_v25 = vld [vmem:[%s11444_s1 + $0x314] sm:$0xf0]  ;;  %v5632_v28 = vld [vmem:[%s11444_s1 + $0x750] sm:$0xf]  ;;  %v4889_v35 = vor.u32 %v7105_v22, %v4888_v21 }
  0x16   :  { %2977 = vmatpush.bf16.msra.mxu2 %v5153_v58  ;;  %v5272_v26 = vld [vmem:[%s11444_s1 + $0x480] sm:$0xf]  ;;  %v7201_v27 = vld [vmem:[%s11444_s1 + $0x494] sm:$0xf0]  ;;  %v7291_v29 = vld [vmem:[%s11444_s1 + $0x764] sm:$0xf0]  ;;  %v5081_v36 = vor.u32 %v7153_v25, %v5080_v23 }
  0x17   :  { %2990 = vmatpush.bf16.msra.mxu3 %v5345_v62  ;;  %v5824_v30 = vld [vmem:[%s11444_s1 + $0x8d0] sm:$0xf]  ;;  %v7339_v32 = vld [vmem:[%s11444_s1 + $0x8e4] sm:$0xf0]  ;;  %v5273_v39 = vor.u32 %v7201_v27, %v5272_v26  ;;  %v5633_v40 = vor.u32 %v7291_v29, %v5632_v28  ;;  %v5608_v43 = vld [vmem:[%s11444_s1 + $0x720] sm:$0xf] }
  0x18   :  { %2952 = vmatpush.bf16.msra.mxu0 %v4745_v4  ;;  %v6016_v33 = vld [vmem:[%s11444_s1 + $0xa50] sm:$0xf]  ;;  %v7387_v34 = vld [vmem:[%s11444_s1 + $0xa64] sm:$0xf0]  ;;  %v5825_v41 = vor.u32 %v7339_v32, %v5824_v30  ;;  %v7285_v44 = vld [vmem:[%s11444_s1 + $0x734] sm:$0xf0] }
  0x19   :  { %2965 = vmatpush.bf16.msra.mxu1 %v4937_v5  ;;  %v6208_v37 = vld [vmem:[%s11444_s1 + $0xbd0] sm:$0xf]  ;;  %v7435_v38 = vld [vmem:[%s11444_s1 + $0xbe4] sm:$0xf0]  ;;  %v6017_v42 = vor.u32 %v7387_v34, %v6016_v33  ;;  %v5800_v45 = vld [vmem:[%s11444_s1 + $0x8a0] sm:$0xf]  ;;  %v5609_v52 = vor.u32 %v7285_v44, %v5608_v43 }
  0x1a   :  { %2978 = vmatpush.bf16.msra.mxu2 %v5129_v6  ;;  %v6209_v46 = vor.u32 %v7435_v38, %v6208_v37  ;;  %v7333_v47 = vld [vmem:[%s11444_s1 + $0x8b4] sm:$0xf0]  ;;  %v5992_v48 = vld [vmem:[%s11444_s1 + $0xa20] sm:$0xf]  ;;  %v5584_v53 = vld [vmem:[%s11444_s1 + $0x6f0] sm:$0xf] }
  0x1b   :  { %2991 = vmatpush.bf16.msra.mxu3 %v5321_v10  ;;  %v7381_v49 = vld [vmem:[%s11444_s1 + $0xa34] sm:$0xf0]  ;;  %v6184_v50 = vld [vmem:[%s11444_s1 + $0xba0] sm:$0xf]  ;;  %v5801_v54 = vor.u32 %v7333_v47, %v5800_v45  ;;  %v7279_v56 = vld [vmem:[%s11444_s1 + $0x704] sm:$0xf0] }
  0x1c   :  { %2953 = vmatpush.bf16.msra.mxu0 %v4721_v16  ;;  %v7429_v51 = vld [vmem:[%s11444_s1 + $0xbb4] sm:$0xf0]  ;;  %v5993_v55 = vor.u32 %v7381_v49, %v5992_v48  ;;  %v5776_v57 = vld [vmem:[%s11444_s1 + $0x870] sm:$0xf]  ;;  %v7327_v58 = vld [vmem:[%s11444_s1 + $0x884] sm:$0xf0]  ;;  %v5585_v0 = vor.u32 %v7279_v56, %v5584_v53 }
  0x1d   :  { %2966 = vmatpush.bf16.msra.mxu1 %v4913_v19  ;;  %v6185_v59 = vor.u32 %v7429_v51, %v6184_v50  ;;  %v5968_v60 = vld [vmem:[%s11444_s1 + $0x9f0] sm:$0xf]  ;;  %v7375_v61 = vld [vmem:[%s11444_s1 + $0xa04] sm:$0xf0]  ;;  %v5777_v1 = vor.u32 %v7327_v58, %v5776_v57  ;;  %v5560_v2 = vld [vmem:[%s11444_s1 + $0x6c0] sm:$0xf] }
  0x1e   :  { %2979 = vmatpush.bf16.msra.mxu2 %v5105_v20  ;;  %v6160_v62 = vld [vmem:[%s11444_s1 + $0xb70] sm:$0xf]  ;;  %v7423_v63 = vld [vmem:[%s11444_s1 + $0xb84] sm:$0xf0]  ;;  %v33_v4 = vld [vmem:[%s11445_s0] sm:$0xff]  ;;  %v5969_v5 = vor.u32 %v7375_v61, %v5968_v60  ;;  %vm4672_vm12 = vcmask 1040384  }
  0x1f   :  { %2992 = vmatpush.bf16.msra.mxu3 %v5297_v24  ;;  %v35_v3 = vld [vmem:[%s11445_s0 + $0x10] sm:$0xff]  ;;  %v7273_v6 = vld [vmem:[%s11444_s1 + $0x6d4] sm:$0xf0]  ;;  %v5752_v7 = vld [vmem:[%s11444_s1 + $0x840] sm:$0xf]  ;;  %v7978_v9 = vpack.c.bf16 %v33_v4, %v33_v4  ;;  %v6161_v11 = vor.u32 %v7423_v63, %v6160_v62  ;;  %vm4668_vm14 = vcmask 408576  }
  0x20   :  { %2954 = vmatpush.bf16.msra.mxu0 %v4697_v31  ;;  %v7976_v8 = vpack.c.bf16 %v35_v3, %v35_v3  ;;  %v36_v10 = vld [vmem:[%s11445_s0 + $0x18] sm:$0xff]  ;;  %v5944_v13 = vld [vmem:[%s11444_s1 + $0x9c0] sm:$0xf]  ;;  %v5561_v18 = vor.u32 %v7273_v6, %v5560_v2  ;;  %v34_v19 = vld [vmem:[%s11445_s0 + $0x8] sm:$0xff] }
  0x21   :  { %2967 = vmatpush.bf16.msra.mxu1 %v4889_v35  ;;  %v7321_v12 = vld [vmem:[%s11444_s1 + $0x854] sm:$0xf0]  ;;  %v7992_v15 = vpack.c.bf16 %v36_v10, %v36_v10  ;;  %v6136_v16 = vld [vmem:[%s11444_s1 + $0xb40] sm:$0xf]  ;;  %v5536_v22 = vld [vmem:[%s11444_s1 + $0x690] sm:$0xf]  ;;  %v8015_v25 = vpack.c.bf16 %v34_v19, %v34_v19 }
  0x22   :  { %2980 = vmatpush.bf16.msra.mxu2 %v5081_v36  ;;  %v7369_v14 = vld [vmem:[%s11444_s1 + $0x9d4] sm:$0xf0]  ;;  %v5753_v20 = vor.u32 %v7321_v12, %v5752_v7  ;;  %v7267_v23 = vld [vmem:[%s11444_s1 + $0x6a4] sm:$0xf0]  ;;  %v5728_v24 = vld [vmem:[%s11444_s1 + $0x810] sm:$0xf] }
  0x23   :  { %2993 = vmatpush.bf16.msra.mxu3 %v5273_v39  ;;  %v7417_v17 = vld [vmem:[%s11444_s1 + $0xb54] sm:$0xf0]  ;;  %2955 = vmatmul.bf16.vlgmr.msra.gmra.mxu0 %v7978_v9  ;;  %v5945_v21 = vor.u32 %v7369_v14, %v5944_v13  ;;  %v7315_v27 = vld [vmem:[%s11444_s1 + $0x824] sm:$0xf0]  ;;  %v5920_v28 = vld [vmem:[%s11444_s1 + $0x990] sm:$0xf]  ;;  %v5537_v32 = vor.u32 %v7267_v23, %v5536_v22 }
  0x24   :  { %2999 = vmatpush.bf16.msrb.mxu0 %v5633_v40  ;;  %v6137_v26 = vor.u32 %v7417_v17, %v6136_v16  ;;  %v7363_v29 = vld [vmem:[%s11444_s1 + $0x9a4] sm:$0xf0]  ;;  %v6112_v30 = vld [vmem:[%s11444_s1 + $0xb10] sm:$0xf]  ;;  %2968 = vmatmul.bf16.vlgmr.msra.gmra.mxu1 %v8015_v25  ;;  %v5729_v33 = vor.u32 %v7315_v27, %v5728_v24  ;;  %v5512_v35 = vld [vmem:[%s11444_s1 + $0x660] sm:$0xf] }
  0x25   :  { %3012 = vmatpush.bf16.msrb.mxu1 %v5825_v41  ;;  %2981 = vmatmul.bf16.vlgmr.msra.gmra.mxu2 %v7976_v8  ;;  %v7411_v31 = vld [vmem:[%s11444_s1 + $0xb24] sm:$0xf0]  ;;  %v5921_v34 = vor.u32 %v7363_v29, %v5920_v28  ;;  %v7261_v36 = vld [vmem:[%s11444_s1 + $0x674] sm:$0xf0]  ;;  %v5704_v37 = vld [vmem:[%s11444_s1 + $0x7e0] sm:$0xf] }
  0x26   :  { %3025 = vmatpush.bf16.msrb.mxu2 %v6017_v42  ;;  %2994 = vmatmul.bf16.vlgmr.msra.gmra.mxu3 %v7992_v15  ;;  %v6113_v38 = vor.u32 %v7411_v31, %v6112_v30  ;;  %v7309_v39 = vld [vmem:[%s11444_s1 + $0x7f4] sm:$0xf0]  ;;  %v5896_v40 = vld [vmem:[%s11444_s1 + $0x960] sm:$0xf]  ;;  %v5513_v44 = vor.u32 %v7261_v36, %v5512_v35  ;;  %v5488_v47 = vld [vmem:[%s11444_s1 + $0x630] sm:$0xf] }
  0x27   :  { %3038 = vmatpush.bf16.msrb.mxu3 %v6209_v46  ;;  %v7357_v41 = vld [vmem:[%s11444_s1 + $0x974] sm:$0xf0]  ;;  %v6088_v42 = vld [vmem:[%s11444_s1 + $0xae0] sm:$0xf]  ;;  %v5705_v45 = vor.u32 %v7309_v39, %v5704_v37  ;;  %v7255_v48 = vld [vmem:[%s11444_s1 + $0x644] sm:$0xf0] }
  0x28   :  { %3000 = vmatpush.bf16.msrb.mxu0 %v5609_v52  ;;  %v7405_v43 = vld [vmem:[%s11444_s1 + $0xaf4] sm:$0xf0]  ;;  %v5897_v46 = vor.u32 %v7357_v41, %v5896_v40  ;;  %v5680_v49 = vld [vmem:[%s11444_s1 + $0x7b0] sm:$0xf]  ;;  %v7303_v51 = vld [vmem:[%s11444_s1 + $0x7c4] sm:$0xf0]  ;;  %v5489_v56 = vor.u32 %v7255_v48, %v5488_v47 }
  0x29   :  { %3013 = vmatpush.bf16.msrb.mxu1 %v5801_v54  ;;  %v6089_v50 = vor.u32 %v7405_v43, %v6088_v42  ;;  %v5872_v52 = vld [vmem:[%s11444_s1 + $0x930] sm:$0xf]  ;;  %v7351_v53 = vld [vmem:[%s11444_s1 + $0x944] sm:$0xf0]  ;;  %v5464_v57 = vld [vmem:[%s11444_s1 + $0x600] sm:$0xf] }
  0x2a   :  { %3026 = vmatpush.bf16.msrb.mxu2 %v5993_v55  ;;  %v6064_v54 = vld [vmem:[%s11444_s1 + $0xab0] sm:$0xf]  ;;  %v7399_v55 = vld [vmem:[%s11444_s1 + $0xac4] sm:$0xf0]  ;;  %v7249_v58 = vld [vmem:[%s11444_s1 + $0x614] sm:$0xf0]  ;;  %v5873_v60 = vor.u32 %v7351_v53, %v5872_v52 }
  0x2b   :  { %3039 = vmatpush.bf16.msrb.mxu3 %v6185_v59  ;;  %v5681_v59 = vor.u32 %v7303_v51, %v5680_v49  ;;  %v5656_v61 = vld [vmem:[%s11444_s1 + $0x780] sm:$0xf]  ;;  %v7297_v62 = vld [vmem:[%s11444_s1 + $0x794] sm:$0xf0]  ;;  %v6400_v4 = vld [vmem:[%s11444_s1 + $0xd50] sm:$0xf]  ;;  %v5465_v7 = vor.u32 %v7249_v58, %v5464_v57 }
  0x2c   :  { %3001 = vmatpush.bf16.msrb.mxu0 %v5585_v0  ;;  %v5848_v63 = vld [vmem:[%s11444_s1 + $0x900] sm:$0xf]  ;;  %v6065_v0 = vor.u32 %v7399_v55, %v6064_v54  ;;  %v7393_v3 = vld [vmem:[%s11444_s1 + $0xa94] sm:$0xf0]  ;;  %v6592_v6 = vld [vmem:[%s11444_s1 + $0xed0] sm:$0xf]  ;;  %v5657_v13 = vor.u32 %v7297_v62, %v5656_v61 }
  0x2d   :  { %3014 = vmatpush.bf16.msrb.mxu1 %v5777_v1  ;;  %v7345_v1 = vld [vmem:[%s11444_s1 + $0x914] sm:$0xf0]  ;;  %v6040_v2 = vld [vmem:[%s11444_s1 + $0xa80] sm:$0xf]  ;;  %v7531_v10 = vld [vmem:[%s11444_s1 + $0xee4] sm:$0xf0] }
  0x2e   :  { %3027 = vmatpush.bf16.msrb.mxu2 %v5969_v5  ;;  %v7483_v5 = vld [vmem:[%s11444_s1 + $0xd64] sm:$0xf0]  ;;  %v4866_v12 = vld [vmem:[%s11444_s1 + $0x168] sm:$0xf0]  ;;  %v5849_v14 = vor.u32 %v7345_v1, %v5848_v63  ;;  %v7144_v16 = vld [vmem:[%s11444_s1 + $0x2d4] sm:$0xf]  ;;  %v6041_v19 = vor.u32 %v7393_v3, %v6040_v2  ;;  %v6593_v24 = vor.u32 %v7531_v10, %v6592_v6 }
  0x2f   :  { %3040 = vmatpush.bf16.msrb.mxu3 %v6161_v11  ;;  %v7096_v11 = vld [vmem:[%s11444_s1 + $0x154] sm:$0xf]  ;;  %v5058_v17 = vld [vmem:[%s11444_s1 + $0x2e8] sm:$0xf0]  ;;  %v37_v22 = vld [vmem:[%s11445_s0 + $0x20] sm:$0xff] }
  0x30   :  { %3002 = vmatpush.bf16.msrb.mxu0 %v5561_v18  ;;  %v39_v18 = vld [vmem:[%s11445_s0 + $0x30] sm:$0xff]  ;;  %v40_v23 = vld [vmem:[%s11445_s0 + $0x38] sm:$0xff]  ;;  %v6568_v28 = vld [vmem:[%s11444_s1 + $0xea0] sm:$0xf]  ;;  %v5061_v30 = vor.u32 %v7144_v16, %v5058_v17  ;;  %v8167_v37 = vpack.c.bf16 %v37_v22, %v37_v22 }
  0x31   :  { %3015 = vmatpush.bf16.msrb.mxu1 %v5753_v20  ;;  %v6401_v20 = vor.u32 %v7483_v5, %v6400_v4  ;;  %v7477_v27 = vld [vmem:[%s11444_s1 + $0xd34] sm:$0xf0]  ;;  %v38_v29 = vld [vmem:[%s11445_s0 + $0x28] sm:$0xff]  ;;  %v7138_v35 = vld [vmem:[%s11444_s1 + $0x2a4] sm:$0xf] }
  0x32   :  { %3028 = vmatpush.bf16.msrb.mxu2 %v5945_v21  ;;  %v6376_v21 = vld [vmem:[%s11444_s1 + $0xd20] sm:$0xf]  ;;  %v7525_v31 = vld [vmem:[%s11444_s1 + $0xeb4] sm:$0xf0]  ;;  %v5034_v36 = vld [vmem:[%s11444_s1 + $0x2b8] sm:$0xf0]  ;;  %v8171_v40 = vpack.c.bf16 %v38_v29, %v38_v29 }
  0x33   :  { %3041 = vmatpush.bf16.msrb.mxu3 %v6137_v26  ;;  %v4869_v26 = vor.u32 %v7096_v11, %v4866_v12  ;;  %v6377_v39 = vor.u32 %v7477_v27, %v6376_v21  ;;  %v6569_v41 = vor.u32 %v7525_v31, %v6568_v28  ;;  %v6352_v43 = vld [vmem:[%s11444_s1 + $0xcf0] sm:$0xf]  ;;  %v7519_v47 = vld [vmem:[%s11444_s1 + $0xe84] sm:$0xf0]  ;;  %v7084_v48 = vld [vmem:[%s11444_s1 + $0xf4] sm:$0xf] }
  0x34   :  { %3003 = vmatpush.bf16.msrb.mxu0 %v5537_v32  ;;  %v7090_v32 = vld [vmem:[%s11444_s1 + $0x124] sm:$0xf]  ;;  %v4818_v49 = vld [vmem:[%s11444_s1 + $0x108] sm:$0xf0]  ;;  %v6328_v55 = vld [vmem:[%s11444_s1 + $0xcc0] sm:$0xf] }
  0x35   :  { %3016 = vmatpush.bf16.msrb.mxu1 %v5729_v33  ;;  %v4842_v33 = vld [vmem:[%s11444_s1 + $0x138] sm:$0xf0]  ;;  %v5010_v51 = vld [vmem:[%s11444_s1 + $0x288] sm:$0xf0]  ;;  %v4821_v54 = vor.u32 %v7084_v48, %v4818_v49  ;;  %v6520_v57 = vld [vmem:[%s11444_s1 + $0xe40] sm:$0xf] }
  0x36   :  { %3029 = vmatpush.bf16.msrb.mxu2 %v5921_v34  ;;  %v8159_v34 = vpack.c.bf16 %v39_v18, %v39_v18  ;;  %v4845_v42 = vor.u32 %v7090_v32, %v4842_v33  ;;  %v4794_v61 = vld [vmem:[%s11444_s1 + $0xd8] sm:$0xf0]  ;;  %v7126_v62 = vld [vmem:[%s11444_s1 + $0x244] sm:$0xf]  ;;  %v6304_v3 = vld [vmem:[%s11444_s1 + $0xc90] sm:$0xf] }
  0x37   :  { %3042 = vmatpush.bf16.msrb.mxu3 %v6113_v38  ;;  %v8169_v38 = vpack.c.bf16 %v40_v23, %v40_v23  ;;  %v4986_v63 = vld [vmem:[%s11444_s1 + $0x258] sm:$0xf0]  ;;  %v7459_v4 = vld [vmem:[%s11444_s1 + $0xca4] sm:$0xf0]  ;;  %v6496_v5 = vld [vmem:[%s11444_s1 + $0xe10] sm:$0xf] }
  0x38   :  { %3004 = vmatpush.bf16.msrb.mxu0 %v5513_v44  ;;  %v7471_v44 = vld [vmem:[%s11444_s1 + $0xd04] sm:$0xf0]  ;;  %v4989_v6 = vor.u32 %v7126_v62, %v4986_v63  ;;  %v7072_v10 = vld [vmem:[%s11444_s1 + $0x94] sm:$0xf]  ;;  %v4770_v11 = vld [vmem:[%s11444_s1 + $0xa8] sm:$0xf0] }
  0x39   :  { %3017 = vmatpush.bf16.msrb.mxu1 %v5705_v45  ;;  %v6544_v45 = vld [vmem:[%s11444_s1 + $0xe70] sm:$0xf]  ;;  %v6353_v52 = vor.u32 %v7471_v44, %v6352_v43  ;;  %v7120_v12 = vld [vmem:[%s11444_s1 + $0x214] sm:$0xf]  ;;  %v4773_v17 = vor.u32 %v7072_v10, %v4770_v11  ;;  %v6280_v18 = vld [vmem:[%s11444_s1 + $0xc60] sm:$0xf] }
  0x3a   :  { %3030 = vmatpush.bf16.msrb.mxu2 %v5897_v46  ;;  %v5037_v46 = vor.u32 %v7138_v35, %v5034_v36  ;;  %v6545_v53 = vor.u32 %v7519_v47, %v6544_v45  ;;  %v7501_v22 = vld [vmem:[%s11444_s1 + $0xdf4] sm:$0xf0]  ;;  %v7066_v23 = vld [vmem:[%s11444_s1 + $0x64] sm:$0xf]  ;;  %v4938_v27 = vld [vmem:[%s11444_s1 + $0x1f8] sm:$0xf0] }
  0x3b   :  { %3043 = vmatpush.bf16.msrb.mxu3 %v6089_v50  ;;  %v7132_v50 = vld [vmem:[%s11444_s1 + $0x274] sm:$0xf]  ;;  %v6256_v31 = vld [vmem:[%s11444_s1 + $0xc30] sm:$0xf]  ;;  %v7447_v32 = vld [vmem:[%s11444_s1 + $0xc44] sm:$0xf0] }
  0x3c   :  { %3005 = vmatpush.bf16.msrb.mxu0 %v5489_v56  ;;  %v7465_v56 = vld [vmem:[%s11444_s1 + $0xcd4] sm:$0xf0]  ;;  %v5013_v58 = vor.u32 %v7132_v50, %v5010_v51  ;;  %v6448_v33 = vld [vmem:[%s11444_s1 + $0xdb0] sm:$0xf]  ;;  %v7495_v36 = vld [vmem:[%s11444_s1 + $0xdc4] sm:$0xf0]  ;;  %v6257_v44 = vor.u32 %v7447_v32, %v6256_v31 }
  0x3d   :  { %3018 = vmatpush.bf16.msrb.mxu1 %v5681_v59  ;;  %v7513_v59 = vld [vmem:[%s11444_s1 + $0xe54] sm:$0xf0]  ;;  %v4914_v43 = vld [vmem:[%s11444_s1 + $0x1c8] sm:$0xf0]  ;;  %v6232_v45 = vld [vmem:[%s11444_s1 + $0xc00] sm:$0xf]  ;;  %v6449_v47 = vor.u32 %v7495_v36, %v6448_v33 }
  0x3e   :  { %3031 = vmatpush.bf16.msrb.mxu2 %v5873_v60  ;;  %v7078_v60 = vld [vmem:[%s11444_s1 + $0xc4] sm:$0xf]  ;;  %v6521_v1 = vor.u32 %v7513_v59, %v6520_v57  ;;  %v6424_v49 = vld [vmem:[%s11444_s1 + $0xd80] sm:$0xf]  ;;  %v7489_v50 = vld [vmem:[%s11444_s1 + $0xd94] sm:$0xf0] }
  0x3f   :  { %3044 = vmatpush.bf16.msrb.mxu3 %v6065_v0  ;;  %v6329_v0 = vor.u32 %v7465_v56, %v6328_v55  ;;  %v4797_v2 = vor.u32 %v7078_v60, %v4794_v61  ;;  %v7054_v51 = vld [vmem:[%s11444_s1 + $0x4] sm:$0xf]  ;;  %v4890_v55 = vld [vmem:[%s11444_s1 + $0x198] sm:$0xf0]  ;;  %v7192_v56 = vld [vmem:[%s11444_s1 + $0x454] sm:$0xf]  ;;  %v6425_v63 = vor.u32 %v7489_v50, %v6424_v49 }
  0x40   :  { %3006 = vmatpush.bf16.msrb.mxu0 %v5465_v7  ;;  %v7507_v7 = vld [vmem:[%s11444_s1 + $0xe24] sm:$0xf0]  ;;  %v5250_v57 = vld [vmem:[%s11444_s1 + $0x468] sm:$0xf0]  ;;  %v7288_v61 = vld [vmem:[%s11444_s1 + $0x754] sm:$0xf] }
  0x41   :  { %3019 = vmatpush.bf16.msrb.mxu1 %v5657_v13  ;;  %v4962_v13 = vld [vmem:[%s11444_s1 + $0x228] sm:$0xf0]  ;;  %v6497_v16 = vor.u32 %v7507_v7, %v6496_v5  ;;  %v5253_v5 = vor.u32 %v7192_v56, %v5250_v57  ;;  %v7186_v11 = vld [vmem:[%s11444_s1 + $0x424] sm:$0xf]  ;;  %v7276_v32 = vld [vmem:[%s11444_s1 + $0x6f4] sm:$0xf] }
  0x42   :  { %3032 = vmatpush.bf16.msrb.mxu2 %v5849_v14  ;;  %v6305_v14 = vor.u32 %v7459_v4, %v6304_v3  ;;  %v4965_v21 = vor.u32 %v7120_v12, %v4962_v13  ;;  %v5442_v60 = vld [vmem:[%s11444_s1 + $0x5e8] sm:$0xf0]  ;;  %v41_v3 = vld [vmem:[%s11445_s0 + $0x40] sm:$0xff]  ;;  %v5226_v12 = vld [vmem:[%s11444_s1 + $0x438] sm:$0xf0] }
  0x43   :  { %3045 = vmatpush.bf16.msrb.mxu3 %v6041_v19  ;;  %3007 = vmatmul.bf16.vlgmr.msrb.gmra.mxu0 %v8167_v37  ;;  %v7453_v19 = vld [vmem:[%s11444_s1 + $0xc74] sm:$0xf0]  ;;  %v5634_v62 = vld [vmem:[%s11444_s1 + $0x768] sm:$0xf0]  ;;  %v7234_v13 = vld [vmem:[%s11444_s1 + $0x5a4] sm:$0xf] }
  0x44   :  { %3051 = vmatpush.bf16.msra.mxu0 %v6401_v20  ;;  %3020 = vmatmul.bf16.vlgmr.msrb.gmra.mxu1 %v8171_v40  ;;  %v6472_v20 = vld [vmem:[%s11444_s1 + $0xde0] sm:$0xf]  ;;  %v6281_v28 = vor.u32 %v7453_v19, %v6280_v18  ;;  %v5637_v10 = vor.u32 %v7288_v61, %v5634_v62  ;;  %v7282_v18 = vld [vmem:[%s11444_s1 + $0x724] sm:$0xf]  ;;  %v5610_v19 = vld [vmem:[%s11444_s1 + $0x738] sm:$0xf0] }
  0x45   :  { %3064 = vmatpush.bf16.msra.mxu1 %v6593_v24  ;;  %3033 = vmatmul.bf16.vlgmr.msrb.gmra.mxu2 %v8159_v34  ;;  %v4746_v24 = vld [vmem:[%s11444_s1 + $0x78] sm:$0xf0]  ;;  %v6473_v29 = vor.u32 %v7501_v22, %v6472_v20  ;;  %v5394_v31 = vld [vmem:[%s11444_s1 + $0x588] sm:$0xf0]  ;;  %v7318_v50 = vld [vmem:[%s11444_s1 + $0x844] sm:$0xf] }
  0x46   :  { %3077 = vmatpush.bf16.msra.mxu2 %v4869_v26  ;;  %3046 = vmatmul.bf16.vlgmr.msrb.gmra.mxu3 %v8169_v38  ;;  %v7114_v26 = vld [vmem:[%s11444_s1 + $0x1e4] sm:$0xf]  ;;  %v5802_v22 = vld [vmem:[%s11444_s1 + $0x8b8] sm:$0xf0]  ;;  %v5586_v33 = vld [vmem:[%s11444_s1 + $0x708] sm:$0xf0] }
  0x47   :  { %3090 = vmatpush.bf16.msra.mxu3 %v5061_v30  ;;  %v4749_v30 = vor.u32 %v7066_v23, %v4746_v24  ;;  %v4941_v35 = vor.u32 %v7114_v26, %v4938_v27  ;;  %v5229_v23 = vor.u32 %v7186_v11, %v5226_v12  ;;  %v5613_v26 = vor.u32 %v7282_v18, %v5610_v19  ;;  %v7180_v27 = vld [vmem:[%s11444_s1 + $0x3f4] sm:$0xf]  ;;  %v5778_v36 = vld [vmem:[%s11444_s1 + $0x888] sm:$0xf0]  ;;  %v5562_v49 = vld [vmem:[%s11444_s1 + $0x6d8] sm:$0xf0] }
  0x48   :  { %3052 = vmatpush.bf16.msra.mxu0 %v6377_v39  ;;  %v7060_v39 = vld [vmem:[%s11444_s1 + $0x34] sm:$0xf]  ;;  %v5154_v56 = vld [vmem:[%s11444_s1 + $0x3a8] sm:$0xf0]  ;;  %v5514_v11 = vld [vmem:[%s11444_s1 + $0x678] sm:$0xf0] }
  0x49   :  { %3065 = vmatpush.bf16.msra.mxu1 %v6569_v41  ;;  %v4722_v41 = vld [vmem:[%s11444_s1 + $0x48] sm:$0xf0]  ;;  %v7216_v57 = vld [vmem:[%s11444_s1 + $0x514] sm:$0xf]  ;;  %v7306_v12 = vld [vmem:[%s11444_s1 + $0x7e4] sm:$0xf] }
  0x4a   :  { %3078 = vmatpush.bf16.msra.mxu2 %v4845_v42  ;;  %v7108_v42 = vld [vmem:[%s11444_s1 + $0x1b4] sm:$0xf]  ;;  %v4725_v48 = vor.u32 %v7060_v39, %v4722_v41  ;;  %v5538_v61 = vld [vmem:[%s11444_s1 + $0x6a8] sm:$0xf0] }
  0x4b   :  { %3091 = vmatpush.bf16.msra.mxu3 %v5037_v46  ;;  %v7441_v46 = vld [vmem:[%s11444_s1 + $0xc14] sm:$0xf0]  ;;  %v7312_v62 = vld [vmem:[%s11444_s1 + $0x814] sm:$0xf] }
  0x4c   :  { %3053 = vmatpush.bf16.msra.mxu0 %v6353_v52  ;;  %v4917_v52 = vor.u32 %v7108_v42, %v4914_v43  ;;  %v6233_v59 = vor.u32 %v7441_v46, %v6232_v45  ;;  %v5589_v42 = vor.u32 %v7276_v32, %v5586_v33  ;;  %v7174_v43 = vld [vmem:[%s11444_s1 + $0x3c4] sm:$0xf]  ;;  %v7156_v19 = vld [vmem:[%s11444_s1 + $0x334] sm:$0xf]  ;;  %v5082_v32 = vld [vmem:[%s11444_s1 + $0x318] sm:$0xf0] }
  0x4d   :  { %3066 = vmatpush.bf16.msra.mxu1 %v6545_v53  ;;  %v4698_v53 = vld [vmem:[%s11444_s1 + $0x18] sm:$0xf0]  ;;  %v7222_v45 = vld [vmem:[%s11444_s1 + $0x544] sm:$0xf] }
  0x4e   :  { %3079 = vmatpush.bf16.msra.mxu2 %v4821_v54  ;;  %v7102_v54 = vld [vmem:[%s11444_s1 + $0x184] sm:$0xf] }
  0x4f   :  { %3092 = vmatpush.bf16.msra.mxu3 %v5013_v58  ;;  %v7240_v58 = vld [vmem:[%s11444_s1 + $0x5d4] sm:$0xf]  ;;  %v4893_v4 = vor.u32 %v7102_v54, %v4890_v55 }
  0x50   :  { %3054 = vmatpush.bf16.msra.mxu0 %v6329_v0  ;;  %v4701_v0 = vor.u32 %v7054_v51, %v4698_v53  ;;  %v5445_v7 = vor.u32 %v7240_v58, %v5442_v60  ;;  %v5754_v51 = vld [vmem:[%s11444_s1 + $0x858] sm:$0xf0]  ;;  %v7168_v55 = vld [vmem:[%s11444_s1 + $0x394] sm:$0xf] }
  0x51   :  { %3067 = vmatpush.bf16.msra.mxu1 %v6521_v1  ;;  %v7336_v1 = vld [vmem:[%s11444_s1 + $0x8d4] sm:$0xf]  ;;  %v5757_v58 = vor.u32 %v7318_v50, %v5754_v51  ;;  %v6210_v50 = vld [vmem:[%s11444_s1 + $0xbe8] sm:$0xf0] }
  0x52   :  { %3080 = vmatpush.bf16.msra.mxu2 %v4797_v2  ;;  %v5826_v2 = vld [vmem:[%s11444_s1 + $0x8e8] sm:$0xf0]  ;;  %v7264_v60 = vld [vmem:[%s11444_s1 + $0x694] sm:$0xf] }
  0x53   :  { %3093 = vmatpush.bf16.msra.mxu3 %v4989_v6  ;;  %v42_v6 = vld [vmem:[%s11445_s0 + $0x48] sm:$0xff]  ;;  %v7480_v51 = vld [vmem:[%s11444_s1 + $0xd54] sm:$0xf] }
  0x54   :  { %3055 = vmatpush.bf16.msra.mxu0 %v6305_v14  ;;  %v5829_v14 = vor.u32 %v7336_v1, %v5826_v2  ;;  %v8371_v20 = vpack.c.bf16 %v42_v6, %v42_v6  ;;  %v5541_v2 = vor.u32 %v7264_v60, %v5538_v61  ;;  %v7378_v61 = vld [vmem:[%s11444_s1 + $0xa24] sm:$0xf] }
  0x55   :  { %3068 = vmatpush.bf16.msra.mxu1 %v6497_v16  ;;  %v8360_v16 = vpack.c.bf16 %v41_v3, %v41_v3  ;;  %v7162_v3 = vld [vmem:[%s11444_s1 + $0x364] sm:$0xf] }
  0x56   :  { %3081 = vmatpush.bf16.msra.mxu2 %v4773_v17  ;;  %v5418_v17 = vld [vmem:[%s11444_s1 + $0x5b8] sm:$0xf0] }
  0x57   :  { %3094 = vmatpush.bf16.msra.mxu3 %v4965_v21  ;;  %v7330_v21 = vld [vmem:[%s11444_s1 + $0x8a4] sm:$0xf]  ;;  %v5421_v24 = vor.u32 %v7234_v13, %v5418_v17  ;;  %v5706_v13 = vld [vmem:[%s11444_s1 + $0x7f8] sm:$0xf0] }
  0x58   :  { %3056 = vmatpush.bf16.msra.mxu0 %v6281_v28  ;;  %v5202_v28 = vld [vmem:[%s11444_s1 + $0x408] sm:$0xf0] }
  0x59   :  { %3069 = vmatpush.bf16.msra.mxu1 %v6473_v29  ;;  %v7228_v29 = vld [vmem:[%s11444_s1 + $0x574] sm:$0xf]  ;;  %v5205_v39 = vor.u32 %v7180_v27, %v5202_v28  ;;  %v5490_v27 = vld [vmem:[%s11444_s1 + $0x648] sm:$0xf0] }
  0x5a   :  { %3082 = vmatpush.bf16.msra.mxu2 %v4749_v30  ;;  %v5805_v30 = vor.u32 %v7330_v21, %v5802_v22  ;;  %v5397_v41 = vor.u32 %v7228_v29, %v5394_v31  ;;  %v5106_v21 = vld [vmem:[%s11444_s1 + $0x348] sm:$0xf0]  ;;  %v7204_v22 = vld [vmem:[%s11444_s1 + $0x4b4] sm:$0xf]  ;;  %v7150_v31 = vld [vmem:[%s11444_s1 + $0x304] sm:$0xf] }
  0x5b   :  { %3095 = vmatpush.bf16.msra.mxu3 %v4941_v35  ;;  %v7324_v35 = vld [vmem:[%s11444_s1 + $0x874] sm:$0xf]  ;;  %v5682_v29 = vld [vmem:[%s11444_s1 + $0x7c8] sm:$0xf0] }
  0x5c   :  { %3057 = vmatpush.bf16.msra.mxu0 %v6257_v44  ;;  %v5178_v44 = vld [vmem:[%s11444_s1 + $0x3d8] sm:$0xf0]  ;;  %v5781_v46 = vor.u32 %v7324_v35, %v5778_v36  ;;  %v7300_v28 = vld [vmem:[%s11444_s1 + $0x7b4] sm:$0xf]  ;;  %v7198_v36 = vld [vmem:[%s11444_s1 + $0x484] sm:$0xf] }
  0x5d   :  { %3070 = vmatpush.bf16.msra.mxu1 %v6449_v47  ;;  %v5370_v47 = vld [vmem:[%s11444_s1 + $0x558] sm:$0xf0] }
  0x5e   :  { %3083 = vmatpush.bf16.msra.mxu2 %v4725_v48  ;;  %v7270_v48 = vld [vmem:[%s11444_s1 + $0x6c4] sm:$0xf]  ;;  %v5373_v53 = vor.u32 %v7222_v45, %v5370_v47  ;;  %v5658_v45 = vld [vmem:[%s11444_s1 + $0x798] sm:$0xf0]  ;;  %v6018_v47 = vld [vmem:[%s11444_s1 + $0xa68] sm:$0xf0] }
  0x5f   :  { %3096 = vmatpush.bf16.msra.mxu3 %v4917_v52  ;;  %v5181_v52 = vor.u32 %v7174_v43, %v5178_v44  ;;  %v5565_v54 = vor.u32 %v7270_v48, %v5562_v49  ;;  %v5466_v43 = vld [vmem:[%s11444_s1 + $0x618] sm:$0xf0]  ;;  %v7294_v44 = vld [vmem:[%s11444_s1 + $0x784] sm:$0xf]  ;;  %v7432_v48 = vld [vmem:[%s11444_s1 + $0xbd4] sm:$0xf]  ;;  %v5085_v49 = vor.u32 %v7150_v31, %v5082_v32 }
  0x60   :  { %3058 = vmatpush.bf16.msra.mxu0 %v6233_v59  ;;  %v5346_v59 = vld [vmem:[%s11444_s1 + $0x528] sm:$0xf0]  ;;  %v6138_v31 = vld [vmem:[%s11444_s1 + $0xb58] sm:$0xf0]  ;;  %v7462_v32 = vld [vmem:[%s11444_s1 + $0xcc4] sm:$0xf] }
  0x61   :  { %3071 = vmatpush.bf16.msra.mxu1 %v6425_v63  ;;  %v5730_v63 = vld [vmem:[%s11444_s1 + $0x828] sm:$0xf0]  ;;  %v5349_v1 = vor.u32 %v7216_v57, %v5346_v59  ;;  %v5661_v57 = vor.u32 %v7294_v44, %v5658_v45  ;;  %v6213_v59 = vor.u32 %v7432_v48, %v6210_v50  ;;  %v7408_v45 = vld [vmem:[%s11444_s1 + $0xb14] sm:$0xf] }
  0x62   :  { %3084 = vmatpush.bf16.msra.mxu2 %v4701_v0  ;;  %v5157_v0 = vor.u32 %v7168_v55, %v5154_v56  ;;  %v5733_v6 = vor.u32 %v7312_v62, %v5730_v63  ;;  %v7528_v55 = vld [vmem:[%s11444_s1 + $0xed4] sm:$0xf]  ;;  %v6594_v56 = vld [vmem:[%s11444_s1 + $0xee8] sm:$0xf0]  ;;  %v5994_v62 = vld [vmem:[%s11444_s1 + $0xa38] sm:$0xf0] }
  0x63   :  { %3097 = vmatpush.bf16.msra.mxu3 %v4893_v4  ;;  %3059 = vmatmul.bf16.vlgmr.msra.gmra.mxu0 %v8360_v16  ;;  %v5130_v4 = vld [vmem:[%s11444_s1 + $0x378] sm:$0xf0]  ;;  %v7426_v63 = vld [vmem:[%s11444_s1 + $0xba4] sm:$0xf]  ;;  %v5922_v44 = vld [vmem:[%s11444_s1 + $0x9a8] sm:$0xf0] }
  0x64   :  { %3103 = vmatpush.bf16.msrb.mxu0 %v5253_v5  ;;  %3072 = vmatmul.bf16.vlgmr.msra.gmra.mxu1 %v8371_v20  ;;  %v7210_v5 = vld [vmem:[%s11444_s1 + $0x4e4] sm:$0xf]  ;;  %v7456_v48 = vld [vmem:[%s11444_s1 + $0xc94] sm:$0xf] }
  0x65   :  { %3116 = vmatpush.bf16.msrb.mxu1 %v5445_v7  ;;  %3085 = vmatmul.bf16.vlgmr.msra.gmra.mxu2 %v7978_v9  ;;  %v5322_v7 = vld [vmem:[%s11444_s1 + $0x4f8] sm:$0xf0]  ;;  %v7504_v50 = vld [vmem:[%s11444_s1 + $0xe14] sm:$0xf] }
  0x66   :  { %3129 = vmatpush.bf16.msrb.mxu2 %v5637_v10  ;;  %3098 = vmatmul.bf16.vlgmr.msra.gmra.mxu3 %v8015_v25  ;;  %v7258_v10 = vld [vmem:[%s11444_s1 + $0x664] sm:$0xf]  ;;  %v5325_v17 = vor.u32 %v7210_v5, %v5322_v7  ;;  %v6570_v5 = vld [vmem:[%s11444_s1 + $0xeb8] sm:$0xf0] }
  0x67   :  { %3142 = vmatpush.bf16.msrb.mxu3 %v5829_v14  ;;  %v5133_v14 = vor.u32 %v7162_v3, %v5130_v4  ;;  %v5517_v18 = vor.u32 %v7258_v10, %v5514_v11  ;;  %v6378_v3 = vld [vmem:[%s11444_s1 + $0xd38] sm:$0xf0]  ;;  %v7522_v4 = vld [vmem:[%s11444_s1 + $0xea4] sm:$0xf]  ;;  %v7372_v11 = vld [vmem:[%s11444_s1 + $0x9f4] sm:$0xf] }
  0x68   :  { %3104 = vmatpush.bf16.msrb.mxu0 %v5229_v23  ;;  %v5709_v23 = vor.u32 %v7306_v12, %v5706_v13  ;;  %v5970_v12 = vld [vmem:[%s11444_s1 + $0xa08] sm:$0xf0]  ;;  %v7420_v13 = vld [vmem:[%s11444_s1 + $0xb74] sm:$0xf] }
  0x69   :  { %3117 = vmatpush.bf16.msrb.mxu1 %v5421_v24  ;;  %v5298_v24 = vld [vmem:[%s11444_s1 + $0x4c8] sm:$0xf0] }
  0x6a   :  { %3130 = vmatpush.bf16.msrb.mxu2 %v5613_v26  ;;  %v7252_v26 = vld [vmem:[%s11444_s1 + $0x634] sm:$0xf]  ;;  %v5301_v33 = vor.u32 %v7204_v22, %v5298_v24  ;;  %v6546_v22 = vld [vmem:[%s11444_s1 + $0xe88] sm:$0xf0] }
  0x6b   :  { %3143 = vmatpush.bf16.msrb.mxu3 %v5805_v30  ;;  %v5109_v30 = vor.u32 %v7156_v19, %v5106_v21  ;;  %v5493_v35 = vor.u32 %v7252_v26, %v5490_v27  ;;  %v6354_v19 = vld [vmem:[%s11444_s1 + $0xd08] sm:$0xf0]  ;;  %v7516_v21 = vld [vmem:[%s11444_s1 + $0xe74] sm:$0xf]  ;;  %v7366_v27 = vld [vmem:[%s11444_s1 + $0x9c4] sm:$0xf] }
  0x6c   :  { %3105 = vmatpush.bf16.msrb.mxu0 %v5205_v39  ;;  %v5274_v39 = vld [vmem:[%s11444_s1 + $0x498] sm:$0xf0] }
  0x6d   :  { %3118 = vmatpush.bf16.msrb.mxu1 %v5397_v41  ;;  %v7246_v41 = vld [vmem:[%s11444_s1 + $0x604] sm:$0xf] }
  0x6e   :  { %3131 = vmatpush.bf16.msrb.mxu2 %v5589_v42  ;;  %v5685_v42 = vor.u32 %v7300_v28, %v5682_v29  ;;  %v5946_v28 = vld [vmem:[%s11444_s1 + $0x9d8] sm:$0xf0]  ;;  %v7414_v29 = vld [vmem:[%s11444_s1 + $0xb44] sm:$0xf] }
  0x6f   :  { %3144 = vmatpush.bf16.msrb.mxu3 %v5781_v46  ;;  %v7384_v46 = vld [vmem:[%s11444_s1 + $0xa54] sm:$0xf] }
  0x70   :  { %3106 = vmatpush.bf16.msrb.mxu0 %v5181_v52  ;;  %v6402_v52 = vld [vmem:[%s11444_s1 + $0xd68] sm:$0xf0] }
  0x71   :  { %3119 = vmatpush.bf16.msrb.mxu1 %v5373_v53  ;;  %v5277_v53 = vor.u32 %v7198_v36, %v5274_v39  ;;  %v6405_v60 = vor.u32 %v7480_v51, %v6402_v52  ;;  %v6522_v36 = vld [vmem:[%s11444_s1 + $0xe58] sm:$0xf0]  ;;  %v5949_v39 = vor.u32 %v7366_v27, %v5946_v28  ;;  %v6498_v51 = vld [vmem:[%s11444_s1 + $0xe28] sm:$0xf0]  ;;  %v7486_v28 = vld [vmem:[%s11444_s1 + $0xd84] sm:$0xf] }
  0x72   :  { %3132 = vmatpush.bf16.msrb.mxu2 %v5565_v54  ;;  %v5469_v54 = vor.u32 %v7246_v41, %v5466_v43  ;;  %v6141_v41 = vor.u32 %v7414_v29, %v6138_v31  ;;  %v7360_v43 = vld [vmem:[%s11444_s1 + $0x994] sm:$0xf]  ;;  %v6234_v27 = vld [vmem:[%s11444_s1 + $0xc18] sm:$0xf0]  ;;  %v7100_v31 = vld [vmem:[%s11444_s1 + $0x16c] sm:$0xf0] }
  0x73   :  { %3145 = vmatpush.bf16.msrb.mxu3 %v5757_v58  ;;  %v6021_v58 = vor.u32 %v7384_v46, %v6018_v47  ;;  %v6114_v47 = vld [vmem:[%s11444_s1 + $0xb28] sm:$0xf0]  ;;  %v5925_v52 = vor.u32 %v7360_v43, %v5922_v44  ;;  %v6426_v29 = vld [vmem:[%s11444_s1 + $0xd98] sm:$0xf0]  ;;  %v5448_v43 = vld [vmem:[%s11444_s1 + $0x5d8] sm:$0xf] }
  0x74   :  { %3107 = vmatpush.bf16.msrb.mxu0 %v5157_v0  ;;  %v6597_v0 = vor.u32 %v7528_v55, %v6594_v56  ;;  %v7354_v55 = vld [vmem:[%s11444_s1 + $0x964] sm:$0xf]  ;;  %v5898_v56 = vld [vmem:[%s11444_s1 + $0x978] sm:$0xf0]  ;;  %v7244_v44 = vld [vmem:[%s11444_s1 + $0x5ec] sm:$0xf0] }
  0x75   :  { %3120 = vmatpush.bf16.msrb.mxu1 %v5349_v1  ;;  %v6186_v1 = vld [vmem:[%s11444_s1 + $0xbb8] sm:$0xf0] }
  0x76   :  { %3133 = vmatpush.bf16.msrb.mxu2 %v5541_v2  ;;  %v7474_v2 = vld [vmem:[%s11444_s1 + $0xd24] sm:$0xf]  ;;  %v6189_v7 = vor.u32 %v7426_v63, %v6186_v1  ;;  %v6474_v63 = vld [vmem:[%s11444_s1 + $0xdf8] sm:$0xf0] }
  0x77   :  { %3146 = vmatpush.bf16.msrb.mxu3 %v5733_v6  ;;  %v5997_v6 = vor.u32 %v7378_v61, %v5994_v62  ;;  %v6381_v10 = vor.u32 %v7474_v2, %v6378_v3  ;;  %v6282_v61 = vld [vmem:[%s11444_s1 + $0xc78] sm:$0xf0]  ;;  %v7498_v62 = vld [vmem:[%s11444_s1 + $0xde4] sm:$0xf]  ;;  %v7348_v3 = vld [vmem:[%s11444_s1 + $0x934] sm:$0xf] }
  0x78   :  { %3108 = vmatpush.bf16.msrb.mxu0 %v5133_v14  ;;  %v6573_v14 = vor.u32 %v7522_v4, %v6570_v5  ;;  %v5874_v4 = vld [vmem:[%s11444_s1 + $0x948] sm:$0xf0]  ;;  %v7396_v5 = vld [vmem:[%s11444_s1 + $0xab4] sm:$0xf] }
  0x79   :  { %3121 = vmatpush.bf16.msrb.mxu1 %v5325_v17  ;;  %v6162_v17 = vld [vmem:[%s11444_s1 + $0xb88] sm:$0xf0] }
  0x7a   :  { %3134 = vmatpush.bf16.msrb.mxu2 %v5517_v18  ;;  %v7468_v18 = vld [vmem:[%s11444_s1 + $0xcf4] sm:$0xf]  ;;  %v6165_v24 = vor.u32 %v7420_v13, %v6162_v17  ;;  %v6450_v13 = vld [vmem:[%s11444_s1 + $0xdc8] sm:$0xf0]  ;;  %v7342_v17 = vld [vmem:[%s11444_s1 + $0x904] sm:$0xf] }
  0x7b   :  { %3147 = vmatpush.bf16.msrb.mxu3 %v5709_v23  ;;  %v5973_v23 = vor.u32 %v7372_v11, %v5970_v12  ;;  %v6357_v26 = vor.u32 %v7468_v18, %v6354_v19  ;;  %v6258_v11 = vld [vmem:[%s11444_s1 + $0xc48] sm:$0xf0]  ;;  %v7492_v12 = vld [vmem:[%s11444_s1 + $0xdb4] sm:$0xf]  ;;  %v5850_v18 = vld [vmem:[%s11444_s1 + $0x918] sm:$0xf0] }
  0x7c   :  { %3109 = vmatpush.bf16.msrb.mxu0 %v5109_v30  ;;  %v6549_v30 = vor.u32 %v7516_v21, %v6546_v22  ;;  %v7390_v22 = vld [vmem:[%s11444_s1 + $0xa84] sm:$0xf] }
  0x7d   :  { %3122 = vmatpush.bf16.msrb.mxu1 %v5301_v33  ;;  %v6330_v33 = vld [vmem:[%s11444_s1 + $0xcd8] sm:$0xf0] }
  0x7e   :  { %3135 = vmatpush.bf16.msrb.mxu2 %v5493_v35  ;;  %v7510_v35 = vld [vmem:[%s11444_s1 + $0xe44] sm:$0xf] }
  0x7f   :  { %3148 = vmatpush.bf16.msrb.mxu3 %v5685_v42  ;;  %v6333_v42 = vor.u32 %v7462_v32, %v6330_v33  ;;  %v6525_v46 = vor.u32 %v7510_v35, %v6522_v36  ;;  %v5064_v32 = vld [vmem:[%s11444_s1 + $0x2d8] sm:$0xf]  ;;  %v5853_v33 = vor.u32 %v7342_v17, %v5850_v18  ;;  %v7148_v35 = vld [vmem:[%s11444_s1 + $0x2ec] sm:$0xf0]  ;;  %v5184_v18 = vld [vmem:[%s11444_s1 + $0x3c8] sm:$0xf] }
  0x80   :  { %3110 = vmatpush.bf16.msrb.mxu0 %v5085_v49  ;;  %v6306_v49 = vld [vmem:[%s11444_s1 + $0xca8] sm:$0xf0]  ;;  %v5256_v36 = vld [vmem:[%s11444_s1 + $0x458] sm:$0xf] }
  0x81   :  { %3123 = vmatpush.bf16.msrb.mxu1 %v5277_v53  ;;  %v6117_v53 = vor.u32 %v7408_v45, %v6114_v47  ;;  %v6429_v45 = vor.u32 %v7486_v28, %v6426_v29  ;;  %v5065_v47 = vor.u32 %v7148_v35, %v5064_v32  ;;  %v7076_v29 = vld [vmem:[%s11444_s1 + $0xac] sm:$0xf0]  ;;  %v5160_v35 = vld [vmem:[%s11444_s1 + $0x398] sm:$0xf] }
  0x82   :  { %3136 = vmatpush.bf16.msrb.mxu2 %v5469_v54  ;;  %v6309_v54 = vor.u32 %v7456_v48, %v6306_v49  ;;  %v4848_v49 = vld [vmem:[%s11444_s1 + $0x128] sm:$0xf] }
  0x83   :  { %3149 = vmatpush.bf16.msrb.mxu3 %v5661_v57  ;;  %3111 = vmatmul.bf16.vlgmr.msrb.gmra.mxu0 %v7976_v8  ;;  %v7402_v57 = vld [vmem:[%s11444_s1 + $0xae4] sm:$0xf] }
  0x84   :  { %3155 = vmatpush.bf16.msra.mxu0 %v6021_v58  ;;  %3124 = vmatmul.bf16.vlgmr.msrb.gmra.mxu1 %v7992_v15  ;;  %v6501_v58 = vor.u32 %v7504_v50, %v6498_v51  ;;  %v7094_v50 = vld [vmem:[%s11444_s1 + $0x13c] sm:$0xf0]  ;;  %v5040_v51 = vld [vmem:[%s11444_s1 + $0x2a8] sm:$0xf] }
  0x85   :  { %3168 = vmatpush.bf16.msra.mxu1 %v6213_v59  ;;  %3137 = vmatmul.bf16.vlgmr.msrb.gmra.mxu2 %v8167_v37  ;;  %v6090_v59 = vld [vmem:[%s11444_s1 + $0xaf8] sm:$0xf0] }
  0x86   :  { %3181 = vmatpush.bf16.msra.mxu2 %v6405_v60  ;;  %3150 = vmatmul.bf16.vlgmr.msrb.gmra.mxu3 %v8171_v40  ;;  %v7450_v60 = vld [vmem:[%s11444_s1 + $0xc64] sm:$0xf]  ;;  %v6093_v1 = vor.u32 %v7402_v57, %v6090_v59  ;;  %v7238_v57 = vld [vmem:[%s11444_s1 + $0x5bc] sm:$0xf0] }
  0x87   :  { %3194 = vmatpush.bf16.msra.mxu3 %v6597_v0  ;;  %v5901_v0 = vor.u32 %v7354_v55, %v5898_v56  ;;  %v6285_v2 = vor.u32 %v7450_v60, %v6282_v61  ;;  %v7190_v55 = vld [vmem:[%s11444_s1 + $0x43c] sm:$0xf0]  ;;  %v5424_v56 = vld [vmem:[%s11444_s1 + $0x5a8] sm:$0xf]  ;;  %v4824_v61 = vld [vmem:[%s11444_s1 + $0xf8] sm:$0xf] }
  0x88   :  { %3156 = vmatpush.bf16.msra.mxu0 %v5997_v6  ;;  %v6477_v6 = vor.u32 %v7498_v62, %v6474_v63  ;;  %v7088_v62 = vld [vmem:[%s11444_s1 + $0x10c] sm:$0xf0]  ;;  %v5016_v63 = vld [vmem:[%s11444_s1 + $0x278] sm:$0xf] }
  0x89   :  { %3169 = vmatpush.bf16.msra.mxu1 %v6189_v7  ;;  %v6066_v7 = vld [vmem:[%s11444_s1 + $0xac8] sm:$0xf0] }
  0x8a   :  { %3182 = vmatpush.bf16.msra.mxu2 %v6381_v10  ;;  %v7444_v10 = vld [vmem:[%s11444_s1 + $0xc34] sm:$0xf]  ;;  %v6069_v19 = vor.u32 %v7396_v5, %v6066_v7  ;;  %v7232_v5 = vld [vmem:[%s11444_s1 + $0x58c] sm:$0xf0]  ;;  %v4800_v7 = vld [vmem:[%s11444_s1 + $0xc8] sm:$0xf] }
  0x8b   :  { %3195 = vmatpush.bf16.msra.mxu3 %v6573_v14  ;;  %v5877_v14 = vor.u32 %v7348_v3, %v5874_v4  ;;  %v6261_v21 = vor.u32 %v7444_v10, %v6258_v11  ;;  %v7184_v3 = vld [vmem:[%s11444_s1 + $0x40c] sm:$0xf0]  ;;  %v5400_v4 = vld [vmem:[%s11444_s1 + $0x578] sm:$0xf] }
  0x8c   :  { %3157 = vmatpush.bf16.msra.mxu0 %v5973_v23  ;;  %v6042_v23 = vld [vmem:[%s11444_s1 + $0xa98] sm:$0xf0]  ;;  %v5401_v17 = vor.u32 %v7232_v5, %v5400_v4  ;;  %v5304_v5 = vld [vmem:[%s11444_s1 + $0x4b8] sm:$0xf] }
  0x8d   :  { %3170 = vmatpush.bf16.msra.mxu1 %v6165_v24  ;;  %v7438_v24 = vld [vmem:[%s11444_s1 + $0xc04] sm:$0xf] }
  0x8e   :  { %3183 = vmatpush.bf16.msra.mxu2 %v6357_v26  ;;  %v6453_v26 = vor.u32 %v7492_v12, %v6450_v13  ;;  %v7082_v12 = vld [vmem:[%s11444_s1 + $0xdc] sm:$0xf0]  ;;  %v4992_v13 = vld [vmem:[%s11444_s1 + $0x248] sm:$0xf] }
  0x8f   :  { %3196 = vmatpush.bf16.msra.mxu3 %v6549_v30  ;;  %v4872_v30 = vld [vmem:[%s11444_s1 + $0x158] sm:$0xf] }
  0x90   :  { %3158 = vmatpush.bf16.msra.mxu0 %v5949_v39  ;;  %v7196_v39 = vld [vmem:[%s11444_s1 + $0x46c] sm:$0xf0] }
  0x91   :  { %3171 = vmatpush.bf16.msra.mxu1 %v6141_v41  ;;  %v6045_v41 = vor.u32 %v7390_v22, %v6042_v23  ;;  %v5257_v48 = vor.u32 %v7196_v39, %v5256_v36  ;;  %v5376_v22 = vld [vmem:[%s11444_s1 + $0x548] sm:$0xf]  ;;  %v7226_v23 = vld [vmem:[%s11444_s1 + $0x55c] sm:$0xf0]  ;;  %v7172_v36 = vld [vmem:[%s11444_s1 + $0x3ac] sm:$0xf0] }
  0x92   :  { %3184 = vmatpush.bf16.msra.mxu2 %v6333_v42  ;;  %v6237_v42 = vor.u32 %v7438_v24, %v6234_v27  ;;  %v4801_v24 = vor.u32 %v7082_v12, %v4800_v7  ;;  %v5377_v32 = vor.u32 %v7226_v23, %v5376_v22  ;;  %v5352_v39 = vld [vmem:[%s11444_s1 + $0x518] sm:$0xf]  ;;  %v4704_v12 = vld [vmem:[%s11444_s1 + $0x8] sm:$0xf]  ;;  %v7106_v22 = vld [vmem:[%s11444_s1 + $0x19c] sm:$0xf0] }
  0x93   :  { %3197 = vmatpush.bf16.msra.mxu3 %v6525_v46  ;;  %v4873_v46 = vor.u32 %v7100_v31, %v4872_v30  ;;  %v4968_v30 = vld [vmem:[%s11444_s1 + $0x218] sm:$0xf]  ;;  %v5088_v23 = vld [vmem:[%s11444_s1 + $0x308] sm:$0xf] }
  0x94   :  { %3159 = vmatpush.bf16.msra.mxu0 %v5925_v52  ;;  %v5449_v52 = vor.u32 %v7244_v44, %v5448_v43 }
  0x95   :  { %3172 = vmatpush.bf16.msra.mxu1 %v6117_v53  ;;  %v7142_v53 = vld [vmem:[%s11444_s1 + $0x2bc] sm:$0xf0] }
  0x96   :  { %3185 = vmatpush.bf16.msra.mxu2 %v6309_v54  ;;  %v5232_v54 = vld [vmem:[%s11444_s1 + $0x428] sm:$0xf]  ;;  %v5041_v59 = vor.u32 %v7142_v53, %v5040_v51  ;;  %v7118_v51 = vld [vmem:[%s11444_s1 + $0x1fc] sm:$0xf0] }
  0x97   :  { %3198 = vmatpush.bf16.msra.mxu3 %v6501_v58  ;;  %v4849_v58 = vor.u32 %v7094_v50, %v4848_v49  ;;  %v5233_v60 = vor.u32 %v7190_v55, %v5232_v54  ;;  %v7166_v53 = vld [vmem:[%s11444_s1 + $0x37c] sm:$0xf0]  ;;  %v5328_v54 = vld [vmem:[%s11444_s1 + $0x4e8] sm:$0xf] }
  0x98   :  { %3160 = vmatpush.bf16.msra.mxu0 %v5901_v0  ;;  %v5425_v0 = vor.u32 %v7238_v57, %v5424_v56  ;;  %v7214_v55 = vld [vmem:[%s11444_s1 + $0x4fc] sm:$0xf0] }
  0x99   :  { %3173 = vmatpush.bf16.msra.mxu1 %v6093_v1  ;;  %v7136_v1 = vld [vmem:[%s11444_s1 + $0x28c] sm:$0xf0] }
  0x9a   :  { %3186 = vmatpush.bf16.msra.mxu2 %v6285_v2  ;;  %v5208_v2 = vld [vmem:[%s11444_s1 + $0x3f8] sm:$0xf]  ;;  %v5017_v10 = vor.u32 %v7136_v1, %v5016_v63  ;;  %v7112_v1 = vld [vmem:[%s11444_s1 + $0x1cc] sm:$0xf0] }
  0x9b   :  { %3199 = vmatpush.bf16.msra.mxu3 %v6477_v6  ;;  %v4825_v6 = vor.u32 %v7088_v62, %v4824_v61  ;;  %v5209_v11 = vor.u32 %v7184_v3, %v5208_v2  ;;  %v7064_v61 = vld [vmem:[%s11444_s1 + $0x4c] sm:$0xf0]  ;;  %v4920_v62 = vld [vmem:[%s11444_s1 + $0x1b8] sm:$0xf] }
  0x9c   :  { %3161 = vmatpush.bf16.msra.mxu0 %v5877_v14  ;;  %v7130_v14 = vld [vmem:[%s11444_s1 + $0x25c] sm:$0xf0]  ;;  %v5112_v2 = vld [vmem:[%s11444_s1 + $0x338] sm:$0xf]  ;;  %v7160_v3 = vld [vmem:[%s11444_s1 + $0x34c] sm:$0xf0] }
  0x9d   :  { %3174 = vmatpush.bf16.msra.mxu1 %v6069_v19  ;;  %v7178_v19 = vld [vmem:[%s11444_s1 + $0x3dc] sm:$0xf0]  ;;  %v4993_v27 = vor.u32 %v7130_v14, %v4992_v13 }
  0x9e   :  { %3187 = vmatpush.bf16.msra.mxu2 %v6261_v21  ;;  %v8820_v21 = vld [vmem:[%s11446_s2] sm:$0x3f]  ;;  %v5185_v28 = vor.u32 %v7178_v19, %v5184_v18  ;;  %v5113_v18 = vor.u32 %v7160_v3, %v5112_v2  ;;  %v4896_v19 = vld [vmem:[%s11444_s1 + $0x188] sm:$0xf]  ;;  %v5784_v2 = vld [vmem:[%s11444_s1 + $0x878] sm:$0xf] }
  0x9f   :  { %3200 = vmatpush.bf16.msra.mxu3 %v6453_v26  ;;  %v4776_v26 = vld [vmem:[%s11444_s1 + $0x98] sm:$0xf]  ;;  %v535_v31 = vperm.slane %v8820_v21, 0  ;;  %v7058_v13 = vld [vmem:[%s11444_s1 + $0x1c] sm:$0xf0] }
  0xa0   :  { %3162 = vmatpush.bf16.msra.mxu0 %v5853_v33  ;;  %v7124_v33 = vld [vmem:[%s11444_s1 + $0x22c] sm:$0xf0]  ;;  %v2956_v43 = vpop.f32.mrf.mxu0 }
  0xa1   :  { %3175 = vmatpush.bf16.msra.mxu1 %v6045_v41  ;;  %v7220_v41 = vld [vmem:[%s11444_s1 + $0x52c] sm:$0xf0]  ;;  %v4969_v44 = vor.u32 %v7124_v33, %v4968_v30  ;;  %v2957_v49 = vadd.f32 %v2956_v43, %v535_v31  ;;  %v2969_v57 = vpop.f32.mrf.mxu1  ;;  %v5640_v30 = vld [vmem:[%s11444_s1 + $0x758] sm:$0xf]  ;;  %v4705_v33 = vor.u32 %v7058_v13, %v4704_v12 }
  0xa2   :  { %3188 = vmatpush.bf16.msra.mxu2 %v6237_v42  ;;  %v4777_v42 = vor.u32 %v7076_v29, %v4776_v26  ;;  %v5353_v50 = vor.u32 %v7220_v41, %v5352_v39  ;;  %v7202_v29 = vld [vmem:[%s11444_s1 + $0x49c] sm:$0xf0]  ;;  %v7292_v31 = vld [vmem:[%s11444_s1 + $0x76c] sm:$0xf0] }
  0xa3   :  { %3201 = vmatpush.bf16.msra.mxu3 %v6429_v45  ;;  %3163 = vmatmul.bf16.vlgmr.msra.gmra.mxu0 %v8159_v34  ;;  %v5161_v45 = vor.u32 %v7172_v36, %v5160_v35  ;;  %v2970_v63 = vadd.f32 %v2969_v57, %v2957_v49  ;;  %v7340_v35 = vld [vmem:[%s11444_s1 + $0x8ec] sm:$0xf0]  ;;  %v6024_v36 = vld [vmem:[%s11444_s1 + $0xa58] sm:$0xf]  ;;  %v6000_v57 = vld [vmem:[%s11444_s1 + $0xa28] sm:$0xf] }
  0xa4   :  { %3207 = vmatpush.bf16.msrb.mxu0 %v4873_v46  ;;  %3176 = vmatmul.bf16.vlgmr.msra.gmra.mxu1 %v8169_v38  ;;  %v4752_v46 = vld [vmem:[%s11444_s1 + $0x68] sm:$0xf]  ;;  %v7388_v39 = vld [vmem:[%s11444_s1 + $0xa6c] sm:$0xf0] }
  0xa5   :  { %3220 = vmatpush.bf16.msrb.mxu1 %v5065_v47  ;;  %3189 = vmatmul.bf16.vlgmr.msra.gmra.mxu2 %v8360_v16  ;;  %v7070_v47 = vld [vmem:[%s11444_s1 + $0x7c] sm:$0xf0] }
  0xa6   :  { %3233 = vmatpush.bf16.msrb.mxu2 %v5257_v48  ;;  %3202 = vmatmul.bf16.vlgmr.msra.gmra.mxu3 %v8371_v20  ;;  %v4944_v48 = vld [vmem:[%s11444_s1 + $0x1e8] sm:$0xf]  ;;  %v4753_v56 = vor.u32 %v7070_v47, %v4752_v46  ;;  %v5641_v47 = vor.u32 %v7292_v31, %v5640_v30 }
  0xa7   :  { %3246 = vmatpush.bf16.msrb.mxu3 %v5449_v52  ;;  %v5136_v52 = vld [vmem:[%s11444_s1 + $0x368] sm:$0xf] }
  0xa8   :  { %3208 = vmatpush.bf16.msrb.mxu0 %v4849_v58  ;;  %v4945_v58 = vor.u32 %v7118_v51, %v4944_v48  ;;  %v2982_v4 = vpop.f32.mrf.mxu2  ;;  %v2958_v14 = vpop.f32.mrf.mxu0  ;;  %v5616_v51 = vld [vmem:[%s11444_s1 + $0x728] sm:$0xf] }
  0xa9   :  { %3221 = vmatpush.bf16.msrb.mxu1 %v5041_v59  ;;  %v5137_v59 = vor.u32 %v7166_v53, %v5136_v52  ;;  %v2983_v7 = vadd.f32 %v2982_v4, %v2970_v63  ;;  %v2971_v41 = vpop.f32.mrf.mxu1  ;;  %v7286_v52 = vld [vmem:[%s11444_s1 + $0x73c] sm:$0xf0]  ;;  %v5808_v53 = vld [vmem:[%s11444_s1 + $0x8a8] sm:$0xf]  ;;  %v7328_v4 = vld [vmem:[%s11444_s1 + $0x88c] sm:$0xf0] }
  0xaa   :  { %3234 = vmatpush.bf16.msrb.mxu2 %v5233_v60  ;;  %v4728_v60 = vld [vmem:[%s11444_s1 + $0x38] sm:$0xf]  ;;  %v5785_v12 = vor.u32 %v7328_v4, %v5784_v2  ;;  %v5568_v14 = vld [vmem:[%s11444_s1 + $0x6c8] sm:$0xf] }
  0xab   :  { %3247 = vmatpush.bf16.msrb.mxu3 %v5425_v0  ;;  %v5329_v0 = vor.u32 %v7214_v55, %v5328_v54  ;;  %v5496_v4 = vld [vmem:[%s11444_s1 + $0x638] sm:$0xf] }
  0xac   :  { %3209 = vmatpush.bf16.msrb.mxu0 %v4825_v6  ;;  %v7208_v6 = vld [vmem:[%s11444_s1 + $0x4cc] sm:$0xf0] }
  0xad   :  { %3222 = vmatpush.bf16.msrb.mxu1 %v5017_v10  ;;  %v2995_v10 = vpop.f32.mrf.mxu3  ;;  %v5305_v26 = vor.u32 %v7208_v6, %v5304_v5  ;;  %v5976_v5 = vld [vmem:[%s11444_s1 + $0x9f8] sm:$0xf]  ;;  %v7376_v6 = vld [vmem:[%s11444_s1 + $0xa0c] sm:$0xf0] }
  0xae   :  { %3235 = vmatpush.bf16.msrb.mxu2 %v5209_v11  ;;  %v4729_v11 = vor.u32 %v7064_v61, %v4728_v60  ;;  %v7430_v60 = vld [vmem:[%s11444_s1 + $0xbbc] sm:$0xf0]  ;;  %v5617_v61 = vor.u32 %v7286_v52, %v5616_v51  ;;  %v5977_v13 = vor.u32 %v7376_v6, %v5976_v5  ;;  %v5520_v51 = vld [vmem:[%s11444_s1 + $0x668] sm:$0xf]  ;;  %v7256_v5 = vld [vmem:[%s11444_s1 + $0x64c] sm:$0xf0] }
  0xaf   :  { %3248 = vmatpush.bf16.msrb.mxu3 %v5401_v17  ;;  %v4921_v17 = vor.u32 %v7112_v1, %v4920_v62  ;;  %v7280_v1 = vld [vmem:[%s11444_s1 + $0x70c] sm:$0xf0]  ;;  %v7262_v52 = vld [vmem:[%s11444_s1 + $0x67c] sm:$0xf0]  ;;  %v5688_v6 = vld [vmem:[%s11444_s1 + $0x7b8] sm:$0xf] }
  0xb0   :  { %3210 = vmatpush.bf16.msrb.mxu0 %v4801_v24  ;;  %v8916_v24 = vadd.f32 %v2995_v10, %v2983_v7  ;;  %v2984_v48 = vpop.f32.mrf.mxu2  ;;  %v6168_v7 = vld [vmem:[%s11444_s1 + $0xb78] sm:$0xf]  ;;  %v7424_v10 = vld [vmem:[%s11444_s1 + $0xb8c] sm:$0xf0] }
  0xb1   :  { %3223 = vmatpush.bf16.msrb.mxu1 %v4993_v27  ;;  %v7154_v27 = vld [vmem:[%s11444_s1 + $0x31c] sm:$0xf0] }
  0xb2   :  { %3236 = vmatpush.bf16.msrb.mxu2 %v5185_v28  ;;  %v5280_v28 = vld [vmem:[%s11444_s1 + $0x488] sm:$0xf]  ;;  %v5089_v43 = vor.u32 %v7154_v27, %v5088_v23 }
  0xb3   :  { %3249 = vmatpush.bf16.msrb.mxu3 %v5377_v32  ;;  %v5832_v32 = vld [vmem:[%s11444_s1 + $0x8d8] sm:$0xf]  ;;  %v5281_v46 = vor.u32 %v7202_v29, %v5280_v28  ;;  %v5952_v23 = vld [vmem:[%s11444_s1 + $0x9c8] sm:$0xf]  ;;  %v7418_v28 = vld [vmem:[%s11444_s1 + $0xb5c] sm:$0xf0] }
  0xb4   :  { %3211 = vmatpush.bf16.msrb.mxu0 %v4777_v42  ;;  %v4897_v42 = vor.u32 %v7106_v22, %v4896_v19  ;;  %v5833_v49 = vor.u32 %v7340_v35, %v5832_v32  ;;  %v6169_v19 = vor.u32 %v7424_v10, %v6168_v7  ;;  %v7322_v22 = vld [vmem:[%s11444_s1 + $0x85c] sm:$0xf0]  ;;  %v6144_v27 = vld [vmem:[%s11444_s1 + $0xb48] sm:$0xf]  ;;  %v7268_v35 = vld [vmem:[%s11444_s1 + $0x6ac] sm:$0xf0] }
  0xb5   :  { %3224 = vmatpush.bf16.msrb.mxu1 %v4969_v44  ;;  %v6216_v44 = vld [vmem:[%s11444_s1 + $0xbd8] sm:$0xf]  ;;  %v2997_v54 = vpop.f32.mrf.mxu3 }
  0xb6   :  { %3237 = vmatpush.bf16.msrb.mxu2 %v5161_v45  ;;  %v7436_v45 = vld [vmem:[%s11444_s1 + $0xbec] sm:$0xf0] }
  0xb7   :  { %3250 = vmatpush.bf16.msrb.mxu3 %v5353_v50  ;;  %v6025_v50 = vor.u32 %v7388_v39, %v6024_v36  ;;  %v6217_v55 = vor.u32 %v7436_v45, %v6216_v44  ;;  %v5736_v36 = vld [vmem:[%s11444_s1 + $0x818] sm:$0xf]  ;;  %v7364_v45 = vld [vmem:[%s11444_s1 + $0x9ac] sm:$0xf0] }
  0xb8   :  { %3212 = vmatpush.bf16.msrb.mxu0 %v4753_v56  ;;  %v7334_v56 = vld [vmem:[%s11444_s1 + $0x8bc] sm:$0xf0]  ;;  %v5928_v44 = vld [vmem:[%s11444_s1 + $0x998] sm:$0xf] }
  0xb9   :  { %3225 = vmatpush.bf16.msrb.mxu1 %v4945_v58  ;;  %v7382_v58 = vld [vmem:[%s11444_s1 + $0xa3c] sm:$0xf0]  ;;  %v5809_v62 = vor.u32 %v7334_v56, %v5808_v53  ;;  %v5712_v53 = vld [vmem:[%s11444_s1 + $0x7e8] sm:$0xf] }
  0xba   :  { %3238 = vmatpush.bf16.msrb.mxu2 %v5137_v59  ;;  %v6192_v59 = vld [vmem:[%s11444_s1 + $0xba8] sm:$0xf]  ;;  %v6001_v63 = vor.u32 %v7382_v58, %v6000_v57  ;;  %v7310_v56 = vld [vmem:[%s11444_s1 + $0x7fc] sm:$0xf0] }
  0xbb   :  { %3251 = vmatpush.bf16.msrb.mxu3 %v5329_v0  ;;  %v5592_v0 = vld [vmem:[%s11444_s1 + $0x6f8] sm:$0xf]  ;;  %v6193_v3 = vor.u32 %v7430_v60, %v6192_v59  ;;  %v5904_v57 = vld [vmem:[%s11444_s1 + $0x968] sm:$0xf]  ;;  %v7358_v58 = vld [vmem:[%s11444_s1 + $0x97c] sm:$0xf0]  ;;  %v5713_v2 = vor.u32 %v7310_v56, %v5712_v53 }
  0xbc   :  { %3213 = vmatpush.bf16.msrb.mxu0 %v4729_v11  ;;  %v5593_v11 = vor.u32 %v7280_v1, %v5592_v0  ;;  %v6576_v56 = vld [vmem:[%s11444_s1 + $0xea8] sm:$0xf] }
  0xbd   :  { %3226 = vmatpush.bf16.msrb.mxu1 %v4921_v17  ;;  %v7274_v17 = vld [vmem:[%s11444_s1 + $0x6dc] sm:$0xf0] }
  0xbe   :  { %3239 = vmatpush.bf16.msrb.mxu2 %v5113_v18  ;;  %v5760_v18 = vld [vmem:[%s11444_s1 + $0x848] sm:$0xf]  ;;  %v5569_v29 = vor.u32 %v7274_v17, %v5568_v14  ;;  %v6072_v14 = vld [vmem:[%s11444_s1 + $0xab8] sm:$0xf]  ;;  %v7400_v17 = vld [vmem:[%s11444_s1 + $0xacc] sm:$0xf0] }
  0xbf   :  { %3252 = vmatpush.bf16.msrb.mxu3 %v5305_v26  ;;  %v7370_v26 = vld [vmem:[%s11444_s1 + $0x9dc] sm:$0xf0]  ;;  %v5761_v31 = vor.u32 %v7322_v22, %v5760_v18  ;;  %v5497_v18 = vor.u32 %v7256_v5, %v5496_v4  ;;  %v7472_v4 = vld [vmem:[%s11444_s1 + $0xd0c] sm:$0xf0]  ;;  %v6552_v5 = vld [vmem:[%s11444_s1 + $0xe78] sm:$0xf] }
  0xc0   :  { %3214 = vmatpush.bf16.msrb.mxu0 %v4705_v33  ;;  %v3008_v30 = vpop.f32.mrf.mxu0  ;;  %v5953_v32 = vor.u32 %v7370_v26, %v5952_v23  ;;  %v5544_v33 = vld [vmem:[%s11444_s1 + $0x698] sm:$0xf]  ;;  %v7250_v22 = vld [vmem:[%s11444_s1 + $0x61c] sm:$0xf0] }
  0xc1   :  { %3227 = vmatpush.bf16.msrb.mxu1 %v4897_v42  ;;  %v3009_v39 = vadd.f32 %v3008_v30, %v8916_v24  ;;  %v3021_v41 = vpop.f32.mrf.mxu1  ;;  %v6145_v42 = vor.u32 %v7418_v28, %v6144_v27  ;;  %v7412_v24 = vld [vmem:[%s11444_s1 + $0xb2c] sm:$0xf0]  ;;  %v5545_v48 = vor.u32 %v7268_v35, %v5544_v33  ;;  %v5664_v27 = vld [vmem:[%s11444_s1 + $0x788] sm:$0xf]  ;;  %v7298_v28 = vld [vmem:[%s11444_s1 + $0x79c] sm:$0xf0] }
  0xc2   :  { %3240 = vmatpush.bf16.msrb.mxu2 %v5089_v43  ;;  %v7316_v43 = vld [vmem:[%s11444_s1 + $0x82c] sm:$0xf0]  ;;  %v6048_v33 = vld [vmem:[%s11444_s1 + $0xa88] sm:$0xf]  ;;  %v7394_v35 = vld [vmem:[%s11444_s1 + $0xa9c] sm:$0xf0] }
  0xc3   :  { %3253 = vmatpush.bf16.msrb.mxu3 %v5281_v46  ;;  %3215 = vmatmul.bf16.vlgmr.msrb.gmra.mxu0 %v7978_v9  ;;  %v6120_v46 = vld [vmem:[%s11444_s1 + $0xb18] sm:$0xf] }
  0xc4   :  { %3259 = vmatpush.bf16.msra.mxu0 %v5641_v47  ;;  %3228 = vmatmul.bf16.vlgmr.msrb.gmra.mxu1 %v8015_v25  ;;  %v3022_v47 = vadd.f32 %v3021_v41, %v3009_v39  ;;  %v6408_v39 = vld [vmem:[%s11444_s1 + $0xd58] sm:$0xf]  ;;  %v7484_v41 = vld [vmem:[%s11444_s1 + $0xd6c] sm:$0xf0] }
  0xc5   :  { %3272 = vmatpush.bf16.msra.mxu1 %v5833_v49  ;;  %3241 = vmatmul.bf16.vlgmr.msrb.gmra.mxu2 %v7976_v8  ;;  %v5737_v49 = vor.u32 %v7316_v43, %v5736_v36 }
  0xc6   :  { %3285 = vmatpush.bf16.msra.mxu2 %v6025_v50  ;;  %3254 = vmatmul.bf16.vlgmr.msrb.gmra.mxu3 %v7992_v15  ;;  %v5929_v50 = vor.u32 %v7364_v45, %v5928_v44  ;;  %v7532_v44 = vld [vmem:[%s11444_s1 + $0xeec] sm:$0xf0]  ;;  %v7097_v45 = vld [vmem:[%s11444_s1 + $0x15c] sm:$0xf] }
  0xc7   :  { %3298 = vmatpush.bf16.msra.mxu3 %v6217_v55  ;;  %v6121_v55 = vor.u32 %v7412_v24, %v6120_v46  ;;  %v4874_v46 = vld [vmem:[%s11444_s1 + $0x170] sm:$0xf0]  ;;  %v5665_v24 = vor.u32 %v7298_v28, %v5664_v27  ;;  %v7514_v27 = vld [vmem:[%s11444_s1 + $0xe5c] sm:$0xf0]  ;;  %v7079_v28 = vld [vmem:[%s11444_s1 + $0xcc] sm:$0xf] }
  0xc8   :  { %3260 = vmatpush.bf16.msra.mxu0 %v5617_v61  ;;  %v3034_v54 = vpop.f32.mrf.mxu2  ;;  %v6096_v61 = vld [vmem:[%s11444_s1 + $0xae8] sm:$0xf]  ;;  %v3010_v1 = vpop.f32.mrf.mxu0  ;;  %v4877_v53 = vor.u32 %v7097_v45, %v4874_v46  ;;  %v7508_v46 = vld [vmem:[%s11444_s1 + $0xe2c] sm:$0xf0] }
  0xc9   :  { %3273 = vmatpush.bf16.msra.mxu1 %v5809_v62  ;;  %v3035_v59 = vadd.f32 %v3034_v54, %v3022_v47  ;;  %v3047_v60 = vpop.f32.mrf.mxu3  ;;  %v7406_v62 = vld [vmem:[%s11444_s1 + $0xafc] sm:$0xf0]  ;;  %v3023_v7 = vpop.f32.mrf.mxu1  ;;  %v6384_v54 = vld [vmem:[%s11444_s1 + $0xd28] sm:$0xf] }
  0xca   :  { %3286 = vmatpush.bf16.msra.mxu2 %v6001_v63  ;;  %v5521_v63 = vor.u32 %v7262_v52, %v5520_v51  ;;  %v6097_v10 = vor.u32 %v7406_v62, %v6096_v61  ;;  %v6409_v51 = vor.u32 %v7484_v41, %v6408_v39  ;;  %v7139_v61 = vld [vmem:[%s11444_s1 + $0x2ac] sm:$0xf]  ;;  %v5042_v62 = vld [vmem:[%s11444_s1 + $0x2c0] sm:$0xf0]  ;;  %v7520_v7 = vld [vmem:[%s11444_s1 + $0xe8c] sm:$0xf0] }
  0xcb   :  { %3299 = vmatpush.bf16.msra.mxu3 %v6193_v3  ;;  %v9076_v0 = vadd.f32 %v3047_v60, %v3035_v59  ;;  %v5905_v3 = vor.u32 %v7358_v58, %v5904_v57  ;;  %v7526_v58 = vld [vmem:[%s11444_s1 + $0xebc] sm:$0xf0]  ;;  %v7091_v59 = vld [vmem:[%s11444_s1 + $0x12c] sm:$0xf]  ;;  %v4850_v60 = vld [vmem:[%s11444_s1 + $0x140] sm:$0xf0] }
  0xcc   :  { %3261 = vmatpush.bf16.msra.mxu0 %v5593_v11  ;;  %v7304_v11 = vld [vmem:[%s11444_s1 + $0x7cc] sm:$0xf0]  ;;  %v6577_v1 = vor.u32 %v7526_v58, %v6576_v56  ;;  %v6480_v56 = vld [vmem:[%s11444_s1 + $0xde8] sm:$0xf]  ;;  %v7067_v58 = vld [vmem:[%s11444_s1 + $0x6c] sm:$0xf] }
  0xcd   :  { %3274 = vmatpush.bf16.msra.mxu1 %v5785_v12  ;;  %v5880_v12 = vld [vmem:[%s11444_s1 + $0x938] sm:$0xf]  ;;  %v5689_v23 = vor.u32 %v7304_v11, %v5688_v6  ;;  %v5045_v6 = vor.u32 %v7139_v61, %v5042_v62  ;;  %v4826_v11 = vld [vmem:[%s11444_s1 + $0x110] sm:$0xf0]  ;;  %v7115_v61 = vld [vmem:[%s11444_s1 + $0x1ec] sm:$0xf] }
  0xce   :  { %3287 = vmatpush.bf16.msra.mxu2 %v5977_v13  ;;  %v7352_v13 = vld [vmem:[%s11444_s1 + $0x94c] sm:$0xf0]  ;;  %v4946_v62 = vld [vmem:[%s11444_s1 + $0x200] sm:$0xf0] }
  0xcf   :  { %3300 = vmatpush.bf16.msra.mxu3 %v6169_v19  ;;  %v5472_v19 = vld [vmem:[%s11444_s1 + $0x608] sm:$0xf]  ;;  %v5881_v26 = vor.u32 %v7352_v13, %v5880_v12  ;;  %v7133_v12 = vld [vmem:[%s11444_s1 + $0x27c] sm:$0xf]  ;;  %v5018_v13 = vld [vmem:[%s11444_s1 + $0x290] sm:$0xf0] }
  0xd0   :  { %3262 = vmatpush.bf16.msra.mxu0 %v5569_v29  ;;  %v5856_v29 = vld [vmem:[%s11444_s1 + $0x908] sm:$0xf]  ;;  %v3036_v30 = vpop.f32.mrf.mxu2  ;;  %v5473_v43 = vor.u32 %v7250_v22, %v5472_v19  ;;  %v7466_v22 = vld [vmem:[%s11444_s1 + $0xcdc] sm:$0xf0] }
  0xd1   :  { %3275 = vmatpush.bf16.msra.mxu1 %v5761_v31  ;;  %v6073_v31 = vor.u32 %v7400_v17, %v6072_v14  ;;  %v3049_v36 = vpop.f32.mrf.mxu3  ;;  %v6553_v17 = vor.u32 %v7520_v7, %v6552_v5  ;;  %v6336_v19 = vld [vmem:[%s11444_s1 + $0xcc8] sm:$0xf]  ;;  %v6264_v7 = vld [vmem:[%s11444_s1 + $0xc38] sm:$0xf] }
  0xd2   :  { %3288 = vmatpush.bf16.msra.mxu2 %v5953_v32  ;;  %v7346_v32 = vld [vmem:[%s11444_s1 + $0x91c] sm:$0xf0] }
  0xd3   :  { %3301 = vmatpush.bf16.msra.mxu3 %v6145_v42  ;;  %v6600_v42 = vld [vmem:[%s11444_s1 + $0xed8] sm:$0xf]  ;;  %v5857_v47 = vor.u32 %v7346_v32, %v5856_v29  ;;  %v4802_v29 = vld [vmem:[%s11444_s1 + $0xe0] sm:$0xf0] }
  0xd4   :  { %3263 = vmatpush.bf16.msra.mxu0 %v5545_v48  ;;  %v7145_v48 = vld [vmem:[%s11444_s1 + $0x2dc] sm:$0xf]  ;;  %v6601_v52 = vor.u32 %v7532_v44, %v6600_v42  ;;  %v4994_v32 = vld [vmem:[%s11444_s1 + $0x260] sm:$0xf0]  ;;  %v4805_v41 = vor.u32 %v7079_v28, %v4802_v29  ;;  %v6312_v42 = vld [vmem:[%s11444_s1 + $0xc98] sm:$0xf] }
  0xd5   :  { %3276 = vmatpush.bf16.msra.mxu1 %v5737_v49  ;;  %v5066_v49 = vld [vmem:[%s11444_s1 + $0x2f0] sm:$0xf0]  ;;  %v6504_v44 = vld [vmem:[%s11444_s1 + $0xe18] sm:$0xf] }
  0xd6   :  { %3289 = vmatpush.bf16.msra.mxu2 %v5929_v50  ;;  %v6049_v50 = vor.u32 %v7394_v35, %v6048_v33  ;;  %v5069_v57 = vor.u32 %v7145_v48, %v5066_v49  ;;  %v6337_v35 = vor.u32 %v7466_v22, %v6336_v19  ;;  %v7121_v48 = vld [vmem:[%s11444_s1 + $0x21c] sm:$0xf]  ;;  %v4970_v49 = vld [vmem:[%s11444_s1 + $0x230] sm:$0xf0] }
  0xd7   :  { %3302 = vmatpush.bf16.msra.mxu3 %v6121_v55  ;;  %v7478_v55 = vld [vmem:[%s11444_s1 + $0xd3c] sm:$0xf0]  ;;  %v7109_v19 = vld [vmem:[%s11444_s1 + $0x1bc] sm:$0xf]  ;;  %v4922_v22 = vld [vmem:[%s11444_s1 + $0x1d0] sm:$0xf0] }
  0xd8   :  { %3264 = vmatpush.bf16.msra.mxu0 %v5521_v63  ;;  %v6385_v63 = vor.u32 %v7478_v55, %v6384_v54  ;;  %v6288_v54 = vld [vmem:[%s11444_s1 + $0xc68] sm:$0xf]  ;;  %v7454_v55 = vld [vmem:[%s11444_s1 + $0xc7c] sm:$0xf0] }
  0xd9   :  { %3277 = vmatpush.bf16.msra.mxu1 %v5713_v2  ;;  %v4853_v2 = vor.u32 %v7091_v59, %v4850_v60  ;;  %v4754_v59 = vld [vmem:[%s11444_s1 + $0x80] sm:$0xf0] }
  0xda   :  { %3290 = vmatpush.bf16.msra.mxu2 %v5905_v3  ;;  %v6360_v3 = vld [vmem:[%s11444_s1 + $0xcf8] sm:$0xf] }
  0xdb   :  { %3303 = vmatpush.bf16.msra.mxu3 %v6097_v10  ;;  %v7085_v10 = vld [vmem:[%s11444_s1 + $0xfc] sm:$0xf]  ;;  %v6361_v14 = vor.u32 %v7472_v4, %v6360_v3  ;;  %v6289_v3 = vor.u32 %v7454_v55, %v6288_v54 }
  0xdc   :  { %3265 = vmatpush.bf16.msra.mxu0 %v5497_v18  ;;  %v4829_v18 = vor.u32 %v7085_v10, %v4826_v11  ;;  %v7448_v10 = vld [vmem:[%s11444_s1 + $0xc4c] sm:$0xf0]  ;;  %v6456_v11 = vld [vmem:[%s11444_s1 + $0xdb8] sm:$0xf] }
  0xdd   :  { %3278 = vmatpush.bf16.msra.mxu1 %v5689_v23  ;;  %v6528_v23 = vld [vmem:[%s11444_s1 + $0xe48] sm:$0xf] }
  0xde   :  { %3291 = vmatpush.bf16.msra.mxu2 %v5881_v26  ;;  %v5021_v26 = vor.u32 %v7133_v12, %v5018_v13  ;;  %v6529_v39 = vor.u32 %v7514_v27, %v6528_v23  ;;  %v4949_v13 = vor.u32 %v7115_v61, %v4946_v62  ;;  %v6265_v23 = vor.u32 %v7448_v10, %v6264_v7  ;;  %v7442_v27 = vld [vmem:[%s11444_s1 + $0xc1c] sm:$0xf0]  ;;  %v7283_v61 = vld [vmem:[%s11444_s1 + $0x72c] sm:$0xf]  ;;  %v5618_v62 = vld [vmem:[%s11444_s1 + $0x740] sm:$0xf0] }
  0xdf   :  { %3304 = vmatpush.bf16.msra.mxu3 %v6073_v31  ;;  %v7127_v31 = vld [vmem:[%s11444_s1 + $0x24c] sm:$0xf]  ;;  %v7229_v7 = vld [vmem:[%s11444_s1 + $0x57c] sm:$0xf] }
  0xe0   :  { %3266 = vmatpush.bf16.msra.mxu0 %v5473_v43  ;;  %v3060_v30 = vpop.f32.mrf.mxu0  ;;  %v7460_v43 = vld [vmem:[%s11444_s1 + $0xcac] sm:$0xf0] }
  0xe1   :  { %3279 = vmatpush.bf16.msra.mxu1 %v5665_v24  ;;  %v3061_v33 = vadd.f32 %v3060_v30, %v9076_v0  ;;  %v3073_v36 = vpop.f32.mrf.mxu1  ;;  %v4997_v0 = vor.u32 %v7127_v31, %v4994_v32  ;;  %v7073_v24 = vld [vmem:[%s11444_s1 + $0x9c] sm:$0xf]  ;;  %v6432_v30 = vld [vmem:[%s11444_s1 + $0xd88] sm:$0xf]  ;;  %v7490_v31 = vld [vmem:[%s11444_s1 + $0xd9c] sm:$0xf0] }
  0xe2   :  { %3292 = vmatpush.bf16.msra.mxu2 %v5857_v47  ;;  %v4778_v47 = vld [vmem:[%s11444_s1 + $0xb0] sm:$0xf0]  ;;  %v7055_v32 = vld [vmem:[%s11444_s1 + $0xc] sm:$0xf] }
  0xe3   :  { %3305 = vmatpush.bf16.msra.mxu3 %v6049_v50  ;;  %3267 = vmatmul.bf16.vlgmr.msra.gmra.mxu0 %v8167_v37  ;;  %v9236_v45 = vadd.f32 %v3073_v36, %v3061_v33  ;;  %v536_v50 = vperm.slane %v8820_v21, 1  ;;  %v4973_v21 = vor.u32 %v7121_v48, %v4970_v49  ;;  %v4925_v33 = vor.u32 %v7109_v19, %v4922_v22  ;;  %v7103_v36 = vld [vmem:[%s11444_s1 + $0x18c] sm:$0xf]  ;;  %v5642_v48 = vld [vmem:[%s11444_s1 + $0x770] sm:$0xf0] }
  0xe4   :  { %3311 = vmatpush.bf16.msrb.mxu0 %v6409_v51  ;;  %3280 = vmatmul.bf16.vlgmr.msra.gmra.mxu1 %v8171_v40  ;;  %v6313_v51 = vor.u32 %v7460_v43, %v6312_v42  ;;  %v7193_v42 = vld [vmem:[%s11444_s1 + $0x45c] sm:$0xf]  ;;  %v5258_v43 = vld [vmem:[%s11444_s1 + $0x470] sm:$0xf0]  ;;  %v6433_v49 = vor.u32 %v7490_v31, %v6432_v30  ;;  %v5378_v30 = vld [vmem:[%s11444_s1 + $0x560] sm:$0xf0] }
  0xe5   :  { %3324 = vmatpush.bf16.msrb.mxu1 %v6601_v52  ;;  %3293 = vmatmul.bf16.vlgmr.msra.gmra.mxu2 %v8159_v34  ;;  %v6505_v52 = vor.u32 %v7508_v46, %v6504_v44  ;;  %v7241_v44 = vld [vmem:[%s11444_s1 + $0x5dc] sm:$0xf]  ;;  %v5261_v54 = vor.u32 %v7193_v42, %v5258_v43  ;;  %v7271_v31 = vld [vmem:[%s11444_s1 + $0x6cc] sm:$0xf]  ;;  %vm3727_vm0 = vcmp.gt.f32.partialorder %v9236_v45, 0.0 }
  0xe6   :  { %3337 = vmatpush.bf16.msrb.mxu2 %v4877_v53  ;;  %3306 = vmatmul.bf16.vlgmr.msra.gmra.mxu3 %v8169_v38  ;;  %v4781_v53 = vor.u32 %v7073_v24, %v4778_v47  ;;  %v5450_v24 = vld [vmem:[%s11444_s1 + $0x5f0] sm:$0xf0]  ;;  %v7289_v47 = vld [vmem:[%s11444_s1 + $0x75c] sm:$0xf] }
  0xe7   :  { %3350 = vmatpush.bf16.msrb.mxu3 %v5069_v57  ;;  %v7502_v57 = vld [vmem:[%s11444_s1 + $0xdfc] sm:$0xf0]  ;;  %v5453_v55 = vor.u32 %v7241_v44, %v5450_v24  ;;  %v7169_v43 = vld [vmem:[%s11444_s1 + $0x39c] sm:$0xf]  ;;  %v5162_v44 = vld [vmem:[%s11444_s1 + $0x3b0] sm:$0xf0] }
  0xe8   :  { %3312 = vmatpush.bf16.msrb.mxu0 %v6385_v63  ;;  %v3086_v60 = vpop.f32.mrf.mxu2  ;;  %v6481_v5 = vor.u32 %v7502_v57, %v6480_v56  ;;  %v5645_v56 = vor.u32 %v7289_v47, %v5642_v48  ;;  %v5234_v57 = vld [vmem:[%s11444_s1 + $0x440] sm:$0xf0]  ;;  %v5354_v48 = vld [vmem:[%s11444_s1 + $0x530] sm:$0xf0] }
  0xe9   :  { %3325 = vmatpush.bf16.msrb.mxu1 %v6577_v1  ;;  %v3087_v63 = vadd.f32 %v3086_v60, %v536_v50  ;;  %v3099_v1 = vpop.f32.mrf.mxu3  ;;  %v3075_v4 = vpop.f32.mrf.mxu1  ;;  %v5426_v60 = vld [vmem:[%s11444_s1 + $0x5c0] sm:$0xf0] }
  0xea   :  { %3338 = vmatpush.bf16.msrb.mxu2 %v4853_v2  ;;  %v3062_v2 = vpop.f32.mrf.mxu0  ;;  %v5621_v4 = vor.u32 %v7283_v61, %v5618_v62  ;;  %v7259_v61 = vld [vmem:[%s11444_s1 + $0x66c] sm:$0xf]  ;;  %v5522_v62 = vld [vmem:[%s11444_s1 + $0x680] sm:$0xf0] }
  0xeb   :  { %3351 = vmatpush.bf16.msrb.mxu3 %v5045_v6  ;;  %v4757_v6 = vor.u32 %v7067_v58, %v4754_v59  ;;  %v9287_v12 = vadd.f32 %v3099_v1, %v3087_v63  ;;  %v7235_v58 = vld [vmem:[%s11444_s1 + $0x5ac] sm:$0xf]  ;;  %v5810_v1 = vld [vmem:[%s11444_s1 + $0x8c0] sm:$0xf0] }
  0xec   :  { %3313 = vmatpush.bf16.msrb.mxu0 %v6361_v14  ;;  %v7496_v14 = vld [vmem:[%s11444_s1 + $0xdcc] sm:$0xf0]  ;;  %v7331_v63 = vld [vmem:[%s11444_s1 + $0x8ac] sm:$0xf] }
  0xed   :  { %3326 = vmatpush.bf16.msrb.mxu1 %v6553_v17  ;;  %v7061_v17 = vld [vmem:[%s11444_s1 + $0x3c] sm:$0xf]  ;;  %v6457_v28 = vor.u32 %v7496_v14, %v6456_v11  ;;  %v5813_v10 = vor.u32 %v7331_v63, %v5810_v1  ;;  %v5402_v11 = vld [vmem:[%s11444_s1 + $0x590] sm:$0xf0] }
  0xee   :  { %3339 = vmatpush.bf16.msrb.mxu2 %v4829_v18  ;;  %v4730_v18 = vld [vmem:[%s11444_s1 + $0x50] sm:$0xf0]  ;;  %v5405_v22 = vor.u32 %v7229_v7, %v5402_v11  ;;  %v7157_v11 = vld [vmem:[%s11444_s1 + $0x33c] sm:$0xf] }
  0xef   :  { %3352 = vmatpush.bf16.msrb.mxu3 %v5021_v26  ;;  %v6240_v26 = vld [vmem:[%s11444_s1 + $0xc08] sm:$0xf]  ;;  %v4733_v29 = vor.u32 %v7061_v17, %v4730_v18  ;;  %v5594_v14 = vld [vmem:[%s11444_s1 + $0x710] sm:$0xf0]  ;;  %v7325_v17 = vld [vmem:[%s11444_s1 + $0x87c] sm:$0xf] }
  0xf0   :  { %3314 = vmatpush.bf16.msrb.mxu0 %v6337_v35  ;;  %v4706_v35 = vld [vmem:[%s11444_s1 + $0x20] sm:$0xf0]  ;;  %v6241_v46 = vor.u32 %v7442_v27, %v6240_v26  ;;  %v5786_v18 = vld [vmem:[%s11444_s1 + $0x890] sm:$0xf0]  ;;  %v7175_v26 = vld [vmem:[%s11444_s1 + $0x3cc] sm:$0xf] }
  0xf1   :  { %3327 = vmatpush.bf16.msrb.mxu1 %v6529_v39  ;;  %v4898_v39 = vld [vmem:[%s11444_s1 + $0x1a0] sm:$0xf0]  ;;  %v4709_v50 = vor.u32 %v7055_v32, %v4706_v35 }
  0xf2   :  { %3340 = vmatpush.bf16.msrb.mxu2 %v4805_v41  ;;  %v3088_v41 = vpop.f32.mrf.mxu2  ;;  %v5186_v27 = vld [vmem:[%s11444_s1 + $0x3e0] sm:$0xf0] }
  0xf3   :  { %3353 = vmatpush.bf16.msrb.mxu3 %v4997_v0  ;;  %v3101_v0 = vpop.f32.mrf.mxu3  ;;  %v5570_v32 = vld [vmem:[%s11444_s1 + $0x6e0] sm:$0xf0] }
  0xf4   :  { %3315 = vmatpush.bf16.msrb.mxu0 %v6313_v51  ;;  %v7337_v51 = vld [vmem:[%s11444_s1 + $0x8dc] sm:$0xf]  ;;  %v5762_v35 = vld [vmem:[%s11444_s1 + $0x860] sm:$0xf0]  ;;  %v5573_v42 = vor.u32 %v7271_v31, %v5570_v32 }
  0xf5   :  { %3328 = vmatpush.bf16.msrb.mxu1 %v6505_v52  ;;  %v5834_v52 = vld [vmem:[%s11444_s1 + $0x8f0] sm:$0xf0]  ;;  %v7217_v0 = vld [vmem:[%s11444_s1 + $0x51c] sm:$0xf] }
  0xf6   :  { %3341 = vmatpush.bf16.msrb.mxu2 %v4781_v53  ;;  %v4901_v53 = vor.u32 %v7103_v36, %v4898_v39  ;;  %v5837_v59 = vor.u32 %v7337_v51, %v5834_v52  ;;  %v5189_v36 = vor.u32 %v7175_v26, %v5186_v27  ;;  %v7313_v51 = vld [vmem:[%s11444_s1 + $0x81c] sm:$0xf]  ;;  %v5690_v27 = vld [vmem:[%s11444_s1 + $0x7d0] sm:$0xf0] }
  0xf7   :  { %3354 = vmatpush.bf16.msrb.mxu3 %v4973_v21  ;;  %v7187_v21 = vld [vmem:[%s11444_s1 + $0x42c] sm:$0xf]  ;;  %v7301_v26 = vld [vmem:[%s11444_s1 + $0x7bc] sm:$0xf] }
  0xf8   :  { %3316 = vmatpush.bf16.msrb.mxu0 %v6289_v3  ;;  %v5237_v2 = vor.u32 %v7187_v21, %v5234_v57  ;;  %v5429_v3 = vor.u32 %v7235_v58, %v5426_v60  ;;  %v5138_v21 = vld [vmem:[%s11444_s1 + $0x380] sm:$0xf0]  ;;  %v7211_v57 = vld [vmem:[%s11444_s1 + $0x4ec] sm:$0xf] }
  0xf9   :  { %3329 = vmatpush.bf16.msrb.mxu1 %v6481_v5  ;;  %v7181_v5 = vld [vmem:[%s11444_s1 + $0x3fc] sm:$0xf]  ;;  %v5330_v60 = vld [vmem:[%s11444_s1 + $0x500] sm:$0xf0] }
  0xfa   :  { %3342 = vmatpush.bf16.msrb.mxu2 %v4757_v6  ;;  %v5210_v6 = vld [vmem:[%s11444_s1 + $0x410] sm:$0xf0]  ;;  %v5333_v7 = vor.u32 %v7211_v57, %v5330_v60  ;;  %v7427_v60 = vld [vmem:[%s11444_s1 + $0xbac] sm:$0xf] }
  0xfb   :  { %3355 = vmatpush.bf16.msrb.mxu3 %v4949_v13  ;;  %v7277_v13 = vld [vmem:[%s11444_s1 + $0x6fc] sm:$0xf]  ;;  %v5213_v19 = vor.u32 %v7181_v5, %v5210_v6 }
  0xfc   :  { %3317 = vmatpush.bf16.msrb.mxu0 %v6265_v23  ;;  %v5597_v23 = vor.u32 %v7277_v13, %v5594_v14  ;;  %v5114_v13 = vld [vmem:[%s11444_s1 + $0x350] sm:$0xf0]  ;;  %v7205_v14 = vld [vmem:[%s11444_s1 + $0x4bc] sm:$0xf] }
  0xfd   :  { %3330 = vmatpush.bf16.msrb.mxu1 %v6457_v28  ;;  %v7223_v28 = vld [vmem:[%s11444_s1 + $0x54c] sm:$0xf] }
  0xfe   :  { %3343 = vmatpush.bf16.msrb.mxu2 %v4733_v29  ;;  %v5789_v29 = vor.u32 %v7325_v17, %v5786_v18  ;;  %v5381_v41 = vor.u32 %v7223_v28, %v5378_v30  ;;  %v5117_v28 = vor.u32 %v7157_v11, %v5114_v13  ;;  %v5090_v30 = vld [vmem:[%s11444_s1 + $0x320] sm:$0xf0]  ;;  %v5978_v11 = vld [vmem:[%s11444_s1 + $0xa10] sm:$0xf0]  ;;  %v7421_v13 = vld [vmem:[%s11444_s1 + $0xb7c] sm:$0xf] }
  0xff   :  { %3356 = vmatpush.bf16.msrb.mxu3 %v4925_v33  ;;  %v7319_v33 = vld [vmem:[%s11444_s1 + $0x84c] sm:$0xf] }
 0x100   :  { %3318 = vmatpush.bf16.msrb.mxu0 %v6241_v46  ;;  %v3112_v39 = vpop.f32.mrf.mxu0  ;;  %v5765_v47 = vor.u32 %v7319_v33, %v5762_v35  ;;  %v7199_v33 = vld [vmem:[%s11444_s1 + $0x48c] sm:$0xf]  ;;  %v5282_v35 = vld [vmem:[%s11444_s1 + $0x4a0] sm:$0xf0] }
 0x101   :  { %3331 = vmatpush.bf16.msrb.mxu1 %v6433_v49  ;;  %v3113_v46 = vadd.f32 %v3112_v39, %v9287_v12  ;;  %v3125_v24 = vpop.f32.mrf.mxu1  ;;  %v7265_v49 = vld [vmem:[%s11444_s1 + $0x69c] sm:$0xf]  ;;  %v5738_v12 = vld [vmem:[%s11444_s1 + $0x830] sm:$0xf0] }
 0x102   :  { %3344 = vmatpush.bf16.msrb.mxu2 %v4709_v50  ;;  %v5546_v50 = vld [vmem:[%s11444_s1 + $0x6b0] sm:$0xf0] }
 0x103   :  { %3357 = vmatpush.bf16.msrb.mxu3 %v4901_v53  ;;  %3319 = vmatmul.bf16.vlgmr.msrb.gmra.mxu0 %v8360_v16  ;;  %v3126_v52 = vadd.f32 %v3125_v24, %v3113_v46  ;;  %v5165_v53 = vor.u32 %v7169_v43, %v5162_v44  ;;  %v7295_v43 = vld [vmem:[%s11444_s1 + $0x78c] sm:$0xf]  ;;  %v5666_v44 = vld [vmem:[%s11444_s1 + $0x7a0] sm:$0xf0]  ;;  %v7385_v46 = vld [vmem:[%s11444_s1 + $0xa5c] sm:$0xf] }
 0x104   :  { %3363 = vmatpush.bf16.msra.mxu0 %v5261_v54  ;;  %3332 = vmatmul.bf16.vlgmr.msrb.gmra.mxu1 %v8371_v20  ;;  %v5357_v54 = vor.u32 %v7217_v0, %v5354_v48  ;;  %v6026_v24 = vld [vmem:[%s11444_s1 + $0xa70] sm:$0xf0] }
 0x105   :  { %3376 = vmatpush.bf16.msra.mxu1 %v5453_v55  ;;  %3345 = vmatmul.bf16.vlgmr.msrb.gmra.mxu2 %v7978_v9  ;;  %v5549_v55 = vor.u32 %v7265_v49, %v5546_v50  ;;  %v6218_v49 = vld [vmem:[%s11444_s1 + $0xbf0] sm:$0xf0]  ;;  %v7481_v50 = vld [vmem:[%s11444_s1 + $0xd5c] sm:$0xf] }
 0x106   :  { %3389 = vmatpush.bf16.msra.mxu2 %v5645_v56  ;;  %3358 = vmatmul.bf16.vlgmr.msrb.gmra.mxu3 %v8015_v25  ;;  %v7163_v56 = vld [vmem:[%s11444_s1 + $0x36c] sm:$0xf] }
 0x107   :  { %3402 = vmatpush.bf16.msra.mxu3 %v5837_v59  ;;  %v5741_v59 = vor.u32 %v7313_v51, %v5738_v12  ;;  %v6410_v51 = vld [vmem:[%s11444_s1 + $0xd70] sm:$0xf0]  ;;  %v5285_v12 = vor.u32 %v7199_v33, %v5282_v35  ;;  %v6146_v33 = vld [vmem:[%s11444_s1 + $0xb60] sm:$0xf0]  ;;  %v7463_v35 = vld [vmem:[%s11444_s1 + $0xccc] sm:$0xf] }
 0x108   :  { %3364 = vmatpush.bf16.msra.mxu0 %v5237_v2  ;;  %v3138_v58 = vpop.f32.mrf.mxu2  ;;  %v7307_v2 = vld [vmem:[%s11444_s1 + $0x7ec] sm:$0xf]  ;;  %v3114_v6 = vpop.f32.mrf.mxu0  ;;  %v6413_v57 = vor.u32 %v7481_v50, %v6410_v51  ;;  %v6122_v51 = vld [vmem:[%s11444_s1 + $0xb30] sm:$0xf0] }
 0x109   :  { %3377 = vmatpush.bf16.msra.mxu1 %v5429_v3  ;;  %v3139_v63 = vadd.f32 %v3138_v58, %v3126_v52  ;;  %v3151_v1 = vpop.f32.mrf.mxu3  ;;  %v5714_v3 = vld [vmem:[%s11444_s1 + $0x800] sm:$0xf0]  ;;  %v3127_v17 = vpop.f32.mrf.mxu1  ;;  %v7379_v58 = vld [vmem:[%s11444_s1 + $0xa2c] sm:$0xf] }
 0x10a   :  { %3390 = vmatpush.bf16.msra.mxu2 %v5621_v4  ;;  %v5141_v4 = vor.u32 %v7163_v56, %v5138_v21  ;;  %v5717_v18 = vor.u32 %v7307_v2, %v5714_v3  ;;  %v6029_v56 = vor.u32 %v7385_v46, %v6026_v24  ;;  %v7523_v2 = vld [vmem:[%s11444_s1 + $0xeac] sm:$0xf]  ;;  %v6578_v3 = vld [vmem:[%s11444_s1 + $0xec0] sm:$0xf0]  ;;  %v6170_v17 = vld [vmem:[%s11444_s1 + $0xb90] sm:$0xf0] }
 0x10b   :  { %3403 = vmatpush.bf16.msra.mxu3 %v5813_v10  ;;  %v9477_v5 = vadd.f32 %v3151_v1, %v3139_v63  ;;  %v5525_v10 = vor.u32 %v7259_v61, %v5522_v62  ;;  %v6194_v62 = vld [vmem:[%s11444_s1 + $0xbc0] sm:$0xf0]  ;;  %v7475_v63 = vld [vmem:[%s11444_s1 + $0xd2c] sm:$0xf] }
 0x10c   :  { %3365 = vmatpush.bf16.msra.mxu0 %v5213_v19  ;;  %v5306_v19 = vld [vmem:[%s11444_s1 + $0x4d0] sm:$0xf0]  ;;  %v6386_v1 = vld [vmem:[%s11444_s1 + $0xd40] sm:$0xf0]  ;;  %v6197_v6 = vor.u32 %v7427_v60, %v6194_v62 }
 0x10d   :  { %3378 = vmatpush.bf16.msra.mxu1 %v5405_v22  ;;  %v7253_v22 = vld [vmem:[%s11444_s1 + $0x63c] sm:$0xf]  ;;  %v5309_v31 = vor.u32 %v7205_v14, %v5306_v19  ;;  %v6581_v14 = vor.u32 %v7523_v2, %v6578_v3  ;;  %v6362_v19 = vld [vmem:[%s11444_s1 + $0xd10] sm:$0xf0]  ;;  %v6098_v62 = vld [vmem:[%s11444_s1 + $0xb00] sm:$0xf0] }
 0x10e   :  { %3391 = vmatpush.bf16.msra.mxu2 %v5597_v23  ;;  %v5498_v23 = vld [vmem:[%s11444_s1 + $0x650] sm:$0xf0] }
 0x10f   :  { %3404 = vmatpush.bf16.msra.mxu3 %v5789_v29  ;;  %v7151_v29 = vld [vmem:[%s11444_s1 + $0x30c] sm:$0xf]  ;;  %v5501_v32 = vor.u32 %v7253_v22, %v5498_v23  ;;  %v7517_v22 = vld [vmem:[%s11444_s1 + $0xe7c] sm:$0xf]  ;;  %v6554_v23 = vld [vmem:[%s11444_s1 + $0xe90] sm:$0xf0] }
 0x110   :  { %3366 = vmatpush.bf16.msra.mxu0 %v5189_v36  ;;  %v7247_v36 = vld [vmem:[%s11444_s1 + $0x60c] sm:$0xf]  ;;  %v3140_v39 = vpop.f32.mrf.mxu2  ;;  %v5093_v48 = vor.u32 %v7151_v29, %v5090_v30  ;;  %v5954_v30 = vld [vmem:[%s11444_s1 + $0x9e0] sm:$0xf0] }
 0x111   :  { %3379 = vmatpush.bf16.msra.mxu1 %v5381_v41  ;;  %v5693_v41 = vor.u32 %v7301_v26, %v5690_v27  ;;  %v3153_v0 = vpop.f32.mrf.mxu3  ;;  %v6173_v27 = vor.u32 %v7421_v13, %v6170_v17  ;;  %v7367_v29 = vld [vmem:[%s11444_s1 + $0x9cc] sm:$0xf] }
 0x112   :  { %3392 = vmatpush.bf16.msra.mxu2 %v5573_v42  ;;  %v5474_v42 = vld [vmem:[%s11444_s1 + $0x620] sm:$0xf0] }
 0x113   :  { %3405 = vmatpush.bf16.msra.mxu3 %v5765_v47  ;;  %v7433_v47 = vld [vmem:[%s11444_s1 + $0xbdc] sm:$0xf]  ;;  %v5477_v52 = vor.u32 %v7247_v36, %v5474_v42  ;;  %v6338_v36 = vld [vmem:[%s11444_s1 + $0xce0] sm:$0xf0] }
 0x114   :  { %3367 = vmatpush.bf16.msra.mxu0 %v5165_v53  ;;  %v7529_v53 = vld [vmem:[%s11444_s1 + $0xedc] sm:$0xf]  ;;  %v6221_v21 = vor.u32 %v7433_v47, %v6218_v49  ;;  %v6530_v42 = vld [vmem:[%s11444_s1 + $0xe60] sm:$0xf0]  ;;  %v6341_v24 = vor.u32 %v7463_v35, %v6338_v36 }
 0x115   :  { %3380 = vmatpush.bf16.msra.mxu1 %v5357_v54  ;;  %v6602_v54 = vld [vmem:[%s11444_s1 + $0xef0] sm:$0xf0]  ;;  %v7361_v47 = vld [vmem:[%s11444_s1 + $0x99c] sm:$0xf] }
 0x116   :  { %3393 = vmatpush.bf16.msra.mxu2 %v5549_v55  ;;  %v5669_v55 = vor.u32 %v7295_v43, %v5666_v44  ;;  %v6605_v61 = vor.u32 %v7529_v53, %v6602_v54  ;;  %v5957_v44 = vor.u32 %v7367_v29, %v5954_v30  ;;  %v7409_v49 = vld [vmem:[%s11444_s1 + $0xb1c] sm:$0xf]  ;;  %v6506_v54 = vld [vmem:[%s11444_s1 + $0xe30] sm:$0xf0] }
 0x117   :  { %3406 = vmatpush.bf16.msra.mxu3 %v5741_v59  ;;  %v6002_v59 = vld [vmem:[%s11444_s1 + $0xa40] sm:$0xf0]  ;;  %v7505_v53 = vld [vmem:[%s11444_s1 + $0xe1c] sm:$0xf]  ;;  %v6458_v30 = vld [vmem:[%s11444_s1 + $0xdd0] sm:$0xf0] }
 0x118   :  { %3368 = vmatpush.bf16.msra.mxu0 %v5141_v4  ;;  %v6005_v4 = vor.u32 %v7379_v58, %v6002_v59  ;;  %v5906_v58 = vld [vmem:[%s11444_s1 + $0x980] sm:$0xf0]  ;;  %v7403_v59 = vld [vmem:[%s11444_s1 + $0xaec] sm:$0xf]  ;;  %v6509_v60 = vor.u32 %v7505_v53, %v6506_v54  ;;  %v7493_v29 = vld [vmem:[%s11444_s1 + $0xdbc] sm:$0xf] }
 0x119   :  { %3381 = vmatpush.bf16.msra.mxu1 %v5333_v7  ;;  %v6389_v7 = vor.u32 %v7475_v63, %v6386_v1  ;;  %v7451_v63 = vld [vmem:[%s11444_s1 + $0xc6c] sm:$0xf]  ;;  %v6290_v1 = vld [vmem:[%s11444_s1 + $0xc80] sm:$0xf0] }
 0x11a   :  { %3394 = vmatpush.bf16.msra.mxu2 %v5525_v10  ;;  %v7373_v10 = vld [vmem:[%s11444_s1 + $0x9fc] sm:$0xf]  ;;  %v6293_v17 = vor.u32 %v7451_v63, %v6290_v1  ;;  %v7143_v1 = vld [vmem:[%s11444_s1 + $0x2c4] sm:$0xf0] }
 0x11b   :  { %3407 = vmatpush.bf16.msra.mxu3 %v5717_v18  ;;  %v7469_v18 = vld [vmem:[%s11444_s1 + $0xcfc] sm:$0xf]  ;;  %v5981_v26 = vor.u32 %v7373_v10, %v5978_v11 }
 0x11c   :  { %3369 = vmatpush.bf16.msra.mxu0 %v5117_v28  ;;  %v6365_v28 = vor.u32 %v7469_v18, %v6362_v19  ;;  %v7349_v18 = vld [vmem:[%s11444_s1 + $0x93c] sm:$0xf]  ;;  %v5882_v19 = vld [vmem:[%s11444_s1 + $0x950] sm:$0xf0] }
 0x11d   :  { %3382 = vmatpush.bf16.msra.mxu1 %v5309_v31  ;;  %v7415_v31 = vld [vmem:[%s11444_s1 + $0xb4c] sm:$0xf] }
 0x11e   :  { %3395 = vmatpush.bf16.msra.mxu2 %v5501_v32  ;;  %v6557_v32 = vor.u32 %v7517_v22, %v6554_v23  ;;  %v6149_v46 = vor.u32 %v7415_v31, %v6146_v33  ;;  %v7397_v22 = vld [vmem:[%s11444_s1 + $0xabc] sm:$0xf]  ;;  %v5885_v31 = vor.u32 %v7349_v18, %v5882_v19  ;;  %v5858_v33 = vld [vmem:[%s11444_s1 + $0x920] sm:$0xf0]  ;;  %v5024_v18 = vld [vmem:[%s11444_s1 + $0x280] sm:$0xf] }
 0x11f   :  { %3408 = vmatpush.bf16.msra.mxu3 %v5693_v41  ;;  %v7511_v41 = vld [vmem:[%s11444_s1 + $0xe4c] sm:$0xf] }
 0x120   :  { %3370 = vmatpush.bf16.msra.mxu0 %v5093_v48  ;;  %v3164_v39 = vpop.f32.mrf.mxu0  ;;  %v5930_v48 = vld [vmem:[%s11444_s1 + $0x9b0] sm:$0xf0] }
 0x121   :  { %3383 = vmatpush.bf16.msra.mxu1 %v5285_v12  ;;  %v3165_v43 = vadd.f32 %v3164_v39, %v9477_v5  ;;  %v3177_v0 = vpop.f32.mrf.mxu1  ;;  %v6533_v5 = vor.u32 %v7511_v41, %v6530_v42  ;;  %v7457_v12 = vld [vmem:[%s11444_s1 + $0xc9c] sm:$0xf]  ;;  %v7391_v39 = vld [vmem:[%s11444_s1 + $0xa8c] sm:$0xf]  ;;  %v6050_v41 = vld [vmem:[%s11444_s1 + $0xaa0] sm:$0xf0] }
 0x122   :  { %3396 = vmatpush.bf16.msra.mxu2 %v5477_v52  ;;  %v6314_v52 = vld [vmem:[%s11444_s1 + $0xcb0] sm:$0xf0]  ;;  %v7439_v42 = vld [vmem:[%s11444_s1 + $0xc0c] sm:$0xf]  ;;  %v6053_v53 = vor.u32 %v7391_v39, %v6050_v41 }
 0x123   :  { %3409 = vmatpush.bf16.msra.mxu3 %v5669_v55  ;;  %3371 = vmatmul.bf16.vlgmr.msra.gmra.mxu0 %v7976_v8  ;;  %v3178_v50 = vadd.f32 %v3177_v0, %v3165_v43  ;;  %v5933_v55 = vor.u32 %v7361_v47, %v5930_v48  ;;  %v6461_v43 = vor.u32 %v7493_v29, %v6458_v30  ;;  %v7487_v0 = vld [vmem:[%s11444_s1 + $0xd8c] sm:$0xf]  ;;  %v4880_v47 = vld [vmem:[%s11444_s1 + $0x160] sm:$0xf]  ;;  %v7101_v48 = vld [vmem:[%s11444_s1 + $0x174] sm:$0xf0] }
 0x124   :  { %3415 = vmatpush.bf16.msrb.mxu0 %v6029_v56  ;;  %3384 = vmatmul.bf16.vlgmr.msra.gmra.mxu1 %v7992_v15  ;;  %v6125_v56 = vor.u32 %v7409_v49, %v6122_v51  ;;  %v5072_v49 = vld [vmem:[%s11444_s1 + $0x2e0] sm:$0xf]  ;;  %v7149_v51 = vld [vmem:[%s11444_s1 + $0x2f4] sm:$0xf0]  ;;  %v4808_v30 = vld [vmem:[%s11444_s1 + $0xd0] sm:$0xf] }
 0x125   :  { %3428 = vmatpush.bf16.msrb.mxu1 %v6221_v21  ;;  %3397 = vmatmul.bf16.vlgmr.msra.gmra.mxu2 %v8167_v37  ;;  %v6317_v21 = vor.u32 %v7457_v12, %v6314_v52  ;;  %v5264_v12 = vld [vmem:[%s11444_s1 + $0x460] sm:$0xf]  ;;  %v7197_v52 = vld [vmem:[%s11444_s1 + $0x474] sm:$0xf0] }
 0x126   :  { %3441 = vmatpush.bf16.msrb.mxu2 %v6413_v57  ;;  %3410 = vmatmul.bf16.vlgmr.msra.gmra.mxu3 %v8171_v40  ;;  %v7355_v57 = vld [vmem:[%s11444_s1 + $0x96c] sm:$0xf] }
 0x127   :  { %3454 = vmatpush.bf16.msrb.mxu3 %v6605_v61  ;;  %v5909_v10 = vor.u32 %v7355_v57, %v5906_v58  ;;  %v4881_v57 = vor.u32 %v7101_v48, %v4880_v47  ;;  %v5073_v58 = vor.u32 %v7149_v51, %v5072_v49  ;;  %v4976_v51 = vld [vmem:[%s11444_s1 + $0x220] sm:$0xf] }
 0x128   :  { %3416 = vmatpush.bf16.msrb.mxu0 %v6005_v4  ;;  %v3190_v61 = vpop.f32.mrf.mxu2  ;;  %v7499_v4 = vld [vmem:[%s11444_s1 + $0xdec] sm:$0xf] }
 0x129   :  { %3429 = vmatpush.bf16.msrb.mxu1 %v6197_v6  ;;  %v3191_v2 = vadd.f32 %v3190_v61, %v3178_v50  ;;  %v3203_v3 = vpop.f32.mrf.mxu3  ;;  %v6482_v6 = vld [vmem:[%s11444_s1 + $0xe00] sm:$0xf0]  ;;  %v3179_v11 = vpop.f32.mrf.mxu1  ;;  %v7095_v61 = vld [vmem:[%s11444_s1 + $0x144] sm:$0xf0] }
 0x12a   :  { %3442 = vmatpush.bf16.msrb.mxu2 %v6389_v7  ;;  %v3166_v7 = vpop.f32.mrf.mxu0  ;;  %v6485_v23 = vor.u32 %v7499_v4, %v6482_v6  ;;  %v5432_v4 = vld [vmem:[%s11444_s1 + $0x5b0] sm:$0xf]  ;;  %v7239_v6 = vld [vmem:[%s11444_s1 + $0x5c4] sm:$0xf0] }
 0x12b   :  { %3455 = vmatpush.bf16.msrb.mxu3 %v6581_v14  ;;  %v9676_v13 = vadd.f32 %v3203_v3, %v3191_v2  ;;  %v6101_v14 = vor.u32 %v7403_v59, %v6098_v62  ;;  %v5265_v59 = vor.u32 %v7197_v52, %v5264_v12  ;;  %v5048_v62 = vld [vmem:[%s11444_s1 + $0x2b0] sm:$0xf]  ;;  %v7191_v3 = vld [vmem:[%s11444_s1 + $0x444] sm:$0xf0]  ;;  %v5433_v19 = vor.u32 %v7239_v6, %v5432_v4 }
 0x12c   :  { %3417 = vmatpush.bf16.msrb.mxu0 %v5981_v26  ;;  %v6074_v26 = vld [vmem:[%s11444_s1 + $0xad0] sm:$0xf0]  ;;  %v5240_v2 = vld [vmem:[%s11444_s1 + $0x430] sm:$0xf]  ;;  %v7119_v4 = vld [vmem:[%s11444_s1 + $0x204] sm:$0xf0] }
 0x12d   :  { %3430 = vmatpush.bf16.msrb.mxu1 %v6173_v27  ;;  %v7445_v27 = vld [vmem:[%s11444_s1 + $0xc3c] sm:$0xf]  ;;  %v6077_v35 = vor.u32 %v7397_v22, %v6074_v26  ;;  %v5241_v11 = vor.u32 %v7191_v3, %v5240_v2  ;;  %v7137_v22 = vld [vmem:[%s11444_s1 + $0x294] sm:$0xf0]  ;;  %v5144_v6 = vld [vmem:[%s11444_s1 + $0x370] sm:$0xf] }
 0x12e   :  { %3443 = vmatpush.bf16.msrb.mxu2 %v6365_v28  ;;  %v6266_v28 = vld [vmem:[%s11444_s1 + $0xc50] sm:$0xf0]  ;;  %v7185_v26 = vld [vmem:[%s11444_s1 + $0x414] sm:$0xf0]  ;;  %vm3728_vm1 = vcmp.gt.f32.partialorder %v9676_v13, 0.0 }
 0x12f   :  { %3456 = vmatpush.bf16.msrb.mxu3 %v6557_v32  ;;  %v7343_v32 = vld [vmem:[%s11444_s1 + $0x90c] sm:$0xf]  ;;  %v6269_v36 = vor.u32 %v7445_v27, %v6266_v28  ;;  %v5408_v27 = vld [vmem:[%s11444_s1 + $0x580] sm:$0xf]  ;;  %v7233_v28 = vld [vmem:[%s11444_s1 + $0x594] sm:$0xf0] }
 0x130   :  { %3418 = vmatpush.bf16.msrb.mxu0 %v5957_v44  ;;  %v6242_v44 = vld [vmem:[%s11444_s1 + $0xc20] sm:$0xf0]  ;;  %v5861_v50 = vor.u32 %v7343_v32, %v5858_v33  ;;  %v7083_v33 = vld [vmem:[%s11444_s1 + $0xe4] sm:$0xf0]  ;;  %v5409_v41 = vor.u32 %v7233_v28, %v5408_v27  ;;  %v4736_v27 = vld [vmem:[%s11444_s1 + $0x40] sm:$0xf] }
 0x131   :  { %3431 = vmatpush.bf16.msrb.mxu1 %v6149_v46  ;;  %v6434_v46 = vld [vmem:[%s11444_s1 + $0xda0] sm:$0xf0]  ;;  %v6245_v54 = vor.u32 %v7439_v42, %v6242_v44  ;;  %v7131_v42 = vld [vmem:[%s11444_s1 + $0x264] sm:$0xf0]  ;;  %v7065_v28 = vld [vmem:[%s11444_s1 + $0x54] sm:$0xf0] }
 0x132   :  { %3444 = vmatpush.bf16.msrb.mxu2 %v6341_v24  ;;  %v3192_v24 = vpop.f32.mrf.mxu2  ;;  %v7179_v44 = vld [vmem:[%s11444_s1 + $0x3e4] sm:$0xf0] }
 0x133   :  { %3457 = vmatpush.bf16.msrb.mxu3 %v6533_v5  ;;  %v3205_v5 = vpop.f32.mrf.mxu3  ;;  %v4809_v24 = vor.u32 %v7083_v33, %v4808_v30  ;;  %v5120_v33 = vld [vmem:[%s11444_s1 + $0x340] sm:$0xf] }
 0x134   :  { %3419 = vmatpush.bf16.msrb.mxu0 %v5933_v55  ;;  %v5456_v55 = vld [vmem:[%s11444_s1 + $0x5e0] sm:$0xf] }
 0x135   :  { %3432 = vmatpush.bf16.msrb.mxu1 %v6125_v56  ;;  %v7245_v56 = vld [vmem:[%s11444_s1 + $0x5f4] sm:$0xf0]  ;;  %v4784_v5 = vld [vmem:[%s11444_s1 + $0xa0] sm:$0xf] }
 0x136   :  { %3445 = vmatpush.bf16.msrb.mxu2 %v6317_v21  ;;  %v6437_v21 = vor.u32 %v7487_v0, %v6434_v46  ;;  %v5457_v63 = vor.u32 %v7245_v56, %v5456_v55  ;;  %v5384_v0 = vld [vmem:[%s11444_s1 + $0x550] sm:$0xf]  ;;  %v7227_v46 = vld [vmem:[%s11444_s1 + $0x564] sm:$0xf0]  ;;  %v5168_v55 = vld [vmem:[%s11444_s1 + $0x3a0] sm:$0xf] }
 0x137   :  { %3458 = vmatpush.bf16.msrb.mxu3 %v6509_v60  ;;  %v4856_v60 = vld [vmem:[%s11444_s1 + $0x130] sm:$0xf]  ;;  %v7173_v56 = vld [vmem:[%s11444_s1 + $0x3b4] sm:$0xf0] }
 0x138   :  { %3420 = vmatpush.bf16.msrb.mxu0 %v5909_v10  ;;  %v4857_v7 = vor.u32 %v7095_v61, %v4856_v60  ;;  %v5049_v10 = vor.u32 %v7143_v1, %v5048_v62  ;;  %v5169_v61 = vor.u32 %v7173_v56, %v5168_v55  ;;  %v4760_v62 = vld [vmem:[%s11444_s1 + $0x70] sm:$0xf]  ;;  %v5840_v55 = vld [vmem:[%s11444_s1 + $0x8e0] sm:$0xf] }
 0x139   :  { %3433 = vmatpush.bf16.msrb.mxu1 %v6101_v14  ;;  %v4832_v14 = vld [vmem:[%s11444_s1 + $0x100] sm:$0xf]  ;;  %v4952_v1 = vld [vmem:[%s11444_s1 + $0x1f0] sm:$0xf] }
 0x13a   :  { %3446 = vmatpush.bf16.msrb.mxu2 %v6293_v17  ;;  %v7089_v17 = vld [vmem:[%s11444_s1 + $0x114] sm:$0xf0] }
 0x13b   :  { %3459 = vmatpush.bf16.msrb.mxu3 %v6485_v23  ;;  %v5216_v23 = vld [vmem:[%s11444_s1 + $0x400] sm:$0xf]  ;;  %v4833_v29 = vor.u32 %v7089_v17, %v4832_v14  ;;  %v5336_v14 = vld [vmem:[%s11444_s1 + $0x4f0] sm:$0xf]  ;;  %v7215_v17 = vld [vmem:[%s11444_s1 + $0x504] sm:$0xf0] }
 0x13c   :  { %3421 = vmatpush.bf16.msrb.mxu0 %v5885_v31  ;;  %v5025_v31 = vor.u32 %v7137_v22, %v5024_v18  ;;  %v5217_v32 = vor.u32 %v7185_v26, %v5216_v23  ;;  %v4953_v23 = vor.u32 %v7119_v4, %v4952_v1  ;;  %v5624_v4 = vld [vmem:[%s11444_s1 + $0x730] sm:$0xf] }
 0x13d   :  { %3434 = vmatpush.bf16.msrb.mxu1 %v6077_v35  ;;  %v5000_v35 = vld [vmem:[%s11444_s1 + $0x250] sm:$0xf] }
 0x13e   :  { %3447 = vmatpush.bf16.msrb.mxu2 %v6269_v36  ;;  %v9814_v36 = vld [vmem:[%s11446_s2] sm:$0x3f]  ;;  %v5001_v48 = vor.u32 %v7131_v42, %v5000_v35  ;;  %v7161_v35 = vld [vmem:[%s11444_s1 + $0x354] sm:$0xf0]  ;;  %v4737_v42 = vor.u32 %v7065_v28, %v4736_v27 }
 0x13f   :  { %3460 = vmatpush.bf16.msrb.mxu3 %v6461_v43  ;;  %v537_v39 = vperm.slane %v9814_v36, 2  ;;  %v5192_v43 = vld [vmem:[%s11444_s1 + $0x3d0] sm:$0xf]  ;;  %v5600_v28 = vld [vmem:[%s11444_s1 + $0x700] sm:$0xf] }
 0x140   :  { %3422 = vmatpush.bf16.msrb.mxu0 %v5861_v50  ;;  %v3216_v47 = vpop.f32.mrf.mxu0  ;;  %v5193_v49 = vor.u32 %v7179_v44, %v5192_v43  ;;  %v7077_v50 = vld [vmem:[%s11444_s1 + $0xb4] sm:$0xf0]  ;;  %v4712_v43 = vld [vmem:[%s11444_s1 + $0x10] sm:$0xf]  ;;  %v7059_v44 = vld [vmem:[%s11444_s1 + $0x24] sm:$0xf0] }
 0x141   :  { %3435 = vmatpush.bf16.msrb.mxu1 %v6053_v53  ;;  %v3217_v12 = vadd.f32 %v3216_v47, %v537_v39  ;;  %v3229_v52 = vpop.f32.mrf.mxu1  ;;  %v5385_v53 = vor.u32 %v7227_v46, %v5384_v0  ;;  %v5312_v39 = vld [vmem:[%s11444_s1 + $0x4c0] sm:$0xf]  ;;  %v5121_v46 = vor.u32 %v7161_v35, %v5120_v33  ;;  %v7107_v47 = vld [vmem:[%s11444_s1 + $0x1a4] sm:$0xf0]  ;;  %v4713_v56 = vor.u32 %v7059_v44, %v4712_v43  ;;  %v7377_v35 = vld [vmem:[%s11444_s1 + $0xa14] sm:$0xf0] }
 0x142   :  { %3448 = vmatpush.bf16.msrb.mxu2 %v6245_v54  ;;  %v7125_v54 = vld [vmem:[%s11444_s1 + $0x234] sm:$0xf0]  ;;  %v5984_v33 = vld [vmem:[%s11444_s1 + $0xa00] sm:$0xf] }
 0x143   :  { %3461 = vmatpush.bf16.msrb.mxu3 %v6437_v21  ;;  %3423 = vmatmul.bf16.vlgmr.msrb.gmra.mxu0 %v8159_v34  ;;  %v5360_v21 = vld [vmem:[%s11444_s1 + $0x520] sm:$0xf]  ;;  %v4977_v60 = vor.u32 %v7125_v54, %v4976_v51  ;;  %v5288_v51 = vld [vmem:[%s11444_s1 + $0x490] sm:$0xf]  ;;  %v7293_v54 = vld [vmem:[%s11444_s1 + $0x774] sm:$0xf0]  ;;  %v5985_v44 = vor.u32 %v7377_v35, %v5984_v33 }
 0x144   :  { %3467 = vmatpush.bf16.msra.mxu0 %v4881_v57  ;;  %3436 = vmatmul.bf16.vlgmr.msrb.gmra.mxu1 %v8169_v38  ;;  %v7221_v57 = vld [vmem:[%s11444_s1 + $0x534] sm:$0xf0]  ;;  %v5504_v35 = vld [vmem:[%s11444_s1 + $0x640] sm:$0xf] }
 0x145   :  { %3480 = vmatpush.bf16.msra.mxu1 %v5073_v58  ;;  %3449 = vmatmul.bf16.vlgmr.msrb.gmra.mxu2 %v8360_v16  ;;  %v3230_v58 = vadd.f32 %v3229_v52, %v3217_v12  ;;  %v5361_v3 = vor.u32 %v7221_v57, %v5360_v21  ;;  %v7203_v12 = vld [vmem:[%s11444_s1 + $0x4a4] sm:$0xf0]  ;;  %v7341_v21 = vld [vmem:[%s11444_s1 + $0x8f4] sm:$0xf0]  ;;  %v6032_v57 = vld [vmem:[%s11444_s1 + $0xa60] sm:$0xf] }
 0x146   :  { %3493 = vmatpush.bf16.msra.mxu2 %v5265_v59  ;;  %3462 = vmatmul.bf16.vlgmr.msrb.gmra.mxu3 %v8371_v20  ;;  %v4785_v59 = vor.u32 %v7077_v50, %v4784_v5  ;;  %v7155_v50 = vld [vmem:[%s11444_s1 + $0x324] sm:$0xf0] }
 0x147   :  { %3506 = vmatpush.bf16.msra.mxu3 %v5457_v63  ;;  %v7071_v63 = vld [vmem:[%s11444_s1 + $0x84] sm:$0xf0] }
 0x148   :  { %3468 = vmatpush.bf16.msra.mxu0 %v4857_v7  ;;  %v3242_v2 = vpop.f32.mrf.mxu2  ;;  %v7167_v7 = vld [vmem:[%s11444_s1 + $0x384] sm:$0xf0]  ;;  %v4761_v18 = vor.u32 %v7071_v63, %v4760_v62  ;;  %v3218_v22 = vpop.f32.mrf.mxu0  ;;  %v7437_v62 = vld [vmem:[%s11444_s1 + $0xbf4] sm:$0xf0]  ;;  %v5289_v63 = vor.u32 %v7203_v12, %v5288_v51 }
 0x149   :  { %3481 = vmatpush.bf16.msra.mxu1 %v5049_v10  ;;  %v3243_v10 = vadd.f32 %v3242_v2, %v3230_v58  ;;  %v5145_v26 = vor.u32 %v7167_v7, %v5144_v6  ;;  %v3231_v30 = vpop.f32.mrf.mxu1  ;;  %v7389_v58 = vld [vmem:[%s11444_s1 + $0xa74] sm:$0xf0]  ;;  %v5841_v2 = vor.u32 %v7341_v21, %v5840_v55  ;;  %v7287_v6 = vld [vmem:[%s11444_s1 + $0x744] sm:$0xf0]  ;;  %v5816_v7 = vld [vmem:[%s11444_s1 + $0x8b0] sm:$0xf] }
 0x14a   :  { %3494 = vmatpush.bf16.msra.mxu2 %v5241_v11  ;;  %v3255_v11 = vpop.f32.mrf.mxu3  ;;  %v7431_v22 = vld [vmem:[%s11444_s1 + $0xbc4] sm:$0xf0]  ;;  %v5792_v30 = vld [vmem:[%s11444_s1 + $0x880] sm:$0xf] }
 0x14b   :  { %3507 = vmatpush.bf16.msra.mxu3 %v5433_v19  ;;  %v9880_v19 = vadd.f32 %v3255_v11, %v3243_v10  ;;  %v7335_v11 = vld [vmem:[%s11444_s1 + $0x8c4] sm:$0xf0]  ;;  %v5552_v55 = vld [vmem:[%s11444_s1 + $0x6a0] sm:$0xf] }
 0x14c   :  { %3469 = vmatpush.bf16.msra.mxu0 %v4833_v29  ;;  %v4928_v29 = vld [vmem:[%s11444_s1 + $0x1c0] sm:$0xf]  ;;  %v7419_v51 = vld [vmem:[%s11444_s1 + $0xb64] sm:$0xf0] }
 0x14d   :  { %3482 = vmatpush.bf16.msra.mxu1 %v5025_v31  ;;  %v5337_v31 = vor.u32 %v7215_v17, %v5336_v14  ;;  %v6008_v14 = vld [vmem:[%s11444_s1 + $0xa30] sm:$0xf]  ;;  %v7383_v17 = vld [vmem:[%s11444_s1 + $0xa44] sm:$0xf0]  ;;  %v5744_v21 = vld [vmem:[%s11444_s1 + $0x820] sm:$0xf] }
 0x14e   :  { %3495 = vmatpush.bf16.msra.mxu2 %v5217_v32  ;;  %v7113_v32 = vld [vmem:[%s11444_s1 + $0x1d4] sm:$0xf0]  ;;  %v6009_v27 = vor.u32 %v7383_v17, %v6008_v14  ;;  %v7311_v17 = vld [vmem:[%s11444_s1 + $0x804] sm:$0xf0] }
 0x14f   :  { %3508 = vmatpush.bf16.msra.mxu3 %v5409_v41  ;;  %v7209_v41 = vld [vmem:[%s11444_s1 + $0x4d4] sm:$0xf0]  ;;  %v4929_v0 = vor.u32 %v7113_v32, %v4928_v29 }
 0x150   :  { %3470 = vmatpush.bf16.msra.mxu0 %v4809_v24  ;;  %v4904_v24 = vld [vmem:[%s11444_s1 + $0x190] sm:$0xf]  ;;  %v5313_v5 = vor.u32 %v7209_v41, %v5312_v39  ;;  %v7281_v29 = vld [vmem:[%s11444_s1 + $0x714] sm:$0xf0]  ;;  %v6176_v39 = vld [vmem:[%s11444_s1 + $0xb80] sm:$0xf] }
 0x151   :  { %3483 = vmatpush.bf16.msra.mxu1 %v5001_v48  ;;  %v5096_v48 = vld [vmem:[%s11444_s1 + $0x310] sm:$0xf]  ;;  %v7329_v32 = vld [vmem:[%s11444_s1 + $0x894] sm:$0xf0] }
 0x152   :  { %3496 = vmatpush.bf16.msra.mxu2 %v5193_v49  ;;  %v3244_v49 = vpop.f32.mrf.mxu2  ;;  %v3257_v52 = vpop.f32.mrf.mxu3  ;;  %v7425_v41 = vld [vmem:[%s11444_s1 + $0xb94] sm:$0xf0]  ;;  %v5793_v43 = vor.u32 %v7329_v32, %v5792_v30 }
 0x153   :  { %3509 = vmatpush.bf16.msra.mxu3 %v5385_v53  ;;  %v5648_v53 = vld [vmem:[%s11444_s1 + $0x760] sm:$0xf]  ;;  %v5960_v49 = vld [vmem:[%s11444_s1 + $0x9d0] sm:$0xf] }
 0x154   :  { %3471 = vmatpush.bf16.msra.mxu0 %v4785_v59  ;;  %v4905_v59 = vor.u32 %v7107_v47, %v4904_v24  ;;  %v5649_v1 = vor.u32 %v7293_v54, %v5648_v53  ;;  %v5768_v24 = vld [vmem:[%s11444_s1 + $0x850] sm:$0xf]  ;;  %v6177_v47 = vor.u32 %v7425_v41, %v6176_v39  ;;  %v7257_v39 = vld [vmem:[%s11444_s1 + $0x654] sm:$0xf0]  ;;  %v5696_v41 = vld [vmem:[%s11444_s1 + $0x7c0] sm:$0xf] }
 0x155   :  { %3484 = vmatpush.bf16.msra.mxu1 %v4977_v60  ;;  %v5097_v60 = vor.u32 %v7155_v50, %v5096_v48  ;;  %v7323_v48 = vld [vmem:[%s11444_s1 + $0x864] sm:$0xf0]  ;;  %v6152_v50 = vld [vmem:[%s11444_s1 + $0xb50] sm:$0xf] }
 0x156   :  { %3497 = vmatpush.bf16.msra.mxu2 %v5169_v61  ;;  %v6224_v61 = vld [vmem:[%s11444_s1 + $0xbe0] sm:$0xf]  ;;  %v5769_v53 = vor.u32 %v7323_v48, %v5768_v24  ;;  %v5505_v48 = vor.u32 %v7257_v39, %v5504_v35 }
 0x157   :  { %3510 = vmatpush.bf16.msra.mxu3 %v5361_v3  ;;  %v6033_v3 = vor.u32 %v7389_v58, %v6032_v57  ;;  %v6225_v10 = vor.u32 %v7437_v62, %v6224_v61  ;;  %v5936_v61 = vld [vmem:[%s11444_s1 + $0x9a0] sm:$0xf]  ;;  %v7365_v62 = vld [vmem:[%s11444_s1 + $0x9b4] sm:$0xf0] }
 0x158   :  { %3472 = vmatpush.bf16.msra.mxu0 %v4761_v18  ;;  %v6200_v18 = vld [vmem:[%s11444_s1 + $0xbb0] sm:$0xf]  ;;  %v6080_v24 = vld [vmem:[%s11444_s1 + $0xac0] sm:$0xf] }
 0x159   :  { %3485 = vmatpush.bf16.msra.mxu1 %v4953_v23  ;;  %v5625_v23 = vor.u32 %v7287_v6, %v5624_v4  ;;  %v5937_v4 = vor.u32 %v7365_v62, %v5936_v61  ;;  %v5528_v6 = vld [vmem:[%s11444_s1 + $0x670] sm:$0xf]  ;;  %v6608_v61 = vld [vmem:[%s11444_s1 + $0xee0] sm:$0xf] }
 0x15a   :  { %3498 = vmatpush.bf16.msra.mxu2 %v5145_v26  ;;  %v5817_v26 = vor.u32 %v7335_v11, %v5816_v7  ;;  %v7263_v7 = vld [vmem:[%s11444_s1 + $0x684] sm:$0xf0]  ;;  %v6368_v39 = vld [vmem:[%s11444_s1 + $0xd00] sm:$0xf] }
 0x15b   :  { %3511 = vmatpush.bf16.msra.mxu3 %v5337_v31  ;;  %v6201_v31 = vor.u32 %v7431_v22, %v6200_v18  ;;  %v5912_v18 = vld [vmem:[%s11444_s1 + $0x970] sm:$0xf]  ;;  %v7359_v22 = vld [vmem:[%s11444_s1 + $0x984] sm:$0xf0] }
 0x15c   :  { %3473 = vmatpush.bf16.msra.mxu0 %v4737_v42  ;;  %v5601_v42 = vor.u32 %v7281_v29, %v5600_v28  ;;  %v7407_v28 = vld [vmem:[%s11444_s1 + $0xb04] sm:$0xf0]  ;;  %v5529_v29 = vor.u32 %v7263_v7, %v5528_v6  ;;  %v5913_v33 = vor.u32 %v7359_v22, %v5912_v18  ;;  %v5074_v6 = vld [vmem:[%s11444_s1 + $0x2f8] sm:$0xf0]  ;;  %v6584_v22 = vld [vmem:[%s11444_s1 + $0xeb0] sm:$0xf] }
 0x15d   :  { %3486 = vmatpush.bf16.msra.mxu1 %v4929_v0  ;;  %v5576_v0 = vld [vmem:[%s11444_s1 + $0x6d0] sm:$0xf]  ;;  %v7479_v18 = vld [vmem:[%s11444_s1 + $0xd44] sm:$0xf0] }
 0x15e   :  { %3499 = vmatpush.bf16.msra.mxu2 %v5121_v46  ;;  %v7275_v46 = vld [vmem:[%s11444_s1 + $0x6e4] sm:$0xf0] }
 0x15f   :  { %3512 = vmatpush.bf16.msra.mxu3 %v5313_v5  ;;  %v7371_v5 = vld [vmem:[%s11444_s1 + $0x9e4] sm:$0xf0]  ;;  %v5577_v12 = vor.u32 %v7275_v46, %v5576_v0  ;;  %v5888_v0 = vld [vmem:[%s11444_s1 + $0x940] sm:$0xf]  ;;  %v7353_v46 = vld [vmem:[%s11444_s1 + $0x954] sm:$0xf0] }
 0x160   :  { %3474 = vmatpush.bf16.msra.mxu0 %v4713_v56  ;;  %v3268_v52 = vpop.f32.mrf.mxu0  ;;  %v5961_v54 = vor.u32 %v7371_v5, %v5960_v49  ;;  %v7269_v56 = vld [vmem:[%s11444_s1 + $0x6b4] sm:$0xf0]  ;;  %v5480_v49 = vld [vmem:[%s11444_s1 + $0x610] sm:$0xf]  ;;  %v7251_v5 = vld [vmem:[%s11444_s1 + $0x624] sm:$0xf0] }
 0x161   :  { %3487 = vmatpush.bf16.msra.mxu1 %v4905_v59  ;;  %v3269_v57 = vadd.f32 %v3268_v52, %v9880_v19  ;;  %v3281_v58 = vpop.f32.mrf.mxu1  ;;  %v6153_v59 = vor.u32 %v7419_v51, %v6152_v50  ;;  %v7413_v19 = vld [vmem:[%s11444_s1 + $0xb34] sm:$0xf0]  ;;  %v5889_v51 = vor.u32 %v7353_v46, %v5888_v0  ;;  %v7299_v52 = vld [vmem:[%s11444_s1 + $0x7a4] sm:$0xf0]  ;;  %v5481_v62 = vor.u32 %v7251_v5, %v5480_v49  ;;  %v7086_v0 = vld [vmem:[%s11444_s1 + $0x104] sm:$0xf] }
 0x162   :  { %3500 = vmatpush.bf16.msra.mxu2 %v5097_v60  ;;  %v7317_v60 = vld [vmem:[%s11444_s1 + $0x834] sm:$0xf0]  ;;  %v4834_v46 = vld [vmem:[%s11444_s1 + $0x118] sm:$0xf0] }
 0x163   :  { %3513 = vmatpush.bf16.msra.mxu3 %v5289_v63  ;;  %3475 = vmatmul.bf16.vlgmr.msra.gmra.mxu0 %v7978_v9  ;;  %v6128_v63 = vld [vmem:[%s11444_s1 + $0xb20] sm:$0xf]  ;;  %v4837_v5 = vor.u32 %v7086_v0, %v4834_v46 }
 0x164   :  { %3519 = vmatpush.bf16.msrb.mxu0 %v5649_v1  ;;  %3488 = vmatmul.bf16.vlgmr.msra.gmra.mxu1 %v8015_v25  ;;  %v3282_v1 = vadd.f32 %v3281_v58, %v3269_v57  ;;  %v6129_v14 = vor.u32 %v7413_v19, %v6128_v63  ;;  %v7395_v57 = vld [vmem:[%s11444_s1 + $0xaa4] sm:$0xf0]  ;;  %v7533_v63 = vld [vmem:[%s11444_s1 + $0xef4] sm:$0xf0]  ;;  %v7098_v19 = vld [vmem:[%s11444_s1 + $0x164] sm:$0xf] }
 0x165   :  { %3532 = vmatpush.bf16.msrb.mxu1 %v5841_v2  ;;  %3501 = vmatmul.bf16.vlgmr.msra.gmra.mxu2 %v7976_v8  ;;  %v5553_v2 = vor.u32 %v7269_v56, %v5552_v55  ;;  %v7347_v56 = vld [vmem:[%s11444_s1 + $0x924] sm:$0xf0]  ;;  %v6272_v46 = vld [vmem:[%s11444_s1 + $0xc40] sm:$0xf] }
 0x166   :  { %3545 = vmatpush.bf16.msrb.mxu2 %v6033_v3  ;;  %3514 = vmatmul.bf16.vlgmr.msra.gmra.mxu3 %v7992_v15  ;;  %v5745_v3 = vor.u32 %v7317_v60, %v5744_v21  ;;  %v6056_v21 = vld [vmem:[%s11444_s1 + $0xa90] sm:$0xf]  ;;  %v7485_v60 = vld [vmem:[%s11444_s1 + $0xd74] sm:$0xf0] }
 0x167   :  { %3558 = vmatpush.bf16.msrb.mxu3 %v6225_v10  ;;  %v5720_v10 = vld [vmem:[%s11444_s1 + $0x7f0] sm:$0xf]  ;;  %v6057_v7 = vor.u32 %v7395_v57, %v6056_v21  ;;  %v7128_v21 = vld [vmem:[%s11444_s1 + $0x254] sm:$0xf]  ;;  %v5002_v57 = vld [vmem:[%s11444_s1 + $0x268] sm:$0xf0] }
 0x168   :  { %3520 = vmatpush.bf16.msrb.mxu0 %v5625_v23  ;;  %v3294_v11 = vpop.f32.mrf.mxu2  ;;  %v5721_v32 = vor.u32 %v7311_v17, %v5720_v10  ;;  %v6392_v17 = vld [vmem:[%s11444_s1 + $0xd30] sm:$0xf] }
 0x169   :  { %3533 = vmatpush.bf16.msrb.mxu1 %v5817_v26  ;;  %v3295_v23 = vadd.f32 %v3294_v11, %v3282_v1  ;;  %v3307_v26 = vpop.f32.mrf.mxu3  ;;  %v4882_v1 = vld [vmem:[%s11444_s1 + $0x178] sm:$0xf0]  ;;  %v6609_v11 = vor.u32 %v7533_v63, %v6608_v61  ;;  %v6320_v63 = vld [vmem:[%s11444_s1 + $0xca0] sm:$0xf] }
 0x16a   :  { %3546 = vmatpush.bf16.msrb.mxu2 %v6009_v27  ;;  %v6104_v27 = vld [vmem:[%s11444_s1 + $0xaf0] sm:$0xf] }
 0x16b   :  { %3559 = vmatpush.bf16.msrb.mxu3 %v6201_v31  ;;  %v10079_v30 = vadd.f32 %v3307_v26, %v3295_v23  ;;  %v3270_v31 = vpop.f32.mrf.mxu0  ;;  %v7527_v26 = vld [vmem:[%s11444_s1 + $0xec4] sm:$0xf0] }
 0x16c   :  { %3521 = vmatpush.bf16.msrb.mxu0 %v5601_v42  ;;  %v3283_v42 = vpop.f32.mrf.mxu1  ;;  %v5050_v31 = vld [vmem:[%s11444_s1 + $0x2c8] sm:$0xf0] }
 0x16d   :  { %3534 = vmatpush.bf16.msrb.mxu1 %v5793_v43  ;;  %v6105_v43 = vor.u32 %v7407_v28, %v6104_v27  ;;  %v7092_v27 = vld [vmem:[%s11444_s1 + $0x134] sm:$0xf]  ;;  %v4858_v28 = vld [vmem:[%s11444_s1 + $0x148] sm:$0xf0]  ;;  %v6560_v42 = vld [vmem:[%s11444_s1 + $0xe80] sm:$0xf] }
 0x16e   :  { %3547 = vmatpush.bf16.msrb.mxu2 %v5985_v44  ;;  %v7305_v44 = vld [vmem:[%s11444_s1 + $0x7d4] sm:$0xf0]  ;;  %v4861_v35 = vor.u32 %v7092_v27, %v4858_v28  ;;  %v7503_v27 = vld [vmem:[%s11444_s1 + $0xe04] sm:$0xf0]  ;;  %v7068_v28 = vld [vmem:[%s11444_s1 + $0x74] sm:$0xf] }
 0x16f   :  { %3560 = vmatpush.bf16.msrb.mxu3 %v6177_v47  ;;  %v7401_v47 = vld [vmem:[%s11444_s1 + $0xad4] sm:$0xf0]  ;;  %v5697_v50 = vor.u32 %v7305_v44, %v5696_v41 }
 0x170   :  { %3522 = vmatpush.bf16.msrb.mxu0 %v5577_v12  ;;  %v5672_v12 = vld [vmem:[%s11444_s1 + $0x790] sm:$0xf]  ;;  %v6081_v55 = vor.u32 %v7401_v47, %v6080_v24  ;;  %v7473_v41 = vld [vmem:[%s11444_s1 + $0xd14] sm:$0xf0]  ;;  %v7134_v24 = vld [vmem:[%s11444_s1 + $0x284] sm:$0xf] }
 0x171   :  { %3535 = vmatpush.bf16.msrb.mxu1 %v5769_v53  ;;  %v5864_v53 = vld [vmem:[%s11444_s1 + $0x910] sm:$0xf]  ;;  %v3309_v58 = vpop.f32.mrf.mxu3  ;;  %v7521_v44 = vld [vmem:[%s11444_s1 + $0xe94] sm:$0xf0]  ;;  %v5026_v47 = vld [vmem:[%s11444_s1 + $0x298] sm:$0xf0] }
 0x172   :  { %3548 = vmatpush.bf16.msrb.mxu2 %v5961_v54  ;;  %v3296_v54 = vpop.f32.mrf.mxu2  ;;  %v6561_v49 = vor.u32 %v7521_v44, %v6560_v42 }
 0x173   :  { %3561 = vmatpush.bf16.msrb.mxu3 %v6153_v59  ;;  %v6416_v59 = vld [vmem:[%s11444_s1 + $0xd60] sm:$0xf]  ;;  %v7080_v54 = vld [vmem:[%s11444_s1 + $0xd4] sm:$0xf] }
 0x174   :  { %3523 = vmatpush.bf16.msrb.mxu0 %v5553_v2  ;;  %v5673_v2 = vor.u32 %v7299_v52, %v5672_v12  ;;  %v6417_v10 = vor.u32 %v7485_v60, %v6416_v59  ;;  %v6536_v12 = vld [vmem:[%s11444_s1 + $0xe50] sm:$0xf]  ;;  %v5029_v52 = vor.u32 %v7134_v24, %v5026_v47  ;;  %v7449_v24 = vld [vmem:[%s11444_s1 + $0xc54] sm:$0xf0]  ;;  %v6464_v47 = vld [vmem:[%s11444_s1 + $0xdc0] sm:$0xf] }
 0x175   :  { %3536 = vmatpush.bf16.msrb.mxu1 %v5745_v3  ;;  %v5865_v3 = vor.u32 %v7347_v56, %v5864_v53  ;;  %v7515_v53 = vld [vmem:[%s11444_s1 + $0xe64] sm:$0xf0] }
 0x176   :  { %3549 = vmatpush.bf16.msrb.mxu2 %v5937_v4  ;;  %v7146_v4 = vld [vmem:[%s11444_s1 + $0x2e4] sm:$0xf]  ;;  %v6537_v61 = vor.u32 %v7515_v53, %v6536_v12  ;;  %v6273_v53 = vor.u32 %v7449_v24, %v6272_v46  ;;  %v5218_v24 = vld [vmem:[%s11444_s1 + $0x418] sm:$0xf0] }
 0x177   :  { %3562 = vmatpush.bf16.msrb.mxu3 %v6129_v14  ;;  %v4885_v14 = vor.u32 %v7098_v19, %v4882_v1  ;;  %v5077_v23 = vor.u32 %v7146_v4, %v5074_v6  ;;  %v7461_v19 = vld [vmem:[%s11444_s1 + $0xcb4] sm:$0xf0]  ;;  %v6512_v1 = vld [vmem:[%s11444_s1 + $0xe20] sm:$0xf]  ;;  %v7074_v4 = vld [vmem:[%s11444_s1 + $0xa4] sm:$0xf] }
 0x178   :  { %3524 = vmatpush.bf16.msrb.mxu0 %v5529_v29  ;;  %v7140_v29 = vld [vmem:[%s11444_s1 + $0x2b4] sm:$0xf]  ;;  %v4786_v6 = vld [vmem:[%s11444_s1 + $0xb8] sm:$0xf0]  ;;  %v7110_v12 = vld [vmem:[%s11444_s1 + $0x1c4] sm:$0xf] }
 0x179   :  { %3537 = vmatpush.bf16.msrb.mxu1 %v5721_v32  ;;  %v6393_v32 = vor.u32 %v7479_v18, %v6392_v17  ;;  %v4789_v18 = vor.u32 %v7074_v4, %v4786_v6  ;;  %v7182_v46 = vld [vmem:[%s11444_s1 + $0x404] sm:$0xf] }
 0x17a   :  { %3550 = vmatpush.bf16.msrb.mxu2 %v5913_v33  ;;  %v6585_v33 = vor.u32 %v7527_v26, %v6584_v22  ;;  %v6296_v22 = vld [vmem:[%s11444_s1 + $0xc70] sm:$0xf] }
 0x17b   :  { %3563 = vmatpush.bf16.msrb.mxu3 %v6105_v43  ;;  %v5053_v43 = vor.u32 %v7140_v29, %v5050_v31  ;;  %v6488_v26 = vld [vmem:[%s11444_s1 + $0xdf0] sm:$0xf]  ;;  %v4762_v29 = vld [vmem:[%s11444_s1 + $0x88] sm:$0xf0] }
 0x17c   :  { %3525 = vmatpush.bf16.msrb.mxu0 %v5505_v48  ;;  %v6369_v48 = vor.u32 %v7473_v41, %v6368_v39  ;;  %v6489_v44 = vor.u32 %v7503_v27, %v6488_v26  ;;  %v4765_v0 = vor.u32 %v7068_v28, %v4762_v29  ;;  %v7188_v28 = vld [vmem:[%s11444_s1 + $0x434] sm:$0xf]  ;;  %v5242_v29 = vld [vmem:[%s11444_s1 + $0x448] sm:$0xf0] }
 0x17d   :  { %3538 = vmatpush.bf16.msrb.mxu1 %v5697_v50  ;;  %v6344_v50 = vld [vmem:[%s11444_s1 + $0xcd0] sm:$0xf] }
 0x17e   :  { %3551 = vmatpush.bf16.msrb.mxu2 %v5889_v51  ;;  %v7467_v51 = vld [vmem:[%s11444_s1 + $0xce4] sm:$0xf0] }
 0x17f   :  { %3564 = vmatpush.bf16.msrb.mxu3 %v6081_v55  ;;  %v4810_v55 = vld [vmem:[%s11444_s1 + $0xe8] sm:$0xf0]  ;;  %v6345_v59 = vor.u32 %v7467_v51, %v6344_v50  ;;  %v7062_v50 = vld [vmem:[%s11444_s1 + $0x44] sm:$0xf]  ;;  %v4738_v51 = vld [vmem:[%s11444_s1 + $0x58] sm:$0xf0] }
 0x180   :  { %3526 = vmatpush.bf16.msrb.mxu0 %v5481_v62  ;;  %v3320_v56 = vpop.f32.mrf.mxu0  ;;  %v4813_v62 = vor.u32 %v7080_v54, %v4810_v55  ;;  %v6248_v54 = vld [vmem:[%s11444_s1 + $0xc10] sm:$0xf]  ;;  %v7443_v55 = vld [vmem:[%s11444_s1 + $0xc24] sm:$0xf0] }
 0x181   :  { %3539 = vmatpush.bf16.msrb.mxu1 %v5673_v2  ;;  %v3321_v58 = vadd.f32 %v3320_v56, %v10079_v30  ;;  %v3333_v60 = vpop.f32.mrf.mxu1  ;;  %v5005_v30 = vor.u32 %v7128_v21, %v5002_v57  ;;  %v4741_v21 = vor.u32 %v7062_v50, %v4738_v51  ;;  %v6440_v57 = vld [vmem:[%s11444_s1 + $0xd90] sm:$0xf]  ;;  %v6249_v6 = vor.u32 %v7443_v55, %v6248_v54  ;;  %v7278_v50 = vld [vmem:[%s11444_s1 + $0x704] sm:$0xf]  ;;  %v5602_v51 = vld [vmem:[%s11444_s1 + $0x718] sm:$0xf0] }
 0x182   :  { %3552 = vmatpush.bf16.msrb.mxu2 %v5865_v3  ;;  %v7509_v3 = vld [vmem:[%s11444_s1 + $0xe34] sm:$0xf0]  ;;  %v5605_v55 = vor.u32 %v7278_v50, %v5602_v51 }
 0x183   :  { %3565 = vmatpush.bf16.msrb.mxu3 %v6057_v7  ;;  %3527 = vmatmul.bf16.vlgmr.msrb.gmra.mxu0 %v8167_v37  ;;  %v10239_v2 = vadd.f32 %v3333_v60, %v3321_v58  ;;  %v7122_v7 = vld [vmem:[%s11444_s1 + $0x224] sm:$0xf]  ;;  %v6513_v17 = vor.u32 %v7509_v3, %v6512_v1  ;;  %v7491_v58 = vld [vmem:[%s11444_s1 + $0xda4] sm:$0xf0] }
 0x184   :  { %3571 = vmatpush.bf16.msra.mxu0 %v6417_v10  ;;  %3540 = vmatmul.bf16.vlgmr.msrb.gmra.mxu1 %v8171_v40  ;;  %v4978_v10 = vld [vmem:[%s11444_s1 + $0x238] sm:$0xf0]  ;;  %v7194_v1 = vld [vmem:[%s11444_s1 + $0x464] sm:$0xf] }
 0x185   :  { %3584 = vmatpush.bf16.msra.mxu1 %v6609_v11  ;;  %3553 = vmatmul.bf16.vlgmr.msrb.gmra.mxu2 %v8159_v34  ;;  %v538_v11 = vperm.slane %v9814_v36, 3  ;;  %v4981_v36 = vor.u32 %v7122_v7, %v4978_v10  ;;  %v7242_v3 = vld [vmem:[%s11444_s1 + $0x5e4] sm:$0xf]  ;;  %v5458_v7 = vld [vmem:[%s11444_s1 + $0x5f8] sm:$0xf0]  ;;  %vm3729_vm2 = vcmp.gt.f32.partialorder %v10239_v2, 0.0 }
 0x186   :  { %3597 = vmatpush.bf16.msra.mxu2 %v4885_v14  ;;  %3566 = vmatmul.bf16.vlgmr.msrb.gmra.mxu3 %v8169_v38  ;;  %v6321_v14 = vor.u32 %v7461_v19, %v6320_v63  ;;  %v4906_v63 = vld [vmem:[%s11444_s1 + $0x1a8] sm:$0xf0]  ;;  %v7290_v10 = vld [vmem:[%s11444_s1 + $0x764] sm:$0xf] }
 0x187   :  { %3610 = vmatpush.bf16.msra.mxu3 %v5077_v23  ;;  %v7455_v23 = vld [vmem:[%s11444_s1 + $0xc84] sm:$0xf0] }
 0x188   :  { %3572 = vmatpush.bf16.msra.mxu0 %v6393_v32  ;;  %v3346_v31 = vpop.f32.mrf.mxu2  ;;  %v7116_v32 = vld [vmem:[%s11444_s1 + $0x1f4] sm:$0xf]  ;;  %v3322_v41 = vpop.f32.mrf.mxu0  ;;  %v6297_v42 = vor.u32 %v7455_v23, %v6296_v22  ;;  %v5842_v22 = vld [vmem:[%s11444_s1 + $0x8f8] sm:$0xf0] }
 0x189   :  { %3585 = vmatpush.bf16.msra.mxu1 %v6585_v33  ;;  %v4954_v33 = vld [vmem:[%s11444_s1 + $0x208] sm:$0xf0]  ;;  %v3359_v39 = vpop.f32.mrf.mxu3  ;;  %v7332_v41 = vld [vmem:[%s11444_s1 + $0x8b4] sm:$0xf] }
 0x18a   :  { %3598 = vmatpush.bf16.msra.mxu2 %v4861_v35  ;;  %v3347_v35 = vadd.f32 %v3346_v31, %v538_v11  ;;  %v5650_v11 = vld [vmem:[%s11444_s1 + $0x778] sm:$0xf0]  ;;  %v7236_v31 = vld [vmem:[%s11444_s1 + $0x5b4] sm:$0xf] }
 0x18b   :  { %3611 = vmatpush.bf16.msra.mxu3 %v5053_v43  ;;  %v3335_v43 = vpop.f32.mrf.mxu1  ;;  %v5653_v27 = vor.u32 %v7290_v10, %v5650_v11  ;;  %v5362_v11 = vld [vmem:[%s11444_s1 + $0x538] sm:$0xf0] }
 0x18c   :  { %3573 = vmatpush.bf16.msra.mxu0 %v6369_v48  ;;  %v10290_v48 = vadd.f32 %v3359_v39, %v3347_v35  ;;  %v7284_v35 = vld [vmem:[%s11444_s1 + $0x734] sm:$0xf]  ;;  %v5626_v39 = vld [vmem:[%s11444_s1 + $0x748] sm:$0xf0]  ;;  %v5245_v43 = vor.u32 %v7188_v28, %v5242_v29 }
 0x18d   :  { %3586 = vmatpush.bf16.msra.mxu1 %v6561_v49  ;;  %v4957_v49 = vor.u32 %v7116_v32, %v4954_v33  ;;  %v5434_v33 = vld [vmem:[%s11444_s1 + $0x5c8] sm:$0xf0]  ;;  %v7212_v29 = vld [vmem:[%s11444_s1 + $0x4f4] sm:$0xf] }
 0x18e   :  { %3599 = vmatpush.bf16.msra.mxu2 %v4837_v5  ;;  %v7497_v5 = vld [vmem:[%s11444_s1 + $0xdd4] sm:$0xf0]  ;;  %v5146_v28 = vld [vmem:[%s11444_s1 + $0x388] sm:$0xf0] }
 0x18f   :  { %3612 = vmatpush.bf16.msra.mxu3 %v5029_v52  ;;  %v4930_v52 = vld [vmem:[%s11444_s1 + $0x1d8] sm:$0xf0]  ;;  %v6465_v56 = vor.u32 %v7497_v5, %v6464_v47  ;;  %v7230_v47 = vld [vmem:[%s11444_s1 + $0x584] sm:$0xf] }
 0x190   :  { %3574 = vmatpush.bf16.msra.mxu0 %v6345_v59  ;;  %v7056_v59 = vld [vmem:[%s11444_s1 + $0x14] sm:$0xf]  ;;  %v4933_v60 = vor.u32 %v7110_v12, %v4930_v52  ;;  %v3348_v19 = vpop.f32.mrf.mxu2  ;;  %v5410_v5 = vld [vmem:[%s11444_s1 + $0x598] sm:$0xf0]  ;;  %v7326_v12 = vld [vmem:[%s11444_s1 + $0x884] sm:$0xf] }
 0x191   :  { %3587 = vmatpush.bf16.msra.mxu1 %v6537_v61  ;;  %v4714_v61 = vld [vmem:[%s11444_s1 + $0x28] sm:$0xf0]  ;;  %v3361_v4 = vpop.f32.mrf.mxu3  ;;  %v5794_v52 = vld [vmem:[%s11444_s1 + $0x898] sm:$0xf0]  ;;  %v5413_v54 = vor.u32 %v7230_v47, %v5410_v5  ;;  %v7158_v47 = vld [vmem:[%s11444_s1 + $0x344] sm:$0xf] }
 0x192   :  { %3600 = vmatpush.bf16.msra.mxu2 %v4813_v62  ;;  %v7104_v62 = vld [vmem:[%s11444_s1 + $0x194] sm:$0xf]  ;;  %v7218_v4 = vld [vmem:[%s11444_s1 + $0x524] sm:$0xf] }
 0x193   :  { %3613 = vmatpush.bf16.msra.mxu3 %v5005_v30  ;;  %v5266_v30 = vld [vmem:[%s11444_s1 + $0x478] sm:$0xf0]  ;;  %v4909_v23 = vor.u32 %v7104_v62, %v4906_v63  ;;  %v7206_v5 = vld [vmem:[%s11444_s1 + $0x4c4] sm:$0xf] }
 0x194   :  { %3575 = vmatpush.bf16.msra.mxu0 %v6321_v14  ;;  %v6441_v14 = vor.u32 %v7491_v58, %v6440_v57  ;;  %v5269_v26 = vor.u32 %v7194_v1, %v5266_v30  ;;  %v5797_v57 = vor.u32 %v7326_v12, %v5794_v52  ;;  %v7272_v58 = vld [vmem:[%s11444_s1 + $0x6d4] sm:$0xf]  ;;  %v7170_v30 = vld [vmem:[%s11444_s1 + $0x3a4] sm:$0xf]  ;;  %v5314_v12 = vld [vmem:[%s11444_s1 + $0x4d8] sm:$0xf0] }
 0x195   :  { %3588 = vmatpush.bf16.msra.mxu1 %v6513_v17  ;;  %v4717_v17 = vor.u32 %v7056_v59, %v4714_v61  ;;  %v5578_v59 = vld [vmem:[%s11444_s1 + $0x6e8] sm:$0xf0]  ;;  %v7254_v52 = vld [vmem:[%s11444_s1 + $0x644] sm:$0xf] }
 0x196   :  { %3601 = vmatpush.bf16.msra.mxu2 %v4789_v18  ;;  %v7338_v18 = vld [vmem:[%s11444_s1 + $0x8e4] sm:$0xf]  ;;  %v5770_v61 = vld [vmem:[%s11444_s1 + $0x868] sm:$0xf0]  ;;  %v5581_v1 = vor.u32 %v7272_v58, %v5578_v59  ;;  %v7200_v58 = vld [vmem:[%s11444_s1 + $0x494] sm:$0xf] }
 0x197   :  { %3614 = vmatpush.bf16.msra.mxu3 %v4981_v36  ;;  %v5461_v36 = vor.u32 %v7242_v3, %v5458_v7  ;;  %v5845_v32 = vor.u32 %v7338_v18, %v5842_v22  ;;  %v5170_v3 = vld [vmem:[%s11444_s1 + $0x3b8] sm:$0xf0]  ;;  %v7314_v18 = vld [vmem:[%s11444_s1 + $0x824] sm:$0xf]  ;;  %v5290_v59 = vld [vmem:[%s11444_s1 + $0x4a8] sm:$0xf0] }
 0x198   :  { %3576 = vmatpush.bf16.msra.mxu0 %v6297_v42  ;;  %v5818_v42 = vld [vmem:[%s11444_s1 + $0x8c8] sm:$0xf0] }
 0x199   :  { %3589 = vmatpush.bf16.msra.mxu1 %v6489_v44  ;;  %v5437_v44 = vor.u32 %v7236_v31, %v5434_v33  ;;  %v5338_v33 = vld [vmem:[%s11444_s1 + $0x508] sm:$0xf0] }
 0x19a   :  { %3602 = vmatpush.bf16.msra.mxu2 %v4765_v0  ;;  %v5629_v0 = vor.u32 %v7284_v35, %v5626_v39  ;;  %v7260_v35 = vld [vmem:[%s11444_s1 + $0x674] sm:$0xf]  ;;  %v5530_v39 = vld [vmem:[%s11444_s1 + $0x688] sm:$0xf0] }
 0x19b   :  { %3615 = vmatpush.bf16.msra.mxu3 %v4957_v49  ;;  %v5821_v49 = vor.u32 %v7332_v41, %v5818_v42  ;;  %v7308_v42 = vld [vmem:[%s11444_s1 + $0x7f4] sm:$0xf] }
 0x19c   :  { %3577 = vmatpush.bf16.msra.mxu0 %v6273_v53  ;;  %v5221_v53 = vor.u32 %v7182_v46, %v5218_v24  ;;  %v5341_v46 = vor.u32 %v7212_v29, %v5338_v33  ;;  %v5533_v24 = vor.u32 %v7260_v35, %v5530_v39  ;;  %v7380_v29 = vld [vmem:[%s11444_s1 + $0xa34] sm:$0xf]  ;;  %v6202_v39 = vld [vmem:[%s11444_s1 + $0xbc8] sm:$0xf0] }
 0x19d   :  { %3590 = vmatpush.bf16.msra.mxu1 %v6465_v56  ;;  %v7176_v56 = vld [vmem:[%s11444_s1 + $0x3d4] sm:$0xf] }
 0x19e   :  { %3603 = vmatpush.bf16.msra.mxu2 %v4741_v21  ;;  %v5194_v21 = vld [vmem:[%s11444_s1 + $0x3e8] sm:$0xf0]  ;;  %v7428_v33 = vld [vmem:[%s11444_s1 + $0xbb4] sm:$0xf] }
 0x19f   :  { %3616 = vmatpush.bf16.msra.mxu3 %v4933_v60  ;;  %v7320_v60 = vld [vmem:[%s11444_s1 + $0x854] sm:$0xf]  ;;  %v5197_v62 = vor.u32 %v7176_v56, %v5194_v21 }
 0x1a0   :  { %3578 = vmatpush.bf16.msra.mxu0 %v6249_v6  ;;  %v3372_v63 = vpop.f32.mrf.mxu0  ;;  %v5773_v10 = vor.u32 %v7320_v60, %v5770_v61  ;;  %v7152_v21 = vld [vmem:[%s11444_s1 + $0x314] sm:$0xf] }
 0x1a1   :  { %3591 = vmatpush.bf16.msra.mxu1 %v6441_v14  ;;  %v3373_v6 = vadd.f32 %v3372_v63, %v10290_v48  ;;  %v3385_v7 = vpop.f32.mrf.mxu1  ;;  %v7266_v14 = vld [vmem:[%s11444_s1 + $0x6a4] sm:$0xf]  ;;  %v5746_v48 = vld [vmem:[%s11444_s1 + $0x838] sm:$0xf0]  ;;  %v7248_v60 = vld [vmem:[%s11444_s1 + $0x614] sm:$0xf] }
 0x1a2   :  { %3604 = vmatpush.bf16.msra.mxu2 %v4717_v17  ;;  %v5554_v17 = vld [vmem:[%s11444_s1 + $0x6b8] sm:$0xf0]  ;;  %v5482_v63 = vld [vmem:[%s11444_s1 + $0x628] sm:$0xf0] }
 0x1a3   :  { %3617 = vmatpush.bf16.msra.mxu3 %v4909_v23  ;;  %3579 = vmatmul.bf16.vlgmr.msra.gmra.mxu0 %v8360_v16  ;;  %v10456_v22 = vadd.f32 %v3385_v7, %v3373_v6  ;;  %v5173_v23 = vor.u32 %v7170_v30, %v5170_v3  ;;  %v7386_v3 = vld [vmem:[%s11444_s1 + $0xa64] sm:$0xf] }
 0x1a4   :  { %3623 = vmatpush.bf16.msrb.mxu0 %v5269_v26  ;;  %3592 = vmatmul.bf16.vlgmr.msra.gmra.mxu1 %v8371_v20  ;;  %v5365_v26 = vor.u32 %v7218_v4, %v5362_v11  ;;  %v6034_v4 = vld [vmem:[%s11444_s1 + $0xa78] sm:$0xf0]  ;;  %v7434_v6 = vld [vmem:[%s11444_s1 + $0xbe4] sm:$0xf] }
 0x1a5   :  { %3636 = vmatpush.bf16.msrb.mxu1 %v5461_v36  ;;  %3605 = vmatmul.bf16.vlgmr.msra.gmra.mxu2 %v7978_v9  ;;  %v7224_v9 = vld [vmem:[%s11444_s1 + $0x554] sm:$0xf]  ;;  %v5557_v36 = vor.u32 %v7266_v14, %v5554_v17  ;;  %v7482_v11 = vld [vmem:[%s11444_s1 + $0xd64] sm:$0xf]  ;;  %v6418_v14 = vld [vmem:[%s11444_s1 + $0xd78] sm:$0xf0]  ;;  %v5293_v17 = vor.u32 %v7200_v58, %v5290_v59 }
 0x1a6   :  { %3649 = vmatpush.bf16.msrb.mxu2 %v5653_v27  ;;  %3618 = vmatmul.bf16.vlgmr.msra.gmra.mxu3 %v8015_v25  ;;  %v5386_v25 = vld [vmem:[%s11444_s1 + $0x568] sm:$0xf0]  ;;  %v7164_v27 = vld [vmem:[%s11444_s1 + $0x374] sm:$0xf] }
 0x1a7   :  { %3662 = vmatpush.bf16.msrb.mxu3 %v5845_v32  ;;  %v5389_v19 = vor.u32 %v7224_v9, %v5386_v25  ;;  %v5749_v32 = vor.u32 %v7314_v18, %v5746_v48  ;;  %v5098_v9 = vld [vmem:[%s11444_s1 + $0x328] sm:$0xf0]  ;;  %v5485_v18 = vor.u32 %v7248_v60, %v5482_v63  ;;  %v7530_v48 = vld [vmem:[%s11444_s1 + $0xee4] sm:$0xf]  ;;  %v7512_v60 = vld [vmem:[%s11444_s1 + $0xe54] sm:$0xf] }
 0x1a8   :  { %3624 = vmatpush.bf16.msrb.mxu0 %v5245_v43  ;;  %v10467_v31 = vpop.f32.mrf.mxu2  ;;  %v5722_v43 = vld [vmem:[%s11444_s1 + $0x808] sm:$0xf0]  ;;  %v5101_v7 = vor.u32 %v7152_v21, %v5098_v9  ;;  %v7368_v9 = vld [vmem:[%s11444_s1 + $0x9d4] sm:$0xf] }
 0x1a9   :  { %3637 = vmatpush.bf16.msrb.mxu1 %v5437_v44  ;;  %v10478_v41 = vpop.f32.mrf.mxu3  ;;  %v5149_v44 = vor.u32 %v7164_v27, %v5146_v28  ;;  %v3387_v50 = vpop.f32.mrf.mxu1  ;;  %v5725_v51 = vor.u32 %v7308_v42, %v5722_v43  ;;  %v6421_v28 = vor.u32 %v7482_v11, %v6418_v14  ;;  %v7476_v42 = vld [vmem:[%s11444_s1 + $0xd34] sm:$0xf]  ;;  %v6394_v43 = vld [vmem:[%s11444_s1 + $0xd48] sm:$0xf0]  ;;  %v6322_v11 = vld [vmem:[%s11444_s1 + $0xcb8] sm:$0xf0] }
 0x1aa   :  { %3650 = vmatpush.bf16.msrb.mxu2 %v5629_v0  ;;  %v3374_v0 = vpop.f32.mrf.mxu0  ;;  %v7422_v50 = vld [vmem:[%s11444_s1 + $0xb84] sm:$0xf]  ;;  %v6346_v58 = vld [vmem:[%s11444_s1 + $0xce8] sm:$0xf0] }
 0x1ab   :  { %3663 = vmatpush.bf16.msrb.mxu3 %v5821_v49  ;;  %v5122_v49 = vld [vmem:[%s11444_s1 + $0x358] sm:$0xf0]  ;;  %v6586_v0 = vld [vmem:[%s11444_s1 + $0xec8] sm:$0xf0]  ;;  %v7506_v14 = vld [vmem:[%s11444_s1 + $0xe24] sm:$0xf] }
 0x1ac   :  { %3625 = vmatpush.bf16.msrb.mxu0 %v5221_v53  ;;  %v5506_v53 = vld [vmem:[%s11444_s1 + $0x658] sm:$0xf0]  ;;  %v5125_v56 = vor.u32 %v7158_v47, %v5122_v49  ;;  %v6397_v47 = vor.u32 %v7476_v42, %v6394_v43  ;;  %v7374_v49 = vld [vmem:[%s11444_s1 + $0xa04] sm:$0xf]  ;;  %v7500_v42 = vld [vmem:[%s11444_s1 + $0xdf4] sm:$0xf] }
 0x1ad   :  { %3638 = vmatpush.bf16.msrb.mxu1 %v5413_v54  ;;  %v7302_v54 = vld [vmem:[%s11444_s1 + $0x7c4] sm:$0xf]  ;;  %v5509_v25 = vor.u32 %v7254_v52, %v5506_v53  ;;  %v6370_v53 = vld [vmem:[%s11444_s1 + $0xd18] sm:$0xf0]  ;;  %v6490_v43 = vld [vmem:[%s11444_s1 + $0xe08] sm:$0xf0] }
 0x1ae   :  { %3651 = vmatpush.bf16.msrb.mxu2 %v5605_v55  ;;  %v5698_v55 = vld [vmem:[%s11444_s1 + $0x7d8] sm:$0xf0]  ;;  %v7470_v52 = vld [vmem:[%s11444_s1 + $0xd04] sm:$0xf] }
 0x1af   :  { %3664 = vmatpush.bf16.msrb.mxu3 %v5797_v57  ;;  %v5317_v57 = vor.u32 %v7206_v5, %v5314_v12  ;;  %v5986_v5 = vld [vmem:[%s11444_s1 + $0xa18] sm:$0xf0]  ;;  %v6373_v21 = vor.u32 %v7470_v52, %v6370_v53  ;;  %v7446_v52 = vld [vmem:[%s11444_s1 + $0xc44] sm:$0xf] }
 0x1b0   :  { %3626 = vmatpush.bf16.msrb.mxu0 %v5197_v62  ;;  %v3400_v61 = vpop.f32.mrf.mxu2  ;;  %v5701_v62 = vor.u32 %v7302_v54, %v5698_v55  ;;  %v6178_v12 = vld [vmem:[%s11444_s1 + $0xb98] sm:$0xf0]  ;;  %v7518_v54 = vld [vmem:[%s11444_s1 + $0xe84] sm:$0xf]  ;;  %v5989_v55 = vor.u32 %v7374_v49, %v5986_v5 }
 0x1b1   :  { %3639 = vmatpush.bf16.msrb.mxu1 %v5389_v19  ;;  %v7296_v19 = vld [vmem:[%s11444_s1 + $0x794] sm:$0xf]  ;;  %v3413_v30 = vpop.f32.mrf.mxu3  ;;  %v6538_v61 = vld [vmem:[%s11444_s1 + $0xe68] sm:$0xf0]  ;;  %v7350_v49 = vld [vmem:[%s11444_s1 + $0x944] sm:$0xf] }
 0x1b2   :  { %3652 = vmatpush.bf16.msrb.mxu2 %v5581_v1  ;;  %v5674_v1 = vld [vmem:[%s11444_s1 + $0x7a8] sm:$0xf0]  ;;  %v7362_v30 = vld [vmem:[%s11444_s1 + $0x9a4] sm:$0xf]  ;;  %v5890_v5 = vld [vmem:[%s11444_s1 + $0x958] sm:$0xf0] }
 0x1b3   :  { %3665 = vmatpush.bf16.msrb.mxu3 %v5773_v10  ;;  %v6226_v10 = vld [vmem:[%s11444_s1 + $0xbf8] sm:$0xf0] }
 0x1b4   :  { %3627 = vmatpush.bf16.msrb.mxu0 %v5173_v23  ;;  %v6610_v23 = vld [vmem:[%s11444_s1 + $0xef8] sm:$0xf0]  ;;  %v6229_v27 = vor.u32 %v7434_v6, %v6226_v10  ;;  %v6541_v6 = vor.u32 %v7512_v60, %v6538_v61  ;;  %v7458_v10 = vld [vmem:[%s11444_s1 + $0xca4] sm:$0xf]  ;;  %v7488_v60 = vld [vmem:[%s11444_s1 + $0xd94] sm:$0xf] }
 0x1b5   :  { %3640 = vmatpush.bf16.msrb.mxu1 %v5365_v26  ;;  %v5677_v26 = vor.u32 %v7296_v19, %v5674_v1  ;;  %v6613_v35 = vor.u32 %v7530_v48, %v6610_v23  ;;  %v6325_v23 = vor.u32 %v7458_v10, %v6322_v11  ;;  %v6274_v53 = vld [vmem:[%s11444_s1 + $0xc58] sm:$0xf0]  ;;  %v6442_v61 = vld [vmem:[%s11444_s1 + $0xda8] sm:$0xf0]  ;;  %v7581_v10 = vld [vmem:[%s11447_s3 + $0x174] sm:$0xf0] }
 0x1b6   :  { %3653 = vmatpush.bf16.msrb.mxu2 %v5557_v36  ;;  %v6037_v36 = vor.u32 %v7386_v3, %v6034_v4  ;;  %v5938_v3 = vld [vmem:[%s11444_s1 + $0x9b8] sm:$0xf0]  ;;  %v7410_v4 = vld [vmem:[%s11444_s1 + $0xb24] sm:$0xf] }
 0x1b7   :  { %3666 = vmatpush.bf16.msrb.mxu3 %v5749_v32  ;;  %v6010_v32 = vld [vmem:[%s11444_s1 + $0xa48] sm:$0xf0] }
 0x1b8   :  { %3628 = vmatpush.bf16.msrb.mxu0 %v5149_v44  ;;  %v7524_v44 = vld [vmem:[%s11444_s1 + $0xeb4] sm:$0xf] }
 0x1b9   :  { %3641 = vmatpush.bf16.msrb.mxu1 %v5341_v46  ;;  %v6013_v46 = vor.u32 %v7380_v29, %v6010_v32  ;;  %v6106_v32 = vld [vmem:[%s11444_s1 + $0xb08] sm:$0xf0] }
 0x1ba   :  { %3654 = vmatpush.bf16.msrb.mxu2 %v5533_v24  ;;  %v6205_v24 = vor.u32 %v7428_v33, %v6202_v39  ;;  %v7452_v33 = vld [vmem:[%s11444_s1 + $0xc74] sm:$0xf] }
 0x1bb   :  { %3667 = vmatpush.bf16.msrb.mxu3 %v5725_v51  ;;  %v6589_v51 = vor.u32 %v7524_v44, %v6586_v0 }
 0x1bc   :  { %3629 = vmatpush.bf16.msrb.mxu0 %v5125_v56  ;;  %v6181_v56 = vor.u32 %v7422_v50, %v6178_v12  ;;  %v7398_v50 = vld [vmem:[%s11444_s1 + $0xac4] sm:$0xf]  ;;  %v6082_v12 = vld [vmem:[%s11444_s1 + $0xad8] sm:$0xf0] }
 0x1bd   :  { %3642 = vmatpush.bf16.msrb.mxu1 %v5317_v57  ;;  %v5962_v57 = vld [vmem:[%s11444_s1 + $0x9e8] sm:$0xf0] }
 0x1be   :  { %3655 = vmatpush.bf16.msrb.mxu2 %v5509_v25  ;;  %v7464_v25 = vld [vmem:[%s11444_s1 + $0xcd4] sm:$0xf] }
 0x1bf   :  { %3668 = vmatpush.bf16.msrb.mxu3 %v5701_v62  ;;  %v5965_v62 = vor.u32 %v7368_v9, %v5962_v57  ;;  %v6349_v1 = vor.u32 %v7464_v25, %v6346_v58  ;;  %v6085_v9 = vor.u32 %v7398_v50, %v6082_v12  ;;  %v6277_v57 = vor.u32 %v7446_v52, %v6274_v53  ;;  %v6250_v58 = vld [vmem:[%s11444_s1 + $0xc28] sm:$0xf0]  ;;  %v6720_v50 = vld [vmem:[%s11447_s3 + $0xd0] sm:$0xf]  ;;  %v7561_v12 = vld [vmem:[%s11447_s3 + $0xd4] sm:$0xf0] }
 0x1c0   :  { %3630 = vmatpush.bf16.msrb.mxu0 %v5101_v7  ;;  %v10628_v59 = vpop.f32.mrf.mxu0  ;;  %v6130_v7 = vld [vmem:[%s11444_s1 + $0xb38] sm:$0xf0]  ;;  %v6784_v52 = vld [vmem:[%s11447_s3 + $0x150] sm:$0xf]  ;;  %v7577_v53 = vld [vmem:[%s11447_s3 + $0x154] sm:$0xf0] }
 0x1c1   :  { %3643 = vmatpush.bf16.msrb.mxu1 %v5293_v17  ;;  %v10636_v63 = vpop.f32.mrf.mxu1  ;;  %v6514_v17 = vld [vmem:[%s11444_s1 + $0xe38] sm:$0xf0]  ;;  %v6133_v48 = vor.u32 %v7410_v4, %v6130_v7  ;;  %v6800_v7 = vld [vmem:[%s11447_s3 + $0x170] sm:$0xf] }
 0x1c2   :  { %3656 = vmatpush.bf16.msrb.mxu2 %v5485_v18  ;;  %v5941_v18 = vor.u32 %v7362_v30, %v5938_v3  ;;  %v6736_v30 = vld [vmem:[%s11447_s3 + $0xf0] sm:$0xf] }
 0x1c3   :  { %3669 = vmatpush.bf16.msrb.mxu3 %v5677_v26  ;;  %3631 = vmatmul.bf16.vlgmr.msrb.gmra.mxu0 %v7976_v8  ;;  %v7416_v8 = vld [vmem:[%s11444_s1 + $0xb54] sm:$0xf] }
 0x1c4   :  { %3675 = vmatpush.bf16.msra.mxu0 %v6037_v36  ;;  %3644 = vmatmul.bf16.vlgmr.msrb.gmra.mxu1 %v7992_v15  ;;  %v6154_v15 = vld [vmem:[%s11444_s1 + $0xb68] sm:$0xf0]  ;;  %v7356_v26 = vld [vmem:[%s11444_s1 + $0x974] sm:$0xf] }
 0x1c5   :  { %3688 = vmatpush.bf16.msra.mxu1 %v6229_v27  ;;  %3657 = vmatmul.bf16.vlgmr.msrb.gmra.mxu2 %v8167_v37  ;;  %v6562_v37 = vld [vmem:[%s11444_s1 + $0xe98] sm:$0xf0]  ;;  %v6157_v19 = vor.u32 %v7416_v8, %v6154_v15  ;;  %v5914_v36 = vld [vmem:[%s11444_s1 + $0x988] sm:$0xf0]  ;;  %v7404_v27 = vld [vmem:[%s11444_s1 + $0xaf4] sm:$0xf] }
 0x1c6   :  { %3701 = vmatpush.bf16.msra.mxu2 %v6421_v28  ;;  %3670 = vmatmul.bf16.vlgmr.msrb.gmra.mxu3 %v8171_v40  ;;  %v6565_v40 = vor.u32 %v7518_v54, %v6562_v37  ;;  %v6517_v28 = vor.u32 %v7506_v14, %v6514_v17  ;;  %v5917_v0 = vor.u32 %v7356_v26, %v5914_v36  ;;  %v7494_v54 = vld [vmem:[%s11444_s1 + $0xdc4] sm:$0xf]  ;;  %v6466_v37 = vld [vmem:[%s11444_s1 + $0xdd8] sm:$0xf0]  ;;  %v7392_v8 = vld [vmem:[%s11444_s1 + $0xa94] sm:$0xf] }
 0x1c7   :  { %3714 = vmatpush.bf16.msra.mxu3 %v6613_v35  ;;  %v6298_v35 = vld [vmem:[%s11444_s1 + $0xc88] sm:$0xf0]  ;;  %v7440_v15 = vld [vmem:[%s11444_s1 + $0xc14] sm:$0xf]  ;;  %v6469_v25 = vor.u32 %v7494_v54, %v6466_v37  ;;  %v6864_v17 = vld [vmem:[%s11447_s3 + $0x1f0] sm:$0xf]  ;;  %v6801_v36 = vor.u32 %v7581_v10, %v6800_v7  ;;  %v3399_v37 = vadd.f32 %v10467_v31, %v10456_v22 }
 0x1c8   :  { %3676 = vmatpush.bf16.msra.mxu0 %v6013_v46  ;;  %v10671_v29 = vpop.f32.mrf.mxu2  ;;  %v3426_v44 = vpop.f32.mrf.mxu0  ;;  %v6253_v14 = vor.u32 %v7440_v15, %v6250_v58  ;;  %v7593_v54 = vld [vmem:[%s11447_s3 + $0x1d4] sm:$0xf0]  ;;  %v6712_v22 = vld [vmem:[%s11447_s3 + $0xc0] sm:$0xf]  ;;  %v7559_v31 = vld [vmem:[%s11447_s3 + $0xc4] sm:$0xf0] }
 0x1c9   :  { %3689 = vmatpush.bf16.msra.mxu1 %v6205_v24  ;;  %v10682_v39 = vpop.f32.mrf.mxu3  ;;  %v3439_v46 = vpop.f32.mrf.mxu1  ;;  %v6109_v24 = vor.u32 %v7404_v27, %v6106_v32  ;;  %v6664_v27 = vld [vmem:[%s11447_s3 + $0x60] sm:$0xf]  ;;  %v3412_v15 = vadd.f32 %v10478_v41, %v3399_v37  ;;  %v6704_v41 = vld [vmem:[%s11447_s3 + $0xb0] sm:$0xf]  ;;  %v7573_v7 = vld [vmem:[%s11447_s3 + $0x134] sm:$0xf0] }
 0x1ca   :  { %3702 = vmatpush.bf16.msra.mxu2 %v6397_v47  ;;  %v6301_v47 = vor.u32 %v7452_v33, %v6298_v35  ;;  %v6728_v32 = vld [vmem:[%s11447_s3 + $0xe0] sm:$0xf]  ;;  %v7563_v35 = vld [vmem:[%s11447_s3 + $0xe4] sm:$0xf0]  ;;  %v6832_v10 = vld [vmem:[%s11447_s3 + $0x1b0] sm:$0xf] }
 0x1cb   :  { %3715 = vmatpush.bf16.msra.mxu3 %v6589_v51  ;;  %v6493_v51 = vor.u32 %v7500_v42, %v6490_v43  ;;  %v6792_v42 = vld [vmem:[%s11447_s3 + $0x160] sm:$0xf]  ;;  %v7579_v43 = vld [vmem:[%s11447_s3 + $0x164] sm:$0xf0]  ;;  %v7585_v37 = vld [vmem:[%s11447_s3 + $0x194] sm:$0xf0] }
 0x1cc   :  { %3677 = vmatpush.bf16.msra.mxu0 %v5989_v55  ;;  %v5893_v55 = vor.u32 %v7350_v49, %v5890_v5  ;;  %v6856_v44 = vld [vmem:[%s11447_s3 + $0x1e0] sm:$0xf]  ;;  %v6656_v49 = vld [vmem:[%s11447_s3 + $0x50] sm:$0xf]  ;;  %v7545_v5 = vld [vmem:[%s11447_s3 + $0x54] sm:$0xf0] }
 0x1cd   :  { %3690 = vmatpush.bf16.msra.mxu1 %v6181_v56  ;;  %v7344_v56 = vld [vmem:[%s11444_s1 + $0x914] sm:$0xf] }
 0x1ce   :  { %3703 = vmatpush.bf16.msra.mxu2 %v6373_v21  ;;  %v5866_v21 = vld [vmem:[%s11444_s1 + $0x928] sm:$0xf0] }
 0x1cf   :  { %3716 = vmatpush.bf16.msra.mxu3 %v6565_v40  ;;  %v6058_v40 = vld [vmem:[%s11444_s1 + $0xaa8] sm:$0xf0]  ;;  %v5869_v4 = vor.u32 %v7344_v56, %v5866_v21  ;;  %v6785_v56 = vor.u32 %v7577_v53, %v6784_v52  ;;  %v7543_v21 = vld [vmem:[%s11447_s3 + $0x44] sm:$0xf0]  ;;  %v6752_v52 = vld [vmem:[%s11447_s3 + $0x110] sm:$0xf] }
 0x1d0   :  { %3678 = vmatpush.bf16.msra.mxu0 %v5965_v62  ;;  %v3452_v62 = vpop.f32.mrf.mxu2  ;;  %v6061_v11 = vor.u32 %v7392_v8, %v6058_v40  ;;  %v6840_v8 = vld [vmem:[%s11447_s3 + $0x1c0] sm:$0xf]  ;;  %v7591_v40 = vld [vmem:[%s11447_s3 + $0x1c4] sm:$0xf0]  ;;  %v7569_v53 = vld [vmem:[%s11447_s3 + $0x114] sm:$0xf0] }
 0x1d1   :  { %3691 = vmatpush.bf16.msra.mxu1 %v6157_v19  ;;  %v6672_v19 = vld [vmem:[%s11447_s3 + $0x70] sm:$0xf]  ;;  %v3465_v3 = vpop.f32.mrf.mxu3 }
 0x1d2   :  { %3704 = vmatpush.bf16.msra.mxu2 %v6349_v1  ;;  %v7549_v1 = vld [vmem:[%s11447_s3 + $0x74] sm:$0xf0]  ;;  %v6640_v62 = vld [vmem:[%s11447_s3 + $0x30] sm:$0xf]  ;;  %v6841_v3 = vor.u32 %v7591_v40, %v6840_v8  ;;  %v6744_v8 = vld [vmem:[%s11447_s3 + $0x100] sm:$0xf] }
 0x1d3   :  { %3717 = vmatpush.bf16.msra.mxu3 %v6541_v6  ;;  %v7565_v6 = vld [vmem:[%s11447_s3 + $0xf4] sm:$0xf0]  ;;  %v7567_v40 = vld [vmem:[%s11447_s3 + $0x104] sm:$0xf0] }
 0x1d4   :  { %3679 = vmatpush.bf16.msra.mxu0 %v5941_v18  ;;  %v7597_v18 = vld [vmem:[%s11447_s3 + $0x1f4] sm:$0xf0]  ;;  %v6737_v26 = vor.u32 %v7565_v6, %v6736_v30  ;;  %v3425_v30 = vadd.f32 %v10628_v59, %v3412_v15  ;;  %v6768_v6 = vld [vmem:[%s11447_s3 + $0x130] sm:$0xf]  ;;  %v6808_v15 = vld [vmem:[%s11447_s3 + $0x180] sm:$0xf] }
 0x1d5   :  { %3692 = vmatpush.bf16.msra.mxu1 %v6133_v48  ;;  %v6445_v48 = vor.u32 %v7488_v60, %v6442_v61  ;;  %v6865_v33 = vor.u32 %v7597_v18, %v6864_v17  ;;  %v6713_v60 = vor.u32 %v7559_v31, %v6712_v22  ;;  %v7589_v59 = vld [vmem:[%s11447_s3 + $0x1b4] sm:$0xf0]  ;;  %v6769_v17 = vor.u32 %v7573_v7, %v6768_v6  ;;  %v6632_v18 = vld [vmem:[%s11447_s3 + $0x20] sm:$0xf] }
 0x1d6   :  { %3705 = vmatpush.bf16.msra.mxu2 %v6325_v23  ;;  %v6673_v23 = vor.u32 %v7549_v1, %v6672_v19  ;;  %v7541_v19 = vld [vmem:[%s11447_s3 + $0x34] sm:$0xf0]  ;;  %v6753_v22 = vor.u32 %v7569_v53, %v6752_v52  ;;  %v6680_v31 = vld [vmem:[%s11447_s3 + $0x80] sm:$0xf]  ;;  %v6745_v6 = vor.u32 %v7567_v40, %v6744_v8  ;;  %v6706_v8 = vld [vmem:[%s11447_s3 + $0xb8] sm:$0xf0] }
 0x1d7   :  { %3718 = vmatpush.bf16.msra.mxu3 %v6517_v28  ;;  %v7547_v28 = vld [vmem:[%s11447_s3 + $0x64] sm:$0xf0]  ;;  %v7609_v52 = vld [vmem:[%s11447_s3 + $0x254] sm:$0xf0] }
 0x1d8   :  { %3680 = vmatpush.bf16.msra.mxu0 %v5917_v0  ;;  %v7595_v0 = vld [vmem:[%s11447_s3 + $0x1e4] sm:$0xf0]  ;;  %v6665_v46 = vor.u32 %v7547_v28, %v6664_v27  ;;  %v6833_v27 = vor.u32 %v7589_v59, %v6832_v10 }
 0x1d9   :  { %3693 = vmatpush.bf16.msra.mxu1 %v6109_v24  ;;  %v6729_v24 = vor.u32 %v7563_v35, %v6728_v32  ;;  %v7555_v28 = vld [vmem:[%s11447_s3 + $0xa4] sm:$0xf0]  ;;  %v6760_v32 = vld [vmem:[%s11447_s3 + $0x120] sm:$0xf] }
 0x1da   :  { %3706 = vmatpush.bf16.msra.mxu2 %v6301_v47  ;;  %v6793_v47 = vor.u32 %v7579_v43, %v6792_v42  ;;  %v7587_v42 = vld [vmem:[%s11447_s3 + $0x1a4] sm:$0xf0]  ;;  %v3733_v43 = vmul.f32 0.01, %v9236_v45 }
 0x1db   :  { %3719 = vmatpush.bf16.msra.mxu3 %v6493_v51  ;;  %v6857_v51 = vor.u32 %v7595_v0, %v6856_v44 }
 0x1dc   :  { %3681 = vmatpush.bf16.msra.mxu0 %v5893_v55  ;;  %v6657_v55 = vor.u32 %v7545_v5, %v6656_v49  ;;  %v6624_v49 = vld [vmem:[%s11447_s3 + $0x10] sm:$0xf]  ;;  %v7537_v5 = vld [vmem:[%s11447_s3 + $0x14] sm:$0xf0]  ;;  %v3739_v7 = vsel %vm3727_vm0, %v9236_v45, %v3733_v43  ;;  %v7611_v43 = vld [vmem:[%s11447_s3 + $0x264] sm:$0xf0] }
 0x1dd   :  { %3694 = vmatpush.bf16.msra.mxu1 %v6085_v9  ;;  %v6776_v9 = vld [vmem:[%s11447_s3 + $0x140] sm:$0xf] }
 0x1de   :  { %3707 = vmatpush.bf16.msra.mxu2 %v6277_v57  ;;  %v7575_v57 = vld [vmem:[%s11447_s3 + $0x144] sm:$0xf0] }
 0x1df   :  { %3720 = vmatpush.bf16.msra.mxu3 %v6469_v25  ;;  %v6777_v61 = vor.u32 %v7575_v57, %v6776_v9 }
 0x1e0   :  { %3682 = vmatpush.bf16.msra.mxu0 %v5869_v4  ;;  %v10841_v58 = vpop.f32.mrf.mxu0  ;;  %v7557_v4 = vld [vmem:[%s11447_s3 + $0xb4] sm:$0xf0] }
 0x1e1   :  { %3695 = vmatpush.bf16.msra.mxu1 %v6061_v11  ;;  %v10852_v1 = vpop.f32.mrf.mxu1  ;;  %v6641_v11 = vor.u32 %v7541_v19, %v6640_v62  ;;  %v6674_v62 = vld [vmem:[%s11447_s3 + $0x78] sm:$0xf0] }
 0x1e2   :  { %3708 = vmatpush.bf16.msra.mxu2 %v6253_v14  ;;  %v6705_v14 = vor.u32 %v7557_v4, %v6704_v41 }
 0x1e3   :  { %3721 = vmatpush.bf16.msra.mxu3 %v6445_v48  ;;  %3683 = vmatmul.bf16.vlgmr.msra.gmra.mxu0 %v8159_v34  ;;  %v6848_v34 = vld [vmem:[%s11447_s3 + $0x1d0] sm:$0xf]  ;;  %v7539_v48 = vld [vmem:[%s11447_s3 + $0x24] sm:$0xf0] }
 0x1e4   :  { %4330 = vmatpush.bf16.msrb.mxu0 %v6673_v23  ;;  %3696 = vmatmul.bf16.vlgmr.msra.gmra.mxu1 %v8169_v38  ;;  %v6721_v38 = vor.u32 %v7561_v12, %v6720_v50  ;;  %v6696_v23 = vld [vmem:[%s11447_s3 + $0xa0] sm:$0xf]  ;;  %v6633_v0 = vor.u32 %v7539_v48, %v6632_v18  ;;  %v6688_v50 = vld [vmem:[%s11447_s3 + $0x90] sm:$0xf]  ;;  %v7553_v12 = vld [vmem:[%s11447_s3 + $0x94] sm:$0xf0] }
 0x1e5   :  { %4343 = vmatpush.bf16.msrb.mxu1 %v6737_v26  ;;  %3709 = vmatmul.bf16.vlgmr.msra.gmra.mxu2 %v8360_v16  ;;  %v6648_v16 = vld [vmem:[%s11447_s3 + $0x40] sm:$0xf]  ;;  %v7546_v48 = vld [vmem:[%s11447_s3 + $0x64] sm:$0xf] }
 0x1e6   :  { %4356 = vmatpush.bf16.msrb.mxu2 %v6801_v36  ;;  %3722 = vmatmul.bf16.vlgmr.msra.gmra.mxu3 %v8371_v20  ;;  %v6849_v20 = vor.u32 %v7593_v54, %v6848_v34  ;;  %v6649_v25 = vor.u32 %v7543_v21, %v6648_v16  ;;  %v3438_v36 = vadd.f32 %v10636_v63, %v3425_v30  ;;  %v6824_v63 = vld [vmem:[%s11447_s3 + $0x1a0] sm:$0xf]  ;;  %v3734_v34 = vmul.f32 0.01, %v9676_v13  ;;  %v6816_v54 = vld [vmem:[%s11447_s3 + $0x190] sm:$0xf] }
 0x1e7   :  { %4369 = vmatpush.bf16.msrb.mxu3 %v6865_v33  ;;  %v7571_v33 = vld [vmem:[%s11447_s3 + $0x124] sm:$0xf0]  ;;  %v6616_v16 = vld [vmem:[%s11447_s3] sm:$0xf]  ;;  %v6689_v21 = vor.u32 %v7553_v12, %v6688_v50  ;;  %v6817_v57 = vor.u32 %v7585_v37, %v6816_v54  ;;  %v7564_v30 = vld [vmem:[%s11447_s3 + $0xf4] sm:$0xf] }
 0x1e8   :  { %4331 = vmatpush.bf16.msrb.mxu0 %v6665_v46  ;;  %v10879_v26 = vpop.f32.mrf.mxu2  ;;  %v3451_v44 = vadd.f32 %v10671_v29, %v3438_v36  ;;  %v3478_v46 = vpop.f32.mrf.mxu0  ;;  %v11028_v50 = vld [vmem:[%s11446_s2] sm:$0x3f]  ;;  %v6912_v12 = vld [vmem:[%s11447_s3 + $0x250] sm:$0xf]  ;;  %v6650_v54 = vld [vmem:[%s11447_s3 + $0x48] sm:$0xf0] }
 0x1e9   :  { %4344 = vmatpush.bf16.msrb.mxu1 %v6729_v24  ;;  %v10891_v35 = vpop.f32.mrf.mxu3  ;;  %v6697_v24 = vor.u32 %v7555_v28, %v6696_v23  ;;  %v3491_v29 = vpop.f32.mrf.mxu1  ;;  %v6666_v23 = vld [vmem:[%s11447_s3 + $0x68] sm:$0xf0]  ;;  %v7544_v46 = vld [vmem:[%s11447_s3 + $0x54] sm:$0xf]  ;;  %v7558_v37 = vld [vmem:[%s11447_s3 + $0xc4] sm:$0xf] }
 0x1ea   :  { %4357 = vmatpush.bf16.msrb.mxu2 %v6793_v47  ;;  %v6761_v47 = vor.u32 %v7571_v33, %v6760_v32  ;;  %v539_v29 = vperm.slane %v11028_v50, 4 }
 0x1eb   :  { %4370 = vmatpush.bf16.msrb.mxu3 %v6857_v51  ;;  %v6825_v51 = vor.u32 %v7587_v42, %v6824_v63  ;;  %v6669_v63 = vor.u32 %v7546_v48, %v6666_v23  ;;  %v6920_v42 = vld [vmem:[%s11447_s3 + $0x260] sm:$0xf]  ;;  %v7552_v48 = vld [vmem:[%s11447_s3 + $0x94] sm:$0xf]  ;;  %v6690_v23 = vld [vmem:[%s11447_s3 + $0x98] sm:$0xf0] }
 0x1ec   :  { %4332 = vmatpush.bf16.msrb.mxu0 %v6657_v55  ;;  %v3735_v55 = vmul.f32 0.01, %v10239_v2 }
 0x1ed   :  { %4345 = vmatpush.bf16.msrb.mxu1 %v6721_v38  ;;  %v3464_v38 = vadd.f32 %v10682_v39, %v3451_v44  ;;  %v7551_v39 = vld [vmem:[%s11447_s3 + $0x84] sm:$0xf0] }
 0x1ee   :  { %4358 = vmatpush.bf16.msrb.mxu2 %v6785_v56  ;;  %v6625_v56 = vor.u32 %v7537_v5, %v6624_v49  ;;  %v6681_v4 = vor.u32 %v7551_v39, %v6680_v31  ;;  %v3741_v18 = vsel %vm3729_vm2, %v10239_v2, %v3735_v55  ;;  %v6730_v2 = vld [vmem:[%s11447_s3 + $0xe8] sm:$0xf0]  ;;  %v6722_v49 = vld [vmem:[%s11447_s3 + $0xd8] sm:$0xf0]  ;;  %v6921_v5 = vor.u32 %v7611_v43, %v6920_v42  ;;  %v7540_v39 = vld [vmem:[%s11447_s3 + $0x34] sm:$0xf] }
 0x1ef   :  { %4371 = vmatpush.bf16.msrb.mxu3 %v6849_v20  ;;  %v7535_v20 = vld [vmem:[%s11447_s3 + $0x4] sm:$0xf0]  ;;  %v3736_v19 = vmul.f32 0.01, %v3464_v38  ;;  %vm3730_vm3 = vcmp.gt.f32.partialorder %v3464_v38, 0.0  ;;  %v10999_v33 = vpack.c.bf16 %v3741_v18, %v3741_v18  ;;  %v6693_v42 = vor.u32 %v7552_v48, %v6690_v23 }
 0x1f0   :  { %4333 = vmatpush.bf16.msrb.mxu0 %v6649_v25  ;;  %v3504_v9 = vpop.f32.mrf.mxu2  ;;  %v6617_v41 = vor.u32 %v7535_v20, %v6616_v16  ;;  %v6714_v55 = vld [vmem:[%s11447_s3 + $0xc8] sm:$0xf0]  ;;  %v7536_v18 = vld [vmem:[%s11447_s3 + $0x14] sm:$0xf]  ;;  %v7534_v43 = vld [vmem:[%s11447_s3 + $0x4] sm:$0xf] }
 0x1f1   :  { %4346 = vmatpush.bf16.msrb.mxu1 %v6713_v60  ;;  %v3517_v25 = vpop.f32.mrf.mxu3  ;;  %v7583_v60 = vld [vmem:[%s11447_s3 + $0x184] sm:$0xf0]  ;;  %v3742_v36 = vsel %vm3730_vm3, %v3464_v38, %v3736_v19  ;;  %v6913_v38 = vor.u32 %v7609_v52, %v6912_v12  ;;  %v6717_v31 = vor.u32 %v7558_v37, %v6714_v55  ;;  %v7538_v19 = vld [vmem:[%s11447_s3 + $0x24] sm:$0xf]  ;;  %v6872_v52 = vld [vmem:[%s11447_s3 + $0x200] sm:$0xf] }
 0x1f2   :  { %4359 = vmatpush.bf16.msrb.mxu2 %v6777_v61  ;;  %v7548_v61 = vld [vmem:[%s11447_s3 + $0x74] sm:$0xf]  ;;  %v6809_v10 = vor.u32 %v7583_v60, %v6808_v15  ;;  %v11007_v44 = vpack.c.bf16 %v3742_v36, %v3742_v36  ;;  %v6896_v60 = vld [vmem:[%s11447_s3 + $0x230] sm:$0xf]  ;;  %v6866_v55 = vld [vmem:[%s11447_s3 + $0x1f8] sm:$0xf0] }
 0x1f3   :  { %4372 = vmatpush.bf16.msrb.mxu3 %v6841_v3  ;;  %v6738_v3 = vld [vmem:[%s11447_s3 + $0xf8] sm:$0xf0]  ;;  %v6677_v59 = vor.u32 %v7548_v61, %v6674_v62  ;;  %v7605_v61 = vld [vmem:[%s11447_s3 + $0x234] sm:$0xf0]  ;;  %v7596_v37 = vld [vmem:[%s11447_s3 + $0x1f4] sm:$0xf] }
 0x1f4   :  { %4334 = vmatpush.bf16.msrb.mxu0 %v6641_v11  ;;  %v6928_v11 = vld [vmem:[%s11447_s3 + $0x270] sm:$0xf]  ;;  %v6741_v45 = vor.u32 %v7564_v30, %v6738_v3  ;;  %v7554_v30 = vld [vmem:[%s11447_s3 + $0xa4] sm:$0xf]  ;;  %v6698_v3 = vld [vmem:[%s11447_s3 + $0xa8] sm:$0xf0] }
 0x1f5   :  { %4347 = vmatpush.bf16.msrb.mxu1 %v6705_v14  ;;  %v7613_v14 = vld [vmem:[%s11447_s3 + $0x274] sm:$0xf0]  ;;  %v7602_v23 = vld [vmem:[%s11447_s3 + $0x224] sm:$0xf] }
 0x1f6   :  { %4360 = vmatpush.bf16.msrb.mxu2 %v6769_v17  ;;  %v3740_v17 = vsel %vm3728_vm1, %v9676_v13, %v3734_v34  ;;  %v7562_v13 = vld [vmem:[%s11447_s3 + $0xe4] sm:$0xf]  ;;  %v6929_v28 = vor.u32 %v7613_v14, %v6928_v11  ;;  %v7603_v11 = vld [vmem:[%s11447_s3 + $0x224] sm:$0xf0] }
 0x1f7   :  { %4373 = vmatpush.bf16.msrb.mxu3 %v6833_v27  ;;  %v10995_v27 = vpack.c.bf16 %v3739_v7, %v3739_v7  ;;  %v10997_v32 = vpack.c.bf16 %v3740_v17, %v3740_v17  ;;  %v7542_v34 = vld [vmem:[%s11447_s3 + $0x44] sm:$0xf]  ;;  %v6701_v17 = vor.u32 %v7554_v30, %v6698_v3 }
 0x1f8   :  { %4335 = vmatpush.bf16.msrb.mxu0 %v6633_v0  ;;  %v6733_v0 = vor.u32 %v7562_v13, %v6730_v2  ;;  %v6653_v16 = vor.u32 %v7542_v34, %v6650_v54 }
 0x1f9   :  { %4348 = vmatpush.bf16.msrb.mxu1 %v6697_v24  ;;  %v6658_v24 = vld [vmem:[%s11447_s3 + $0x58] sm:$0xf0] }
 0x1fa   :  { %4361 = vmatpush.bf16.msrb.mxu2 %v6761_v47  ;;  %v7560_v47 = vld [vmem:[%s11447_s3 + $0xd4] sm:$0xf] }
 0x1fb   :  { %4374 = vmatpush.bf16.msrb.mxu3 %v6825_v51  ;;  %v6661_v51 = vor.u32 %v7544_v46, %v6658_v24  ;;  %v6725_v53 = vor.u32 %v7560_v47, %v6722_v49  ;;  %v6682_v24 = vld [vmem:[%s11447_s3 + $0x88] sm:$0xf0]  ;;  %v7612_v47 = vld [vmem:[%s11447_s3 + $0x274] sm:$0xf]  ;;  %v6930_v49 = vld [vmem:[%s11447_s3 + $0x278] sm:$0xf0] }
 0x1fc   :  { %4336 = vmatpush.bf16.msrb.mxu0 %v6625_v56  ;;  %v3477_v56 = vadd.f32 %v10841_v58, %v539_v29  ;;  %v6642_v58 = vld [vmem:[%s11447_s3 + $0x38] sm:$0xf0]  ;;  %v6933_v54 = vor.u32 %v7612_v47, %v6930_v49 }
 0x1fd   :  { %4349 = vmatpush.bf16.msrb.mxu1 %v6689_v21  ;;  %v6904_v21 = vld [vmem:[%s11447_s3 + $0x240] sm:$0xf]  ;;  %v6645_v25 = vor.u32 %v7540_v39, %v6642_v58  ;;  %v6858_v39 = vld [vmem:[%s11447_s3 + $0x1e8] sm:$0xf0]  ;;  %v7608_v58 = vld [vmem:[%s11447_s3 + $0x254] sm:$0xf] }
 0x1fe   :  { %4362 = vmatpush.bf16.msrb.mxu2 %v6753_v22  ;;  %v7607_v22 = vld [vmem:[%s11447_s3 + $0x244] sm:$0xf0]  ;;  %v3490_v15 = vadd.f32 %v10852_v1, %v3477_v56  ;;  %v6634_v1 = vld [vmem:[%s11447_s3 + $0x28] sm:$0xf0] }
 0x1ff   :  { %4375 = vmatpush.bf16.msrb.mxu3 %v6817_v57  ;;  %v7556_v57 = vld [vmem:[%s11447_s3 + $0xb4] sm:$0xf]  ;;  %v6905_v40 = vor.u32 %v7607_v22, %v6904_v21  ;;  %v6922_v56 = vld [vmem:[%s11447_s3 + $0x268] sm:$0xf0]  ;;  %v6869_v22 = vor.u32 %v7596_v37, %v6866_v55 }
 0x200   :  { %4337 = vmatpush.bf16.msrb.mxu0 %v6617_v41  ;;  %v3528_v20 = vpop.f32.mrf.mxu0  ;;  %v6709_v62 = vor.u32 %v7556_v57, %v6706_v8  ;;  %v3503_v7 = vadd.f32 %v10879_v26, %v3490_v15  ;;  %v6626_v26 = vld [vmem:[%s11447_s3 + $0x18] sm:$0xf0]  ;;  %v6984_v57 = vld [vmem:[%s11447_s3 + $0x2e0] sm:$0xf]  ;;  %v7627_v8 = vld [vmem:[%s11447_s3 + $0x2e4] sm:$0x70] }
 0x201   :  { %4350 = vmatpush.bf16.msrb.mxu1 %v6681_v4  ;;  %v11062_v9 = vpop.f32.mrf.mxu1  ;;  %v6629_v2 = vor.u32 %v7536_v18, %v6626_v26  ;;  %v6986_v55 = vld [vmem:[%s11447_s3 + $0x2e8] sm:$0x70] }
 0x202   :  { %4363 = vmatpush.bf16.msrb.mxu2 %v6745_v6  ;;  %v6897_v6 = vor.u32 %v7605_v61, %v6896_v60  ;;  %v3516_v13 = vadd.f32 %v10891_v35, %v3503_v7  ;;  %v6618_v35 = vld [vmem:[%s11447_s3 + $0x8] sm:$0xf0]  ;;  %v6850_v61 = vld [vmem:[%s11447_s3 + $0x1d8] sm:$0xf0] }
 0x203   :  { %4376 = vmatpush.bf16.msrb.mxu3 %v6809_v10  ;;  %4338 = vmatmul.bf16.vlgmr.msrb.gmra.mxu0 %v10995_v27  ;;  %v6637_v10 = vor.u32 %v7538_v19, %v6634_v1  ;;  %v6621_v12 = vor.u32 %v7534_v43, %v6618_v35  ;;  %v6842_v7 = vld [vmem:[%s11447_s3 + $0x1c8] sm:$0xf0] }
 0x204   :  { %4351 = vmatmul.bf16.vlgmr.msrb.gmra.mxu1 %v10997_v32  ;;  %4382 = vmatpush.bf16.msra.mxu0 %v6929_v28  ;;  %v6880_v28 = vld [vmem:[%s11447_s3 + $0x210] sm:$0xf]  ;;  %v6826_v35 = vld [vmem:[%s11447_s3 + $0x1a8] sm:$0xf0] }
 0x205   :  { %4364 = vmatmul.bf16.vlgmr.msrb.gmra.mxu2 %v10999_v33 }
 0x206   :  { %4408 = vmatpush.bf16.msra.mxu2 %v6677_v59  ;;  %4377 = vmatmul.bf16.vlgmr.msrb.gmra.mxu3 %v11007_v44  ;;  %v6888_v59 = vld [vmem:[%s11447_s3 + $0x220] sm:$0xf] }
 0x207   :  { %4421 = vmatpush.bf16.msra.mxu3 %v6741_v45  ;;  %v6889_v36 = vor.u32 %v7603_v11, %v6888_v59  ;;  %v7604_v11 = vld [vmem:[%s11447_s3 + $0x234] sm:$0xf] }
 0x208   :  { %4383 = vmatpush.bf16.msra.mxu0 %v6921_v5  ;;  %v11083_v41 = vpop.f32.mrf.mxu2  ;;  %v3530_v14 = vpop.f32.mrf.mxu0 }
 0x209   :  { %v11091_v4 = vpop.f32.mrf.mxu3  ;;  %v3543_v45 = vpop.f32.mrf.mxu1  ;;  %v6976_v14 = vld [vmem:[%s11447_s3 + $0x2d0] sm:$0xf] }
 0x20a   :  { %4409 = vmatpush.bf16.msra.mxu2 %v6669_v63  ;;  %v7601_v63 = vld [vmem:[%s11447_s3 + $0x214] sm:$0xf0] }
 0x20b   :  { %4422 = vmatpush.bf16.msra.mxu3 %v6733_v0  ;;  %v7550_v0 = vld [vmem:[%s11447_s3 + $0x84] sm:$0xf]  ;;  %v6881_v29 = vor.u32 %v7601_v63, %v6880_v28  ;;  %v6890_v28 = vld [vmem:[%s11447_s3 + $0x228] sm:$0xf0] }
 0x20c   :  { %4384 = vmatpush.bf16.msra.mxu0 %v6913_v38  ;;  %v6685_v34 = vor.u32 %v7550_v0, %v6682_v24  ;;  %v7610_v38 = vld [vmem:[%s11447_s3 + $0x264] sm:$0xf]  ;;  %v7623_v24 = vld [vmem:[%s11447_s3 + $0x2c4] sm:$0xf0]  ;;  %v6893_v49 = vor.u32 %v7602_v23, %v6890_v28 }
 0x20d   :  { %v7586_v63 = vld [vmem:[%s11447_s3 + $0x1a4] sm:$0xf] }
 0x20e   :  { %4410 = vmatpush.bf16.msra.mxu2 %v6661_v51  ;;  %v3529_v51 = vadd.f32 %v3528_v20, %v3516_v13  ;;  %v6925_v20 = vor.u32 %v7610_v38, %v6922_v56  ;;  %v6834_v13 = vld [vmem:[%s11447_s3 + $0x1b8] sm:$0xf0]  ;;  %v7578_v23 = vld [vmem:[%s11447_s3 + $0x164] sm:$0xf] }
 0x20f   :  { %4423 = vmatpush.bf16.msra.mxu3 %v6725_v53  ;;  %v7599_v53 = vld [vmem:[%s11447_s3 + $0x204] sm:$0xf0] }
 0x210   :  { %4385 = vmatpush.bf16.msra.mxu0 %v6905_v40  ;;  %v3556_v46 = vpop.f32.mrf.mxu2  ;;  %v3542_v21 = vadd.f32 %v11062_v9, %v3529_v51  ;;  %v6914_v9 = vld [vmem:[%s11447_s3 + $0x258] sm:$0xf0] }
 0x211   :  { %v3569_v5 = vpop.f32.mrf.mxu3  ;;  %v6917_v60 = vor.u32 %v7608_v58, %v6914_v9  ;;  %v6968_v46 = vld [vmem:[%s11447_s3 + $0x2c0] sm:$0xf] }
 0x212   :  { %4411 = vmatpush.bf16.msra.mxu2 %v6653_v16  ;;  %v6873_v16 = vor.u32 %v7599_v53, %v6872_v52  ;;  %v3555_v40 = vadd.f32 %v11083_v41, %v3542_v21  ;;  %v6969_v51 = vor.u32 %v7623_v24, %v6968_v46  ;;  %v7621_v52 = vld [vmem:[%s11447_s3 + $0x2b4] sm:$0xf0]  ;;  %v7626_v53 = vld [vmem:[%s11447_s3 + $0x2e4] sm:$0xf]  ;;  %v6952_v9 = vld [vmem:[%s11447_s3 + $0x2a0] sm:$0xf] }
 0x213   :  { %4424 = vmatpush.bf16.msra.mxu3 %v6717_v31  ;;  %v7594_v31 = vld [vmem:[%s11447_s3 + $0x1e4] sm:$0xf]  ;;  %v6989_v56 = vor.u32 %v7626_v53, %v6986_v55  ;;  %v7576_v46 = vld [vmem:[%s11447_s3 + $0x154] sm:$0xf]  ;;  %v6786_v24 = vld [vmem:[%s11447_s3 + $0x158] sm:$0xf0] }
 0x214   :  { %4386 = vmatpush.bf16.msra.mxu0 %v6897_v6  ;;  %v6861_v15 = vor.u32 %v7594_v31, %v6858_v39  ;;  %v3568_v1 = vadd.f32 %v11091_v4, %v3555_v40  ;;  %v7590_v6 = vld [vmem:[%s11447_s3 + $0x1c4] sm:$0xf]  ;;  %v6898_v4 = vld [vmem:[%s11447_s3 + $0x238] sm:$0xf0]  ;;  %v7584_v31 = vld [vmem:[%s11447_s3 + $0x194] sm:$0xf] }
 0x215   :  { %v6845_v26 = vor.u32 %v7590_v6, %v6842_v7  ;;  %v6901_v48 = vor.u32 %v7604_v11, %v6898_v4  ;;  %v7598_v21 = vld [vmem:[%s11447_s3 + $0x204] sm:$0xf]  ;;  %v6818_v39 = vld [vmem:[%s11447_s3 + $0x198] sm:$0xf0]  ;;  %v4328_v58 = vsel %vm4323_vm4, %v6989_v56, 0 }
 0x216   :  { %4412 = vmatpush.bf16.msra.mxu2 %v6645_v25  ;;  %v6985_v25 = vor.u32 %v7627_v8, %v6984_v57  ;;  %v7619_v57 = vld [vmem:[%s11447_s3 + $0x2a4] sm:$0xf0]  ;;  %v7624_v8 = vld [vmem:[%s11447_s3 + $0x2d4] sm:$0xf] }
 0x217   :  { %4425 = vmatpush.bf16.msra.mxu3 %v6709_v62  ;;  %v7606_v62 = vld [vmem:[%s11447_s3 + $0x244] sm:$0xf]  ;;  %v6953_v40 = vor.u32 %v7619_v57, %v6952_v9  ;;  %v7615_v11 = vld [vmem:[%s11447_s3 + $0x284] sm:$0xf0]  ;;  %v7568_v57 = vld [vmem:[%s11447_s3 + $0x114] sm:$0xf] }
 0x218   :  { %4387 = vmatpush.bf16.msra.mxu0 %v6889_v36  ;;  %v4325_v19 = vsel %vm4323_vm4, %v6985_v25, 0  ;;  %v7588_v36 = vld [vmem:[%s11447_s3 + $0x1b4] sm:$0xf]  ;;  %v6944_v25 = vld [vmem:[%s11447_s3 + $0x290] sm:$0xf] }
 0x219   :  { %4396 = vmatpush.bf16.msra.mxu1 %v4325_v19  ;;  %v6837_v43 = vor.u32 %v7588_v36, %v6834_v13  ;;  %v6970_v19 = vld [vmem:[%s11447_s3 + $0x2c8] sm:$0xf0]  ;;  %v7618_v13 = vld [vmem:[%s11447_s3 + $0x2a4] sm:$0xf] }
 0x21a   :  { %4413 = vmatpush.bf16.msra.mxu2 %v6637_v10  ;;  %v6794_v36 = vld [vmem:[%s11447_s3 + $0x168] sm:$0xf0] }
 0x21b   :  { %4426 = vmatpush.bf16.msra.mxu3 %v6701_v17  ;;  %v7625_v17 = vld [vmem:[%s11447_s3 + $0x2d4] sm:$0xf0]  ;;  %v6797_v28 = vor.u32 %v7578_v23, %v6794_v36 }
 0x21c   :  { %4388 = vmatpush.bf16.msra.mxu0 %v6881_v29  ;;  %v6977_v45 = vor.u32 %v7625_v17, %v6976_v14  ;;  %v7580_v14 = vld [vmem:[%s11447_s3 + $0x174] sm:$0xf]  ;;  %v6802_v17 = vld [vmem:[%s11447_s3 + $0x178] sm:$0xf0] }
 0x21e   :  { %4414 = vmatpush.bf16.msra.mxu2 %v6629_v2  ;;  %4397 = vmatpush.bf16.msra.mxu1 %v6977_v45 }
 0x21f   :  { %4427 = vmatpush.bf16.msra.mxu3 %v6693_v42 }
 0x220   :  { %4389 = vmatpush.bf16.msra.mxu0 %v6873_v16  ;;  %v3580_v30 = vpop.f32.mrf.mxu0  ;;  %v6829_v16 = vor.u32 %v7586_v63, %v6826_v35  ;;  %v6954_v63 = vld [vmem:[%s11447_s3 + $0x2a8] sm:$0xf0] }
 0x221   :  { %v3581_v10 = vadd.f32 %v3580_v30, %v3568_v1  ;;  %v3593_v59 = vpop.f32.mrf.mxu1  ;;  %v6810_v30 = vld [vmem:[%s11447_s3 + $0x188] sm:$0xf0] }
 0x222   :  { %4415 = vmatpush.bf16.msra.mxu2 %v6621_v12  ;;  %v6960_v12 = vld [vmem:[%s11447_s3 + $0x2b0] sm:$0xf]  ;;  %4398 = vmatpush.bf16.msra.mxu1 %v6969_v51 }
 0x223   :  { %4428 = vmatpush.bf16.msra.mxu3 %v6685_v34  ;;  %v3594_v18 = vadd.f32 %v3593_v59, %v3581_v10  ;;  %v7600_v34 = vld [vmem:[%s11447_s3 + $0x214] sm:$0xf]  ;;  %v6961_v38 = vor.u32 %v7621_v52, %v6960_v12  ;;  %v6936_v59 = vld [vmem:[%s11447_s3 + $0x280] sm:$0xf] }
 0x224   :  { %4447 = vmatpush.bf16.msrb.mxu0 %v6869_v22  ;;  %v6874_v22 = vld [vmem:[%s11447_s3 + $0x208] sm:$0xf0]  ;;  %v6937_v4 = vor.u32 %v7615_v11, %v6936_v59 }
 0x225   :  { %4416 = vmatmul.bf16.vlgmr.msra.gmra.mxu2 %v10995_v27  ;;  %v7592_v27 = vld [vmem:[%s11447_s3 + $0x1d4] sm:$0xf]  ;;  %vm3731_vm5 = vcmp.gt.f32.partialorder %v3594_v18, 0.0  ;;  %v3737_v2 = vmul.f32 0.01, %v3594_v18  ;;  %v6877_v1 = vor.u32 %v7598_v21, %v6874_v22 }
 0x226   :  { %4460 = vmatpush.bf16.msrb.mxu2 %v6933_v54  ;;  %4429 = vmatmul.bf16.vlgmr.msra.gmra.mxu3 %v10997_v32  ;;  %v6906_v32 = vld [vmem:[%s11447_s3 + $0x248] sm:$0xf0]  ;;  %v6853_v41 = vor.u32 %v7592_v27, %v6850_v61  ;;  %v6882_v54 = vld [vmem:[%s11447_s3 + $0x218] sm:$0xf0]  ;;  %v7572_v21 = vld [vmem:[%s11447_s3 + $0x134] sm:$0xf] }
 0x227   :  { %v6909_v3 = vor.u32 %v7606_v62, %v6906_v32  ;;  %v3743_v42 = vsel %vm3731_vm5, %v3594_v18, %v3737_v2  ;;  %4474 = vmatpush.bf16.msrb.mxu3 %v4328_v58  ;;  %4399 = vmatpush.bf16.msra.mxu1 %v6961_v38  ;;  %v7617_v62 = vld [vmem:[%s11447_s3 + $0x294] sm:$0xf0]  ;;  %v7622_v32 = vld [vmem:[%s11447_s3 + $0x2c4] sm:$0xf]  ;;  %v6805_v18 = vor.u32 %v7580_v14, %v6802_v17  ;;  %v6938_v38 = vld [vmem:[%s11447_s3 + $0x288] sm:$0xf0] }
 0x228   :  { %4448 = vmatpush.bf16.msrb.mxu0 %v6861_v15  ;;  %v11227_v0 = vpop.f32.mrf.mxu2  ;;  %v3844_v47 = vpack.c.bf16 %v3743_v42, %v3743_v42  ;;  %v3582_v29 = vpop.f32.mrf.mxu0  ;;  %v6978_v15 = vld [vmem:[%s11447_s3 + $0x2d8] sm:$0xf0]  ;;  %v6973_v6 = vor.u32 %v7622_v32, %v6970_v19  ;;  %v6945_v7 = vor.u32 %v7617_v62, %v6944_v25  ;;  %v6957_v42 = vor.u32 %v7618_v13, %v6954_v63 }
 0x229   :  { %v11235_v5 = vpop.f32.mrf.mxu3  ;;  %v3595_v37 = vpop.f32.mrf.mxu1  ;;  %v6981_v61 = vor.u32 %v7624_v8, %v6978_v15  ;;  %v6789_v29 = vor.u32 %v7576_v46, %v6786_v24  ;;  %v6770_v22 = vld [vmem:[%s11447_s3 + $0x138] sm:$0xf0] }
 0x22a   :  { %4461 = vmatpush.bf16.msrb.mxu2 %v6925_v20  ;;  %4390 = vmatmul.bf16.vlgmr.msra.gmra.mxu0 %v3844_v47  ;;  %v6885_v20 = vor.u32 %v7600_v34, %v6882_v54  ;;  %v7574_v34 = vld [vmem:[%s11447_s3 + $0x144] sm:$0xf]  ;;  %v6778_v54 = vld [vmem:[%s11447_s3 + $0x148] sm:$0xf0]  ;;  %v6754_v8 = vld [vmem:[%s11447_s3 + $0x118] sm:$0xf0] }
 0x22b   :  { %4475 = vmatpush.bf16.msrb.mxu3 %v6981_v61  ;;  %4400 = vmatpush.bf16.msra.mxu1 %v6953_v40  ;;  %v7614_v37 = vld [vmem:[%s11447_s3 + $0x284] sm:$0xf]  ;;  %v6781_v55 = vor.u32 %v7574_v34, %v6778_v54  ;;  %v6757_v40 = vor.u32 %v7568_v57, %v6754_v8  ;;  %v7633_v54 = vld [vmem:[%s11450_s5 + $0x28] sm:$0xff]  ;;  %v7639_v57 = vld [vmem:[%s11450_s5 + $0x58] sm:$0xff] }
 0x22c   :  { %4449 = vmatpush.bf16.msrb.mxu0 %v6853_v41  ;;  %v7582_v41 = vld [vmem:[%s11447_s3 + $0x184] sm:$0xf]  ;;  %v7638_v8 = vld [vmem:[%s11450_s5 + $0x50] sm:$0xff] }
 0x22d   :  { %v6813_v10 = vor.u32 %v7582_v41, %v6810_v30 }
 0x22e   :  { %4462 = vmatpush.bf16.msrb.mxu2 %v6917_v60  ;;  %v6821_v60 = vor.u32 %v7584_v31, %v6818_v39  ;;  %v6773_v31 = vor.u32 %v7572_v21, %v6770_v22  ;;  %v7570_v39 = vld [vmem:[%s11447_s3 + $0x124] sm:$0xf] }
 0x22f   :  { %4476 = vmatpush.bf16.msrb.mxu3 %v6973_v6  ;;  %4401 = vmatpush.bf16.msra.mxu1 %v6945_v7 }
 0x230   :  { %4450 = vmatpush.bf16.msrb.mxu0 %v6845_v26  ;;  %v3608_v27 = vpop.f32.mrf.mxu2  ;;  %v6962_v26 = vld [vmem:[%s11447_s3 + $0x2b8] sm:$0xf0] }
 0x231   :  { %v6746_v27 = vld [vmem:[%s11447_s3 + $0x108] sm:$0xf0] }
 0x232   :  { %4463 = vmatpush.bf16.msrb.mxu2 %v6909_v3  ;;  %v3621_v3 = vpop.f32.mrf.mxu3 }
 0x233   :  { %4402 = vmatpush.bf16.msra.mxu1 %v6937_v4 }
 0x234   :  { %4451 = vmatpush.bf16.msrb.mxu0 %v6837_v43  ;;  %v540_v43 = vperm.slane %v11028_v50, 5  ;;  %v6946_v50 = vld [vmem:[%s11447_s3 + $0x298] sm:$0xf0] }
 0x236   :  { %4464 = vmatpush.bf16.msrb.mxu2 %v6901_v48  ;;  %v3607_v52 = vadd.f32 %v11227_v0, %v540_v43  ;;  %v6941_v0 = vor.u32 %v7614_v37, %v6938_v38  ;;  %v7632_v37 = vld [vmem:[%s11450_s5 + $0x20] sm:$0xff]  ;;  %v7631_v38 = vld [vmem:[%s11450_s5 + $0x18] sm:$0xff] }
 0x237   :  { %4434 = vmatpush.bf16.msrb.mxu1 %v6805_v18  ;;  %v3839_v18 = vld [vmem:[%s11448_s4] sm:$0x3] }
 0x238   :  { %4452 = vmatpush.bf16.msrb.mxu0 %v6829_v16  ;;  %v3620_v56 = vadd.f32 %v11235_v5, %v3607_v52  ;;  %v6762_v5 = vld [vmem:[%s11447_s3 + $0x128] sm:$0xf0]  ;;  %v3848_v24 = vperm.slane %v3839_v18, 1 }
 0x239   :  { %v6765_v58 = vor.u32 %v7570_v39, %v6762_v5  ;;  %v4516_v39 = vld [vmem:[%s11450_s5 + $0x60] sm:$0xf] }
 0x23a   :  { %4465 = vmatpush.bf16.msrb.mxu2 %v6893_v49  ;;  %v4572_v5 = vunpack.c.l.b16 %v4516_v39 }
 0x23b   :  { %4435 = vmatpush.bf16.msrb.mxu1 %v6797_v28 }
 0x23c   :  { %4453 = vmatpush.bf16.msrb.mxu0 %v6821_v60  ;;  %v7566_v60 = vld [vmem:[%s11447_s3 + $0x104] sm:$0xf] }
 0x23d   :  { %v6749_v61 = vor.u32 %v7566_v60, %v6746_v27 }
 0x23e   :  { %4466 = vmatpush.bf16.msrb.mxu2 %v6885_v20 }
 0x23f   :  { %4436 = vmatpush.bf16.msrb.mxu1 %v6789_v29 }
 0x240   :  { %4454 = vmatpush.bf16.msrb.mxu0 %v6813_v10  ;;  %v3632_v48 = vpop.f32.mrf.mxu0 }
 0x241   :  { %v3645_v2 = vpop.f32.mrf.mxu1  ;;  %v3633_v9 = vadd.f32 %v3632_v48, %v3620_v56 }
 0x242   :  { %4467 = vmatpush.bf16.msrb.mxu2 %v6877_v1 }
 0x243   :  { %4455 = vmatmul.bf16.vlgmr.msrb.gmra.mxu0 %v11007_v44  ;;  %v7620_v44 = vld [vmem:[%s11447_s3 + $0x2b4] sm:$0xf]  ;;  %4437 = vmatpush.bf16.msrb.mxu1 %v6781_v55  ;;  %v3646_v15 = vadd.f32 %v3645_v2, %v3633_v9 }
 0x244   :  { %v6965_v45 = vor.u32 %v7620_v44, %v6962_v26  ;;  %v3847_v26 = vperm.slane %v3839_v18, 0 }
 0x245   :  { %4468 = vmatmul.bf16.vlgmr.msrb.gmra.mxu2 %v3844_v47  ;;  %v7616_v47 = vld [vmem:[%s11447_s3 + $0x294] sm:$0xf] }
 0x246   :  { %4477 = vmatpush.bf16.msrb.mxu3 %v6965_v45  ;;  %v6949_v51 = vor.u32 %v7616_v47, %v6946_v50 }
 0x247   :  { %4438 = vmatpush.bf16.msrb.mxu1 %v6773_v31  ;;  %v7628_v31 = vld [vmem:[%s11450_s5] sm:$0xff] }
 0x248   :  { %v3658_v35 = vpop.f32.mrf.mxu2  ;;  %v3634_v12 = vpop.f32.mrf.mxu0 }
 0x249   :  { %v3671_v49 = vpop.f32.mrf.mxu3  ;;  %v3647_v53 = vpop.f32.mrf.mxu1  ;;  %v3659_v25 = vadd.f32 %v3658_v35, %v3646_v15  ;;  %v7636_v15 = vld [vmem:[%s11450_s5 + $0x40] sm:$0xff] }
 0x24a   :  { %4478 = vmatpush.bf16.msrb.mxu3 %v6957_v42 }
 0x24b   :  { %4439 = vmatpush.bf16.msrb.mxu1 %v6765_v58  ;;  %v3672_v62 = vadd.f32 %v3671_v49, %v3659_v25  ;;  %v4585_v58 = vpack.c.b16 %v4572_v5, %v4572_v5 }
 0x24d   :  { %v4604_v9 = vsel %vm4602_vm8, %v4585_v58, 0 }
 0x24e   :  { %4479 = vmatpush.bf16.msrb.mxu3 %v6949_v51  ;;  %v7635_v51 = vld [vmem:[%s11450_s5 + $0x38] sm:$0xff] }
 0x24f   :  { %4440 = vmatpush.bf16.msrb.mxu1 %v6757_v40  ;;  %v7637_v40 = vld [vmem:[%s11450_s5 + $0x48] sm:$0xff] }
 0x250   :  { %v3660_v16 = vpop.f32.mrf.mxu2 }
 0x251   :  { %v3673_v20 = vpop.f32.mrf.mxu3 }
 0x252   :  { %4480 = vmatpush.bf16.msrb.mxu3 %v6941_v0  ;;  %v7630_v0 = vld [vmem:[%s11450_s5 + $0x10] sm:$0xff]  ;;  %v7629_v20 = vld [vmem:[%s11450_s5 + $0x8] sm:$0xff] }
 0x253   :  { %4441 = vmatpush.bf16.msrb.mxu1 %v6749_v61 }
 0x256   :  { %4622 = vmatpush.bf16.msra.mxu3 %v4604_v9 }
 0x25a   :  { %4623 = vmatpush.bf16.msra.mxu3 %v7639_v57 }
 0x25e   :  { %4624 = vmatpush.bf16.msra.mxu3 %v7638_v8 }
 0x260   :  { %v3684_v32 = vpop.f32.mrf.mxu0 }
 0x261   :  { %v3697_v19 = vpop.f32.mrf.mxu1  ;;  %v3685_v1 = vadd.f32 %v3684_v32, %v3672_v62 }
 0x262   :  { %4625 = vmatpush.bf16.msra.mxu3 %v7637_v40 }
 0x263   :  { %v3698_v41 = vadd.f32 %v3697_v19, %v3685_v1 }
 0x266   :  { %4626 = vmatpush.bf16.msra.mxu3 %v7636_v15 }
 0x268   :  { %v3710_v30 = vpop.f32.mrf.mxu2  ;;  %v3686_v7 = vpop.f32.mrf.mxu0 }
 0x269   :  { %v3711_v3 = vadd.f32 %v3710_v30, %v3698_v41  ;;  %v3723_v6 = vpop.f32.mrf.mxu3  ;;  %v3699_v10 = vpop.f32.mrf.mxu1 }
 0x26b   :  { %v3724_v59 = vadd.f32 %v3723_v6, %v3711_v3 }
 0x26d   :  { %vm3732_vm6 = vcmp.gt.f32.partialorder %v3724_v59, 0.0  ;;  %v3738_v11 = vmul.f32 0.01, %v3724_v59 }
 0x26f   :  { %v3744_v4 = vsel %vm3732_vm6, %v3724_v59, %v3738_v11 }
 0x270   :  { %v3845_v14 = vpack.c.bf16 %v3744_v4, %v3744_v4  ;;  %v3712_v17 = vpop.f32.mrf.mxu2 }
 0x271   :  { %v3725_v44 = vpop.f32.mrf.mxu3 }
 0x272   :  { %6990 = vmatmul.msk.bf16.vlgmr.msra.gmra.mxu1 %vm4319_vm7, %v3845_v14  ;;  %6991 = vmatmul.msk.bf16.vlgmr.msrb.gmra.mxu3 %vm4319_vm7, %v3845_v14  ;;  %v4641_v14 = vld [vmem:[%s11452_s7 + $0x18] sm:$0x1] }
 0x273   :  { %4606 = vmatpush.bf16.msra.mxu1 %v7635_v51  ;;  %v4660_v17 = vunpack.c.l.b16 %v4641_v14 }
 0x275   :  { %v4664_v44 = vpack.c.b16 %v4660_v17, %v4660_v17 }
 0x277   :  { %v4674_v18 = vsel %vm4672_vm12, %v4664_v44, 0 }
 0x278   :  { %4680 = vmatpush.bf16.msra.mxu0 %v4674_v18 }
 0x280   :  { %v4339_v45 = vpop.f32.mrf.mxu0 }
 0x281   :  { %v4340_v48 = vadd.f32 %v4339_v45, %v3847_v26  ;;  %v4352_v23 = vpop.f32.mrf.mxu1  ;;  %v7642_v26 = vld [vmem:[%s11452_s7 + $0x10] sm:$0xff]  ;;  %v7641_v45 = vld [vmem:[%s11452_s7 + $0x8] sm:$0xff] }
 0x282   :  { %4442 = vmatmul.bf16.vlgmr.msrb.gmra.mxu1 %v10999_v33  ;;  %v7634_v33 = vld [vmem:[%s11450_s5 + $0x30] sm:$0xff]  ;;  %4681 = vmatpush.bf16.msra.mxu0 %v7642_v26 }
 0x283   :  { %v4353_v36 = vadd.f32 %v4352_v23, %v4340_v48  ;;  %4607 = vmatpush.bf16.msra.mxu1 %v7634_v33  ;;  %v7640_v23 = vld [vmem:[%s11452_s7] sm:$0xff] }
 0x286   :  { %4682 = vmatpush.bf16.msra.mxu0 %v7641_v45 }
 0x287   :  { %4608 = vmatpush.bf16.msra.mxu1 %v7633_v54 }
 0x288   :  { %v4365_v13 = vpop.f32.mrf.mxu2  ;;  %v4341_v63 = vpop.f32.mrf.mxu0 }
 0x289   :  { %v4366_v2 = vadd.f32 %v4365_v13, %v4353_v36  ;;  %v4378_v28 = vpop.f32.mrf.mxu3  ;;  %v4354_v42 = vpop.f32.mrf.mxu1  ;;  %v7643_v13 = vld [vmem:[%s11449_s6] ss:$0 sm:$0xff] }
 0x28a   :  { %4683 = vmatpush.bf16.msra.mxu0 %v7640_v23 }
 0x28b   :  { %v4379_v43 = vadd.f32 %v4378_v28, %v4366_v2  ;;  %4609 = vmatpush.bf16.msra.mxu1 %v7632_v37 }
 0x28f   :  { %4610 = vmatpush.bf16.msra.mxu1 %v7631_v38 }
 0x290   :  { %v4367_v35 = vpop.f32.mrf.mxu2 }
 0x291   :  { %v4380_v46 = vpop.f32.mrf.mxu3 }
 0x293   :  { %4611 = vmatpush.bf16.msra.mxu1 %v7630_v0 }
 0x297   :  { %4612 = vmatpush.bf16.msra.mxu1 %v7629_v20 }
 0x29b   :  { %4613 = vmatpush.bf16.msra.mxu1 %v7628_v31 }
 0x2a7   :  { %v4391_v53 = vpop.f32.mrf.mxu0 }
 0x2a8   :  { %v4417_v47 = vpop.f32.mrf.mxu2  ;;  %v4392_v34 = vadd.f32 %v4391_v53, %v4379_v43 }
 0x2a9   :  { %v4418_v49 = vadd.f32 %v4417_v47, %v3848_v24  ;;  %v4430_v29 = vpop.f32.mrf.mxu3  ;;  %v7644_v24 = vld [vmem:[%s11451_s8] ss:$0 sm:$0xff] }
 0x2ab   :  { %v4431_v50 = vadd.f32 %v4430_v29, %v4418_v49 }
 0x2af   :  { %v4393_v55 = vpop.f32.mrf.mxu0 }
 0x2b0   :  { %v4419_v12 = vpop.f32.mrf.mxu2 }
 0x2b1   :  { %v4432_v52 = vpop.f32.mrf.mxu3 }
 0x2c0   :  { %v4456_v56 = vpop.f32.mrf.mxu0 }
 0x2c8   :  { %v4469_v16 = vpop.f32.mrf.mxu2  ;;  %v4458_v21 = vpop.f32.mrf.mxu0 }
 0x2d0   :  { %v4471_v22 = vpop.f32.mrf.mxu2 }
 0x2ef   :  { %v4404_v25 = vpop.f32.mrf.mxu1 }
 0x2f0   :  { %v4405_v60 = vadd.f32 %v4404_v25, %v4392_v34 }
 0x2f2   :  { %vm4486_vm9 = vcmp.gt.f32.partialorder %v4405_v60, 0.0  ;;  %v4488_v27 = vmul.f32 0.01, %v4405_v60 }
 0x2f4   :  { %v4490_v61 = vsel %vm4486_vm9, %v4405_v60, %v4488_v27 }
 0x2f5   :  { %v4518_v62 = vpack.c.bf16 %v4490_v61, %v4490_v61  ;;  %v4482_v32 = vpop.f32.mrf.mxu3 }
 0x2f7   :  { %v4406_v19 = vpop.f32.mrf.mxu1  ;;  %4614 = vmatmul.bf16.vlgmr.msra.gmra.mxu1 %v4518_v62 }
 0x2fd   :  { %v4484_v1 = vpop.f32.mrf.mxu3 }
 0x2ff   :  { %v4443_v41 = vpop.f32.mrf.mxu1 }
 0x300   :  { %v4444_v30 = vadd.f32 %v4443_v41, %v4431_v50 }
 0x302   :  { %v4457_v3 = vadd.f32 %v4456_v56, %v4444_v30 }
 0x304   :  { %v4470_v6 = vadd.f32 %v4469_v16, %v4457_v3 }
 0x306   :  { %v4483_v7 = vadd.f32 %v4482_v32, %v4470_v6 }
 0x307   :  { %v4445_v10 = vpop.f32.mrf.mxu1 }
 0x308   :  { %vm4487_vm10 = vcmp.gt.f32.partialorder %v4483_v7, 0.0  ;;  %v4489_v59 = vmul.f32 0.01, %v4483_v7 }
 0x30a   :  { %v4491_v11 = vsel %vm4487_vm10, %v4483_v7, %v4489_v59 }
 0x30b   :  { %v4519_v4 = vpack.c.bf16 %v4491_v11, %v4491_v11 }
 0x30d   :  { %7040 = vmatmul.msk.bf16.vlgmr.msra.gmra.mxu3 %vm4598_vm11, %v4519_v4 }
 0x374   :  { %v4615_v48 = vpop.f32.mrf.mxu1 }
 0x375   :  { %v4616_v2 = vadd.f32 %v7643_v13, %v4615_v48 }
 0x37c   :  { %v4617_v36 = vpop.f32.mrf.mxu1 }
 0x390   :  { %v4628_v28 = vpop.f32.mrf.mxu3 }
 0x391   :  { %v4629_v63 = vadd.f32 %v4628_v28, %v4616_v2 }
 0x393   :  { %vm4632_vm13 = vcmp.gt.f32.partialorder %v4629_v63, 0.0  ;;  %v4633_v42 = vmul.f32 0.01, %v4629_v63 }
 0x395   :  { %v4634_v43 = vsel %vm4632_vm13, %v4629_v63, %v4633_v42 }
 0x396   :  { %v4643_v35 = vpack.c.bf16 %v4634_v43, %v4634_v43 }
 0x398   :  { %v4630_v46 = vpop.f32.mrf.mxu3  ;;  %7053 = vmatmul.msk.bf16.vlgmr.msra.gmra.mxu0 %vm4668_vm14, %v4643_v35 }
 0x415   :  { %v4685_v47 = vpop.f32.mrf.mxu0 }
 0x416   :  { %v4686_v49 = vadd.f32 %v7644_v24, %v4685_v47 }
 0x418   :  { %4689 = vst [vmem:[%s11453_s9] sm:$0xff] %v4686_v49 }
 0x41d   :  { %v4687_v29 = vpop.f32.mrf.mxu0 }

// kernel: network_vae_quad_forward.5
= control target key start
LH: loop header
LB: loop body
LE: loop exit
PB: predicated region body
PF: predicated region fallthrough
CT: control target
= control target key end

     0   :  { %vm207_vm0 = vcmask 1040384   ;;  %vm716_vm2 = vcmask 1043456   ;;  %vm203_vm4 = vcmask 408576   ;;  %vm712_vm7 = vcmask 588800   ;;  %s11032_s5 = inlined_call_operand.vmem [shape: bf16[128,50], index: 5, kind: input, shape index: {}]   ;;  %s11033_s0 = inlined_call_operand.vmem [shape: f32[8,128], index: 0, kind: input, shape index: {}]   ;;  %s11034_s1 = inlined_call_operand.vmem [shape: f32[1,128], index: 1, kind: input, shape index: {}]   ;;  %s11035_s2 = inlined_call_operand.vmem [shape: f32[1,128], index: 2, kind: input, shape index: {}]   ;;  %s11036_s3 = inlined_call_operand.vmem [shape: f32[1,128], index: 3, kind: input, shape index: {}]   ;;  %s11037_s7 = inlined_call_operand.vmem [shape: bf16[50,200], index: 7, kind: input, shape index: {}]   ;;  %s11038_s4 = inlined_call_operand.vmem [shape: f32[1,128], index: 4, kind: input, shape index: {}]   ;;  %s11039_s6 = inlined_call_operand.vmem [shape: f32[1,50], index: 6, kind: input, shape index: {}]   ;;  %s11040_s9 = inlined_call_operand.vmem [shape: bf16[200,750], index: 9, kind: input, shape index: {}]   ;;  %s11041_s8 = inlined_call_operand.vmem [shape: f32[1,200], index: 8, kind: input, shape index: {}]   ;;  %s11042_s11 = inlined_call_operand.vmem [shape: bf16[750,1280], index: 11, kind: input, shape index: {}]   ;;  %s11043_s10 = inlined_call_operand.vmem [shape: f32[1,750], index: 10, kind: input, shape index: {}]   ;;  %s11044_s12 = inlined_call_operand.vmem [shape: f32[1,1280], index: 12, kind: input, shape index: {}]   ;;  %s11045_s13 = inlined_call_operand.vmem [shape: f32[8,1280], index: 13, kind: output, shape index: {}]  }
   0x1   :  { %v6827_v0 = vld [vmem:[%s11032_s5 + $0x38] sm:$0xff]  ;;  %v6826_v1 = vld [vmem:[%s11032_s5 + $0x30] sm:$0xff]  ;;  %v45_v2 = vld [vmem:[%s11033_s0] sm:$0xff]  ;;  %vm3753_vm8 = vcmask 1046528   ;;  %vm3749_vm15 = vcmask 900096  }
   0x2   :  { %138 = vmatpush.bf16.msra.mxu0 %v6827_v0  ;;  %v7376_v3 = vld [vmem:[%s11034_s1] ss:$0 sm:$0xff]  ;;  %v160_v4 = vld [vmem:[%s11037_s7 + $0x30] sm:$0x11]  ;;  %v6825_v5 = vld [vmem:[%s11032_s5 + $0x28] sm:$0xff] }
   0x3   :  { %v53_v6 = vsub.f32 %v45_v2, %v7376_v3  ;;  %v7377_v7 = vld [vmem:[%s11035_s2] ss:$0 sm:$0xff]  ;;  %v187_v8 = vunpack.c.l.b16 %v160_v4  ;;  %v188_v9 = vunpack.c.h.b16 %v160_v4  ;;  %v6833_v13 = vld [vmem:[%s11037_s7 + $0x24] sm:$0xf0]  ;;  %v6832_v14 = vld [vmem:[%s11037_s7 + $0x24] sm:$0xf] }
   0x4   :  { %v4628_v10 = vld [vmem:[%s11037_s7 + $0x20] sm:$0xf]  ;;  %v4630_v15 = vld [vmem:[%s11037_s7 + $0x28] sm:$0xf0]  ;;  %v6823_v23 = vld [vmem:[%s11032_s5 + $0x18] sm:$0xff] }
   0x5   :  { %v195_v11 = vpack.c.b16 %v187_v8, %v187_v8  ;;  %v196_v12 = vpack.c.b16 %v188_v9, %v188_v9  ;;  %v6824_v16 = vld [vmem:[%s11032_s5 + $0x20] sm:$0xff]  ;;  %v57_v17 = vmul.f32 %v7377_v7, %v53_v6  ;;  %v4629_v21 = vor.u32 %v6833_v13, %v4628_v10  ;;  %v6822_v26 = vld [vmem:[%s11032_s5 + $0x10] sm:$0xff]  ;;  %v6821_v28 = vld [vmem:[%s11032_s5 + $0x8] sm:$0xff] }
   0x6   :  { %139 = vmatpush.bf16.msra.mxu0 %v6826_v1  ;;  %v7378_v18 = vld [vmem:[%s11036_s3] ss:$0 sm:$0xff]  ;;  %v4633_v22 = vor.u32 %v6832_v14, %v4630_v15  ;;  %v4620_v33 = vld [vmem:[%s11037_s7 + $0x10] sm:$0xf]  ;;  %v6831_v34 = vld [vmem:[%s11037_s7 + $0x14] sm:$0xf0] }
   0x7   :  { %v209_v19 = vsel %vm207_vm0, %v195_v11, 0  ;;  %v212_v20 = vsel %vm207_vm0, %v196_v12, 0  ;;  %v61_v24 = vmul.f32 %v7378_v18, %v57_v17  ;;  %v7379_v25 = vld [vmem:[%s11038_s4] ss:$0 sm:$0xff]  ;;  %v6830_v35 = vld [vmem:[%s11037_s7 + $0x14] sm:$0xf]  ;;  %v4621_v36 = vor.u32 %v6831_v34, %v4620_v33 }
   0x8   :  { %218 = vmatpush.bf16.msra.mxu1 %v209_v19  ;;  %231 = vmatpush.bf16.msra.mxu2 %v212_v20  ;;  %v6820_v30 = vld [vmem:[%s11032_s5] sm:$0xff]  ;;  %v4622_v37 = vld [vmem:[%s11037_s7 + $0x18] sm:$0xf0]  ;;  %v6829_v40 = vld [vmem:[%s11037_s7 + $0x4] sm:$0xf0] }
   0x9   :  { %v65_v27 = vadd.f32 %v7379_v25, %v61_v24  ;;  %v4625_v38 = vor.u32 %v6830_v35, %v4622_v37  ;;  %v4612_v39 = vld [vmem:[%s11037_s7] sm:$0xf]  ;;  %v6828_v41 = vld [vmem:[%s11037_s7 + $0x4] sm:$0xf]  ;;  %v4614_v43 = vld [vmem:[%s11037_s7 + $0x8] sm:$0xf0] }
   0xa   :  { %140 = vmatpush.bf16.msra.mxu0 %v6825_v5  ;;  %v4613_v42 = vor.u32 %v6829_v40, %v4612_v39  ;;  %v4617_v44 = vor.u32 %v6828_v41, %v4614_v43  ;;  %v4806_v45 = vld [vmem:[%s11040_s9 + $0x150] sm:$0xf]  ;;  %v6879_v46 = vld [vmem:[%s11040_s9 + $0x164] sm:$0xf0]  ;;  %v6876_v47 = vld [vmem:[%s11040_s9 + $0x154] sm:$0xf] }
   0xb   :  { %v67_v29 = vmul.f32 0.01, %v65_v27  ;;  %vm66_vm1 = vcmp.gt.f32.partialorder %v65_v27, 0.0  ;;  %v4807_v48 = vor.u32 %v6879_v46, %v4806_v45  ;;  %v4808_v49 = vld [vmem:[%s11040_s9 + $0x168] sm:$0xf0]  ;;  %v318_v61 = vld [vmem:[%s11040_s9 + $0x240] sm:$0xff] }
   0xc   :  { %219 = vmatpush.bf16.msra.mxu1 %v4629_v21  ;;  %232 = vmatpush.bf16.msra.mxu2 %v4633_v22  ;;  %v4782_v50 = vld [vmem:[%s11040_s9 + $0x120] sm:$0xf]  ;;  %v6873_v51 = vld [vmem:[%s11040_s9 + $0x134] sm:$0xf0]  ;;  %v4811_v52 = vor.u32 %v6876_v47, %v4808_v49  ;;  %v6870_v53 = vld [vmem:[%s11040_s9 + $0x124] sm:$0xf]  ;;  %v556_v0 = vunpack.c.l.b16 %v318_v61  ;;  %v557_v1 = vunpack.c.h.b16 %v318_v61 }
   0xd   :  { %v68_v31 = vsel %vm66_vm1, %v65_v27, %v67_v29  ;;  %v4784_v54 = vld [vmem:[%s11040_s9 + $0x138] sm:$0xf0]  ;;  %735 = vmatpush.bf16.msra.mxu3 %v4807_v48  ;;  %v4783_v55 = vor.u32 %v6873_v51, %v4782_v50  ;;  %v4758_v57 = vld [vmem:[%s11040_s9 + $0xf0] sm:$0xf]  ;;  %v6867_v58 = vld [vmem:[%s11040_s9 + $0x104] sm:$0xf0] }
   0xe   :  { %141 = vmatpush.bf16.msra.mxu0 %v6824_v16  ;;  %v86_v32 = vpack.c.bf16 %v68_v31, %v68_v31  ;;  %v4787_v56 = vor.u32 %v6870_v53, %v4784_v54  ;;  %v6864_v59 = vld [vmem:[%s11040_s9 + $0xf4] sm:$0xf]  ;;  %v4760_v60 = vld [vmem:[%s11040_s9 + $0x108] sm:$0xf0]  ;;  %v4759_v62 = vor.u32 %v6867_v58, %v4758_v57  ;;  %v4734_v63 = vld [vmem:[%s11040_s9 + $0xc0] sm:$0xf]  ;;  %v634_v6 = vpack.c.b16 %v556_v0, %v556_v0 }
   0xf   :  { %v4763_v2 = vor.u32 %v6864_v59, %v4760_v60  ;;  %v6861_v3 = vld [vmem:[%s11040_s9 + $0xd4] sm:$0xf0]  ;;  %v6858_v4 = vld [vmem:[%s11040_s9 + $0xc4] sm:$0xf]  ;;  %v4736_v5 = vld [vmem:[%s11040_s9 + $0xd8] sm:$0xf0]  ;;  %v635_v7 = vpack.c.b16 %v557_v1, %v557_v1 }
  0x10   :  { %220 = vmatpush.bf16.msra.mxu1 %v4621_v36  ;;  %233 = vmatpush.bf16.msra.mxu2 %v4625_v38  ;;  %v4902_v8 = vld [vmem:[%s11040_s9 + $0x210] sm:$0xf]  ;;  %v6903_v9 = vld [vmem:[%s11040_s9 + $0x224] sm:$0xf0]  ;;  %v6900_v10 = vld [vmem:[%s11040_s9 + $0x214] sm:$0xf]  ;;  %v4735_v12 = vor.u32 %v6861_v3, %v4734_v63  ;;  %v4739_v15 = vor.u32 %v6858_v4, %v4736_v5 }
  0x11   :  { %736 = vmatpush.bf16.msra.mxu3 %v4783_v55  ;;  %v4904_v11 = vld [vmem:[%s11040_s9 + $0x228] sm:$0xf0]  ;;  %v718_v13 = vsel %vm716_vm2, %v634_v6, 0  ;;  %v721_v14 = vsel %vm716_vm2, %v635_v7, 0  ;;  %v4710_v16 = vld [vmem:[%s11040_s9 + $0x90] sm:$0xf]  ;;  %v4903_v19 = vor.u32 %v6903_v9, %v4902_v8 }
  0x12   :  { %142 = vmatpush.bf16.msra.mxu0 %v6823_v23  ;;  %v6855_v17 = vld [vmem:[%s11040_s9 + $0xa4] sm:$0xf0]  ;;  %v6852_v18 = vld [vmem:[%s11040_s9 + $0x94] sm:$0xf]  ;;  %v4712_v20 = vld [vmem:[%s11040_s9 + $0xa8] sm:$0xf0]  ;;  %v4907_v21 = vor.u32 %v6900_v10, %v4904_v11 }
  0x13   :  { %v4878_v22 = vld [vmem:[%s11040_s9 + $0x1e0] sm:$0xf]  ;;  %v6897_v23 = vld [vmem:[%s11040_s9 + $0x1f4] sm:$0xf0]  ;;  %v6894_v24 = vld [vmem:[%s11040_s9 + $0x1e4] sm:$0xf]  ;;  %v4715_v27 = vor.u32 %v6852_v18, %v4712_v20 }
  0x14   :  { %221 = vmatpush.bf16.msra.mxu1 %v4613_v42  ;;  %234 = vmatpush.bf16.msra.mxu2 %v4617_v44  ;;  %v4880_v25 = vld [vmem:[%s11040_s9 + $0x1f8] sm:$0xf0]  ;;  %v6849_v29 = vld [vmem:[%s11040_s9 + $0x74] sm:$0xf0]  ;;  %v4879_v31 = vor.u32 %v6897_v23, %v4878_v22  ;;  %v4854_v34 = vld [vmem:[%s11040_s9 + $0x1b0] sm:$0xf] }
  0x15   :  { %737 = vmatpush.bf16.msra.mxu3 %v4759_v62  ;;  %v4883_v33 = vor.u32 %v6894_v24, %v4880_v25  ;;  %v6891_v35 = vld [vmem:[%s11040_s9 + $0x1c4] sm:$0xf0]  ;;  %v6888_v36 = vld [vmem:[%s11040_s9 + $0x1b4] sm:$0xf]  ;;  %v4856_v37 = vld [vmem:[%s11040_s9 + $0x1c8] sm:$0xf0] }
  0x16   :  { %143 = vmatpush.bf16.msra.mxu0 %v6822_v26  ;;  %v4711_v26 = vor.u32 %v6855_v17, %v4710_v16  ;;  %v7380_v38 = vld [vmem:[%s11039_s6] ss:$0 sm:$0xff]  ;;  %v319_v40 = vld [vmem:[%s11040_s9 + $0x248] sm:$0xff]  ;;  %v4662_v42 = vld [vmem:[%s11040_s9 + $0x30] sm:$0xf]  ;;  %v4855_v45 = vor.u32 %v6891_v35, %v4854_v34  ;;  %v4859_v48 = vor.u32 %v6888_v36, %v4856_v37 }
  0x17   :  { %v6843_v43 = vld [vmem:[%s11040_s9 + $0x44] sm:$0xf0]  ;;  %v6840_v44 = vld [vmem:[%s11040_s9 + $0x34] sm:$0xf]  ;;  %v559_v46 = vunpack.c.h.b16 %v319_v40  ;;  %v4664_v47 = vld [vmem:[%s11040_s9 + $0x48] sm:$0xf0] }
  0x18   :  { %761 = vmatpush.bf16.msrb.mxu2 %v4811_v52  ;;  %751 = vmatpush.bf16.msrb.mxu1 %v718_v13  ;;  %v4830_v49 = vld [vmem:[%s11040_s9 + $0x180] sm:$0xf]  ;;  %v6885_v50 = vld [vmem:[%s11040_s9 + $0x194] sm:$0xf0]  ;;  %v6882_v51 = vld [vmem:[%s11040_s9 + $0x184] sm:$0xf]  ;;  %v4663_v53 = vor.u32 %v6843_v43, %v4662_v42  ;;  %v4667_v59 = vor.u32 %v6840_v44, %v4664_v47 }
  0x19   :  { %738 = vmatpush.bf16.msra.mxu3 %v4735_v12  ;;  %v4832_v52 = vld [vmem:[%s11040_s9 + $0x198] sm:$0xf0]  ;;  %v4638_v54 = vld [vmem:[%s11040_s9] sm:$0xf]  ;;  %v6837_v55 = vld [vmem:[%s11040_s9 + $0x14] sm:$0xf0]  ;;  %v637_v57 = vpack.c.b16 %v559_v46, %v559_v46  ;;  %v4831_v60 = vor.u32 %v6885_v50, %v4830_v49 }
  0x1a   :  { %144 = vmatpush.bf16.msra.mxu0 %v6821_v28  ;;  %v4686_v28 = vld [vmem:[%s11040_s9 + $0x60] sm:$0xf]  ;;  %v6834_v62 = vld [vmem:[%s11040_s9 + $0x4] sm:$0xf]  ;;  %v4640_v63 = vld [vmem:[%s11040_s9 + $0x18] sm:$0xf0]  ;;  %v4835_v0 = vor.u32 %v6882_v51, %v4832_v52  ;;  %v4639_v1 = vor.u32 %v6837_v55, %v4638_v54 }
  0x1b   :  { %v4687_v39 = vor.u32 %v6849_v29, %v4686_v28  ;;  %v6880_v3 = vld [vmem:[%s11040_s9 + $0x16c] sm:$0xf0]  ;;  %v6877_v4 = vld [vmem:[%s11040_s9 + $0x15c] sm:$0xf]  ;;  %v4816_v6 = vld [vmem:[%s11040_s9 + $0x170] sm:$0xf0]  ;;  %v4643_v10 = vor.u32 %v6834_v62, %v4640_v63 }
  0x1c   :  { %762 = vmatpush.bf16.msrb.mxu2 %v4787_v56  ;;  %752 = vmatpush.bf16.msrb.mxu1 %v4903_v19  ;;  %v558_v56 = vunpack.c.l.b16 %v319_v40  ;;  %v727_v8 = vsel %vm716_vm2, %v637_v57, 0  ;;  %v4819_v13 = vor.u32 %v6877_v4, %v4816_v6  ;;  %v6871_v16 = vld [vmem:[%s11040_s9 + $0x12c] sm:$0xf]  ;;  %v4792_v17 = vld [vmem:[%s11040_s9 + $0x140] sm:$0xf0] }
  0x1d   :  { %739 = vmatpush.bf16.msra.mxu3 %v4711_v26  ;;  %v4766_v22 = vld [vmem:[%s11040_s9 + $0xf8] sm:$0xf]  ;;  %v6868_v23 = vld [vmem:[%s11040_s9 + $0x10c] sm:$0xf0]  ;;  %v6865_v24 = vld [vmem:[%s11040_s9 + $0xfc] sm:$0xf] }
  0x1e   :  { %145 = vmatpush.bf16.msra.mxu0 %v6820_v30  ;;  %v6846_v30 = vld [vmem:[%s11040_s9 + $0x64] sm:$0xf]  ;;  %v636_v7 = vpack.c.b16 %v558_v56, %v558_v56  ;;  %v4767_v25 = vor.u32 %v6868_v23, %v4766_v22  ;;  %v4768_v26 = vld [vmem:[%s11040_s9 + $0x110] sm:$0xf0]  ;;  %v4910_v28 = vld [vmem:[%s11040_s9 + $0x218] sm:$0xf] }
  0x1f   :  { %v6904_v29 = vld [vmem:[%s11040_s9 + $0x22c] sm:$0xf0]  ;;  %v4742_v34 = vld [vmem:[%s11040_s9 + $0xc8] sm:$0xf]  ;;  %v6862_v35 = vld [vmem:[%s11040_s9 + $0xdc] sm:$0xf0] }
  0x20   :  { %763 = vmatpush.bf16.msrb.mxu2 %v4763_v2  ;;  %753 = vmatpush.bf16.msrb.mxu1 %v4879_v31  ;;  %v4814_v2 = vld [vmem:[%s11040_s9 + $0x158] sm:$0xf]  ;;  %v724_v18 = vsel %vm716_vm2, %v636_v7, 0  ;;  %v4911_v31 = vor.u32 %v6904_v29, %v4910_v28  ;;  %v6859_v36 = vld [vmem:[%s11040_s9 + $0xcc] sm:$0xf]  ;;  %v4743_v37 = vor.u32 %v6862_v35, %v4742_v34 }
  0x21   :  { %146 = vmatmul.bf16.vlgmr.msra.gmra.mxu0 %v86_v32  ;;  %v4688_v32 = vld [vmem:[%s11040_s9 + $0x78] sm:$0xf0]  ;;  %740 = vmatpush.bf16.msra.mxu3 %v4687_v39  ;;  %v4815_v11 = vor.u32 %v6880_v3, %v4814_v2  ;;  %v4886_v40 = vld [vmem:[%s11040_s9 + $0x1e8] sm:$0xf]  ;;  %v6895_v42 = vld [vmem:[%s11040_s9 + $0x1ec] sm:$0xf] }
  0x22   :  { %777 = vmatpush.bf16.msrb.mxu0 %v721_v14  ;;  %v4691_v41 = vor.u32 %v6846_v30, %v4688_v32  ;;  %v4790_v14 = vld [vmem:[%s11040_s9 + $0x128] sm:$0xf]  ;;  %v6901_v30 = vld [vmem:[%s11040_s9 + $0x21c] sm:$0xf]  ;;  %v4912_v32 = vld [vmem:[%s11040_s9 + $0x230] sm:$0xf0] }
  0x23   :  { %v4888_v44 = vld [vmem:[%s11040_s9 + $0x200] sm:$0xf0]  ;;  %v4718_v46 = vld [vmem:[%s11040_s9 + $0x98] sm:$0xf]  ;;  %v6856_v47 = vld [vmem:[%s11040_s9 + $0xac] sm:$0xf0] }
  0x24   :  { %764 = vmatpush.bf16.msrb.mxu2 %v4739_v15  ;;  %754 = vmatpush.bf16.msrb.mxu1 %v4855_v45  ;;  %v6874_v15 = vld [vmem:[%s11040_s9 + $0x13c] sm:$0xf0]  ;;  %v4891_v45 = vor.u32 %v6895_v42, %v4888_v44  ;;  %v6853_v49 = vld [vmem:[%s11040_s9 + $0x9c] sm:$0xf]  ;;  %v4720_v50 = vld [vmem:[%s11040_s9 + $0xb0] sm:$0xf0] }
  0x25   :  { %741 = vmatpush.bf16.msra.mxu3 %v4663_v53  ;;  %v4791_v20 = vor.u32 %v6874_v15, %v4790_v14  ;;  %v4723_v51 = vor.u32 %v6853_v49, %v4720_v50  ;;  %v4862_v52 = vld [vmem:[%s11040_s9 + $0x1b8] sm:$0xf]  ;;  %v6892_v53 = vld [vmem:[%s11040_s9 + $0x1cc] sm:$0xf0]  ;;  %v6889_v54 = vld [vmem:[%s11040_s9 + $0x1bc] sm:$0xf] }
  0x26   :  { %778 = vmatpush.bf16.msrb.mxu0 %v4907_v21  ;;  %v4795_v21 = vor.u32 %v6871_v16, %v4792_v17  ;;  %v4863_v55 = vor.u32 %v6892_v53, %v4862_v52  ;;  %v4864_v56 = vld [vmem:[%s11040_s9 + $0x1d0] sm:$0xf0]  ;;  %v4696_v62 = vld [vmem:[%s11040_s9 + $0x80] sm:$0xf0]  ;;  %v6883_v2 = vld [vmem:[%s11040_s9 + $0x18c] sm:$0xf] }
  0x27   :  { %v4867_v57 = vor.u32 %v6889_v54, %v4864_v56  ;;  %v4840_v4 = vld [vmem:[%s11040_s9 + $0x1a0] sm:$0xf0]  ;;  %v4670_v6 = vld [vmem:[%s11040_s9 + $0x38] sm:$0xf]  ;;  %v6844_v7 = vld [vmem:[%s11040_s9 + $0x4c] sm:$0xf0] }
  0x28   :  { %765 = vmatpush.bf16.msrb.mxu2 %v4715_v27  ;;  %755 = vmatpush.bf16.msrb.mxu1 %v4831_v60  ;;  %v4771_v27 = vor.u32 %v6865_v24, %v4768_v26  ;;  %v6847_v60 = vld [vmem:[%s11040_s9 + $0x6c] sm:$0xf]  ;;  %v4648_v16 = vld [vmem:[%s11040_s9 + $0x20] sm:$0xf0]  ;;  %v6905_v35 = vld [vmem:[%s11040_s9 + $0x234] sm:$0xf0] }
  0x29   :  { %742 = vmatpush.bf16.msra.mxu3 %v4639_v1  ;;  %v4699_v63 = vor.u32 %v6847_v60, %v4696_v62  ;;  %v6886_v1 = vld [vmem:[%s11040_s9 + $0x19c] sm:$0xf0]  ;;  %v6835_v14 = vld [vmem:[%s11040_s9 + $0xc] sm:$0xf]  ;;  %v6878_v42 = vld [vmem:[%s11040_s9 + $0x164] sm:$0xf] }
  0x2a   :  { %779 = vmatpush.bf16.msrb.mxu0 %v4883_v33  ;;  %v4915_v33 = vor.u32 %v6901_v30, %v4912_v32  ;;  %v4651_v17 = vor.u32 %v6835_v14, %v4648_v16  ;;  %v4918_v32 = vld [vmem:[%s11040_s9 + $0x220] sm:$0xf]  ;;  %v6896_v49 = vld [vmem:[%s11040_s9 + $0x1f4] sm:$0xf]  ;;  %v4896_v50 = vld [vmem:[%s11040_s9 + $0x208] sm:$0xf0] }
  0x2b   :  { %v4798_v54 = vld [vmem:[%s11040_s9 + $0x130] sm:$0xf]  ;;  %v6875_v56 = vld [vmem:[%s11040_s9 + $0x144] sm:$0xf0]  ;;  %v4899_v60 = vor.u32 %v6896_v49, %v4896_v50  ;;  %v6884_v14 = vld [vmem:[%s11040_s9 + $0x194] sm:$0xf] }
  0x2c   :  { %766 = vmatpush.bf16.msrb.mxu2 %v4691_v41  ;;  %v6898_v41 = vld [vmem:[%s11040_s9 + $0x1fc] sm:$0xf0]  ;;  %v5772_v49 = vld [vmem:[%s11042_s11 + $0x690] sm:$0xf]  ;;  %v7121_v50 = vld [vmem:[%s11042_s11 + $0x6b4] sm:$0xf0] }
  0x2d   :  { %787 = vmatpush.bf16.msrb.mxu3 %v4815_v11  ;;  %v4887_v43 = vor.u32 %v6898_v41, %v4886_v40  ;;  %v6881_v41 = vld [vmem:[%s11040_s9 + $0x174] sm:$0xf0] }
  0x2e   :  { %780 = vmatpush.bf16.msrb.mxu0 %v4859_v48  ;;  %v4719_v48 = vor.u32 %v6856_v47, %v4718_v46  ;;  %v4894_v47 = vld [vmem:[%s11040_s9 + $0x1f0] sm:$0xf] }
  0x30   :  { %767 = vmatpush.bf16.msrb.mxu2 %v4667_v59  ;;  %v6850_v59 = vld [vmem:[%s11040_s9 + $0x7c] sm:$0xf0] }
  0x31   :  { %788 = vmatpush.bf16.msrb.mxu3 %v4791_v20 }
  0x32   :  { %781 = vmatpush.bf16.msrb.mxu0 %v4835_v0  ;;  %v4838_v0 = vld [vmem:[%s11040_s9 + $0x188] sm:$0xf] }
  0x33   :  { %v4839_v3 = vor.u32 %v6886_v1, %v4838_v0  ;;  %v6890_v0 = vld [vmem:[%s11040_s9 + $0x1c4] sm:$0xf]  ;;  %v4872_v1 = vld [vmem:[%s11040_s9 + $0x1d8] sm:$0xf0] }
  0x34   :  { %768 = vmatpush.bf16.msrb.mxu2 %v4643_v10  ;;  %v4672_v10 = vld [vmem:[%s11040_s9 + $0x50] sm:$0xf0] }
  0x35   :  { %789 = vmatpush.bf16.msrb.mxu3 %v4767_v25 }
  0x36   :  { %829 = vmatpush.bf16.msra.mxu0 %v727_v8  ;;  %v6841_v8 = vld [vmem:[%s11040_s9 + $0x3c] sm:$0xf] }
  0x37   :  { %v4675_v11 = vor.u32 %v6841_v8, %v4672_v10  ;;  %v4846_v10 = vld [vmem:[%s11040_s9 + $0x190] sm:$0xf] }
  0x39   :  { %790 = vmatpush.bf16.msrb.mxu3 %v4743_v37  ;;  %v4920_v37 = vld [vmem:[%s11040_s9 + $0x238] sm:$0xf0] }
  0x3a   :  { %830 = vmatpush.bf16.msra.mxu0 %v4915_v33 }
  0x3d   :  { %791 = vmatpush.bf16.msrb.mxu3 %v4719_v48  ;;  %v6899_v48 = vld [vmem:[%s11040_s9 + $0x204] sm:$0xf0] }
  0x3e   :  { %831 = vmatpush.bf16.msra.mxu0 %v4891_v45  ;;  %v4919_v45 = vor.u32 %v6905_v35, %v4918_v32  ;;  %v6854_v32 = vld [vmem:[%s11040_s9 + $0xa4] sm:$0xf]  ;;  %v5172_v35 = vld [vmem:[%s11042_s11 + $0x1e0] sm:$0xf] }
  0x42   :  { %832 = vmatpush.bf16.msra.mxu0 %v4867_v57  ;;  %v6872_v57 = vld [vmem:[%s11040_s9 + $0x134] sm:$0xf] }
  0x9e   :  { %v147_v58 = vpop.f32.mrf.mxu0 }
  0x9f   :  { %v148_v61 = vadd.f32 %v7380_v38, %v147_v58  ;;  %v4744_v38 = vld [vmem:[%s11040_s9 + $0xe0] sm:$0xf0]  ;;  %v4694_v58 = vld [vmem:[%s11040_s9 + $0x68] sm:$0xf] }
  0xa0   :  { %v4747_v39 = vor.u32 %v6859_v36, %v4744_v38  ;;  %v6902_v36 = vld [vmem:[%s11040_s9 + $0x224] sm:$0xf] }
  0xa1   :  { %vm151_vm3 = vcmp.gt.f32.partialorder %v148_v61, 0.0  ;;  %v152_v5 = vmul.f32 0.01, %v148_v61  ;;  %v4923_v46 = vor.u32 %v6902_v36, %v4920_v37  ;;  %v6971_v36 = vld [vmem:[%s11042_s11 + $0x204] sm:$0xf0] }
  0xa2   :  { %v5812_v37 = vld [vmem:[%s11042_s11 + $0x6e0] sm:$0xf] }
  0xa3   :  { %v153_v9 = vsel %vm151_vm3, %v148_v61, %v152_v5  ;;  %v4695_v61 = vor.u32 %v6850_v59, %v4694_v58  ;;  %v4843_v5 = vor.u32 %v6883_v2, %v4840_v4  ;;  %v4800_v58 = vld [vmem:[%s11040_s9 + $0x148] sm:$0xf0]  ;;  %v4895_v59 = vor.u32 %v6899_v48, %v4894_v47  ;;  %v4774_v4 = vld [vmem:[%s11040_s9 + $0x100] sm:$0xf]  ;;  %v6961_v48 = vld [vmem:[%s11042_s11 + $0x1b4] sm:$0xf0] }
  0xa4   :  { %v162_v12 = vpack.c.bf16 %v153_v9, %v153_v9  ;;  %v4671_v9 = vor.u32 %v6844_v7, %v4670_v6  ;;  %v4799_v2 = vor.u32 %v6875_v56, %v4798_v54  ;;  %v6866_v6 = vld [vmem:[%s11040_s9 + $0x104] sm:$0xf]  ;;  %v4776_v7 = vld [vmem:[%s11040_s9 + $0x118] sm:$0xf0]  ;;  %v6845_v54 = vld [vmem:[%s11040_s9 + $0x54] sm:$0xf0] }
  0xa5   :  { %792 = vmatpush.bf16.msrb.mxu3 %v4695_v61  ;;  %833 = vmatpush.bf16.msra.mxu0 %v4843_v5  ;;  %v4870_v61 = vld [vmem:[%s11040_s9 + $0x1c0] sm:$0xf]  ;;  %v6869_v5 = vld [vmem:[%s11040_s9 + $0x114] sm:$0xf0]  ;;  %v6842_v56 = vld [vmem:[%s11040_s9 + $0x44] sm:$0xf] }
  0xa6   :  { %v149_v19 = vpop.f32.mrf.mxu0  ;;  %4634 = vmatmul.msk.bf16.vlgmr.msra.gmra.mxu1 %vm203_vm4, %v162_v12  ;;  %4635 = vmatmul.msk.bf16.vlgmr.msra.gmra.mxu2 %vm203_vm4, %v162_v12  ;;  %v4646_v12 = vld [vmem:[%s11040_s9 + $0x8] sm:$0xf]  ;;  %v4775_v16 = vor.u32 %v6869_v5, %v4774_v4  ;;  %v6836_v4 = vld [vmem:[%s11040_s9 + $0x14] sm:$0xf]  ;;  %v4656_v5 = vld [vmem:[%s11040_s9 + $0x28] sm:$0xf0] }
  0xa7   :  { %813 = vmatpush.bf16.msra.mxu2 %v4819_v13  ;;  %803 = vmatpush.bf16.msra.mxu1 %v724_v18  ;;  %v6838_v13 = vld [vmem:[%s11040_s9 + $0x1c] sm:$0xf0]  ;;  %v320_v19 = vld [vmem:[%s11040_s9 + $0x250] sm:$0xff] }
  0xa8   :  { %v4647_v15 = vor.u32 %v6838_v13, %v4646_v12  ;;  %v161_v18 = vld [vmem:[%s11041_s8] sm:$0x3]  ;;  %v561_v22 = vunpack.c.h.b16 %v320_v19  ;;  %v6863_v12 = vld [vmem:[%s11040_s9 + $0xe4] sm:$0xf0] }
  0xa9   :  { %793 = vmatpush.bf16.msrb.mxu3 %v4671_v9  ;;  %v164_v20 = vperm.slane %v161_v18, 0  ;;  %v165_v28 = vperm.slane %v161_v18, 1  ;;  %v4875_v9 = vor.u32 %v6890_v0, %v4872_v1  ;;  %v6887_v13 = vld [vmem:[%s11040_s9 + $0x1a4] sm:$0xf0]  ;;  %v6860_v18 = vld [vmem:[%s11040_s9 + $0xd4] sm:$0xf] }
  0xaa   :  { %v639_v26 = vpack.c.b16 %v561_v22, %v561_v22  ;;  %v5852_v22 = vld [vmem:[%s11042_s11 + $0x730] sm:$0xf] }
  0xab   :  { %814 = vmatpush.bf16.msra.mxu2 %v4795_v21  ;;  %804 = vmatpush.bf16.msra.mxu1 %v4911_v31  ;;  %v560_v21 = vunpack.c.l.b16 %v320_v19  ;;  %v5212_v19 = vld [vmem:[%s11042_s11 + $0x230] sm:$0xf] }
  0xac   :  { %v733_v31 = vsel %vm716_vm2, %v639_v26, 0 }
  0xad   :  { %794 = vmatpush.bf16.msrb.mxu3 %v4647_v15  ;;  %v638_v25 = vpack.c.b16 %v560_v21, %v560_v21  ;;  %v4848_v15 = vld [vmem:[%s11040_s9 + $0x1a8] sm:$0xf0] }
  0xae   :  { %v4752_v21 = vld [vmem:[%s11040_s9 + $0xe8] sm:$0xf0] }
  0xaf   :  { %815 = vmatpush.bf16.msra.mxu2 %v4771_v27  ;;  %805 = vmatpush.bf16.msra.mxu1 %v4887_v43  ;;  %v730_v30 = vsel %vm716_vm2, %v638_v25, 0  ;;  %v4824_v43 = vld [vmem:[%s11040_s9 + $0x178] sm:$0xf0]  ;;  %v4851_v25 = vor.u32 %v6884_v14, %v4848_v15  ;;  %v5692_v14 = vld [vmem:[%s11042_s11 + $0x5f0] sm:$0xf] }
  0xb0   :  { %v4827_v53 = vor.u32 %v6878_v42, %v4824_v43  ;;  %v6851_v42 = vld [vmem:[%s11040_s9 + $0x84] sm:$0xf0]  ;;  %v6848_v43 = vld [vmem:[%s11040_s9 + $0x74] sm:$0xf]  ;;  %v7101_v15 = vld [vmem:[%s11042_s11 + $0x614] sm:$0xf0] }
  0xb3   :  { %816 = vmatpush.bf16.msra.mxu2 %v4747_v39  ;;  %806 = vmatpush.bf16.msra.mxu1 %v4863_v55  ;;  %v4822_v39 = vld [vmem:[%s11040_s9 + $0x160] sm:$0xf] }
  0xb4   :  { %v4823_v52 = vor.u32 %v6881_v41, %v4822_v39  ;;  %v4702_v41 = vld [vmem:[%s11040_s9 + $0x70] sm:$0xf] }
  0xb7   :  { %817 = vmatpush.bf16.msra.mxu2 %v4723_v51  ;;  %807 = vmatpush.bf16.msra.mxu1 %v4839_v3  ;;  %v4803_v3 = vor.u32 %v6872_v57, %v4800_v58  ;;  %v4680_v57 = vld [vmem:[%s11040_s9 + $0x58] sm:$0xf0] }
  0xb8   :  { %v4683_v1 = vor.u32 %v6842_v56, %v4680_v57  ;;  %v6976_v56 = vld [vmem:[%s11042_s11 + $0x234] sm:$0xf]  ;;  %v5214_v57 = vld [vmem:[%s11042_s11 + $0x258] sm:$0xf0] }
  0xbb   :  { %818 = vmatpush.bf16.msra.mxu2 %v4699_v63  ;;  %v6893_v63 = vld [vmem:[%s11040_s9 + $0x1d4] sm:$0xf0] }
  0xbc   :  { %v4871_v8 = vor.u32 %v6893_v63, %v4870_v61  ;;  %v6951_v61 = vld [vmem:[%s11042_s11 + $0x164] sm:$0xf0] }
  0xbd   :  { %v7111_v63 = vld [vmem:[%s11042_s11 + $0x664] sm:$0xf0] }
  0xbf   :  { %819 = vmatpush.bf16.msra.mxu2 %v4675_v11  ;;  %v4750_v11 = vld [vmem:[%s11040_s9 + $0xd0] sm:$0xf] }
  0xc3   :  { %820 = vmatpush.bf16.msra.mxu2 %v4651_v17  ;;  %v4779_v17 = vor.u32 %v6866_v6, %v4776_v7  ;;  %v5532_v6 = vld [vmem:[%s11042_s11 + $0x4b0] sm:$0xf]  ;;  %v7061_v7 = vld [vmem:[%s11042_s11 + $0x4d4] sm:$0xf0] }
 0x123   :  { %v223_v23 = vpop.f32.mrf.mxu1 }
 0x124   :  { %v224_v24 = vadd.f32 %v223_v23, %v164_v20  ;;  %v6981_v20 = vld [vmem:[%s11042_s11 + $0x254] sm:$0xf0] }
 0x125   :  { %v7141_v23 = vld [vmem:[%s11042_s11 + $0x754] sm:$0xf0]  ;;  %v5213_v26 = vor.u32 %v6981_v20, %v5212_v19  ;;  %v5492_v19 = vld [vmem:[%s11042_s11 + $0x460] sm:$0xf]  ;;  %v7051_v20 = vld [vmem:[%s11042_s11 + $0x484] sm:$0xf0] }
 0x126   :  { %vm240_vm5 = vcmp.gt.f32.partialorder %v224_v24, 0.0  ;;  %v242_v27 = vmul.f32 0.01, %v224_v24 }
 0x128   :  { %v244_v29 = vsel %vm240_vm5, %v224_v24, %v242_v27  ;;  %v4847_v24 = vor.u32 %v6887_v13, %v4846_v10  ;;  %v5853_v27 = vor.u32 %v7141_v23, %v5852_v22  ;;  %v7221_v10 = vld [vmem:[%s11042_s11 + $0x9d4] sm:$0xf0]  ;;  %v6132_v23 = vld [vmem:[%s11042_s11 + $0x960] sm:$0xf] }
 0x129   :  { %v7843_v33 = vpack.c.bf16 %v244_v29, %v244_v29  ;;  %v236_v34 = vpop.f32.mrf.mxu2  ;;  %v4755_v29 = vor.u32 %v6860_v18, %v4752_v21  ;;  %v6941_v13 = vld [vmem:[%s11042_s11 + $0x114] sm:$0xf0]  ;;  %v5533_v18 = vor.u32 %v7061_v7, %v5532_v6  ;;  %v5332_v7 = vld [vmem:[%s11042_s11 + $0x320] sm:$0xf] }
 0x12a   :  { %v237_v38 = vadd.f32 %v236_v34, %v165_v28  ;;  %v4751_v28 = vor.u32 %v6863_v12, %v4750_v11  ;;  %v4728_v34 = vld [vmem:[%s11040_s9 + $0xb8] sm:$0xf0]  ;;  %v5052_v11 = vld [vmem:[%s11042_s11 + $0xf0] sm:$0xf] }
 0x12b   :  { %v225_v40 = vpop.f32.mrf.mxu1  ;;  %743 = vmatmul.bf16.vlgmr.msra.gmra.mxu3 %v7843_v33  ;;  %769 = vmatmul.bf16.vlgmr.msrb.gmra.mxu2 %v7843_v33  ;;  %v5053_v22 = vor.u32 %v6941_v13, %v5052_v11  ;;  %v7171_v11 = vld [vmem:[%s11042_s11 + $0x844] sm:$0xf0]  ;;  %v6412_v13 = vld [vmem:[%s11042_s11 + $0xb90] sm:$0xf] }
 0x12c   :  { %vm241_vm6 = vcmp.gt.f32.partialorder %v237_v38, 0.0  ;;  %v243_v44 = vmul.f32 0.01, %v237_v38  ;;  %855 = vmatpush.bf16.msra.mxu3 %v730_v30  ;;  %881 = vmatpush.bf16.msrb.mxu2 %v733_v31  ;;  %v4726_v30 = vld [vmem:[%s11040_s9 + $0xa0] sm:$0xf]  ;;  %v4731_v40 = vor.u32 %v6854_v32, %v4728_v34 }
 0x12d   :  { %v6857_v31 = vld [vmem:[%s11040_s9 + $0xb4] sm:$0xf0] }
 0x12e   :  { %v245_v51 = vsel %vm241_vm6, %v237_v38, %v243_v44  ;;  %v7131_v38 = vld [vmem:[%s11042_s11 + $0x704] sm:$0xf0]  ;;  %v4727_v39 = vor.u32 %v6857_v31, %v4726_v30  ;;  %v4704_v44 = vld [vmem:[%s11040_s9 + $0x88] sm:$0xf0]  ;;  %v5452_v30 = vld [vmem:[%s11042_s11 + $0x410] sm:$0xf] }
 0x12f   :  { %v7883_v55 = vpack.c.bf16 %v245_v51, %v245_v51  ;;  %v5813_v47 = vor.u32 %v7131_v38, %v5812_v37  ;;  %v4703_v51 = vor.u32 %v6851_v42, %v4702_v41  ;;  %v7041_v31 = vld [vmem:[%s11042_s11 + $0x434] sm:$0xf0]  ;;  %v4972_v37 = vld [vmem:[%s11042_s11 + $0x50] sm:$0xf] }
 0x130   :  { %856 = vmatpush.bf16.msra.mxu3 %v4919_v45  ;;  %882 = vmatpush.bf16.msrb.mxu2 %v4923_v46  ;;  %v5173_v45 = vor.u32 %v6971_v36, %v5172_v35  ;;  %v5132_v46 = vld [vmem:[%s11042_s11 + $0x190] sm:$0xf]  ;;  %v7201_v36 = vld [vmem:[%s11042_s11 + $0x934] sm:$0xf0]  ;;  %v5453_v42 = vor.u32 %v7041_v31, %v5452_v30  ;;  %v7151_v30 = vld [vmem:[%s11042_s11 + $0x7a4] sm:$0xf0] }
 0x131   :  { %v238_v62 = vpop.f32.mrf.mxu2  ;;  %4924 = vmatmul.msk.bf16.vlgmr.msrb.gmra.mxu1 %vm712_vm7, %v7883_v55  ;;  %4925 = vmatmul.msk.bf16.vlgmr.msrb.gmra.mxu0 %vm712_vm7, %v7883_v55  ;;  %v5133_v58 = vor.u32 %v6961_v48, %v5132_v46  ;;  %v6092_v35 = vld [vmem:[%s11042_s11 + $0x910] sm:$0xf]  ;;  %v7081_v41 = vld [vmem:[%s11042_s11 + $0x574] sm:$0xf0]  ;;  %v4932_v48 = vld [vmem:[%s11042_s11] sm:$0xf] }
 0x132   :  { %839 = vmatpush.bf16.msrb.mxu1 %v4823_v52  ;;  %865 = vmatpush.bf16.msrb.mxu0 %v4827_v53  ;;  %v4707_v52 = vor.u32 %v6848_v43, %v4704_v44  ;;  %v4678_v53 = vld [vmem:[%s11040_s9 + $0x40] sm:$0xf]  ;;  %v6093_v44 = vor.u32 %v7201_v36, %v6092_v35  ;;  %v5534_v35 = vld [vmem:[%s11042_s11 + $0x4d8] sm:$0xf0] }
 0x133   :  { %v5732_v62 = vld [vmem:[%s11042_s11 + $0x640] sm:$0xf]  ;;  %v4679_v0 = vor.u32 %v6845_v54, %v4678_v53  ;;  %v7071_v53 = vld [vmem:[%s11042_s11 + $0x524] sm:$0xf0]  ;;  %v7301_v54 = vld [vmem:[%s11042_s11 + $0xc54] sm:$0xf0] }
 0x134   :  { %857 = vmatpush.bf16.msra.mxu3 %v4895_v59  ;;  %883 = vmatpush.bf16.msrb.mxu2 %v4899_v60  ;;  %v5773_v59 = vor.u32 %v7121_v50, %v5772_v49  ;;  %v5092_v60 = vld [vmem:[%s11042_s11 + $0x140] sm:$0xf]  ;;  %v5733_v12 = vor.u32 %v7111_v63, %v5732_v62  ;;  %v6911_v49 = vld [vmem:[%s11042_s11 + $0x24] sm:$0xf0]  ;;  %v6012_v63 = vld [vmem:[%s11042_s11 + $0x870] sm:$0xf] }
 0x135   :  { %v5412_v43 = vld [vmem:[%s11042_s11 + $0x3c0] sm:$0xf]  ;;  %v4933_v62 = vor.u32 %v6911_v49, %v4932_v48  ;;  %v7341_v49 = vld [vmem:[%s11042_s11 + $0xd94] sm:$0xf0] }
 0x136   :  { %840 = vmatpush.bf16.msrb.mxu1 %v4799_v2  ;;  %866 = vmatpush.bf16.msrb.mxu0 %v4803_v3  ;;  %v4654_v2 = vld [vmem:[%s11040_s9 + $0x10] sm:$0xf]  ;;  %v6839_v3 = vld [vmem:[%s11040_s9 + $0x24] sm:$0xf0] }
 0x138   :  { %858 = vmatpush.bf16.msra.mxu3 %v4871_v8  ;;  %884 = vmatpush.bf16.msrb.mxu2 %v4875_v9  ;;  %v5093_v8 = vor.u32 %v6951_v61, %v5092_v60  ;;  %v6172_v9 = vld [vmem:[%s11042_s11 + $0x9b0] sm:$0xf]  ;;  %v7021_v61 = vld [vmem:[%s11042_s11 + $0x394] sm:$0xf0] }
 0x139   :  { %v6173_v21 = vor.u32 %v7221_v10, %v6172_v9  ;;  %v7011_v9 = vld [vmem:[%s11042_s11 + $0x344] sm:$0xf0]  ;;  %v5972_v10 = vld [vmem:[%s11042_s11 + $0x820] sm:$0xf] }
 0x13a   :  { %841 = vmatpush.bf16.msrb.mxu1 %v4775_v16  ;;  %867 = vmatpush.bf16.msrb.mxu0 %v4779_v17  ;;  %v4655_v16 = vor.u32 %v6839_v3, %v4654_v2  ;;  %v4659_v17 = vor.u32 %v6836_v4, %v4656_v5  ;;  %v5217_v3 = vor.u32 %v6976_v56, %v5214_v57  ;;  %v6452_v4 = vld [vmem:[%s11042_s11 + $0xbe0] sm:$0xf]  ;;  %v7291_v5 = vld [vmem:[%s11042_s11 + $0xc04] sm:$0xf0] }
 0x13b   :  { %795 = vmatmul.bf16.vlgmr.msrb.gmra.mxu3 %v7843_v33  ;;  %821 = vmatmul.bf16.vlgmr.msra.gmra.mxu2 %v7843_v33 }
 0x13c   :  { %859 = vmatpush.bf16.msra.mxu3 %v4847_v24  ;;  %885 = vmatpush.bf16.msrb.mxu2 %v4851_v25  ;;  %v5012_v24 = vld [vmem:[%s11042_s11 + $0xa0] sm:$0xf]  ;;  %v5693_v25 = vor.u32 %v7101_v15, %v5692_v14  ;;  %v7281_v14 = vld [vmem:[%s11042_s11 + $0xbb4] sm:$0xf0]  ;;  %v5333_v15 = vor.u32 %v7011_v9, %v5332_v7 }
 0x13d   :  { %v7241_v7 = vld [vmem:[%s11042_s11 + $0xa74] sm:$0xf0] }
 0x13e   :  { %842 = vmatpush.bf16.msrb.mxu1 %v4751_v28  ;;  %868 = vmatpush.bf16.msrb.mxu0 %v4755_v29  ;;  %v7091_v28 = vld [vmem:[%s11042_s11 + $0x5c4] sm:$0xf0]  ;;  %v5493_v29 = vor.u32 %v7051_v20, %v5492_v19  ;;  %v5932_v19 = vld [vmem:[%s11042_s11 + $0x7d0] sm:$0xf]  ;;  %v7161_v20 = vld [vmem:[%s11042_s11 + $0x7f4] sm:$0xf0] }
 0x140   :  { %3784 = vmatpush.bf16.msrb.mxu3 %v5213_v26  ;;  %3810 = vmatpush.bf16.msra.mxu2 %v5853_v27  ;;  %v6931_v26 = vld [vmem:[%s11042_s11 + $0xc4] sm:$0xf0]  ;;  %v5652_v27 = vld [vmem:[%s11042_s11 + $0x5a0] sm:$0xf] }
 0x141   :  { %4926 = vmatmul.msk.bf16.vlgmr.msra.gmra.mxu1 %vm712_vm7, %v7883_v55  ;;  %4927 = vmatmul.msk.bf16.vlgmr.msra.gmra.mxu0 %vm712_vm7, %v7883_v55  ;;  %v5013_v34 = vor.u32 %v6931_v26, %v5012_v24  ;;  %v5653_v38 = vor.u32 %v7091_v28, %v5652_v27  ;;  %v7271_v24 = vld [vmem:[%s11042_s11 + $0xb64] sm:$0xf0]  ;;  %v5252_v26 = vld [vmem:[%s11042_s11 + $0x280] sm:$0xf]  ;;  %v5933_v27 = vor.u32 %v7161_v20, %v5932_v19 }
 0x142   :  { %843 = vmatpush.bf16.msrb.mxu1 %v4727_v39  ;;  %869 = vmatpush.bf16.msrb.mxu0 %v4731_v40  ;;  %v6921_v39 = vld [vmem:[%s11042_s11 + $0x74] sm:$0xf0]  ;;  %v5612_v40 = vld [vmem:[%s11042_s11 + $0x550] sm:$0xf]  ;;  %v6991_v28 = vld [vmem:[%s11042_s11 + $0x2a4] sm:$0xf0] }
 0x143   :  { %v4973_v46 = vor.u32 %v6921_v39, %v4972_v37  ;;  %v5613_v50 = vor.u32 %v7081_v41, %v5612_v40  ;;  %v5253_v36 = vor.u32 %v6991_v28, %v5252_v26  ;;  %v6732_v40 = vld [vmem:[%s11042_s11 + $0xe10] sm:$0xf]  ;;  %v7361_v41 = vld [vmem:[%s11042_s11 + $0xe34] sm:$0xf0]  ;;  %v7231_v19 = vld [vmem:[%s11042_s11 + $0xa24] sm:$0xf0] }
 0x144   :  { %3785 = vmatpush.bf16.msrb.mxu3 %v5173_v45  ;;  %3811 = vmatpush.bf16.msra.mxu2 %v5813_v47  ;;  %v6052_v45 = vld [vmem:[%s11042_s11 + $0x8c0] sm:$0xf]  ;;  %v7191_v47 = vld [vmem:[%s11042_s11 + $0x8e4] sm:$0xf0]  ;;  %v7016_v26 = vld [vmem:[%s11042_s11 + $0x374] sm:$0xf] }
 0x145   :  { %v6053_v60 = vor.u32 %v7191_v47, %v6052_v45  ;;  %v6332_v45 = vld [vmem:[%s11042_s11 + $0xaf0] sm:$0xf]  ;;  %v6532_v20 = vld [vmem:[%s11042_s11 + $0xc80] sm:$0xf] }
 0x146   :  { %844 = vmatpush.bf16.msrb.mxu1 %v4703_v51  ;;  %870 = vmatpush.bf16.msrb.mxu0 %v4707_v52  ;;  %v6492_v51 = vld [vmem:[%s11042_s11 + $0xc30] sm:$0xf]  ;;  %v5572_v52 = vld [vmem:[%s11042_s11 + $0x500] sm:$0xf] }
 0x147   :  { %v6493_v2 = vor.u32 %v7301_v54, %v6492_v51  ;;  %v6652_v47 = vld [vmem:[%s11042_s11 + $0xd70] sm:$0xf]  ;;  %v5494_v54 = vld [vmem:[%s11042_s11 + $0x488] sm:$0xf0] }
 0x148   :  { %3786 = vmatpush.bf16.msrb.mxu3 %v5133_v58  ;;  %3812 = vmatpush.bf16.msra.mxu2 %v5773_v59  ;;  %v5372_v59 = vld [vmem:[%s11042_s11 + $0x370] sm:$0xf]  ;;  %v6653_v51 = vor.u32 %v7341_v49, %v6652_v47  ;;  %v8388_v47 = vld [vmem:[%s11043_s10] sm:$0x3f] }
 0x149   :  { %v5373_v6 = vor.u32 %v7021_v61, %v5372_v59  ;;  %v7251_v59 = vld [vmem:[%s11042_s11 + $0xac4] sm:$0xf0]  ;;  %v326_v49 = vperm.slane %v8388_v47, 1 }
 0x14a   :  { %845 = vmatpush.bf16.msrb.mxu1 %v4679_v0  ;;  %871 = vmatpush.bf16.msrb.mxu0 %v4683_v1  ;;  %v7181_v0 = vld [vmem:[%s11042_s11 + $0x894] sm:$0xf0]  ;;  %v5573_v1 = vor.u32 %v7071_v53, %v5572_v52  ;;  %v5174_v52 = vld [vmem:[%s11042_s11 + $0x208] sm:$0xf0]  ;;  %v7046_v53 = vld [vmem:[%s11042_s11 + $0x464] sm:$0xf] }
 0x14b   :  { %4928 = vmatmul.msk.bf16.vlgmr.msra.gmra.mxu3 %vm712_vm7, %v7883_v55  ;;  %4929 = vmatmul.msk.bf16.vlgmr.msrb.gmra.mxu2 %vm712_vm7, %v7883_v55  ;;  %v7211_v55 = vld [vmem:[%s11042_s11 + $0x984] sm:$0xf0]  ;;  %v5497_v57 = vor.u32 %v7046_v53, %v5494_v54 }
 0x14c   :  { %3787 = vmatpush.bf16.msrb.mxu3 %v5093_v8  ;;  %3813 = vmatpush.bf16.msra.mxu2 %v5733_v12  ;;  %v6133_v32 = vor.u32 %v7211_v55, %v6132_v23  ;;  %v6013_v8 = vor.u32 %v7181_v0, %v6012_v63  ;;  %v6453_v12 = vor.u32 %v7291_v5, %v6452_v4  ;;  %v7371_v23 = vld [vmem:[%s11042_s11 + $0xe84] sm:$0x70]  ;;  %v6372_v55 = vld [vmem:[%s11042_s11 + $0xb40] sm:$0xf]  ;;  %v6956_v63 = vld [vmem:[%s11042_s11 + $0x194] sm:$0xf] }
 0x14d   :  { %v5134_v0 = vld [vmem:[%s11042_s11 + $0x1b8] sm:$0xf0] }
 0x14e   :  { %846 = vmatpush.bf16.msrb.mxu1 %v4655_v16  ;;  %872 = vmatpush.bf16.msrb.mxu0 %v4659_v17  ;;  %v5292_v16 = vld [vmem:[%s11042_s11 + $0x2d0] sm:$0xf]  ;;  %v5973_v17 = vor.u32 %v7171_v11, %v5972_v10  ;;  %v5454_v4 = vld [vmem:[%s11042_s11 + $0x438] sm:$0xf0]  ;;  %v7321_v10 = vld [vmem:[%s11042_s11 + $0xcf4] sm:$0xf0] }
 0x14f   :  { %v6946_v11 = vld [vmem:[%s11042_s11 + $0x144] sm:$0xf] }
 0x150   :  { %3788 = vmatpush.bf16.msrb.mxu3 %v5053_v22  ;;  %3814 = vmatpush.bf16.msra.mxu2 %v5693_v25  ;;  %v6413_v22 = vor.u32 %v7281_v14, %v6412_v13 }
 0x151   :  { %847 = vmatmul.bf16.vlgmr.msrb.gmra.mxu1 %v7843_v33  ;;  %873 = vmatmul.bf16.vlgmr.msrb.gmra.mxu0 %v7843_v33  ;;  %v7031_v33 = vld [vmem:[%s11042_s11 + $0x3e4] sm:$0xf0] }
 0x152   :  { %3797 = vmatpush.bf16.msra.mxu1 %v5533_v18  ;;  %3823 = vmatpush.bf16.msra.mxu0 %v6173_v21  ;;  %v5413_v58 = vor.u32 %v7031_v33, %v5412_v43  ;;  %v7001_v18 = vld [vmem:[%s11042_s11 + $0x2f4] sm:$0xf0]  ;;  %v6772_v21 = vld [vmem:[%s11042_s11 + $0xe60] sm:$0xf]  ;;  %v7351_v33 = vld [vmem:[%s11042_s11 + $0xde4] sm:$0xf0] }
 0x153   :  { %v5293_v25 = vor.u32 %v7001_v18, %v5292_v16  ;;  %v6773_v31 = vor.u32 %v7371_v23, %v6772_v21  ;;  %v6692_v43 = vld [vmem:[%s11042_s11 + $0xdc0] sm:$0xf]  ;;  %v5414_v16 = vld [vmem:[%s11042_s11 + $0x3e8] sm:$0xf0]  ;;  %v6936_v23 = vld [vmem:[%s11042_s11 + $0xf4] sm:$0xf] }
 0x154   :  { %3789 = vmatpush.bf16.msrb.mxu3 %v5013_v34  ;;  %3815 = vmatpush.bf16.msra.mxu2 %v5653_v38  ;;  %v7056_v34 = vld [vmem:[%s11042_s11 + $0x4b4] sm:$0xf]  ;;  %v6212_v18 = vld [vmem:[%s11042_s11 + $0xa00] sm:$0xf] }
 0x155   :  { %v5537_v38 = vor.u32 %v7056_v34, %v5534_v35  ;;  %v3755_v39 = vsel %vm3753_vm8, %v6773_v31, 0  ;;  %v6213_v21 = vor.u32 %v7231_v19, %v6212_v18  ;;  %v7006_v31 = vld [vmem:[%s11042_s11 + $0x324] sm:$0xf]  ;;  %v5334_v34 = vld [vmem:[%s11042_s11 + $0x348] sm:$0xf0]  ;;  %v327_v19 = vperm.slane %v8388_v47, 2 }
 0x156   :  { %3798 = vmatpush.bf16.msra.mxu1 %v5493_v29  ;;  %3824 = vmatpush.bf16.msra.mxu0 %v6133_v32  ;;  %v5892_v29 = vld [vmem:[%s11042_s11 + $0x780] sm:$0xf]  ;;  %v6373_v32 = vor.u32 %v7271_v24, %v6372_v55  ;;  %v5054_v55 = vld [vmem:[%s11042_s11 + $0x118] sm:$0xf0]  ;;  %v5337_v35 = vor.u32 %v7006_v31, %v5334_v34  ;;  %v7106_v34 = vld [vmem:[%s11042_s11 + $0x644] sm:$0xf] }
 0x157   :  { %v5893_v37 = vor.u32 %v7151_v30, %v5892_v29  ;;  %v6926_v29 = vld [vmem:[%s11042_s11 + $0xa4] sm:$0xf]  ;;  %v5014_v30 = vld [vmem:[%s11042_s11 + $0xc8] sm:$0xf0]  ;;  %v6094_v18 = vld [vmem:[%s11042_s11 + $0x938] sm:$0xf0] }
 0x158   :  { %3790 = vmatpush.bf16.msrb.mxu3 %v4973_v46  ;;  %3816 = vmatpush.bf16.msra.mxu2 %v5613_v50  ;;  %v7261_v46 = vld [vmem:[%s11042_s11 + $0xb14] sm:$0xf0]  ;;  %v6966_v50 = vld [vmem:[%s11042_s11 + $0x1e4] sm:$0xf] }
 0x159   :  { %v6333_v48 = vor.u32 %v7261_v46, %v6332_v45  ;;  %v5177_v56 = vor.u32 %v6966_v50, %v5174_v52  ;;  %v5254_v45 = vld [vmem:[%s11042_s11 + $0x2a8] sm:$0xf0] }
 0x15a   :  { %3799 = vmatpush.bf16.msra.mxu1 %v5453_v42  ;;  %3825 = vmatpush.bf16.msra.mxu0 %v6093_v44  ;;  %v6733_v42 = vor.u32 %v7361_v41, %v6732_v40  ;;  %v6693_v44 = vor.u32 %v7351_v33, %v6692_v43  ;;  %v5294_v40 = vld [vmem:[%s11042_s11 + $0x2f8] sm:$0xf0]  ;;  %v4934_v43 = vld [vmem:[%s11042_s11 + $0x28] sm:$0xf0]  ;;  %v6986_v33 = vld [vmem:[%s11042_s11 + $0x284] sm:$0xf] }
 0x15b   :  { %v5257_v46 = vor.u32 %v6986_v33, %v5254_v45  ;;  %v7096_v33 = vld [vmem:[%s11042_s11 + $0x5f4] sm:$0xf] }
 0x15c   :  { %3791 = vmatpush.bf16.msrb.mxu3 %v4933_v62  ;;  %3817 = vmatpush.bf16.msra.mxu2 %v5573_v1  ;;  %v7331_v62 = vld [vmem:[%s11042_s11 + $0xd44] sm:$0xf0] }
 0x15e   :  { %3800 = vmatpush.bf16.msra.mxu1 %v5413_v58  ;;  %3826 = vmatpush.bf16.msra.mxu0 %v6053_v60  ;;  %v6292_v58 = vld [vmem:[%s11042_s11 + $0xaa0] sm:$0xf] }
 0x15f   :  { %v6612_v60 = vld [vmem:[%s11042_s11 + $0xd20] sm:$0xf]  ;;  %v6293_v61 = vor.u32 %v7251_v59, %v6292_v58  ;;  %v7136_v59 = vld [vmem:[%s11042_s11 + $0x734] sm:$0xf] }
 0x160   :  { %3836 = vmatpush.bf16.msra.mxu3 %v6493_v2  ;;  %3862 = vmatpush.bf16.msrb.mxu2 %v5217_v3  ;;  %v6613_v1 = vor.u32 %v7331_v62, %v6612_v60  ;;  %v5137_v2 = vor.u32 %v6956_v63, %v5134_v0  ;;  %v7036_v3 = vld [vmem:[%s11042_s11 + $0x414] sm:$0xf]  ;;  %v5854_v63 = vld [vmem:[%s11042_s11 + $0x758] sm:$0xf0] }
 0x161   :  { %v5457_v5 = vor.u32 %v7036_v3, %v5454_v4  ;;  %v7216_v60 = vld [vmem:[%s11042_s11 + $0x9b4] sm:$0xf] }
 0x162   :  { %3801 = vmatpush.bf16.msra.mxu1 %v5373_v6  ;;  %3827 = vmatpush.bf16.msra.mxu0 %v6013_v8  ;;  %v6252_v6 = vld [vmem:[%s11042_s11 + $0xa50] sm:$0xf] }
 0x163   :  { %v6572_v8 = vld [vmem:[%s11042_s11 + $0xcd0] sm:$0xf]  ;;  %v6253_v9 = vor.u32 %v7241_v7, %v6252_v6  ;;  %v5857_v7 = vor.u32 %v7136_v59, %v5854_v63  ;;  %v7286_v59 = vld [vmem:[%s11042_s11 + $0xbe4] sm:$0xf] }
 0x164   :  { %3837 = vmatpush.bf16.msra.mxu3 %v6453_v12  ;;  %3863 = vmatpush.bf16.msrb.mxu2 %v5177_v56  ;;  %v5094_v12 = vld [vmem:[%s11042_s11 + $0x168] sm:$0xf0]  ;;  %v6573_v13 = vor.u32 %v7321_v10, %v6572_v8  ;;  %v7206_v8 = vld [vmem:[%s11042_s11 + $0x964] sm:$0xf] }
 0x165   :  { %v5097_v14 = vor.u32 %v6946_v11, %v5094_v12 }
 0x166   :  { %3802 = vmatpush.bf16.msra.mxu1 %v5333_v15  ;;  %3828 = vmatpush.bf16.msra.mxu0 %v5973_v17  ;;  %v7026_v15 = vld [vmem:[%s11042_s11 + $0x3c4] sm:$0xf] }
 0x167   :  { %v5417_v17 = vor.u32 %v7026_v15, %v5414_v16 }
 0x168   :  { %3838 = vmatpush.bf16.msra.mxu3 %v6413_v22  ;;  %3864 = vmatpush.bf16.msrb.mxu2 %v5137_v2  ;;  %v7311_v22 = vld [vmem:[%s11042_s11 + $0xca4] sm:$0xf0] }
 0x169   :  { %v6533_v24 = vor.u32 %v7311_v22, %v6532_v20  ;;  %v7116_v20 = vld [vmem:[%s11042_s11 + $0x694] sm:$0xf]  ;;  %v328_v22 = vperm.slane %v8388_v47, 3 }
 0x16a   :  { %3803 = vmatpush.bf16.msra.mxu1 %v5293_v25  ;;  %3829 = vmatpush.bf16.msra.mxu0 %v5933_v27  ;;  %v5057_v25 = vor.u32 %v6936_v23, %v5054_v55  ;;  %v5374_v27 = vld [vmem:[%s11042_s11 + $0x398] sm:$0xf0]  ;;  %v7186_v55 = vld [vmem:[%s11042_s11 + $0x8c4] sm:$0xf] }
 0x16b   :  { %v5377_v28 = vor.u32 %v7016_v26, %v5374_v27  ;;  %v6054_v27 = vld [vmem:[%s11042_s11 + $0x8e8] sm:$0xf0] }
 0x16c   :  { %3839 = vmatpush.bf16.msra.mxu3 %v6373_v32  ;;  %3865 = vmatpush.bf16.msrb.mxu2 %v5097_v14  ;;  %v5017_v32 = vor.u32 %v6926_v29, %v5014_v30  ;;  %v5814_v14 = vld [vmem:[%s11042_s11 + $0x708] sm:$0xf0] }
 0x16d   :  { %v6774_v29 = vld [vmem:[%s11042_s11 + $0xe88] sm:$0x70] }
 0x16e   :  { %3804 = vmatpush.bf16.msra.mxu1 %v5253_v36  ;;  %3830 = vmatpush.bf16.msra.mxu0 %v5893_v37  ;;  %v6916_v36 = vld [vmem:[%s11042_s11 + $0x54] sm:$0xf]  ;;  %v4974_v37 = vld [vmem:[%s11042_s11 + $0x78] sm:$0xf0] }
 0x170   :  { %3840 = vmatpush.bf16.msra.mxu3 %v6333_v48  ;;  %3866 = vmatpush.bf16.msrb.mxu2 %v5057_v25  ;;  %v325_v48 = vperm.slane %v8388_v47, 0 }
 0x172   :  { %3850 = vmatpush.bf16.msrb.mxu1 %v3755_v39  ;;  %3875 = vmatpush.bf16.msrb.mxu0 %v5537_v38  ;;  %v6996_v38 = vld [vmem:[%s11042_s11 + $0x2d4] sm:$0xf]  ;;  %v4977_v39 = vor.u32 %v6916_v36, %v4974_v37 }
 0x173   :  { %v5297_v41 = vor.u32 %v6996_v38, %v5294_v40  ;;  %v6057_v38 = vor.u32 %v7186_v55, %v6054_v27  ;;  %v6374_v27 = vld [vmem:[%s11042_s11 + $0xb68] sm:$0xf0] }
 0x174   :  { %3841 = vmatpush.bf16.msra.mxu3 %v6293_v61  ;;  %3867 = vmatpush.bf16.msrb.mxu2 %v5017_v32  ;;  %v6174_v61 = vld [vmem:[%s11042_s11 + $0x9d8] sm:$0xf0] }
 0x175   :  { %v6177_v2 = vor.u32 %v7216_v60, %v6174_v61  ;;  %v6454_v60 = vld [vmem:[%s11042_s11 + $0xc08] sm:$0xf0]  ;;  %v7356_v61 = vld [vmem:[%s11042_s11 + $0xe14] sm:$0xf] }
 0x176   :  { %3851 = vmatpush.bf16.msrb.mxu1 %v6733_v42  ;;  %3876 = vmatpush.bf16.msrb.mxu0 %v5497_v57  ;;  %v6906_v42 = vld [vmem:[%s11042_s11 + $0x4] sm:$0xf] }
 0x178   :  { %3842 = vmatpush.bf16.msra.mxu3 %v6253_v9  ;;  %3868 = vmatpush.bf16.msrb.mxu2 %v4977_v39  ;;  %v6134_v9 = vld [vmem:[%s11042_s11 + $0x988] sm:$0xf0]  ;;  %v7296_v39 = vld [vmem:[%s11042_s11 + $0xc34] sm:$0xf] }
 0x179   :  { %v6137_v15 = vor.u32 %v7206_v8, %v6134_v9  ;;  %v6457_v8 = vor.u32 %v7286_v59, %v6454_v60  ;;  %v329_v9 = vperm.slane %v8388_v47, 4 }
 0x17a   :  { %3852 = vmatpush.bf16.msrb.mxu1 %v6693_v44  ;;  %3877 = vmatpush.bf16.msrb.mxu0 %v5457_v5  ;;  %v4937_v44 = vor.u32 %v6906_v42, %v4934_v43  ;;  %v6494_v43 = vld [vmem:[%s11042_s11 + $0xc58] sm:$0xf0] }
 0x17c   :  { %3843 = vmatpush.bf16.msra.mxu3 %v6213_v21  ;;  %3869 = vmatpush.bf16.msrb.mxu2 %v4937_v44  ;;  %v5774_v21 = vld [vmem:[%s11042_s11 + $0x6b8] sm:$0xf0] }
 0x17d   :  { %v5777_v26 = vor.u32 %v7116_v20, %v5774_v21  ;;  %v5694_v44 = vld [vmem:[%s11042_s11 + $0x618] sm:$0xf0]  ;;  %v330_v20 = vperm.slane %v8388_v47, 5  ;;  %v7156_v21 = vld [vmem:[%s11042_s11 + $0x7d4] sm:$0xf] }
 0x17e   :  { %3853 = vmatpush.bf16.msrb.mxu1 %v6653_v51  ;;  %3878 = vmatpush.bf16.msrb.mxu0 %v5417_v17  ;;  %v7196_v17 = vld [vmem:[%s11042_s11 + $0x914] sm:$0xf]  ;;  %v7266_v47 = vld [vmem:[%s11042_s11 + $0xb44] sm:$0xf] }
 0x17f   :  { %v6097_v23 = vor.u32 %v7196_v17, %v6094_v18  ;;  %v6694_v17 = vld [vmem:[%s11042_s11 + $0xde8] sm:$0xf0]  ;;  %v7076_v18 = vld [vmem:[%s11042_s11 + $0x554] sm:$0xf] }
 0x182   :  { %3854 = vmatpush.bf16.msrb.mxu1 %v6613_v1  ;;  %3879 = vmatpush.bf16.msrb.mxu0 %v5377_v28  ;;  %v7366_v28 = vld [vmem:[%s11042_s11 + $0xe64] sm:$0xf] }
 0x183   :  { %v6777_v40 = vor.u32 %v7366_v28, %v6774_v29  ;;  %v7336_v28 = vld [vmem:[%s11042_s11 + $0xd74] sm:$0xf] }
 0x186   :  { %3855 = vmatpush.bf16.msrb.mxu1 %v6573_v13  ;;  %3880 = vmatpush.bf16.msrb.mxu0 %v5337_v35  ;;  %v7126_v13 = vld [vmem:[%s11042_s11 + $0x6e4] sm:$0xf]  ;;  %v5734_v35 = vld [vmem:[%s11042_s11 + $0x668] sm:$0xf0] }
 0x187   :  { %v5817_v16 = vor.u32 %v7126_v13, %v5814_v14  ;;  %v5737_v42 = vor.u32 %v7106_v34, %v5734_v35  ;;  %v7276_v13 = vld [vmem:[%s11042_s11 + $0xb94] sm:$0xf]  ;;  %v6414_v14 = vld [vmem:[%s11042_s11 + $0xbb8] sm:$0xf0]  ;;  %v7066_v35 = vld [vmem:[%s11042_s11 + $0x504] sm:$0xf] }
 0x188   :  { %v6654_v34 = vld [vmem:[%s11042_s11 + $0xd98] sm:$0xf0] }
 0x18a   :  { %3856 = vmatpush.bf16.msrb.mxu1 %v6533_v24  ;;  %3881 = vmatpush.bf16.msrb.mxu0 %v5297_v41 }
 0x18e   :  { %3882 = vmatpush.bf16.msrb.mxu0 %v5257_v46  ;;  %v7176_v46 = vld [vmem:[%s11042_s11 + $0x874] sm:$0xf] }
 0x1ae   :  { %v744_v50 = vpop.f32.mrf.mxu3  ;;  %v757_v51 = vpop.f32.mrf.mxu1 }
 0x1af   :  { %v745_v52 = vadd.f32 %v744_v50, %v325_v48  ;;  %v770_v53 = vpop.f32.mrf.mxu2  ;;  %v783_v54 = vpop.f32.mrf.mxu0 }
 0x1b0   :  { %v771_v56 = vadd.f32 %v770_v53, %v326_v49  ;;  %v6014_v49 = vld [vmem:[%s11042_s11 + $0x898] sm:$0xf0] }
 0x1b1   :  { %v758_v57 = vadd.f32 %v757_v51, %v745_v52  ;;  %v6497_v51 = vor.u32 %v7296_v39, %v6494_v43  ;;  %v3758_v52 = vsel %vm3753_vm8, %v6777_v40, 0  ;;  %v5894_v39 = vld [vmem:[%s11042_s11 + $0x7a8] sm:$0xf0]  ;;  %v6334_v43 = vld [vmem:[%s11042_s11 + $0xb18] sm:$0xf0] }
 0x1b2   :  { %v784_v58 = vadd.f32 %v783_v54, %v771_v56 }
 0x1b3   :  { %vm891_vm9 = vcmp.gt.f32.partialorder %v758_v57, 0.0  ;;  %v897_v62 = vmul.f32 0.01, %v758_v57 }
 0x1b4   :  { %vm892_vm10 = vcmp.gt.f32.partialorder %v784_v58, 0.0  ;;  %v898_v0 = vmul.f32 0.01, %v784_v58 }
 0x1b5   :  { %v903_v1 = vsel %vm891_vm9, %v758_v57, %v897_v62 }
 0x1b6   :  { %v8404_v3 = vpack.c.bf16 %v903_v1, %v903_v1  ;;  %v904_v4 = vsel %vm892_vm10, %v784_v58, %v898_v0  ;;  %v746_v5 = vpop.f32.mrf.mxu3  ;;  %v759_v6 = vpop.f32.mrf.mxu1  ;;  %v5697_v58 = vor.u32 %v7096_v33, %v5694_v44  ;;  %v6017_v1 = vor.u32 %v7176_v46, %v6014_v49  ;;  %v7326_v33 = vld [vmem:[%s11042_s11 + $0xd24] sm:$0xf]  ;;  %v5220_v49 = vld [vmem:[%s11042_s11 + $0x238] sm:$0xf] }
 0x1b7   :  { %v8412_v10 = vpack.c.bf16 %v904_v4, %v904_v4  ;;  %v772_v11 = vpop.f32.mrf.mxu2  ;;  %v785_v12 = vpop.f32.mrf.mxu0  ;;  %v7086_v4 = vld [vmem:[%s11042_s11 + $0x5a4] sm:$0xf]  ;;  %v5654_v5 = vld [vmem:[%s11042_s11 + $0x5c8] sm:$0xf0] }
 0x1b8   :  { %3792 = vmatmul.bf16.vlgmr.msrb.gmra.mxu3 %v8404_v3  ;;  %v7166_v6 = vld [vmem:[%s11042_s11 + $0x824] sm:$0xf]  ;;  %v5657_v12 = vor.u32 %v7086_v4, %v5654_v5  ;;  %v6294_v4 = vld [vmem:[%s11042_s11 + $0xac8] sm:$0xf0] }
 0x1b9   :  { %3805 = vmatmul.bf16.vlgmr.msra.gmra.mxu1 %v8412_v10  ;;  %3901 = vmatpush.bf16.msrb.mxu3 %v6177_v2  ;;  %v6734_v2 = vld [vmem:[%s11042_s11 + $0xe38] sm:$0xf0] }
 0x1ba   :  { %3888 = vmatpush.bf16.msra.mxu1 %v5857_v7  ;;  %v5974_v7 = vld [vmem:[%s11042_s11 + $0x848] sm:$0xf0]  ;;  %v6737_v11 = vor.u32 %v7356_v61, %v6734_v2  ;;  %v7246_v2 = vld [vmem:[%s11042_s11 + $0xaa4] sm:$0xf] }
 0x1bd   :  { %3902 = vmatpush.bf16.msrb.mxu3 %v6137_v15  ;;  %v7346_v15 = vld [vmem:[%s11042_s11 + $0xdc4] sm:$0xf] }
 0x1be   :  { %v796_v24 = vpop.f32.mrf.mxu3  ;;  %v809_v25 = vpop.f32.mrf.mxu1  ;;  %3889 = vmatpush.bf16.msra.mxu1 %v5817_v16  ;;  %v5977_v16 = vor.u32 %v7166_v6, %v5974_v7 }
 0x1bf   :  { %v797_v30 = vadd.f32 %v796_v24, %v327_v19  ;;  %v822_v31 = vpop.f32.mrf.mxu2  ;;  %v835_v32 = vpop.f32.mrf.mxu0  ;;  %v5614_v19 = vld [vmem:[%s11042_s11 + $0x578] sm:$0xf0] }
 0x1c0   :  { %v823_v36 = vadd.f32 %v822_v31, %v328_v22  ;;  %v5934_v22 = vld [vmem:[%s11042_s11 + $0x7f8] sm:$0xf0] }
 0x1c1   :  { %v810_v37 = vadd.f32 %v809_v25, %v797_v30  ;;  %3903 = vmatpush.bf16.msrb.mxu3 %v6097_v23  ;;  %v6417_v23 = vor.u32 %v7276_v13, %v6414_v14  ;;  %v6697_v25 = vor.u32 %v7346_v15, %v6694_v17  ;;  %v5180_v13 = vld [vmem:[%s11042_s11 + $0x1e8] sm:$0xf]  ;;  %v6972_v14 = vld [vmem:[%s11042_s11 + $0x20c] sm:$0xf0]  ;;  %v6297_v17 = vor.u32 %v7246_v2, %v6294_v4 }
 0x1c2   :  { %v836_v41 = vadd.f32 %v835_v32, %v823_v36  ;;  %3890 = vmatpush.bf16.msra.mxu1 %v5777_v26  ;;  %v5617_v26 = vor.u32 %v7076_v18, %v5614_v19  ;;  %v5937_v32 = vor.u32 %v7156_v21, %v5934_v22  ;;  %v5574_v36 = vld [vmem:[%s11042_s11 + $0x528] sm:$0xf0]  ;;  %v5500_v15 = vld [vmem:[%s11042_s11 + $0x468] sm:$0xf]  ;;  %v7236_v19 = vld [vmem:[%s11042_s11 + $0xa54] sm:$0xf]  ;;  %v5181_v21 = vor.u32 %v6972_v14, %v5180_v13 }
 0x1c3   :  { %vm893_vm11 = vcmp.gt.f32.partialorder %v810_v37, 0.0  ;;  %v899_v45 = vmul.f32 0.01, %v810_v37  ;;  %v5577_v46 = vor.u32 %v7066_v35, %v5574_v36  ;;  %v6214_v35 = vld [vmem:[%s11042_s11 + $0xa28] sm:$0xf0] }
 0x1c4   :  { %vm894_vm12 = vcmp.gt.f32.partialorder %v836_v41, 0.0  ;;  %v900_v48 = vmul.f32 0.01, %v836_v41  ;;  %v5100_v36 = vld [vmem:[%s11042_s11 + $0x148] sm:$0xf] }
 0x1c5   :  { %v905_v50 = vsel %vm893_vm11, %v810_v37, %v899_v45  ;;  %3904 = vmatpush.bf16.msrb.mxu3 %v6057_v38  ;;  %v7146_v38 = vld [vmem:[%s11042_s11 + $0x784] sm:$0xf]  ;;  %v6657_v45 = vor.u32 %v7336_v28, %v6654_v34  ;;  %v7142_v28 = vld [vmem:[%s11042_s11 + $0x75c] sm:$0xf0] }
 0x1c6   :  { %v8473_v53 = vpack.c.bf16 %v905_v50, %v905_v50  ;;  %v906_v54 = vsel %vm894_vm12, %v836_v41, %v900_v48  ;;  %v798_v56 = vpop.f32.mrf.mxu3  ;;  %v811_v57 = vpop.f32.mrf.mxu1  ;;  %3891 = vmatpush.bf16.msra.mxu1 %v5737_v42  ;;  %v6377_v41 = vor.u32 %v7266_v47, %v6374_v27  ;;  %v7256_v42 = vld [vmem:[%s11042_s11 + $0xaf4] sm:$0xf]  ;;  %v6614_v48 = vld [vmem:[%s11042_s11 + $0xd48] sm:$0xf0]  ;;  %v6982_v50 = vld [vmem:[%s11042_s11 + $0x25c] sm:$0xf0] }
 0x1c7   :  { %v8484_v62 = vpack.c.bf16 %v906_v54, %v906_v54  ;;  %v824_v63 = vpop.f32.mrf.mxu2  ;;  %v837_v0 = vpop.f32.mrf.mxu0  ;;  %v5540_v54 = vld [vmem:[%s11042_s11 + $0x4b8] sm:$0xf]  ;;  %v7062_v57 = vld [vmem:[%s11042_s11 + $0x4dc] sm:$0xf0]  ;;  %v6337_v59 = vor.u32 %v7256_v42, %v6334_v43  ;;  %v7132_v42 = vld [vmem:[%s11042_s11 + $0x70c] sm:$0xf0] }
 0x1c8   :  { %3818 = vmatmul.bf16.vlgmr.msra.gmra.mxu2 %v8473_v53  ;;  %v7042_v47 = vld [vmem:[%s11042_s11 + $0x43c] sm:$0xf0]  ;;  %v5860_v27 = vld [vmem:[%s11042_s11 + $0x738] sm:$0xf] }
 0x1c9   :  { %3831 = vmatmul.bf16.vlgmr.msra.gmra.mxu0 %v8484_v62  ;;  %3914 = vmatpush.bf16.msra.mxu2 %v6497_v51  ;;  %v6180_v43 = vld [vmem:[%s11042_s11 + $0x9b8] sm:$0xf] }
 0x1ca   :  { %3928 = vmatpush.bf16.msra.mxu0 %v3758_v52  ;;  %3892 = vmatpush.bf16.msra.mxu1 %v5697_v58  ;;  %v5897_v52 = vor.u32 %v7146_v38, %v5894_v39  ;;  %v5861_v38 = vor.u32 %v7142_v28, %v5860_v27  ;;  %v5420_v39 = vld [vmem:[%s11042_s11 + $0x3c8] sm:$0xf]  ;;  %v6912_v28 = vld [vmem:[%s11042_s11 + $0x2c] sm:$0xf0] }
 0x1cb   :  { %3905 = vmatpush.bf16.msrb.mxu3 %v6017_v1  ;;  %v6617_v1 = vor.u32 %v7326_v33, %v6614_v48  ;;  %v7222_v33 = vld [vmem:[%s11042_s11 + $0x9dc] sm:$0xf0]  ;;  %v5060_v48 = vld [vmem:[%s11042_s11 + $0xf8] sm:$0xf]  ;;  %v4940_v27 = vld [vmem:[%s11042_s11 + $0x8] sm:$0xf] }
 0x1cd   :  { %3915 = vmatpush.bf16.msra.mxu2 %v6457_v8  ;;  %v5221_v8 = vor.u32 %v6982_v50, %v5220_v49  ;;  %v6942_v49 = vld [vmem:[%s11042_s11 + $0x11c] sm:$0xf0] }
 0x1ce   :  { %3929 = vmatpush.bf16.msra.mxu0 %v6737_v11  ;;  %v848_v55 = vpop.f32.mrf.mxu1  ;;  %v861_v24 = vpop.f32.mrf.mxu3  ;;  %3893 = vmatpush.bf16.msra.mxu1 %v5657_v12  ;;  %v7316_v11 = vld [vmem:[%s11042_s11 + $0xcd4] sm:$0xf]  ;;  %v6574_v12 = vld [vmem:[%s11042_s11 + $0xcf8] sm:$0xf0] }
 0x1cf   :  { %v849_v29 = vadd.f32 %v848_v55, %v329_v9  ;;  %v874_v30 = vpop.f32.mrf.mxu0  ;;  %v887_v31 = vpop.f32.mrf.mxu2  ;;  %3906 = vmatpush.bf16.msrb.mxu3 %v5977_v16  ;;  %v5541_v9 = vor.u32 %v7062_v57, %v5540_v54  ;;  %v7052_v16 = vld [vmem:[%s11042_s11 + $0x48c] sm:$0xf0]  ;;  %v6577_v18 = vor.u32 %v7316_v11, %v6574_v12  ;;  %v6534_v55 = vld [vmem:[%s11042_s11 + $0xca8] sm:$0xf0]  ;;  %v7022_v54 = vld [vmem:[%s11042_s11 + $0x39c] sm:$0xf0] }
 0x1d0   :  { %v875_v37 = vadd.f32 %v874_v30, %v330_v20  ;;  %v6254_v20 = vld [vmem:[%s11042_s11 + $0xa78] sm:$0xf0]  ;;  %v5501_v22 = vor.u32 %v7052_v16, %v5500_v15  ;;  %v7122_v57 = vld [vmem:[%s11042_s11 + $0x6bc] sm:$0xf0]  ;;  %v6100_v11 = vld [vmem:[%s11042_s11 + $0x918] sm:$0xf] }
 0x1d1   :  { %v862_v40 = vadd.f32 %v861_v24, %v849_v29  ;;  %3916 = vmatpush.bf16.msra.mxu2 %v6417_v23  ;;  %v7306_v23 = vld [vmem:[%s11042_s11 + $0xc84] sm:$0xf]  ;;  %v5140_v24 = vld [vmem:[%s11042_s11 + $0x198] sm:$0xf]  ;;  %v6257_v29 = vor.u32 %v7236_v19, %v6254_v20  ;;  %v7202_v12 = vld [vmem:[%s11042_s11 + $0x93c] sm:$0xf0] }
 0x1d2   :  { %v888_v44 = vadd.f32 %v887_v31, %v875_v37  ;;  %3930 = vmatpush.bf16.msra.mxu0 %v6697_v25  ;;  %3894 = vmatpush.bf16.msra.mxu1 %v5617_v26  ;;  %v6962_v25 = vld [vmem:[%s11042_s11 + $0x1bc] sm:$0xf0]  ;;  %v5460_v26 = vld [vmem:[%s11042_s11 + $0x418] sm:$0xf]  ;;  %v6537_v30 = vor.u32 %v7306_v23, %v6534_v55  ;;  %v7226_v31 = vld [vmem:[%s11042_s11 + $0xa04] sm:$0xf] }
 0x1d3   :  { %vm895_vm13 = vcmp.gt.f32.partialorder %v862_v40, 0.0  ;;  %v901_v51 = vmul.f32 0.01, %v862_v40  ;;  %3907 = vmatpush.bf16.msrb.mxu3 %v5937_v32  ;;  %v5141_v32 = vor.u32 %v6962_v25, %v5140_v24  ;;  %v5461_v34 = vor.u32 %v7042_v47, %v5460_v26  ;;  %v6952_v37 = vld [vmem:[%s11042_s11 + $0x16c] sm:$0xf0] }
 0x1d4   :  { %vm896_vm14 = vcmp.gt.f32.partialorder %v888_v44, 0.0  ;;  %v902_v56 = vmul.f32 0.01, %v888_v44  ;;  %v4980_v15 = vld [vmem:[%s11042_s11 + $0x58] sm:$0xf] }
 0x1d5   :  { %v907_v58 = vsel %vm895_vm13, %v862_v40, %v901_v51  ;;  %3917 = vmatpush.bf16.msra.mxu2 %v6377_v41  ;;  %v7032_v40 = vld [vmem:[%s11042_s11 + $0x3ec] sm:$0xf0]  ;;  %v5820_v41 = vld [vmem:[%s11042_s11 + $0x6e8] sm:$0xf]  ;;  %v6181_v51 = vor.u32 %v7222_v33, %v6180_v43  ;;  %v6922_v16 = vld [vmem:[%s11042_s11 + $0x7c] sm:$0xf0] }
 0x1d6   :  { %v8577_v60 = vpack.c.bf16 %v907_v58, %v907_v58  ;;  %v908_v61 = vsel %vm896_vm14, %v888_v44, %v902_v56  ;;  %3931 = vmatpush.bf16.msra.mxu0 %v6657_v45  ;;  %v850_v63 = vpop.f32.mrf.mxu1  ;;  %v863_v0 = vpop.f32.mrf.mxu3  ;;  %3895 = vmatpush.bf16.msra.mxu1 %v5577_v46  ;;  %v6217_v44 = vor.u32 %v7226_v31, %v6214_v35  ;;  %v5780_v56 = vld [vmem:[%s11042_s11 + $0x698] sm:$0xf]  ;;  %v6140_v58 = vld [vmem:[%s11042_s11 + $0x968] sm:$0xf]  ;;  %v7002_v20 = vld [vmem:[%s11042_s11 + $0x2fc] sm:$0xf0] }
 0x1d7   :  { %v8585_v5 = vpack.c.bf16 %v908_v61, %v908_v61  ;;  %v876_v6 = vpop.f32.mrf.mxu0  ;;  %v889_v7 = vpop.f32.mrf.mxu2  ;;  %3908 = vmatpush.bf16.msrb.mxu3 %v5897_v52  ;;  %v5101_v45 = vor.u32 %v6952_v37, %v5100_v36  ;;  %v5421_v46 = vor.u32 %v7032_v40, %v5420_v39  ;;  %v5821_v50 = vor.u32 %v7132_v42, %v5820_v41  ;;  %v5380_v52 = vld [vmem:[%s11042_s11 + $0x378] sm:$0xf]  ;;  %v5020_v0 = vld [vmem:[%s11042_s11 + $0xa8] sm:$0xf]  ;;  %v7192_v55 = vld [vmem:[%s11042_s11 + $0x8ec] sm:$0xf0] }
 0x1d8   :  { %3844 = vmatmul.bf16.vlgmr.msra.gmra.mxu3 %v8577_v60  ;;  %3870 = vmatmul.bf16.vlgmr.msrb.gmra.mxu2 %v8404_v3  ;;  %v5061_v61 = vor.u32 %v6942_v49, %v5060_v48  ;;  %v5381_v63 = vor.u32 %v7022_v54, %v5380_v52  ;;  %v5781_v2 = vor.u32 %v7122_v57, %v5780_v56  ;;  %v5340_v6 = vld [vmem:[%s11042_s11 + $0x328] sm:$0xf]  ;;  %v7012_v7 = vld [vmem:[%s11042_s11 + $0x34c] sm:$0xf0]  ;;  %v5300_v19 = vld [vmem:[%s11042_s11 + $0x2d8] sm:$0xf] }
 0x1d9   :  { %6810 = vmatmul.msk.bf16.vlgmr.msrb.gmra.mxu1 %vm3749_vm15, %v8585_v5  ;;  %3883 = vmatmul.bf16.vlgmr.msrb.gmra.mxu0 %v8412_v10  ;;  %v5341_v14 = vor.u32 %v7012_v7, %v5340_v6  ;;  %v6060_v23 = vld [vmem:[%s11042_s11 + $0x8c8] sm:$0xf]  ;;  %v7372_v25 = vld [vmem:[%s11042_s11 + $0xe8c] sm:$0x70]  ;;  %v4981_v26 = vor.u32 %v6922_v16, %v4980_v15  ;;  %v5301_v47 = vor.u32 %v7002_v20, %v5300_v19  ;;  %v6020_v36 = vld [vmem:[%s11042_s11 + $0x878] sm:$0xf] }
 0x1da   :  { %3918 = vmatpush.bf16.msra.mxu2 %v6337_v59  ;;  %3932 = vmatpush.bf16.msra.mxu0 %v6617_v1  ;;  %v7212_v59 = vld [vmem:[%s11042_s11 + $0x98c] sm:$0xf0]  ;;  %v6780_v24 = vld [vmem:[%s11042_s11 + $0xe68] sm:$0xf]  ;;  %v7182_v37 = vld [vmem:[%s11042_s11 + $0x89c] sm:$0xf0]  ;;  %v4941_v41 = vor.u32 %v6912_v28, %v4940_v27 }
 0x1db   :  { %3940 = vmatpush.bf16.msrb.mxu1 %v5221_v8  ;;  %3953 = vmatpush.bf16.msra.mxu3 %v5541_v9  ;;  %v6932_v1 = vld [vmem:[%s11042_s11 + $0xcc] sm:$0xf0]  ;;  %v6141_v4 = vor.u32 %v7212_v59, %v6140_v58  ;;  %v5740_v8 = vld [vmem:[%s11042_s11 + $0x648] sm:$0xf]  ;;  %v6500_v39 = vld [vmem:[%s11042_s11 + $0xc38] sm:$0xf]  ;;  %v6021_v33 = vor.u32 %v7182_v37, %v6020_v36 }
 0x1dc   :  { %v7112_v9 = vld [vmem:[%s11042_s11 + $0x66c] sm:$0xf0]  ;;  %v5021_v13 = vor.u32 %v6932_v1, %v5020_v0  ;;  %v5260_v31 = vld [vmem:[%s11042_s11 + $0x288] sm:$0xf]  ;;  %v7302_v40 = vld [vmem:[%s11042_s11 + $0xc5c] sm:$0xf0] }
 0x1dd   :  { %v7092_v35 = vld [vmem:[%s11042_s11 + $0x5cc] sm:$0xf0]  ;;  %v6501_v48 = vor.u32 %v7302_v40, %v6500_v39  ;;  %v6740_v54 = vld [vmem:[%s11042_s11 + $0xe18] sm:$0xf]  ;;  %v7362_v56 = vld [vmem:[%s11042_s11 + $0xe3c] sm:$0xf0] }
 0x1de   :  { %3919 = vmatpush.bf16.msra.mxu2 %v6297_v17  ;;  %3933 = vmatpush.bf16.msra.mxu0 %v6577_v18  ;;  %v5741_v17 = vor.u32 %v7112_v9, %v5740_v8  ;;  %v6101_v18 = vor.u32 %v7202_v12, %v6100_v11  ;;  %v7292_v52 = vld [vmem:[%s11042_s11 + $0xc0c] sm:$0xf0]  ;;  %v5580_v59 = vld [vmem:[%s11042_s11 + $0x508] sm:$0xf]  ;;  %v6741_v0 = vor.u32 %v7362_v56, %v6740_v54  ;;  %v5940_v1 = vld [vmem:[%s11042_s11 + $0x7d8] sm:$0xf] }
 0x1df   :  { %3941 = vmatpush.bf16.msrb.mxu1 %v5181_v21  ;;  %3954 = vmatpush.bf16.msra.mxu3 %v5501_v22  ;;  %v5700_v21 = vld [vmem:[%s11042_s11 + $0x5f8] sm:$0xf]  ;;  %v7102_v22 = vld [vmem:[%s11042_s11 + $0x61c] sm:$0xf0]  ;;  %v6700_v7 = vld [vmem:[%s11042_s11 + $0xdc8] sm:$0xf] }
 0x1e0   :  { %v7282_v6 = vld [vmem:[%s11042_s11 + $0xbbc] sm:$0xf0]  ;;  %v7352_v8 = vld [vmem:[%s11042_s11 + $0xdec] sm:$0xf0]  ;;  %v6977_v9 = vld [vmem:[%s11042_s11 + $0x23c] sm:$0xf] }
 0x1e1   :  { %v5222_v11 = vld [vmem:[%s11042_s11 + $0x260] sm:$0xf0]  ;;  %v6701_v16 = vor.u32 %v7352_v8, %v6700_v7  ;;  %v7272_v19 = vld [vmem:[%s11042_s11 + $0xb6c] sm:$0xf0]  ;;  %v6340_v28 = vld [vmem:[%s11042_s11 + $0xaf8] sm:$0xf] }
 0x1e2   :  { %3920 = vmatpush.bf16.msra.mxu2 %v6257_v29  ;;  %3934 = vmatpush.bf16.msra.mxu0 %v6537_v30  ;;  %v5701_v29 = vor.u32 %v7102_v22, %v5700_v21  ;;  %v6061_v30 = vor.u32 %v7192_v55, %v6060_v23  ;;  %v5225_v20 = vor.u32 %v6977_v9, %v5222_v11  ;;  %v6660_v21 = vld [vmem:[%s11042_s11 + $0xd78] sm:$0xf]  ;;  %v7342_v22 = vld [vmem:[%s11042_s11 + $0xd9c] sm:$0xf0]  ;;  %v6967_v23 = vld [vmem:[%s11042_s11 + $0x1ec] sm:$0xf] }
 0x1e3   :  { %3942 = vmatpush.bf16.msrb.mxu1 %v5141_v32  ;;  %3955 = vmatpush.bf16.msra.mxu3 %v5461_v34  ;;  %v6992_v32 = vld [vmem:[%s11042_s11 + $0x2ac] sm:$0xf0]  ;;  %v5660_v34 = vld [vmem:[%s11042_s11 + $0x5a8] sm:$0xf]  ;;  %v5182_v55 = vld [vmem:[%s11042_s11 + $0x210] sm:$0xf0]  ;;  %v6661_v27 = vor.u32 %v7342_v22, %v6660_v21 }
 0x1e4   :  { %v5261_v42 = vor.u32 %v6992_v32, %v5260_v31  ;;  %v5661_v43 = vor.u32 %v7092_v35, %v5660_v34  ;;  %v6620_v32 = vld [vmem:[%s11042_s11 + $0xd28] sm:$0xf]  ;;  %v7332_v34 = vld [vmem:[%s11042_s11 + $0xd4c] sm:$0xf0]  ;;  %v6957_v35 = vld [vmem:[%s11042_s11 + $0x19c] sm:$0xf] }
 0x1e5   :  { %v5142_v36 = vld [vmem:[%s11042_s11 + $0x1c0] sm:$0xf0]  ;;  %v7047_v37 = vld [vmem:[%s11042_s11 + $0x46c] sm:$0xf]  ;;  %v6621_v40 = vor.u32 %v7332_v34, %v6620_v32  ;;  %v6260_v54 = vld [vmem:[%s11042_s11 + $0xa58] sm:$0xf] }
 0x1e6   :  { %3966 = vmatpush.bf16.msrb.mxu0 %v5861_v38  ;;  %3921 = vmatpush.bf16.msra.mxu2 %v6217_v44  ;;  %v6781_v38 = vor.u32 %v7372_v25, %v6780_v24  ;;  %v5620_v44 = vld [vmem:[%s11042_s11 + $0x558] sm:$0xf]  ;;  %v7057_v24 = vld [vmem:[%s11042_s11 + $0x4bc] sm:$0xf]  ;;  %v5542_v25 = vld [vmem:[%s11042_s11 + $0x4e0] sm:$0xf0] }
 0x1e7   :  { %3943 = vmatpush.bf16.msrb.mxu1 %v5101_v45  ;;  %3956 = vmatpush.bf16.msra.mxu3 %v5421_v46  ;;  %v7082_v45 = vld [vmem:[%s11042_s11 + $0x57c] sm:$0xf0]  ;;  %v5980_v46 = vld [vmem:[%s11042_s11 + $0x828] sm:$0xf]  ;;  %v5545_v31 = vor.u32 %v7057_v24, %v5542_v25  ;;  %v7217_v21 = vld [vmem:[%s11042_s11 + $0x9bc] sm:$0xf] }
 0x1e8   :  { %3909 = vmatmul.bf16.vlgmr.msrb.gmra.mxu3 %v8484_v62  ;;  %v3761_v49 = vsel %vm3753_vm8, %v6781_v38, 0  ;;  %v5621_v57 = vor.u32 %v7082_v45, %v5620_v44  ;;  %v5502_v38 = vld [vmem:[%s11042_s11 + $0x490] sm:$0xf0]  ;;  %v6580_v44 = vld [vmem:[%s11042_s11 + $0xcd8] sm:$0xf] }
 0x1e9   :  { %3896 = vmatmul.bf16.vlgmr.msra.gmra.mxu1 %v8473_v53  ;;  %3922 = vmatmul.bf16.vlgmr.msra.gmra.mxu2 %v8577_v60  ;;  %v7322_v45 = vld [vmem:[%s11042_s11 + $0xcfc] sm:$0xf0]  ;;  %v6220_v9 = vld [vmem:[%s11042_s11 + $0xa08] sm:$0xf]  ;;  %v6182_v22 = vld [vmem:[%s11042_s11 + $0x9e0] sm:$0xf0] }
 0x1ea   :  { %3967 = vmatpush.bf16.msrb.mxu0 %v5821_v50  ;;  %3979 = vmatpush.bf16.msrb.mxu2 %v6181_v51  ;;  %v7172_v50 = vld [vmem:[%s11042_s11 + $0x84c] sm:$0xf0]  ;;  %v6460_v51 = vld [vmem:[%s11042_s11 + $0xbe8] sm:$0xf]  ;;  %v7242_v56 = vld [vmem:[%s11042_s11 + $0xa7c] sm:$0xf0] }
 0x1eb   :  { %6811 = vmatmul.msk.bf16.vlgmr.msra.gmra.mxu0 %vm3749_vm15, %v8585_v5  ;;  %3944 = vmatpush.bf16.msrb.mxu1 %v5061_v61  ;;  %v5981_v58 = vor.u32 %v7172_v50, %v5980_v46  ;;  %v7072_v61 = vld [vmem:[%s11042_s11 + $0x52c] sm:$0xf0]  ;;  %v6947_v46 = vld [vmem:[%s11042_s11 + $0x14c] sm:$0xf]  ;;  %v5462_v50 = vld [vmem:[%s11042_s11 + $0x440] sm:$0xf0]  ;;  %v6261_v7 = vor.u32 %v7242_v56, %v6260_v54 }
 0x1ec   :  { %3957 = vmatpush.bf16.msra.mxu3 %v5381_v63  ;;  %v6461_v63 = vor.u32 %v7292_v52, %v6460_v51  ;;  %v5581_v12 = vor.u32 %v7072_v61, %v5580_v59  ;;  %v6581_v52 = vor.u32 %v7322_v45, %v6580_v44  ;;  %v6540_v59 = vld [vmem:[%s11042_s11 + $0xc88] sm:$0xf]  ;;  %v7312_v61 = vld [vmem:[%s11042_s11 + $0xcac] sm:$0xf0]  ;;  %v6917_v25 = vld [vmem:[%s11042_s11 + $0x5c] sm:$0xf] }
 0x1ed   :  { %v6541_v8 = vor.u32 %v7312_v61, %v6540_v59  ;;  %v7207_v32 = vld [vmem:[%s11042_s11 + $0x96c] sm:$0xf]  ;;  %v6142_v34 = vld [vmem:[%s11042_s11 + $0x990] sm:$0xf0]  ;;  %v7197_v44 = vld [vmem:[%s11042_s11 + $0x91c] sm:$0xf] }
 0x1ee   :  { %3968 = vmatpush.bf16.msrb.mxu0 %v5781_v2  ;;  %3980 = vmatpush.bf16.msrb.mxu2 %v6141_v4  ;;  %v7162_v2 = vld [vmem:[%s11042_s11 + $0x7fc] sm:$0xf0]  ;;  %v6420_v4 = vld [vmem:[%s11042_s11 + $0xb98] sm:$0xf]  ;;  %v6102_v45 = vld [vmem:[%s11042_s11 + $0x940] sm:$0xf0] }
 0x1ef   :  { %3945 = vmatpush.bf16.msrb.mxu1 %v5021_v13  ;;  %v5941_v13 = vor.u32 %v7162_v2, %v5940_v1  ;;  %v6421_v15 = vor.u32 %v7282_v6, %v6420_v4  ;;  %v7027_v1 = vld [vmem:[%s11042_s11 + $0x3cc] sm:$0xf]  ;;  %v5422_v2 = vld [vmem:[%s11042_s11 + $0x3f0] sm:$0xf0]  ;;  %v7137_v4 = vld [vmem:[%s11042_s11 + $0x73c] sm:$0xf]  ;;  %v6105_v56 = vor.u32 %v7197_v44, %v6102_v45 }
 0x1f0   :  { %3958 = vmatpush.bf16.msra.mxu3 %v5341_v14  ;;  %v5900_v14 = vld [vmem:[%s11042_s11 + $0x788] sm:$0xf]  ;;  %v5862_v6 = vld [vmem:[%s11042_s11 + $0x760] sm:$0xf0]  ;;  %v7097_v59 = vld [vmem:[%s11042_s11 + $0x5fc] sm:$0xf] }
 0x1f1   :  { %v6983_v44 = vld [vmem:[%s11042_s11 + $0x264] sm:$0xf0] }
 0x1f2   :  { %3969 = vmatpush.bf16.msrb.mxu0 %v5741_v17  ;;  %3981 = vmatpush.bf16.msrb.mxu2 %v6101_v18  ;;  %v7152_v17 = vld [vmem:[%s11042_s11 + $0x7ac] sm:$0xf0]  ;;  %v6380_v18 = vld [vmem:[%s11042_s11 + $0xb48] sm:$0xf] }
 0x1f3   :  { %3946 = vmatpush.bf16.msrb.mxu1 %v4981_v26  ;;  %v5901_v26 = vor.u32 %v7152_v17, %v5900_v14  ;;  %v6927_v14 = vld [vmem:[%s11042_s11 + $0xac] sm:$0xf]  ;;  %v7017_v17 = vld [vmem:[%s11042_s11 + $0x37c] sm:$0xf] }
 0x1f4   :  { %3959 = vmatpush.bf16.msra.mxu3 %v5301_v47  ;;  %v6381_v47 = vor.u32 %v7272_v19, %v6380_v18  ;;  %v5382_v18 = vld [vmem:[%s11042_s11 + $0x3a0] sm:$0xf0]  ;;  %v7127_v19 = vld [vmem:[%s11042_s11 + $0x6ec] sm:$0xf] }
 0x1f5   :  { %v5385_v24 = vor.u32 %v7017_v17, %v5382_v18  ;;  %v6422_v17 = vld [vmem:[%s11042_s11 + $0xbc0] sm:$0xf0] }
 0x1f6   :  { %3970 = vmatpush.bf16.msrb.mxu0 %v5701_v29  ;;  %3982 = vmatpush.bf16.msrb.mxu2 %v6061_v30  ;;  %v7262_v29 = vld [vmem:[%s11042_s11 + $0xb1c] sm:$0xf0]  ;;  %v5185_v30 = vor.u32 %v6967_v23, %v5182_v55 }
 0x1f7   :  { %3947 = vmatpush.bf16.msrb.mxu1 %v4941_v41  ;;  %v6341_v39 = vor.u32 %v7262_v29, %v6340_v28  ;;  %v6300_v41 = vld [vmem:[%s11042_s11 + $0xaa8] sm:$0xf]  ;;  %v7007_v28 = vld [vmem:[%s11042_s11 + $0x32c] sm:$0xf]  ;;  %v5342_v29 = vld [vmem:[%s11042_s11 + $0x350] sm:$0xf0] }
 0x1f8   :  { %3960 = vmatpush.bf16.msra.mxu3 %v5261_v42  ;;  %v7252_v42 = vld [vmem:[%s11042_s11 + $0xacc] sm:$0xf0] }
 0x1f9   :  { %v6301_v51 = vor.u32 %v7252_v42, %v6300_v41  ;;  %v6997_v41 = vld [vmem:[%s11042_s11 + $0x2dc] sm:$0xf]  ;;  %v5302_v42 = vld [vmem:[%s11042_s11 + $0x300] sm:$0xf0] }
 0x1fa   :  { %3971 = vmatpush.bf16.msrb.mxu0 %v5661_v43  ;;  %3983 = vmatpush.bf16.msrb.mxu2 %v6021_v33  ;;  %v5145_v43 = vor.u32 %v6957_v35, %v5142_v36  ;;  %v5505_v33 = vor.u32 %v7047_v37, %v5502_v38  ;;  %v5345_v36 = vor.u32 %v7007_v28, %v5342_v29  ;;  %v6907_v37 = vld [vmem:[%s11042_s11 + $0xc] sm:$0xf]  ;;  %v4942_v38 = vld [vmem:[%s11042_s11 + $0x30] sm:$0xf0] }
 0x1fb   :  { %3992 = vmatpush.bf16.msra.mxu1 %v6501_v48  ;;  %3961 = vmatmul.bf16.vlgmr.msra.gmra.mxu3 %v8412_v10  ;;  %v5102_v48 = vld [vmem:[%s11042_s11 + $0x170] sm:$0xf0]  ;;  %v7347_v29 = vld [vmem:[%s11042_s11 + $0xdcc] sm:$0xf] }
 0x1fc   :  { %4006 = vmatpush.bf16.msrb.mxu3 %v3761_v49  ;;  %3948 = vmatmul.bf16.vlgmr.msrb.gmra.mxu1 %v8404_v3  ;;  %v7037_v49 = vld [vmem:[%s11042_s11 + $0x41c] sm:$0xf]  ;;  %v6382_v28 = vld [vmem:[%s11042_s11 + $0xb70] sm:$0xf0] }
 0x1fe   :  { %3972 = vmatpush.bf16.msrb.mxu0 %v5621_v57  ;;  %3984 = vmatpush.bf16.msrb.mxu2 %v5981_v58  ;;  %v5105_v57 = vor.u32 %v6947_v46, %v5102_v48  ;;  %v5465_v58 = vor.u32 %v7037_v49, %v5462_v50  ;;  %v7297_v46 = vld [vmem:[%s11042_s11 + $0xc3c] sm:$0xf]  ;;  %v6502_v48 = vld [vmem:[%s11042_s11 + $0xc60] sm:$0xf0]  ;;  %v4945_v49 = vor.u32 %v6907_v37, %v4942_v38 }
 0x1ff   :  { %3993 = vmatpush.bf16.msra.mxu1 %v6461_v63  ;;  %v6937_v63 = vld [vmem:[%s11042_s11 + $0xfc] sm:$0xf]  ;;  %v5305_v50 = vor.u32 %v6997_v41, %v5302_v42  ;;  %v6505_v61 = vor.u32 %v7297_v46, %v6502_v48  ;;  %v6342_v41 = vld [vmem:[%s11042_s11 + $0xb20] sm:$0xf0]  ;;  %v7147_v48 = vld [vmem:[%s11042_s11 + $0x78c] sm:$0xf] }
 0x200   :  { %4007 = vmatpush.bf16.msrb.mxu3 %v6741_v0  ;;  %v5062_v0 = vld [vmem:[%s11042_s11 + $0x120] sm:$0xf0]  ;;  %v7157_v38 = vld [vmem:[%s11042_s11 + $0x7dc] sm:$0xf] }
 0x201   :  { %v5065_v11 = vor.u32 %v6937_v63, %v5062_v0  ;;  %v5702_v63 = vld [vmem:[%s11042_s11 + $0x620] sm:$0xf0]  ;;  %v7187_v0 = vld [vmem:[%s11042_s11 + $0x8cc] sm:$0xf]  ;;  %v7337_v42 = vld [vmem:[%s11042_s11 + $0xd7c] sm:$0xf] }
 0x202   :  { %3973 = vmatpush.bf16.msrb.mxu0 %v5581_v12  ;;  %3985 = vmatpush.bf16.msrb.mxu2 %v5941_v13  ;;  %v5425_v12 = vor.u32 %v7027_v1, %v5422_v2  ;;  %v7232_v13 = vld [vmem:[%s11042_s11 + $0xa2c] sm:$0xf0]  ;;  %v6062_v1 = vld [vmem:[%s11042_s11 + $0x8f0] sm:$0xf0]  ;;  %v7287_v2 = vld [vmem:[%s11042_s11 + $0xbec] sm:$0xf] }
 0x203   :  { %3994 = vmatpush.bf16.msra.mxu1 %v6421_v15  ;;  %v5022_v15 = vld [vmem:[%s11042_s11 + $0xd0] sm:$0xf0]  ;;  %v6221_v23 = vor.u32 %v7232_v13, %v6220_v9  ;;  %v6065_v9 = vor.u32 %v7187_v0, %v6062_v1  ;;  %v7177_v13 = vld [vmem:[%s11042_s11 + $0x87c] sm:$0xf]  ;;  %v7063_v0 = vld [vmem:[%s11042_s11 + $0x4e4] sm:$0xf0] }
 0x204   :  { %4008 = vmatpush.bf16.msrb.mxu3 %v6701_v16  ;;  %v5865_v16 = vor.u32 %v7137_v4, %v5862_v6  ;;  %v5025_v55 = vor.u32 %v6927_v14, %v5022_v15  ;;  %v6462_v4 = vld [vmem:[%s11042_s11 + $0xc10] sm:$0xf0]  ;;  %v6022_v15 = vld [vmem:[%s11042_s11 + $0x8a0] sm:$0xf0] }
 0x205   :  { %3974 = vmatmul.bf16.vlgmr.msrb.gmra.mxu0 %v8473_v53  ;;  %v6465_v14 = vor.u32 %v7287_v2, %v6462_v4 }
 0x206   :  { %4018 = vmatpush.bf16.msra.mxu0 %v5225_v20  ;;  %3986 = vmatpush.bf16.msrb.mxu2 %v5901_v26  ;;  %v5822_v20 = vld [vmem:[%s11042_s11 + $0x710] sm:$0xf0]  ;;  %v4982_v26 = vld [vmem:[%s11042_s11 + $0x80] sm:$0xf0] }
 0x207   :  { %3995 = vmatpush.bf16.msra.mxu1 %v6381_v47  ;;  %v5825_v47 = vor.u32 %v7127_v19, %v5822_v20  ;;  %v4985_v35 = vor.u32 %v6917_v25, %v4982_v26  ;;  %v7357_v19 = vld [vmem:[%s11042_s11 + $0xe1c] sm:$0xf]  ;;  %v6742_v20 = vld [vmem:[%s11042_s11 + $0xe40] sm:$0xf0]  ;;  %v7167_v26 = vld [vmem:[%s11042_s11 + $0x82c] sm:$0xf] }
 0x208   :  { %4009 = vmatpush.bf16.msrb.mxu3 %v6661_v27  ;;  %v6185_v27 = vor.u32 %v7217_v21, %v6182_v22  ;;  %v6025_v22 = vor.u32 %v7177_v13, %v6022_v15  ;;  %v6745_v25 = vor.u32 %v7357_v19, %v6742_v20  ;;  %v5148_v13 = vld [vmem:[%s11042_s11 + $0x1a0] sm:$0xf]  ;;  %v5508_v15 = vld [vmem:[%s11042_s11 + $0x470] sm:$0xf]  ;;  %v7227_v19 = vld [vmem:[%s11042_s11 + $0xa0c] sm:$0xf] }
 0x209   :  { %3987 = vmatmul.bf16.vlgmr.msrb.gmra.mxu2 %v8484_v62  ;;  %v6222_v20 = vld [vmem:[%s11042_s11 + $0xa30] sm:$0xf0] }
 0x20a   :  { %4019 = vmatpush.bf16.msra.mxu0 %v5185_v30  ;;  %4031 = vmatpush.bf16.msra.mxu2 %v5545_v31  ;;  %v7117_v30 = vld [vmem:[%s11042_s11 + $0x69c] sm:$0xf]  ;;  %v5782_v31 = vld [vmem:[%s11042_s11 + $0x6c0] sm:$0xf0] }
 0x20b   :  { %3996 = vmatpush.bf16.msra.mxu1 %v6341_v39  ;;  %v5785_v39 = vor.u32 %v7117_v30, %v5782_v31  ;;  %v6702_v30 = vld [vmem:[%s11042_s11 + $0xdf0] sm:$0xf0] }
 0x20c   :  { %4010 = vmatpush.bf16.msrb.mxu3 %v6621_v40  ;;  %v6145_v40 = vor.u32 %v7207_v32, %v6142_v34  ;;  %v7067_v34 = vld [vmem:[%s11042_s11 + $0x50c] sm:$0xf]  ;;  %v6705_v37 = vor.u32 %v7347_v29, %v6702_v30  ;;  %v7143_v29 = vld [vmem:[%s11042_s11 + $0x764] sm:$0xf0]  ;;  %v6188_v30 = vld [vmem:[%s11042_s11 + $0x9c0] sm:$0xf] }
 0x20e   :  { %4020 = vmatpush.bf16.msra.mxu0 %v5145_v43  ;;  %4032 = vmatpush.bf16.msra.mxu2 %v5505_v33  ;;  %v7107_v43 = vld [vmem:[%s11042_s11 + $0x64c] sm:$0xf]  ;;  %v5742_v33 = vld [vmem:[%s11042_s11 + $0x670] sm:$0xf0] }
 0x20f   :  { %3997 = vmatpush.bf16.msra.mxu1 %v6301_v51  ;;  %v7367_v51 = vld [vmem:[%s11042_s11 + $0xe6c] sm:$0xf]  ;;  %v5745_v54 = vor.u32 %v7107_v43, %v5742_v33  ;;  %v6662_v43 = vld [vmem:[%s11042_s11 + $0xda0] sm:$0xf0]  ;;  %v5228_v33 = vld [vmem:[%s11042_s11 + $0x240] sm:$0xf] }
 0x210   :  { %4011 = vmatpush.bf16.msrb.mxu3 %v6581_v52  ;;  %v6782_v52 = vld [vmem:[%s11042_s11 + $0xe90] sm:$0x70] }
 0x211   :  { %v6785_v6 = vor.u32 %v7367_v51, %v6782_v52  ;;  %v5902_v51 = vld [vmem:[%s11042_s11 + $0x7b0] sm:$0xf0]  ;;  %v7247_v52 = vld [vmem:[%s11042_s11 + $0xaac] sm:$0xf] }
 0x212   :  { %4021 = vmatpush.bf16.msra.mxu0 %v5105_v57  ;;  %4033 = vmatpush.bf16.msra.mxu2 %v5465_v58  ;;  %v6987_v57 = vld [vmem:[%s11042_s11 + $0x28c] sm:$0xf]  ;;  %v5262_v58 = vld [vmem:[%s11042_s11 + $0x2b0] sm:$0xf0]  ;;  %v5905_v1 = vor.u32 %v7147_v48, %v5902_v51  ;;  %v6933_v51 = vld [vmem:[%s11042_s11 + $0xd4] sm:$0xf0] }
 0x213   :  { %3998 = vmatpush.bf16.msra.mxu1 %v6261_v7  ;;  %v5265_v7 = vor.u32 %v6987_v57, %v5262_v58  ;;  %v3764_v18 = vsel %vm3753_vm8, %v6785_v6, 0  ;;  %v7327_v57 = vld [vmem:[%s11042_s11 + $0xd2c] sm:$0xf]  ;;  %v6622_v58 = vld [vmem:[%s11042_s11 + $0xd50] sm:$0xf0] }
 0x214   :  { %4012 = vmatpush.bf16.msrb.mxu3 %v6541_v8  ;;  %v5705_v8 = vor.u32 %v7097_v59, %v5702_v63  ;;  %v5188_v59 = vld [vmem:[%s11042_s11 + $0x1f0] sm:$0xf]  ;;  %v5548_v63 = vld [vmem:[%s11042_s11 + $0x4c0] sm:$0xf]  ;;  %v6625_v4 = vor.u32 %v7327_v57, %v6622_v58  ;;  %v7237_v6 = vld [vmem:[%s11042_s11 + $0xa5c] sm:$0xf] }
 0x215   :  { %v5388_v57 = vld [vmem:[%s11042_s11 + $0x380] sm:$0xf]  ;;  %v7023_v58 = vld [vmem:[%s11042_s11 + $0x3a4] sm:$0xf0] }
 0x216   :  { %4022 = vmatpush.bf16.msra.mxu0 %v5065_v11  ;;  %4034 = vmatpush.bf16.msra.mxu2 %v5425_v12  ;;  %v7087_v11 = vld [vmem:[%s11042_s11 + $0x5ac] sm:$0xf]  ;;  %v5662_v12 = vld [vmem:[%s11042_s11 + $0x5d0] sm:$0xf0] }
 0x217   :  { %6812 = vmatmul.msk.bf16.vlgmr.msrb.gmra.mxu3 %vm3749_vm15, %v8585_v5  ;;  %3999 = vmatpush.bf16.msra.mxu1 %v6221_v23  ;;  %v5665_v21 = vor.u32 %v7087_v11, %v5662_v12  ;;  %v7077_v23 = vld [vmem:[%s11042_s11 + $0x55c] sm:$0xf]  ;;  %v6582_v12 = vld [vmem:[%s11042_s11 + $0xd00] sm:$0xf0] }
 0x218   :  { %4044 = vmatpush.bf16.msra.mxu3 %v5865_v16  ;;  %v7277_v16 = vld [vmem:[%s11042_s11 + $0xb9c] sm:$0xf] }
 0x219   :  { %v7317_v11 = vld [vmem:[%s11042_s11 + $0xcdc] sm:$0xf] }
 0x21a   :  { %4023 = vmatpush.bf16.msra.mxu0 %v5025_v55  ;;  %4035 = vmatpush.bf16.msra.mxu2 %v5385_v24  ;;  %v5622_v55 = vld [vmem:[%s11042_s11 + $0x580] sm:$0xf0]  ;;  %v6425_v24 = vor.u32 %v7277_v16, %v6422_v17  ;;  %v7053_v16 = vld [vmem:[%s11042_s11 + $0x494] sm:$0xf0] }
 0x21b   :  { %4057 = vmatpush.bf16.msrb.mxu1 %v6185_v27  ;;  %v7267_v27 = vld [vmem:[%s11042_s11 + $0xb4c] sm:$0xf]  ;;  %v5625_v31 = vor.u32 %v7077_v23, %v5622_v55  ;;  %v5509_v23 = vor.u32 %v7053_v16, %v5508_v15  ;;  %v6542_v55 = vld [vmem:[%s11042_s11 + $0xcb0] sm:$0xf0]  ;;  %v6068_v15 = vld [vmem:[%s11042_s11 + $0x8d0] sm:$0xf] }
 0x21c   :  { %4045 = vmatpush.bf16.msra.mxu3 %v5825_v47  ;;  %4000 = vmatmul.bf16.vlgmr.msra.gmra.mxu1 %v8577_v60  ;;  %v5982_v47 = vld [vmem:[%s11042_s11 + $0x850] sm:$0xf0]  ;;  %v7193_v16 = vld [vmem:[%s11042_s11 + $0x8f4] sm:$0xf0] }
 0x21d   :  { %v5985_v32 = vor.u32 %v7167_v26, %v5982_v47  ;;  %v5468_v47 = vld [vmem:[%s11042_s11 + $0x420] sm:$0xf] }
 0x21e   :  { %4024 = vmatpush.bf16.msra.mxu0 %v4985_v35  ;;  %4036 = vmatpush.bf16.msra.mxu2 %v5345_v36  ;;  %v5582_v35 = vld [vmem:[%s11042_s11 + $0x530] sm:$0xf0]  ;;  %v6385_v36 = vor.u32 %v7267_v27, %v6382_v28  ;;  %v7043_v27 = vld [vmem:[%s11042_s11 + $0x444] sm:$0xf0]  ;;  %v5868_v28 = vld [vmem:[%s11042_s11 + $0x740] sm:$0xf] }
 0x21f   :  { %4058 = vmatpush.bf16.msrb.mxu1 %v6145_v40  ;;  %v7257_v40 = vld [vmem:[%s11042_s11 + $0xafc] sm:$0xf]  ;;  %v5585_v45 = vor.u32 %v7067_v34, %v5582_v35 }
 0x220   :  { %4046 = vmatpush.bf16.msra.mxu3 %v5785_v39  ;;  %v5942_v39 = vld [vmem:[%s11042_s11 + $0x800] sm:$0xf0] }
 0x221   :  { %v5945_v46 = vor.u32 %v7157_v38, %v5942_v39  ;;  %v6943_v38 = vld [vmem:[%s11042_s11 + $0x124] sm:$0xf0]  ;;  %v5869_v39 = vor.u32 %v7143_v29, %v5868_v28  ;;  %v6508_v29 = vld [vmem:[%s11042_s11 + $0xc40] sm:$0xf] }
 0x222   :  { %4025 = vmatpush.bf16.msra.mxu0 %v4945_v49  ;;  %4037 = vmatpush.bf16.msra.mxu2 %v5305_v50  ;;  %v6345_v49 = vor.u32 %v7257_v40, %v6342_v41  ;;  %v6665_v50 = vor.u32 %v7337_v42, %v6662_v43  ;;  %v5428_v41 = vld [vmem:[%s11042_s11 + $0x3d0] sm:$0xf]  ;;  %v7033_v42 = vld [vmem:[%s11042_s11 + $0x3f4] sm:$0xf0]  ;;  %v7183_v28 = vld [vmem:[%s11042_s11 + $0x8a4] sm:$0xf0] }
 0x223   :  { %4059 = vmatpush.bf16.msrb.mxu1 %v6105_v56  ;;  %v5229_v56 = vor.u32 %v6983_v44, %v5228_v33  ;;  %v5828_v43 = vld [vmem:[%s11042_s11 + $0x6f0] sm:$0xf]  ;;  %v7133_v44 = vld [vmem:[%s11042_s11 + $0x714] sm:$0xf0] }
 0x224   :  { %4047 = vmatpush.bf16.msra.mxu3 %v5745_v54  ;;  %v6302_v54 = vld [vmem:[%s11042_s11 + $0xad0] sm:$0xf0] }
 0x225   :  { %4026 = vmatmul.bf16.vlgmr.msra.gmra.mxu0 %v8404_v3  ;;  %v6305_v2 = vor.u32 %v7247_v52, %v6302_v54  ;;  %v5829_v52 = vor.u32 %v7133_v44, %v5828_v43  ;;  %v7093_v44 = vld [vmem:[%s11042_s11 + $0x5d4] sm:$0xf0] }
 0x226   :  { %4070 = vmatpush.bf16.msrb.mxu0 %v6505_v61  ;;  %4038 = vmatpush.bf16.msra.mxu2 %v5265_v7  ;;  %v6973_v61 = vld [vmem:[%s11042_s11 + $0x214] sm:$0xf0]  ;;  %v6262_v7 = vld [vmem:[%s11042_s11 + $0xa80] sm:$0xf0] }
 0x227   :  { %4060 = vmatpush.bf16.msrb.mxu1 %v6065_v9  ;;  %v5549_v9 = vor.u32 %v7063_v0, %v5548_v63  ;;  %v6265_v17 = vor.u32 %v7237_v6, %v6262_v7  ;;  %v6108_v63 = vld [vmem:[%s11042_s11 + $0x920] sm:$0xf]  ;;  %v7203_v0 = vld [vmem:[%s11042_s11 + $0x944] sm:$0xf0] }
 0x228   :  { %4048 = vmatpush.bf16.msra.mxu3 %v5705_v8  ;;  %v5189_v8 = vor.u32 %v6973_v61, %v5188_v59  ;;  %v5788_v59 = vld [vmem:[%s11042_s11 + $0x6a0] sm:$0xf]  ;;  %v7123_v61 = vld [vmem:[%s11042_s11 + $0x6c4] sm:$0xf0] }
 0x229   :  { %4039 = vmatmul.bf16.vlgmr.msra.gmra.mxu2 %v8412_v10  ;;  %v6923_v6 = vld [vmem:[%s11042_s11 + $0x84] sm:$0xf0]  ;;  %v5789_v7 = vor.u32 %v7123_v61, %v5788_v59  ;;  %v5948_v61 = vld [vmem:[%s11042_s11 + $0x7e0] sm:$0xf] }
 0x22a   :  { %4071 = vmatpush.bf16.msrb.mxu0 %v6465_v14  ;;  %4084 = vmatpush.bf16.msrb.mxu2 %v3764_v18  ;;  %v6963_v14 = vld [vmem:[%s11042_s11 + $0x1c4] sm:$0xf0]  ;;  %v6585_v18 = vor.u32 %v7317_v11, %v6582_v12  ;;  %v7013_v11 = vld [vmem:[%s11042_s11 + $0x354] sm:$0xf0]  ;;  %v5748_v12 = vld [vmem:[%s11042_s11 + $0x650] sm:$0xf] }
 0x22b   :  { %4061 = vmatpush.bf16.msrb.mxu1 %v6025_v22  ;;  %v5149_v22 = vor.u32 %v6963_v14, %v5148_v13  ;;  %v7113_v14 = vld [vmem:[%s11042_s11 + $0x674] sm:$0xf0]  ;;  %v7083_v59 = vld [vmem:[%s11042_s11 + $0x584] sm:$0xf0] }
 0x22c   :  { %4049 = vmatpush.bf16.msra.mxu3 %v5665_v21  ;;  %v7307_v21 = vld [vmem:[%s11042_s11 + $0xc8c] sm:$0xf] }
 0x22d   :  { %v6545_v34 = vor.u32 %v7307_v21, %v6542_v55  ;;  %v5308_v21 = vld [vmem:[%s11042_s11 + $0x2e0] sm:$0xf] }
 0x22e   :  { %4072 = vmatpush.bf16.msrb.mxu0 %v6425_v24  ;;  %4085 = vmatpush.bf16.msrb.mxu2 %v6745_v25  ;;  %v5108_v24 = vld [vmem:[%s11042_s11 + $0x150] sm:$0xf]  ;;  %v6953_v25 = vld [vmem:[%s11042_s11 + $0x174] sm:$0xf0] }
 0x22f   :  { %4062 = vmatpush.bf16.msrb.mxu1 %v5985_v32  ;;  %v6225_v32 = vor.u32 %v7227_v19, %v6222_v20  ;;  %v5109_v35 = vor.u32 %v6953_v25, %v5108_v24  ;;  %v4948_v19 = vld [vmem:[%s11042_s11 + $0x10] sm:$0xf]  ;;  %v6913_v20 = vld [vmem:[%s11042_s11 + $0x34] sm:$0xf0]  ;;  %v7003_v24 = vld [vmem:[%s11042_s11 + $0x304] sm:$0xf0] }
 0x230   :  { %4050 = vmatpush.bf16.msra.mxu3 %v5625_v31  ;;  %v7223_v31 = vld [vmem:[%s11042_s11 + $0x9e4] sm:$0xf0]  ;;  %v5708_v25 = vld [vmem:[%s11042_s11 + $0x600] sm:$0xf] }
 0x231   :  { %v6189_v40 = vor.u32 %v7223_v31, %v6188_v30  ;;  %v7303_v30 = vld [vmem:[%s11042_s11 + $0xc64] sm:$0xf0]  ;;  %v6788_v31 = vld [vmem:[%s11042_s11 + $0xe70] sm:$0xf] }
 0x232   :  { %4073 = vmatpush.bf16.msrb.mxu0 %v6385_v36  ;;  %4086 = vmatpush.bf16.msrb.mxu2 %v6705_v37  ;;  %v5469_v36 = vor.u32 %v7043_v27, %v5468_v47  ;;  %v5068_v37 = vld [vmem:[%s11042_s11 + $0x100] sm:$0xf]  ;;  %v7103_v47 = vld [vmem:[%s11042_s11 + $0x624] sm:$0xf0] }
 0x233   :  { %4063 = vmatpush.bf16.msrb.mxu1 %v5945_v46  ;;  %v7213_v46 = vld [vmem:[%s11042_s11 + $0x994] sm:$0xf0]  ;;  %v5069_v48 = vor.u32 %v6943_v38, %v5068_v37  ;;  %v6028_v27 = vld [vmem:[%s11042_s11 + $0x880] sm:$0xf]  ;;  %v5709_v37 = vor.u32 %v7103_v47, %v5708_v25  ;;  %v5550_v25 = vld [vmem:[%s11042_s11 + $0x4e8] sm:$0xf0] }
 0x234   :  { %4051 = vmatpush.bf16.msra.mxu3 %v5585_v45  ;;  %v6148_v45 = vld [vmem:[%s11042_s11 + $0x970] sm:$0xf]  ;;  %v6029_v38 = vor.u32 %v7183_v28, %v6028_v27 }
 0x235   :  { %v6149_v54 = vor.u32 %v7213_v46, %v6148_v45  ;;  %v5988_v45 = vld [vmem:[%s11042_s11 + $0x830] sm:$0xf]  ;;  %v7173_v46 = vld [vmem:[%s11042_s11 + $0x854] sm:$0xf0] }
 0x236   :  { %4074 = vmatpush.bf16.msrb.mxu0 %v6345_v49  ;;  %4087 = vmatpush.bf16.msrb.mxu2 %v6665_v50  ;;  %v9222_v26 = vpop.f32.mrf.mxu1  ;;  %v5429_v49 = vor.u32 %v7033_v42, %v5428_v41  ;;  %v5028_v50 = vld [vmem:[%s11042_s11 + $0xb0] sm:$0xf]  ;;  %v6509_v42 = vor.u32 %v7303_v30, %v6508_v29 }
 0x237   :  { %4052 = vmatmul.bf16.vlgmr.msra.gmra.mxu3 %v8473_v53  ;;  %4064 = vmatpush.bf16.msrb.mxu1 %v5905_v1  ;;  %v5029_v1 = vor.u32 %v6933_v51, %v5028_v50  ;;  %v5668_v41 = vld [vmem:[%s11042_s11 + $0x5b0] sm:$0xf]  ;;  %v7293_v51 = vld [vmem:[%s11042_s11 + $0xc14] sm:$0xf0] }
 0x238   :  { %4096 = vmatpush.bf16.msrb.mxu3 %v5229_v56  ;;  %v6468_v50 = vld [vmem:[%s11042_s11 + $0xbf0] sm:$0xf] }
 0x23a   :  { %4075 = vmatpush.bf16.msrb.mxu0 %v6305_v2  ;;  %4088 = vmatpush.bf16.msrb.mxu2 %v6625_v4  ;;  %v5389_v2 = vor.u32 %v7023_v58, %v5388_v57  ;;  %v4988_v4 = vld [vmem:[%s11042_s11 + $0x60] sm:$0xf] }
 0x23b   :  { %4109 = vmatpush.bf16.msra.mxu1 %v5549_v9  ;;  %v9257_v33 = vpop.f32.mrf.mxu3  ;;  %v5348_v9 = vld [vmem:[%s11042_s11 + $0x330] sm:$0xf]  ;;  %v5628_v58 = vld [vmem:[%s11042_s11 + $0x560] sm:$0xf] }
 0x23c   :  { %4097 = vmatpush.bf16.msrb.mxu3 %v5189_v8  ;;  %4065 = vmatmul.bf16.vlgmr.msrb.gmra.mxu1 %v8484_v62  ;;  %v6109_v8 = vor.u32 %v7203_v0, %v6108_v63  ;;  %v6469_v63 = vor.u32 %v7293_v51, %v6468_v50  ;;  %v6308_v51 = vld [vmem:[%s11042_s11 + $0xab0] sm:$0xf] }
 0x23e   :  { %4076 = vmatpush.bf16.msrb.mxu0 %v6265_v17  ;;  %4089 = vmatpush.bf16.msrb.mxu2 %v6585_v18  ;;  %v3808_v56 = vpop.f32.mrf.mxu1  ;;  %v4989_v17 = vor.u32 %v6923_v6, %v4988_v4  ;;  %v5349_v18 = vor.u32 %v7013_v11, %v5348_v9  ;;  %v7283_v6 = vld [vmem:[%s11042_s11 + $0xbc4] sm:$0xf0]  ;;  %v5629_v9 = vor.u32 %v7083_v59, %v5628_v58  ;;  %v7333_v58 = vld [vmem:[%s11042_s11 + $0xd54] sm:$0xf0]  ;;  %v6958_v59 = vld [vmem:[%s11042_s11 + $0x1a4] sm:$0xf] }
 0x23f   :  { %4110 = vmatpush.bf16.msra.mxu1 %v5509_v23  ;;  %v6069_v23 = vor.u32 %v7193_v16, %v6068_v15  ;;  %v5989_v56 = vor.u32 %v7173_v46, %v5988_v45 }
 0x240   :  { %4098 = vmatpush.bf16.msrb.mxu3 %v5149_v22  ;;  %v5749_v22 = vor.u32 %v7113_v14, %v5748_v12  ;;  %v7073_v12 = vld [vmem:[%s11042_s11 + $0x534] sm:$0xf0] }
 0x242   :  { %4077 = vmatpush.bf16.msrb.mxu0 %v6225_v32  ;;  %4090 = vmatpush.bf16.msrb.mxu2 %v6545_v34  ;;  %v7373_v32 = vld [vmem:[%s11042_s11 + $0xe94] sm:$0x70]  ;;  %v9360_v34 = vld [vmem:[%s11044_s12] sm:$0xff] }
 0x243   :  { %4111 = vmatpush.bf16.msra.mxu1 %v5469_v36  ;;  %v3795_v13 = vpop.f32.mrf.mxu3  ;;  %v5309_v36 = vor.u32 %v7003_v24, %v5308_v21  ;;  %v6708_v21 = vld [vmem:[%s11042_s11 + $0xdd0] sm:$0xf]  ;;  %v5230_v24 = vld [vmem:[%s11042_s11 + $0x268] sm:$0xf0] }
 0x244   :  { %4099 = vmatpush.bf16.msrb.mxu3 %v5109_v35  ;;  %v4949_v35 = vor.u32 %v6913_v20, %v4948_v19  ;;  %v5908_v13 = vld [vmem:[%s11042_s11 + $0x790] sm:$0xf]  ;;  %v7273_v19 = vld [vmem:[%s11042_s11 + $0xb74] sm:$0xf0] }
 0x245   :  { %4078 = vmatmul.bf16.vlgmr.msrb.gmra.mxu0 %v8577_v60  ;;  %6813 = vmatmul.msk.bf16.vlgmr.msrb.gmra.mxu2 %vm3749_vm15, %v8585_v5 }
 0x246   :  { %4122 = vmatpush.bf16.msra.mxu2 %v5869_v39  ;;  %4135 = vmatpush.bf16.msra.mxu0 %v6189_v40  ;;  %v9328_v55 = vpop.f32.mrf.mxu0  ;;  %v5268_v39 = vld [vmem:[%s11042_s11 + $0x290] sm:$0xf]  ;;  %v6993_v40 = vld [vmem:[%s11042_s11 + $0x2b4] sm:$0xf0] }
 0x247   :  { %4112 = vmatpush.bf16.msra.mxu1 %v5429_v49  ;;  %v1389_v49 = vperm.slane %v9360_v34, 0 }
 0x248   :  { %4100 = vmatpush.bf16.msrb.mxu3 %v5069_v48  ;;  %v6789_v48 = vor.u32 %v7373_v32, %v6788_v31 }
 0x249   :  { %v3794_v4 = vadd.f32 %v9257_v33, %v1389_v49  ;;  %v5588_v33 = vld [vmem:[%s11042_s11 + $0x510] sm:$0xf] }
 0x24a   :  { %4123 = vmatpush.bf16.msra.mxu2 %v5829_v52  ;;  %4136 = vmatpush.bf16.msra.mxu0 %v6149_v54  ;;  %v5269_v52 = vor.u32 %v6993_v40, %v5268_v39  ;;  %v5669_v54 = vor.u32 %v7093_v44, %v5668_v41  ;;  %v3767_v0 = vsel %vm3753_vm8, %v6789_v48, 0  ;;  %v5589_v27 = vor.u32 %v7073_v12, %v5588_v33  ;;  %v6668_v39 = vld [vmem:[%s11042_s11 + $0xd80] sm:$0xf]  ;;  %v7343_v40 = vld [vmem:[%s11042_s11 + $0xda4] sm:$0xf0] }
 0x24b   :  { %4113 = vmatpush.bf16.msra.mxu1 %v5389_v2  ;;  %v3819_v43 = vpop.f32.mrf.mxu2  ;;  %v6428_v2 = vld [vmem:[%s11042_s11 + $0xba0] sm:$0xf]  ;;  %v3807_v20 = vadd.f32 %v9222_v26, %v3794_v4  ;;  %v7058_v26 = vld [vmem:[%s11042_s11 + $0x4c4] sm:$0xf]  ;;  %v6968_v41 = vld [vmem:[%s11042_s11 + $0x1f4] sm:$0xf]  ;;  %v6669_v48 = vor.u32 %v7343_v40, %v6668_v39 }
 0x24c   :  { %4101 = vmatpush.bf16.msrb.mxu3 %v5029_v1  ;;  %v7163_v1 = vld [vmem:[%s11042_s11 + $0x804] sm:$0xf0]  ;;  %v6429_v14 = vor.u32 %v7283_v6, %v6428_v2  ;;  %v5510_v44 = vld [vmem:[%s11042_s11 + $0x498] sm:$0xf0]  ;;  %v1390_v6 = vperm.slane %v9360_v34, 1 }
 0x24d   :  { %v5949_v11 = vor.u32 %v7163_v1, %v5948_v61  ;;  %v3820_v47 = vadd.f32 %v3819_v43, %v3807_v20  ;;  %v7048_v43 = vld [vmem:[%s11042_s11 + $0x474] sm:$0xf]  ;;  %v5150_v61 = vld [vmem:[%s11042_s11 + $0x1c8] sm:$0xf0]  ;;  %v7218_v39 = vld [vmem:[%s11042_s11 + $0x9c4] sm:$0xf] }
 0x24e   :  { %4124 = vmatpush.bf16.msra.mxu2 %v5789_v7  ;;  %4137 = vmatpush.bf16.msra.mxu0 %v6109_v8  ;;  %v3834_v57 = vpop.f32.mrf.mxu0  ;;  %v6748_v7 = vld [vmem:[%s11042_s11 + $0xe20] sm:$0xf]  ;;  %v7363_v8 = vld [vmem:[%s11042_s11 + $0xe44] sm:$0xf0]  ;;  %v5153_v33 = vor.u32 %v6958_v59, %v5150_v61  ;;  %v6190_v40 = vld [vmem:[%s11042_s11 + $0x9e8] sm:$0xf0] }
 0x24f   :  { %4114 = vmatpush.bf16.msra.mxu1 %v5349_v18  ;;  %v6749_v15 = vor.u32 %v7363_v8, %v6748_v7  ;;  %v6388_v18 = vld [vmem:[%s11042_s11 + $0xb50] sm:$0xf]  ;;  %v3833_v45 = vadd.f32 %v9328_v55, %v3820_v47 }
 0x250   :  { %4102 = vmatpush.bf16.msrb.mxu3 %v4989_v17  ;;  %v7153_v17 = vld [vmem:[%s11042_s11 + $0x7b4] sm:$0xf0]  ;;  %v6389_v31 = vor.u32 %v7273_v19, %v6388_v18  ;;  %v6628_v55 = vld [vmem:[%s11042_s11 + $0xd30] sm:$0xf]  ;;  %v5430_v18 = vld [vmem:[%s11042_s11 + $0x3f8] sm:$0xf0] }
 0x251   :  { %v5909_v28 = vor.u32 %v7153_v17, %v5908_v13  ;;  %v6629_v8 = vor.u32 %v7333_v58, %v6628_v55  ;;  %v6588_v13 = vld [vmem:[%s11042_s11 + $0xce0] sm:$0xf]  ;;  %v7028_v17 = vld [vmem:[%s11042_s11 + $0x3d4] sm:$0xf]  ;;  %v6150_v55 = vld [vmem:[%s11042_s11 + $0x998] sm:$0xf0] }
 0x252   :  { %4125 = vmatpush.bf16.msra.mxu2 %v5749_v22  ;;  %4138 = vmatpush.bf16.msra.mxu0 %v6069_v23  ;;  %v7353_v22 = vld [vmem:[%s11042_s11 + $0xdf4] sm:$0xf0]  ;;  %v6978_v23 = vld [vmem:[%s11042_s11 + $0x244] sm:$0xf]  ;;  %v5433_v47 = vor.u32 %v7028_v17, %v5430_v18  ;;  %v7368_v17 = vld [vmem:[%s11042_s11 + $0xe74] sm:$0xf] }
 0x253   :  { %4115 = vmatpush.bf16.msra.mxu1 %v5309_v36  ;;  %v3821_v16 = vpop.f32.mrf.mxu2  ;;  %v6709_v32 = vor.u32 %v7353_v22, %v6708_v21  ;;  %v7263_v36 = vld [vmem:[%s11042_s11 + $0xb24] sm:$0xf0]  ;;  %v6790_v18 = vld [vmem:[%s11042_s11 + $0xe98] sm:$0x70] }
 0x254   :  { %4103 = vmatpush.bf16.msrb.mxu3 %v4949_v35  ;;  %v6348_v35 = vld [vmem:[%s11042_s11 + $0xb00] sm:$0xf]  ;;  %v5110_v16 = vld [vmem:[%s11042_s11 + $0x178] sm:$0xf0] }
 0x255   :  { %v6349_v46 = vor.u32 %v7263_v36, %v6348_v35  ;;  %v5390_v35 = vld [vmem:[%s11042_s11 + $0x3a8] sm:$0xf0]  ;;  %v7138_v36 = vld [vmem:[%s11042_s11 + $0x744] sm:$0xf] }
 0x256   :  { %4126 = vmatpush.bf16.msra.mxu2 %v5709_v37  ;;  %4139 = vmatpush.bf16.msra.mxu0 %v6029_v38  ;;  %v3858_v29 = vpop.f32.mrf.mxu1  ;;  %v9452_v30 = vpop.f32.mrf.mxu0  ;;  %v5233_v37 = vor.u32 %v6978_v23, %v5230_v24  ;;  %v5553_v38 = vor.u32 %v7058_v26, %v5550_v25  ;;  %v6228_v23 = vld [vmem:[%s11042_s11 + $0xa10] sm:$0xf]  ;;  %v7233_v24 = vld [vmem:[%s11042_s11 + $0xa34] sm:$0xf0] }
 0x257   :  { %4104 = vmatmul.bf16.vlgmr.msrb.gmra.mxu3 %v8404_v3  ;;  %4116 = vmatpush.bf16.msra.mxu1 %v5269_v52  ;;  %v7253_v52 = vld [vmem:[%s11042_s11 + $0xad4] sm:$0xf0]  ;;  %v6548_v26 = vld [vmem:[%s11042_s11 + $0xc90] sm:$0xf] }
 0x258   :  { %4148 = vmatpush.bf16.msra.mxu3 %v6509_v42  ;;  %v5190_v42 = vld [vmem:[%s11042_s11 + $0x218] sm:$0xf0]  ;;  %v6309_v7 = vor.u32 %v7253_v52, %v6308_v51  ;;  %v6193_v51 = vor.u32 %v7218_v39, %v6190_v40  ;;  %v7008_v52 = vld [vmem:[%s11042_s11 + $0x334] sm:$0xf] }
 0x25a   :  { %4127 = vmatpush.bf16.msra.mxu2 %v5669_v54  ;;  %4140 = vmatpush.bf16.msra.mxu0 %v5989_v56  ;;  %v5193_v54 = vor.u32 %v6968_v41, %v5190_v42  ;;  %v5513_v56 = vor.u32 %v7048_v43, %v5510_v44  ;;  %v6229_v41 = vor.u32 %v7233_v24, %v6228_v23 }
 0x25b   :  { %4162 = vmatpush.bf16.msrb.mxu1 %v3767_v0  ;;  %v3845_v49 = vpop.f32.mrf.mxu3  ;;  %v3871_v50 = vpop.f32.mrf.mxu2  ;;  %v5470_v0 = vld [vmem:[%s11042_s11 + $0x448] sm:$0xf0] }
 0x25c   :  { %4149 = vmatpush.bf16.msra.mxu3 %v6469_v63  ;;  %4117 = vmatmul.bf16.vlgmr.msra.gmra.mxu1 %v8412_v10  ;;  %v3846_v57 = vadd.f32 %v3845_v49, %v3833_v45  ;;  %v7038_v63 = vld [vmem:[%s11042_s11 + $0x424] sm:$0xf] }
 0x25d   :  { %v5473_v12 = vor.u32 %v7038_v63, %v5470_v0  ;;  %v6918_v0 = vld [vmem:[%s11042_s11 + $0x64] sm:$0xf] }
 0x25e   :  { %4128 = vmatpush.bf16.msra.mxu2 %v5629_v9  ;;  %4141 = vmatpush.bf16.msra.mxu0 %v5949_v11  ;;  %v3859_v1 = vadd.f32 %v3858_v29, %v3846_v57  ;;  %v3860_v2 = vpop.f32.mrf.mxu1  ;;  %v3886_v4 = vpop.f32.mrf.mxu0  ;;  %v6268_v9 = vld [vmem:[%s11042_s11 + $0xa60] sm:$0xf]  ;;  %v7243_v11 = vld [vmem:[%s11042_s11 + $0xa84] sm:$0xf0]  ;;  %v5070_v29 = vld [vmem:[%s11042_s11 + $0x128] sm:$0xf0] }
 0x25f   :  { %4163 = vmatpush.bf16.msrb.mxu1 %v6749_v15  ;;  %v6948_v15 = vld [vmem:[%s11042_s11 + $0x154] sm:$0xf]  ;;  %v6269_v19 = vor.u32 %v7243_v11, %v6268_v9  ;;  %v5830_v57 = vld [vmem:[%s11042_s11 + $0x718] sm:$0xf0]  ;;  %v5310_v9 = vld [vmem:[%s11042_s11 + $0x308] sm:$0xf0] }
 0x260   :  { %4150 = vmatpush.bf16.msra.mxu3 %v6429_v14  ;;  %4564 = vst [vmem:[%s11045_s13] sm:$0xff] %v3859_v1  ;;  %v7323_v14 = vld [vmem:[%s11042_s11 + $0xd04] sm:$0xf0]  ;;  %v5113_v25 = vor.u32 %v6948_v15, %v5110_v16  ;;  %v4990_v1 = vld [vmem:[%s11042_s11 + $0x88] sm:$0xf0]  ;;  %v7118_v11 = vld [vmem:[%s11042_s11 + $0x6a4] sm:$0xf] }
 0x261   :  { %v6589_v20 = vor.u32 %v7323_v14, %v6588_v13  ;;  %v7198_v13 = vld [vmem:[%s11042_s11 + $0x924] sm:$0xf]  ;;  %v6110_v14 = vld [vmem:[%s11042_s11 + $0x948] sm:$0xf0] }
 0x262   :  { %4129 = vmatpush.bf16.msra.mxu2 %v5589_v27  ;;  %4142 = vmatpush.bf16.msra.mxu0 %v5909_v28  ;;  %v7313_v27 = vld [vmem:[%s11042_s11 + $0xcb4] sm:$0xf0]  ;;  %v6938_v28 = vld [vmem:[%s11042_s11 + $0x104] sm:$0xf] }
 0x263   :  { %4164 = vmatpush.bf16.msrb.mxu1 %v6709_v32  ;;  %v3847_v21 = vpop.f32.mrf.mxu3  ;;  %v3873_v22 = vpop.f32.mrf.mxu2  ;;  %v7018_v32 = vld [vmem:[%s11042_s11 + $0x384] sm:$0xf]  ;;  %v6549_v42 = vor.u32 %v7313_v27, %v6548_v26  ;;  %v5073_v44 = vor.u32 %v6938_v28, %v5070_v29  ;;  %v6113_v26 = vor.u32 %v7198_v13, %v6110_v14  ;;  %v7108_v27 = vld [vmem:[%s11042_s11 + $0x654] sm:$0xf]  ;;  %v5750_v28 = vld [vmem:[%s11042_s11 + $0x678] sm:$0xf0] }
 0x264   :  { %4151 = vmatpush.bf16.msra.mxu3 %v6389_v31  ;;  %v3872_v31 = vadd.f32 %v3871_v50, %v1390_v6  ;;  %v5393_v45 = vor.u32 %v7018_v32, %v5390_v35  ;;  %v6908_v21 = vld [vmem:[%s11042_s11 + $0x14] sm:$0xf]  ;;  %v4950_v22 = vld [vmem:[%s11042_s11 + $0x38] sm:$0xf0]  ;;  %v6793_v32 = vor.u32 %v7368_v17, %v6790_v18  ;;  %v7298_v35 = vld [vmem:[%s11042_s11 + $0xc44] sm:$0xf]  ;;  %v5753_v40 = vor.u32 %v7108_v27, %v5750_v28 }
 0x265   :  { %4130 = vmatmul.bf16.vlgmr.msra.gmra.mxu2 %v8473_v53  ;;  %4143 = vmatmul.bf16.vlgmr.msra.gmra.mxu0 %v8484_v62  ;;  %v7188_v29 = vld [vmem:[%s11042_s11 + $0x8d4] sm:$0xf]  ;;  %v7158_v14 = vld [vmem:[%s11042_s11 + $0x7e4] sm:$0xf]  ;;  %v6390_v18 = vld [vmem:[%s11042_s11 + $0xb78] sm:$0xf0] }
 0x266   :  { %4174 = vmatpush.bf16.msrb.mxu2 %v5233_v37  ;;  %4187 = vmatpush.bf16.msrb.mxu0 %v5553_v38  ;;  %v3897_v37 = vpop.f32.mrf.mxu1  ;;  %v5870_v38 = vld [vmem:[%s11042_s11 + $0x768] sm:$0xf0]  ;;  %v3885_v49 = vadd.f32 %v9452_v30, %v3872_v31  ;;  %v7208_v30 = vld [vmem:[%s11042_s11 + $0x974] sm:$0xf]  ;;  %v6070_v31 = vld [vmem:[%s11042_s11 + $0x8f8] sm:$0xf0] }
 0x267   :  { %4165 = vmatpush.bf16.msrb.mxu1 %v6669_v48  ;;  %v5030_v48 = vld [vmem:[%s11042_s11 + $0xd8] sm:$0xf0]  ;;  %v5873_v50 = vor.u32 %v7138_v36, %v5870_v38  ;;  %v6153_v4 = vor.u32 %v7208_v30, %v6150_v55  ;;  %v6510_v36 = vld [vmem:[%s11042_s11 + $0xc68] sm:$0xf0]  ;;  %v7088_v55 = vld [vmem:[%s11042_s11 + $0x5b4] sm:$0xf] }
 0x268   :  { %4152 = vmatpush.bf16.msra.mxu3 %v6349_v46  ;;  %v3936_v43 = vpop.f32.mrf.mxu0  ;;  %v6928_v46 = vld [vmem:[%s11042_s11 + $0xb4] sm:$0xf]  ;;  %v3898_v58 = vadd.f32 %v3897_v37, %v3885_v49  ;;  %v4953_v37 = vor.u32 %v6908_v21, %v4950_v22  ;;  %v6030_v49 = vld [vmem:[%s11042_s11 + $0x8a8] sm:$0xf0]  ;;  %v5910_v28 = vld [vmem:[%s11042_s11 + $0x7b8] sm:$0xf0] }
 0x269   :  { %v5033_v59 = vor.u32 %v6928_v46, %v5030_v48  ;;  %v6513_v46 = vor.u32 %v7298_v35, %v6510_v36  ;;  %v3770_v48 = vsel %vm3753_vm8, %v6793_v32, 0  ;;  %v7328_v32 = vld [vmem:[%s11042_s11 + $0xd34] sm:$0xf]  ;;  %v6630_v35 = vld [vmem:[%s11042_s11 + $0xd58] sm:$0xf0] }
 0x26a   :  { %4175 = vmatpush.bf16.msrb.mxu2 %v5193_v54  ;;  %4188 = vmatpush.bf16.msrb.mxu0 %v5513_v56  ;;  %v5350_v54 = vld [vmem:[%s11042_s11 + $0x358] sm:$0xf0]  ;;  %v7128_v56 = vld [vmem:[%s11042_s11 + $0x6f4] sm:$0xf]  ;;  %v5236_v36 = vld [vmem:[%s11042_s11 + $0x248] sm:$0xf] }
 0x26b   :  { %4166 = vmatpush.bf16.msrb.mxu1 %v6629_v8  ;;  %v5353_v61 = vor.u32 %v7008_v52, %v5350_v54  ;;  %v3910_v63 = vpop.f32.mrf.mxu3  ;;  %v5833_v2 = vor.u32 %v7128_v56, %v5830_v57  ;;  %v6998_v8 = vld [vmem:[%s11042_s11 + $0x2e4] sm:$0xf]  ;;  %v6470_v52 = vld [vmem:[%s11042_s11 + $0xc18] sm:$0xf0]  ;;  %v6750_v56 = vld [vmem:[%s11042_s11 + $0xe48] sm:$0xf0] }
 0x26c   :  { %4153 = vmatpush.bf16.msra.mxu3 %v6309_v7  ;;  %v3911_v6 = vadd.f32 %v3910_v63, %v3898_v58  ;;  %v3923_v7 = vpop.f32.mrf.mxu2  ;;  %v7358_v54 = vld [vmem:[%s11042_s11 + $0xe24] sm:$0xf]  ;;  %v5670_v58 = vld [vmem:[%s11042_s11 + $0x5d8] sm:$0xf0]  ;;  %v7168_v63 = vld [vmem:[%s11042_s11 + $0x834] sm:$0xf] }
 0x26e   :  { %4176 = vmatpush.bf16.msrb.mxu2 %v5153_v33  ;;  %4189 = vmatpush.bf16.msrb.mxu0 %v5473_v12  ;;  %v3899_v33 = vpop.f32.mrf.mxu1  ;;  %v5790_v12 = vld [vmem:[%s11042_s11 + $0x6c8] sm:$0xf0]  ;;  %v3924_v15 = vadd.f32 %v3923_v7, %v3911_v6  ;;  %v6710_v6 = vld [vmem:[%s11042_s11 + $0xdf8] sm:$0xf0]  ;;  %v5673_v7 = vor.u32 %v7088_v55, %v5670_v58  ;;  %v7054_v55 = vld [vmem:[%s11042_s11 + $0x49c] sm:$0xf0] }
 0x26f   :  { %4167 = vmatpush.bf16.msrb.mxu1 %v6589_v20  ;;  %v5313_v20 = vor.u32 %v6998_v8, %v5310_v9  ;;  %v5793_v24 = vor.u32 %v7118_v11, %v5790_v12  ;;  %v7078_v11 = vld [vmem:[%s11042_s11 + $0x564] sm:$0xf]  ;;  %v5630_v33 = vld [vmem:[%s11042_s11 + $0x588] sm:$0xf0] }
 0x270   :  { %4154 = vmatpush.bf16.msra.mxu3 %v6269_v19  ;;  %v3938_v16 = vpop.f32.mrf.mxu0  ;;  %v4993_v19 = vor.u32 %v6918_v0, %v4990_v1  ;;  %v3937_v23 = vadd.f32 %v3936_v43, %v3924_v15  ;;  %v7098_v43 = vld [vmem:[%s11042_s11 + $0x604] sm:$0xf]  ;;  %v5990_v0 = vld [vmem:[%s11042_s11 + $0x858] sm:$0xf0]  ;;  %v5950_v15 = vld [vmem:[%s11042_s11 + $0x808] sm:$0xf0]  ;;  %v5633_v22 = vor.u32 %v7078_v11, %v5630_v33 }
 0x271   :  { %v7278_v1 = vld [vmem:[%s11042_s11 + $0xba4] sm:$0xf]  ;;  %v5993_v8 = vor.u32 %v7168_v63, %v5990_v0  ;;  %v7268_v16 = vld [vmem:[%s11042_s11 + $0xb54] sm:$0xf]  ;;  %v6270_v0 = vld [vmem:[%s11042_s11 + $0xa88] sm:$0xf0] }
 0x272   :  { %4177 = vmatpush.bf16.msrb.mxu2 %v5113_v25  ;;  %4190 = vmatpush.bf16.msrb.mxu0 %v5433_v47  ;;  %v6988_v25 = vld [vmem:[%s11042_s11 + $0x294] sm:$0xf]  ;;  %v5270_v47 = vld [vmem:[%s11042_s11 + $0x2b8] sm:$0xf0]  ;;  %4565 = vst [vmem:[%s11045_s13 + $0x8] sm:$0xff] %v3937_v23  ;;  %v5953_v23 = vor.u32 %v7158_v14, %v5950_v15 }
 0x273   :  { %4168 = vmatpush.bf16.msrb.mxu1 %v6549_v42  ;;  %v5273_v38 = vor.u32 %v6988_v25, %v5270_v47  ;;  %v3912_v39 = vpop.f32.mrf.mxu3  ;;  %v7148_v25 = vld [vmem:[%s11042_s11 + $0x794] sm:$0xf]  ;;  %v6393_v47 = vor.u32 %v7268_v16, %v6390_v18  ;;  %v7238_v63 = vld [vmem:[%s11042_s11 + $0xa64] sm:$0xf]  ;;  %v6964_v11 = vld [vmem:[%s11042_s11 + $0x1cc] sm:$0xf0] }
 0x274   :  { %4155 = vmatpush.bf16.msra.mxu3 %v6229_v41  ;;  %v6073_v41 = vor.u32 %v7188_v29, %v6070_v31  ;;  %v3925_v42 = vpop.f32.mrf.mxu2  ;;  %v7258_v29 = vld [vmem:[%s11042_s11 + $0xb04] sm:$0xf]  ;;  %v6350_v31 = vld [vmem:[%s11042_s11 + $0xb28] sm:$0xf0]  ;;  %v7064_v39 = vld [vmem:[%s11042_s11 + $0x4ec] sm:$0xf0]  ;;  %v6273_v15 = vor.u32 %v7238_v63, %v6270_v0 }
 0x275   :  { %v5476_v33 = vld [vmem:[%s11042_s11 + $0x428] sm:$0xf]  ;;  %v7114_v63 = vld [vmem:[%s11042_s11 + $0x67c] sm:$0xf0] }
 0x276   :  { %4178 = vmatpush.bf16.msrb.mxu2 %v5073_v44  ;;  %4191 = vmatpush.bf16.msrb.mxu0 %v5393_v45  ;;  %v5710_v44 = vld [vmem:[%s11042_s11 + $0x628] sm:$0xf0]  ;;  %v7178_v45 = vld [vmem:[%s11042_s11 + $0x884] sm:$0xf]  ;;  %v6116_v0 = vld [vmem:[%s11042_s11 + $0x928] sm:$0xf] }
 0x277   :  { %4200 = vmatpush.bf16.msra.mxu1 %v5873_v50  ;;  %4156 = vmatmul.bf16.vlgmr.msra.gmra.mxu3 %v8577_v60  ;;  %v7288_v50 = vld [vmem:[%s11042_s11 + $0xbf4] sm:$0xf]  ;;  %v5713_v57 = vor.u32 %v7098_v43, %v5710_v44  ;;  %v6033_v30 = vor.u32 %v7178_v45, %v6030_v49  ;;  %v1391_v43 = vperm.slane %v9360_v34, 2  ;;  %v6353_v44 = vor.u32 %v7258_v29, %v6350_v31  ;;  %v6590_v34 = vld [vmem:[%s11042_s11 + $0xd08] sm:$0xf0] }
 0x278   :  { %4213 = vmatpush.bf16.msrb.mxu3 %v6193_v51  ;;  %6814 = vmatmul.msk.bf16.vlgmr.msrb.gmra.mxu1 %vm3749_vm15, %v8585_v5  ;;  %v6633_v45 = vor.u32 %v7328_v32, %v6630_v35 }
 0x279   :  { %v9676_v51 = vpop.f32.mrf.mxu1 }
 0x27a   :  { %4179 = vmatpush.bf16.msrb.mxu2 %v5033_v59  ;;  %4192 = vmatpush.bf16.msrb.mxu0 %v5353_v61  ;;  %v6473_v59 = vor.u32 %v7288_v50, %v6470_v52  ;;  %v6753_v61 = vor.u32 %v7358_v54, %v6750_v56  ;;  %v7318_v52 = vld [vmem:[%s11042_s11 + $0xce4] sm:$0xf]  ;;  %v5196_v54 = vld [vmem:[%s11042_s11 + $0x1f8] sm:$0xf] }
 0x27b   :  { %4201 = vmatpush.bf16.msra.mxu1 %v5833_v2  ;;  %v6430_v2 = vld [vmem:[%s11042_s11 + $0xbc8] sm:$0xf0] }
 0x27c   :  { %4214 = vmatpush.bf16.msrb.mxu3 %v6153_v4  ;;  %v7348_v4 = vld [vmem:[%s11042_s11 + $0xdd4] sm:$0xf]  ;;  %v6433_v12 = vor.u32 %v7278_v1, %v6430_v2 }
 0x27d   :  { %v6713_v13 = vor.u32 %v7348_v4, %v6710_v6  ;;  %v7308_v4 = vld [vmem:[%s11042_s11 + $0xc94] sm:$0xf]  ;;  %v6550_v6 = vld [vmem:[%s11042_s11 + $0xcb8] sm:$0xf0] }
 0x27e   :  { %4180 = vmatpush.bf16.msrb.mxu2 %v4993_v19  ;;  %4193 = vmatpush.bf16.msrb.mxu0 %v5313_v20  ;;  %v9713_v9 = vpop.f32.mrf.mxu3  ;;  %v7338_v19 = vld [vmem:[%s11042_s11 + $0xd84] sm:$0xf]  ;;  %v6670_v20 = vld [vmem:[%s11042_s11 + $0xda8] sm:$0xf0]  ;;  %v6553_v16 = vor.u32 %v7308_v4, %v6550_v6 }
 0x27f   :  { %4202 = vmatpush.bf16.msra.mxu1 %v5793_v24  ;;  %v7068_v24 = vld [vmem:[%s11042_s11 + $0x514] sm:$0xf]  ;;  %v6673_v27 = vor.u32 %v7338_v19, %v6670_v20  ;;  %v6230_v20 = vld [vmem:[%s11042_s11 + $0xa38] sm:$0xf0] }
 0x280   :  { %4215 = vmatpush.bf16.msrb.mxu3 %v6113_v26  ;;  %v5590_v26 = vld [vmem:[%s11042_s11 + $0x538] sm:$0xf0] }
 0x281   :  { %v3951_v17 = vpop.f32.mrf.mxu1 }
 0x282   :  { %4181 = vmatpush.bf16.msrb.mxu2 %v4953_v37  ;;  %4194 = vmatpush.bf16.msrb.mxu0 %v5273_v38  ;;  %v9739_v21 = vpop.f32.mrf.mxu0  ;;  %v6984_v37 = vld [vmem:[%s11042_s11 + $0x26c] sm:$0xf0]  ;;  %v5556_v38 = vld [vmem:[%s11042_s11 + $0x4c8] sm:$0xf]  ;;  %v7228_v17 = vld [vmem:[%s11042_s11 + $0xa14] sm:$0xf] }
 0x283   :  { %4203 = vmatpush.bf16.msra.mxu1 %v5753_v40  ;;  %v5593_v40 = vor.u32 %v7068_v24, %v5590_v26  ;;  %v5237_v49 = vor.u32 %v6984_v37, %v5236_v36  ;;  %v5557_v50 = vor.u32 %v7064_v39, %v5556_v38  ;;  %v5436_v24 = vld [vmem:[%s11042_s11 + $0x3d8] sm:$0xf]  ;;  %v7034_v26 = vld [vmem:[%s11042_s11 + $0x3fc] sm:$0xf0]  ;;  %v6233_v31 = vor.u32 %v7228_v17, %v6230_v20  ;;  %v5076_v37 = vld [vmem:[%s11042_s11 + $0x108] sm:$0xf] }
 0x284   :  { %4216 = vmatpush.bf16.msrb.mxu3 %v6073_v41  ;;  %v5913_v41 = vor.u32 %v7148_v25, %v5910_v28  ;;  %v5836_v25 = vld [vmem:[%s11042_s11 + $0x6f8] sm:$0xf]  ;;  %v7224_v28 = vld [vmem:[%s11042_s11 + $0x9ec] sm:$0xf0]  ;;  %v5437_v36 = vor.u32 %v7034_v26, %v5436_v24  ;;  %v6914_v24 = vld [vmem:[%s11042_s11 + $0x3c] sm:$0xf0] }
 0x285   :  { %4182 = vmatmul.bf16.vlgmr.msrb.gmra.mxu2 %v8404_v3  ;;  %4195 = vmatmul.bf16.vlgmr.msrb.gmra.mxu0 %v8412_v10  ;;  %v6944_v38 = vld [vmem:[%s11042_s11 + $0x12c] sm:$0xf0]  ;;  %v6796_v17 = vld [vmem:[%s11042_s11 + $0xe78] sm:$0xf] }
 0x286   :  { %4226 = vmatpush.bf16.msra.mxu2 %v6513_v46  ;;  %4240 = vmatpush.bf16.msra.mxu0 %v3770_v48  ;;  %v3964_v42 = vpop.f32.mrf.mxu3  ;;  %v7248_v46 = vld [vmem:[%s11042_s11 + $0xab4] sm:$0xf]  ;;  %v6310_v48 = vld [vmem:[%s11042_s11 + $0xad8] sm:$0xf0] }
 0x287   :  { %4204 = vmatpush.bf16.msra.mxu1 %v5713_v57  ;;  %v6974_v57 = vld [vmem:[%s11042_s11 + $0x21c] sm:$0xf0]  ;;  %v6313_v58 = vor.u32 %v7248_v46, %v6310_v48  ;;  %v7024_v42 = vld [vmem:[%s11042_s11 + $0x3ac] sm:$0xf0]  ;;  %v6156_v46 = vld [vmem:[%s11042_s11 + $0x978] sm:$0xf] }
 0x288   :  { %4217 = vmatpush.bf16.msrb.mxu3 %v6033_v30  ;;  %v5516_v30 = vld [vmem:[%s11042_s11 + $0x478] sm:$0xf]  ;;  %v5197_v1 = vor.u32 %v6974_v57, %v5196_v54  ;;  %v7214_v48 = vld [vmem:[%s11042_s11 + $0x99c] sm:$0xf0] }
 0x289   :  { %v5517_v2 = vor.u32 %v7054_v55, %v5516_v30  ;;  %v5036_v54 = vld [vmem:[%s11042_s11 + $0xb8] sm:$0xf]  ;;  %v6157_v55 = vor.u32 %v7214_v48, %v6156_v46  ;;  %v7174_v46 = vld [vmem:[%s11042_s11 + $0x85c] sm:$0xf0] }
 0x28a   :  { %4227 = vmatpush.bf16.msra.mxu2 %v6473_v59  ;;  %4241 = vmatpush.bf16.msra.mxu0 %v6753_v61  ;;  %v3977_v56 = vpop.f32.mrf.mxu0  ;;  %v6593_v59 = vor.u32 %v7318_v52, %v6590_v34  ;;  %v6476_v48 = vld [vmem:[%s11042_s11 + $0xbf8] sm:$0xf] }
 0x28b   :  { %4205 = vmatpush.bf16.msra.mxu1 %v5673_v7  ;;  %v5156_v7 = vld [vmem:[%s11042_s11 + $0x1a8] sm:$0xf]  ;;  %v6934_v56 = vld [vmem:[%s11042_s11 + $0xdc] sm:$0xf0] }
 0x28c   :  { %4218 = vmatpush.bf16.msrb.mxu3 %v5993_v8  ;;  %v3988_v61 = vpop.f32.mrf.mxu2  ;;  %v3950_v8 = vadd.f32 %v9676_v51, %v1391_v43  ;;  %v5876_v51 = vld [vmem:[%s11042_s11 + $0x748] sm:$0xf]  ;;  %v5157_v18 = vor.u32 %v6964_v11, %v5156_v7  ;;  %v5037_v4 = vor.u32 %v6934_v56, %v5036_v54  ;;  %v6924_v7 = vld [vmem:[%s11042_s11 + $0x8c] sm:$0xf0] }
 0x28d   :  { %v5796_v43 = vld [vmem:[%s11042_s11 + $0x6a8] sm:$0xf]  ;;  %v7004_v11 = vld [vmem:[%s11042_s11 + $0x30c] sm:$0xf0] }
 0x28e   :  { %4228 = vmatpush.bf16.msra.mxu2 %v6433_v12  ;;  %4242 = vmatpush.bf16.msra.mxu0 %v6713_v13  ;;  %v7044_v12 = vld [vmem:[%s11042_s11 + $0x44c] sm:$0xf0]  ;;  %v3963_v14 = vadd.f32 %v9713_v9, %v3950_v8  ;;  %v5116_v9 = vld [vmem:[%s11042_s11 + $0x158] sm:$0xf]  ;;  %v5316_v8 = vld [vmem:[%s11042_s11 + $0x2e8] sm:$0xf] }
 0x28f   :  { %4206 = vmatpush.bf16.msra.mxu1 %v5633_v22  ;;  %v7144_v13 = vld [vmem:[%s11042_s11 + $0x76c] sm:$0xf0]  ;;  %v5477_v19 = vor.u32 %v7044_v12, %v5476_v33  ;;  %v6954_v22 = vld [vmem:[%s11042_s11 + $0x17c] sm:$0xf0] }
 0x290   :  { %4219 = vmatpush.bf16.msrb.mxu3 %v5953_v23  ;;  %v5877_v23 = vor.u32 %v7144_v13, %v5876_v51  ;;  %v3976_v29 = vadd.f32 %v9739_v21, %v3963_v14  ;;  %v5117_v35 = vor.u32 %v6954_v22, %v5116_v9  ;;  %v5716_v51 = vld [vmem:[%s11042_s11 + $0x608] sm:$0xf]  ;;  %v7104_v13 = vld [vmem:[%s11042_s11 + $0x62c] sm:$0xf0]  ;;  %v6076_v14 = vld [vmem:[%s11042_s11 + $0x8d8] sm:$0xf]  ;;  %v5317_v9 = vor.u32 %v7004_v11, %v5316_v8 }
 0x291   :  { %v5717_v26 = vor.u32 %v7104_v13, %v5716_v51  ;;  %v7154_v13 = vld [vmem:[%s11042_s11 + $0x7bc] sm:$0xf0] }
 0x292   :  { %4229 = vmatpush.bf16.msra.mxu2 %v6393_v47  ;;  %4243 = vmatpush.bf16.msra.mxu0 %v6673_v27  ;;  %v7134_v47 = vld [vmem:[%s11042_s11 + $0x71c] sm:$0xf0]  ;;  %v6196_v27 = vld [vmem:[%s11042_s11 + $0x9c8] sm:$0xf]  ;;  %v3989_v39 = vadd.f32 %v3988_v61, %v3976_v29  ;;  %v5756_v61 = vld [vmem:[%s11042_s11 + $0x658] sm:$0xf] }
 0x293   :  { %4207 = vmatpush.bf16.msra.mxu1 %v5593_v40  ;;  %v5837_v40 = vor.u32 %v7134_v47, %v5836_v25  ;;  %v6197_v21 = vor.u32 %v7224_v28, %v6196_v27  ;;  %v5757_v33 = vor.u32 %v7114_v63, %v5756_v61  ;;  %v5276_v47 = vld [vmem:[%s11042_s11 + $0x298] sm:$0xf]  ;;  %v6994_v27 = vld [vmem:[%s11042_s11 + $0x2bc] sm:$0xf0]  ;;  %v5956_v61 = vld [vmem:[%s11042_s11 + $0x7e8] sm:$0xf] }
 0x294   :  { %4220 = vmatpush.bf16.msrb.mxu3 %v5913_v41  ;;  %v3990_v32 = vpop.f32.mrf.mxu2  ;;  %v5396_v41 = vld [vmem:[%s11042_s11 + $0x388] sm:$0xf]  ;;  %v5676_v28 = vld [vmem:[%s11042_s11 + $0x5b8] sm:$0xf]  ;;  %v7164_v63 = vld [vmem:[%s11042_s11 + $0x80c] sm:$0xf0] }
 0x295   :  { %v5397_v52 = vor.u32 %v7024_v42, %v5396_v41  ;;  %v6036_v32 = vld [vmem:[%s11042_s11 + $0x888] sm:$0xf]  ;;  %v5957_v11 = vor.u32 %v7164_v63, %v5956_v61  ;;  %v7244_v63 = vld [vmem:[%s11042_s11 + $0xa8c] sm:$0xf0] }
 0x296   :  { %4230 = vmatpush.bf16.msra.mxu2 %v6353_v44  ;;  %4244 = vmatpush.bf16.msra.mxu0 %v6633_v45  ;;  %v7124_v45 = vld [vmem:[%s11042_s11 + $0x6cc] sm:$0xf0]  ;;  %v5636_v42 = vld [vmem:[%s11042_s11 + $0x568] sm:$0xf] }
 0x297   :  { %4252 = vmatpush.bf16.msrb.mxu1 %v5237_v49  ;;  %4221 = vmatmul.bf16.vlgmr.msrb.gmra.mxu3 %v8484_v62  ;;  %v5797_v30 = vor.u32 %v7124_v45, %v5796_v43  ;;  %v7084_v43 = vld [vmem:[%s11042_s11 + $0x58c] sm:$0xf0]  ;;  %v5996_v45 = vld [vmem:[%s11042_s11 + $0x838] sm:$0xf]  ;;  %v6276_v61 = vld [vmem:[%s11042_s11 + $0xa68] sm:$0xf] }
 0x298   :  { %4265 = vmatpush.bf16.msra.mxu3 %v5557_v50  ;;  %4208 = vmatmul.bf16.vlgmr.msra.gmra.mxu1 %v8473_v53  ;;  %v5077_v50 = vor.u32 %v6944_v38, %v5076_v37  ;;  %v7304_v37 = vld [vmem:[%s11042_s11 + $0xc6c] sm:$0xf0]  ;;  %v5637_v54 = vor.u32 %v7084_v43, %v5636_v42  ;;  %v5997_v56 = vor.u32 %v7174_v46, %v5996_v45  ;;  %v6316_v45 = vld [vmem:[%s11042_s11 + $0xab8] sm:$0xf]  ;;  %v7254_v46 = vld [vmem:[%s11042_s11 + $0xadc] sm:$0xf0] }
 0x299   :  { %v4001_v44 = vpop.f32.mrf.mxu1 }
 0x29a   :  { %4231 = vmatpush.bf16.msra.mxu2 %v6313_v58  ;;  %4245 = vmatpush.bf16.msra.mxu0 %v6593_v59  ;;  %v4002_v49 = vadd.f32 %v4001_v44, %v3989_v39  ;;  %v4014_v34 = vpop.f32.mrf.mxu3  ;;  %v5356_v58 = vld [vmem:[%s11042_s11 + $0x338] sm:$0xf]  ;;  %v7014_v59 = vld [vmem:[%s11042_s11 + $0x35c] sm:$0xf0]  ;;  %v5277_v39 = vor.u32 %v6994_v27, %v5276_v47 }
 0x29b   :  { %4253 = vmatpush.bf16.msrb.mxu1 %v5197_v1  ;;  %v7204_v1 = vld [vmem:[%s11042_s11 + $0x94c] sm:$0xf0]  ;;  %v5357_v6 = vor.u32 %v7014_v59, %v5356_v58 }
 0x29c   :  { %4266 = vmatpush.bf16.msra.mxu3 %v5517_v2  ;;  %v4015_v57 = vadd.f32 %v4014_v34, %v4002_v49  ;;  %v4996_v2 = vld [vmem:[%s11042_s11 + $0x68] sm:$0xf]  ;;  %v6117_v12 = vor.u32 %v7204_v1, %v6116_v0  ;;  %v7364_v34 = vld [vmem:[%s11042_s11 + $0xe4c] sm:$0xf0] }
 0x29d   :  { %v4997_v20 = vor.u32 %v6924_v7, %v4996_v2  ;;  %v6436_v0 = vld [vmem:[%s11042_s11 + $0xba8] sm:$0xf]  ;;  %v7284_v1 = vld [vmem:[%s11042_s11 + $0xbcc] sm:$0xf0]  ;;  %v6716_v2 = vld [vmem:[%s11042_s11 + $0xdd8] sm:$0xf] }
 0x29e   :  { %4232 = vmatpush.bf16.msra.mxu2 %v6273_v15  ;;  %4246 = vmatpush.bf16.msra.mxu0 %v6553_v16  ;;  %4566 = vst [vmem:[%s11045_s13 + $0x10] sm:$0xff] %v4015_v57  ;;  %v7194_v16 = vld [vmem:[%s11042_s11 + $0x8fc] sm:$0xf0]  ;;  %v5238_v7 = vld [vmem:[%s11042_s11 + $0x270] sm:$0xf0] }
 0x29f   :  { %4254 = vmatpush.bf16.msrb.mxu1 %v5157_v18  ;;  %v7374_v18 = vld [vmem:[%s11042_s11 + $0xe9c] sm:$0x70]  ;;  %v6077_v25 = vor.u32 %v7194_v16, %v6076_v14  ;;  %v6396_v14 = vld [vmem:[%s11042_s11 + $0xb58] sm:$0xf] }
 0x2a0   :  { %4267 = vmatpush.bf16.msra.mxu3 %v5477_v19  ;;  %v6797_v29 = vor.u32 %v7374_v18, %v6796_v17  ;;  %v6676_v17 = vld [vmem:[%s11042_s11 + $0xd88] sm:$0xf]  ;;  %v7344_v18 = vld [vmem:[%s11042_s11 + $0xdac] sm:$0xf0] }
 0x2a1   :  { %6815 = vmatmul.msk.bf16.vlgmr.msra.gmra.mxu0 %vm3749_vm15, %v8585_v5  ;;  %v4003_v15 = vpop.f32.mrf.mxu1 }
 0x2a2   :  { %4278 = vmatpush.bf16.msrb.mxu0 %v5877_v23  ;;  %4233 = vmatpush.bf16.msra.mxu2 %v6233_v31  ;;  %v9951_v19 = vpop.f32.mrf.mxu0  ;;  %v4016_v22 = vpop.f32.mrf.mxu3  ;;  %v4956_v23 = vld [vmem:[%s11042_s11 + $0x18] sm:$0xf]  ;;  %v7094_v31 = vld [vmem:[%s11042_s11 + $0x5dc] sm:$0xf0]  ;;  %v3773_v41 = vsel %vm3753_vm8, %v6797_v29, 0 }
 0x2a3   :  { %4255 = vmatpush.bf16.msrb.mxu1 %v5117_v35  ;;  %v7184_v35 = vld [vmem:[%s11042_s11 + $0x8ac] sm:$0xf0]  ;;  %v4957_v38 = vor.u32 %v6914_v24, %v4956_v23  ;;  %v7274_v15 = vld [vmem:[%s11042_s11 + $0xb7c] sm:$0xf0]  ;;  %v7059_v22 = vld [vmem:[%s11042_s11 + $0x4cc] sm:$0xf] }
 0x2a4   :  { %4268 = vmatpush.bf16.msra.mxu3 %v5437_v36  ;;  %v6516_v36 = vld [vmem:[%s11042_s11 + $0xc48] sm:$0xf]  ;;  %v5558_v23 = vld [vmem:[%s11042_s11 + $0x4f0] sm:$0xf0]  ;;  %v6397_v27 = vor.u32 %v7274_v15, %v6396_v14  ;;  %v6277_v14 = vor.u32 %v7244_v63, %v6276_v61  ;;  %v7109_v61 = vld [vmem:[%s11042_s11 + $0x65c] sm:$0xf] }
 0x2a5   :  { %4234 = vmatmul.bf16.vlgmr.msra.gmra.mxu2 %v8577_v60  ;;  %v6517_v44 = vor.u32 %v7304_v37, %v6516_v36  ;;  %v6356_v29 = vld [vmem:[%s11042_s11 + $0xb08] sm:$0xf]  ;;  %v6636_v36 = vld [vmem:[%s11042_s11 + $0xd38] sm:$0xf]  ;;  %v7334_v37 = vld [vmem:[%s11042_s11 + $0xd5c] sm:$0xf0] }
 0x2a6   :  { %4279 = vmatpush.bf16.msrb.mxu0 %v5837_v40  ;;  %4291 = vmatpush.bf16.msrb.mxu2 %v6197_v21  ;;  %v5677_v40 = vor.u32 %v7094_v31, %v5676_v28  ;;  %v6037_v21 = vor.u32 %v7184_v35, %v6036_v32  ;;  %v6677_v28 = vor.u32 %v7344_v18, %v6676_v17  ;;  %v7264_v31 = vld [vmem:[%s11042_s11 + $0xb2c] sm:$0xf0]  ;;  %v6236_v17 = vld [vmem:[%s11042_s11 + $0xa18] sm:$0xf]  ;;  %v5758_v63 = vld [vmem:[%s11042_s11 + $0x680] sm:$0xf0] }
 0x2a7   :  { %4256 = vmatpush.bf16.msrb.mxu1 %v5077_v50  ;;  %v7294_v50 = vld [vmem:[%s11042_s11 + $0xc1c] sm:$0xf0]  ;;  %v5561_v35 = vor.u32 %v7059_v22, %v5558_v23  ;;  %v6357_v42 = vor.u32 %v7264_v31, %v6356_v29  ;;  %v6637_v43 = vor.u32 %v7334_v37, %v6636_v36  ;;  %v6929_v22 = vld [vmem:[%s11042_s11 + $0xbc] sm:$0xf]  ;;  %v5038_v23 = vld [vmem:[%s11042_s11 + $0xe0] sm:$0xf0] }
 0x2a8   :  { %4269 = vmatpush.bf16.msra.mxu3 %v5397_v52  ;;  %v6756_v52 = vld [vmem:[%s11042_s11 + $0xe28] sm:$0xf]  ;;  %v6477_v58 = vor.u32 %v7294_v50, %v6476_v48  ;;  %v5838_v29 = vld [vmem:[%s11042_s11 + $0x720] sm:$0xf0]  ;;  %v7219_v31 = vld [vmem:[%s11042_s11 + $0x9cc] sm:$0xf]  ;;  %v5041_v37 = vor.u32 %v6929_v22, %v5038_v23 }
 0x2a9   :  { %v6757_v59 = vor.u32 %v7364_v34, %v6756_v52  ;;  %v6596_v50 = vld [vmem:[%s11042_s11 + $0xce8] sm:$0xf]  ;;  %v7324_v52 = vld [vmem:[%s11042_s11 + $0xd0c] sm:$0xf0]  ;;  %v6949_v34 = vld [vmem:[%s11042_s11 + $0x15c] sm:$0xf] }
 0x2aa   :  { %4280 = vmatpush.bf16.msrb.mxu0 %v5797_v30  ;;  %4292 = vmatpush.bf16.msrb.mxu2 %v6157_v55  ;;  %v4029_v49 = vpop.f32.mrf.mxu0  ;;  %v5596_v30 = vld [vmem:[%s11042_s11 + $0x518] sm:$0xf]  ;;  %v7074_v55 = vld [vmem:[%s11042_s11 + $0x53c] sm:$0xf0] }
 0x2ab   :  { %4257 = vmatpush.bf16.msrb.mxu1 %v5037_v4  ;;  %v7354_v4 = vld [vmem:[%s11042_s11 + $0xdfc] sm:$0xf0]  ;;  %v5597_v8 = vor.u32 %v7074_v55, %v5596_v30  ;;  %v7039_v30 = vld [vmem:[%s11042_s11 + $0x42c] sm:$0xf]  ;;  %v5478_v55 = vld [vmem:[%s11042_s11 + $0x450] sm:$0xf0] }
 0x2ac   :  { %4270 = vmatpush.bf16.msra.mxu3 %v5357_v6  ;;  %v10008_v57 = vpop.f32.mrf.mxu2  ;;  %v6979_v6 = vld [vmem:[%s11042_s11 + $0x24c] sm:$0xf]  ;;  %v6717_v51 = vor.u32 %v7354_v4, %v6716_v2  ;;  %v7314_v2 = vld [vmem:[%s11042_s11 + $0xcbc] sm:$0xf0] }
 0x2ad   :  { %v5241_v16 = vor.u32 %v6979_v6, %v5238_v7  ;;  %v6939_v4 = vld [vmem:[%s11042_s11 + $0x10c] sm:$0xf] }
 0x2ae   :  { %4281 = vmatpush.bf16.msrb.mxu0 %v5757_v33  ;;  %4293 = vmatpush.bf16.msrb.mxu2 %v6117_v12  ;;  %v5916_v33 = vld [vmem:[%s11042_s11 + $0x798] sm:$0xf]  ;;  %v6437_v12 = vor.u32 %v7284_v1, %v6436_v0  ;;  %v5481_v1 = vor.u32 %v7039_v30, %v5478_v55  ;;  %v4958_v30 = vld [vmem:[%s11042_s11 + $0x40] sm:$0xf0] }
 0x2af   :  { %4258 = vmatpush.bf16.msrb.mxu1 %v4997_v20  ;;  %v6969_v20 = vld [vmem:[%s11042_s11 + $0x1fc] sm:$0xf]  ;;  %v5917_v24 = vor.u32 %v7154_v13, %v5916_v33  ;;  %v5438_v33 = vld [vmem:[%s11042_s11 + $0x400] sm:$0xf0]  ;;  %v5878_v13 = vld [vmem:[%s11042_s11 + $0x770] sm:$0xf0] }
 0x2b0   :  { %4271 = vmatpush.bf16.msra.mxu3 %v5317_v9  ;;  %v5198_v9 = vld [vmem:[%s11042_s11 + $0x220] sm:$0xf0] }
 0x2b1   :  { %v5201_v32 = vor.u32 %v6969_v20, %v5198_v9  ;;  %v7234_v9 = vld [vmem:[%s11042_s11 + $0xa3c] sm:$0xf0] }
 0x2b2   :  { %4282 = vmatpush.bf16.msrb.mxu0 %v5717_v26  ;;  %4294 = vmatpush.bf16.msrb.mxu2 %v6077_v25  ;;  %v10075_v25 = vld [vmem:[%s11044_s12] sm:$0xff]  ;;  %v6237_v36 = vor.u32 %v7234_v9, %v6236_v17  ;;  %v7189_v17 = vld [vmem:[%s11042_s11 + $0x8dc] sm:$0xf] }
 0x2b3   :  { %4259 = vmatpush.bf16.msrb.mxu1 %v4957_v38  ;;  %v1392_v47 = vperm.slane %v10075_v25, 3  ;;  %v6959_v38 = vld [vmem:[%s11042_s11 + $0x1ac] sm:$0xf]  ;;  %v6478_v9 = vld [vmem:[%s11042_s11 + $0xc20] sm:$0xf0] }
 0x2b4   :  { %4272 = vmatpush.bf16.msra.mxu3 %v5277_v39  ;;  %v4042_v26 = vpop.f32.mrf.mxu2 }
 0x2b6   :  { %4283 = vmatpush.bf16.msrb.mxu0 %v5677_v40  ;;  %4295 = vmatpush.bf16.msrb.mxu2 %v6037_v21  ;;  %v5158_v40 = vld [vmem:[%s11042_s11 + $0x1d0] sm:$0xf0]  ;;  %v7049_v21 = vld [vmem:[%s11042_s11 + $0x47c] sm:$0xf] }
 0x2b7   :  { %4304 = vmatpush.bf16.msra.mxu1 %v6517_v44  ;;  %4273 = vmatmul.bf16.vlgmr.msra.gmra.mxu3 %v8412_v10  ;;  %v5161_v48 = vor.u32 %v6959_v38, %v5158_v40  ;;  %v6919_v40 = vld [vmem:[%s11042_s11 + $0x6c] sm:$0xf] }
 0x2b8   :  { %4318 = vmatpush.bf16.msrb.mxu3 %v3773_v41  ;;  %4260 = vmatmul.bf16.vlgmr.msrb.gmra.mxu1 %v8404_v3  ;;  %v5518_v41 = vld [vmem:[%s11042_s11 + $0x4a0] sm:$0xf0] }
 0x2b9   :  { %v4066_v39 = vpop.f32.mrf.mxu1  ;;  %v5521_v49 = vor.u32 %v7049_v21, %v5518_v41  ;;  %v4998_v21 = vld [vmem:[%s11042_s11 + $0x90] sm:$0xf0] }
 0x2ba   :  { %4284 = vmatpush.bf16.msrb.mxu0 %v5637_v54  ;;  %4296 = vmatpush.bf16.msrb.mxu2 %v5997_v56  ;;  %v4053_v44 = vpop.f32.mrf.mxu3  ;;  %v4028_v54 = vadd.f32 %v9951_v19, %v1392_v47  ;;  %v5118_v56 = vld [vmem:[%s11042_s11 + $0x180] sm:$0xf0]  ;;  %v6597_v19 = vor.u32 %v7324_v52, %v6596_v50  ;;  %v7019_v47 = vld [vmem:[%s11042_s11 + $0x38c] sm:$0xf]  ;;  %v7209_v50 = vld [vmem:[%s11042_s11 + $0x97c] sm:$0xf] }
 0x2bb   :  { %4305 = vmatpush.bf16.msra.mxu1 %v6477_v58  ;;  %v5121_v0 = vor.u32 %v6949_v34, %v5118_v56  ;;  %v6158_v52 = vld [vmem:[%s11042_s11 + $0x9a0] sm:$0xf0]  ;;  %v5001_v34 = vor.u32 %v6919_v40, %v4998_v21  ;;  %v6909_v56 = vld [vmem:[%s11042_s11 + $0x1c] sm:$0xf] }
 0x2bc   :  { %4319 = vmatpush.bf16.msrb.mxu3 %v6757_v59  ;;  %v4041_v58 = vadd.f32 %v10008_v57, %v4028_v54  ;;  %v6317_v59 = vor.u32 %v7254_v46, %v6316_v45  ;;  %v6556_v57 = vld [vmem:[%s11042_s11 + $0xc98] sm:$0xf]  ;;  %v5358_v45 = vld [vmem:[%s11042_s11 + $0x360] sm:$0xf0]  ;;  %v7119_v46 = vld [vmem:[%s11042_s11 + $0x6ac] sm:$0xf] }
 0x2bd   :  { %v6557_v15 = vor.u32 %v7314_v2, %v6556_v57  ;;  %v7299_v57 = vld [vmem:[%s11042_s11 + $0xc4c] sm:$0xf]  ;;  %v6518_v2 = vld [vmem:[%s11042_s11 + $0xc70] sm:$0xf0] }
 0x2be   :  { %4285 = vmatpush.bf16.msrb.mxu0 %v5597_v8  ;;  %4297 = vmatpush.bf16.msrb.mxu2 %v5957_v11  ;;  %v4054_v6 = vadd.f32 %v4053_v44, %v4041_v58  ;;  %v5078_v8 = vld [vmem:[%s11042_s11 + $0x130] sm:$0xf0]  ;;  %v7029_v11 = vld [vmem:[%s11042_s11 + $0x3dc] sm:$0xf]  ;;  %v6161_v58 = vor.u32 %v7209_v50, %v6158_v52  ;;  %v6398_v50 = vld [vmem:[%s11042_s11 + $0xb80] sm:$0xf0] }
 0x2bf   :  { %4306 = vmatpush.bf16.msra.mxu1 %v6437_v12  ;;  %v5081_v18 = vor.u32 %v6939_v4, %v5078_v8  ;;  %v5441_v20 = vor.u32 %v7029_v11, %v5438_v33  ;;  %v7009_v44 = vld [vmem:[%s11042_s11 + $0x33c] sm:$0xf]  ;;  %v4961_v4 = vor.u32 %v6909_v56, %v4958_v30  ;;  %v6798_v11 = vld [vmem:[%s11042_s11 + $0xea0] sm:$0x70]  ;;  %v5761_v33 = vor.u32 %v7109_v61, %v5758_v63  ;;  %v5958_v61 = vld [vmem:[%s11042_s11 + $0x810] sm:$0xf0] }
 0x2c0   :  { %4320 = vmatpush.bf16.msrb.mxu3 %v6717_v51  ;;  %v7139_v51 = vld [vmem:[%s11042_s11 + $0x74c] sm:$0xf]  ;;  %v5361_v54 = vor.u32 %v7009_v44, %v5358_v45  ;;  %v7369_v8 = vld [vmem:[%s11042_s11 + $0xe7c] sm:$0xf] }
 0x2c1   :  { %4286 = vmatmul.bf16.vlgmr.msrb.gmra.mxu0 %v8473_v53  ;;  %v4068_v7 = vpop.f32.mrf.mxu1  ;;  %v5881_v26 = vor.u32 %v7139_v51, %v5878_v13  ;;  %v6989_v51 = vld [vmem:[%s11042_s11 + $0x29c] sm:$0xf]  ;;  %v5278_v13 = vld [vmem:[%s11042_s11 + $0x2c0] sm:$0xf0]  ;;  %v6801_v22 = vor.u32 %v7369_v8, %v6798_v11  ;;  %v7259_v63 = vld [vmem:[%s11042_s11 + $0xb0c] sm:$0xf] }
 0x2c2   :  { %4330 = vmatpush.bf16.msra.mxu0 %v5241_v16  ;;  %4298 = vmatpush.bf16.msrb.mxu2 %v5917_v24  ;;  %v4079_v12 = vpop.f32.mrf.mxu0  ;;  %v4055_v16 = vpop.f32.mrf.mxu3  ;;  %v4067_v24 = vadd.f32 %v4066_v39, %v4054_v6  ;;  %v5281_v23 = vor.u32 %v6989_v51, %v5278_v13  ;;  %v7349_v52 = vld [vmem:[%s11042_s11 + $0xddc] sm:$0xf] }
 0x2c3   :  { %4307 = vmatpush.bf16.msra.mxu1 %v6397_v27  ;;  %v5398_v27 = vld [vmem:[%s11042_s11 + $0x3b0] sm:$0xf0]  ;;  %v7069_v30 = vld [vmem:[%s11042_s11 + $0x51c] sm:$0xf] }
 0x2c4   :  { %4321 = vmatpush.bf16.msrb.mxu3 %v6677_v28  ;;  %v7129_v28 = vld [vmem:[%s11042_s11 + $0x6fc] sm:$0xf]  ;;  %v5401_v38 = vor.u32 %v7019_v47, %v5398_v27  ;;  %v5718_v16 = vld [vmem:[%s11042_s11 + $0x630] sm:$0xf0]  ;;  %v5678_v27 = vld [vmem:[%s11042_s11 + $0x5e0] sm:$0xf0] }
 0x2c5   :  { %4299 = vmatmul.bf16.vlgmr.msrb.gmra.mxu2 %v8484_v62  ;;  %v5841_v41 = vor.u32 %v7129_v28, %v5838_v29  ;;  %v7089_v47 = vld [vmem:[%s11042_s11 + $0x5bc] sm:$0xf]  ;;  %v7179_v28 = vld [vmem:[%s11042_s11 + $0x88c] sm:$0xf] }
 0x2c6   :  { %4331 = vmatpush.bf16.msra.mxu0 %v5201_v32  ;;  %4343 = vmatpush.bf16.msra.mxu2 %v5561_v35  ;;  %v6198_v32 = vld [vmem:[%s11042_s11 + $0x9f0] sm:$0xf0]  ;;  %v4080_v35 = vadd.f32 %v4079_v12, %v4067_v24  ;;  %v5681_v40 = vor.u32 %v7089_v47, %v5678_v27  ;;  %v1393_v47 = vperm.slane %v10075_v25, 4 }
 0x2c7   :  { %4308 = vmatpush.bf16.msra.mxu1 %v6357_v42  ;;  %v6201_v42 = vor.u32 %v7219_v31, %v6198_v32  ;;  %v6038_v31 = vld [vmem:[%s11042_s11 + $0x8b0] sm:$0xf0]  ;;  %v7279_v32 = vld [vmem:[%s11042_s11 + $0xbac] sm:$0xf] }
 0x2c8   :  { %4322 = vmatpush.bf16.msrb.mxu3 %v6637_v43  ;;  %v4092_v39 = vpop.f32.mrf.mxu2  ;;  %v6041_v21 = vor.u32 %v7179_v28, %v6038_v31  ;;  %v7239_v31 = vld [vmem:[%s11042_s11 + $0xa6c] sm:$0xf] }
 0x2c9   :  { %v4093_v43 = vadd.f32 %v4092_v39, %v4080_v35  ;;  %v6438_v35 = vld [vmem:[%s11042_s11 + $0xbd0] sm:$0xf0] }
 0x2ca   :  { %4332 = vmatpush.bf16.msra.mxu0 %v5161_v48  ;;  %4344 = vmatpush.bf16.msra.mxu2 %v5521_v49  ;;  %v4081_v48 = vpop.f32.mrf.mxu0  ;;  %v5798_v49 = vld [vmem:[%s11042_s11 + $0x6d0] sm:$0xf0]  ;;  %v6441_v44 = vor.u32 %v7279_v32, %v6438_v35 }
 0x2cb   :  { %4309 = vmatpush.bf16.msra.mxu1 %v6317_v59  ;;  %4567 = vst [vmem:[%s11045_s13 + $0x18] sm:$0xff] %v4093_v43  ;;  %v5801_v55 = vor.u32 %v7119_v46, %v5798_v49  ;;  %v6999_v59 = vld [vmem:[%s11042_s11 + $0x2ec] sm:$0xf]  ;;  %v6758_v39 = vld [vmem:[%s11042_s11 + $0xe50] sm:$0xf0] }
 0x2cc   :  { %4323 = vmatpush.bf16.msrb.mxu3 %v6597_v19  ;;  %v5318_v19 = vld [vmem:[%s11042_s11 + $0x310] sm:$0xf0]  ;;  %v7169_v46 = vld [vmem:[%s11042_s11 + $0x83c] sm:$0xf]  ;;  %v5998_v48 = vld [vmem:[%s11042_s11 + $0x860] sm:$0xf0] }
 0x2cd   :  { %v5321_v6 = vor.u32 %v6999_v59, %v5318_v19  ;;  %v5638_v43 = vld [vmem:[%s11042_s11 + $0x590] sm:$0xf0]  ;;  %v7269_v49 = vld [vmem:[%s11042_s11 + $0xb5c] sm:$0xf]  ;;  %v6001_v56 = vor.u32 %v7169_v46, %v5998_v48  ;;  %v7159_v19 = vld [vmem:[%s11042_s11 + $0x7ec] sm:$0xf] }
 0x2ce   :  { %4333 = vmatpush.bf16.msra.mxu0 %v5121_v0  ;;  %4345 = vmatpush.bf16.msra.mxu2 %v5481_v1  ;;  %v7199_v0 = vld [vmem:[%s11042_s11 + $0x92c] sm:$0xf]  ;;  %v6118_v1 = vld [vmem:[%s11042_s11 + $0x950] sm:$0xf0]  ;;  %v5961_v11 = vor.u32 %v7159_v19, %v5958_v61  ;;  %v7229_v48 = vld [vmem:[%s11042_s11 + $0xa1c] sm:$0xf] }
 0x2cf   :  { %4310 = vmatpush.bf16.msra.mxu1 %v6277_v14  ;;  %v6121_v12 = vor.u32 %v7199_v0, %v6118_v1  ;;  %v7099_v14 = vld [vmem:[%s11042_s11 + $0x60c] sm:$0xf]  ;;  %v6358_v1 = vld [vmem:[%s11042_s11 + $0xb30] sm:$0xf0]  ;;  %v5884_v19 = vld [vmem:[%s11042_s11 + $0x750] sm:$0xf] }
 0x2d0   :  { %4324 = vmatpush.bf16.msrb.mxu3 %v6557_v15  ;;  %v4094_v7 = vpop.f32.mrf.mxu2  ;;  %v6521_v15 = vor.u32 %v7299_v57, %v6518_v2  ;;  %v5721_v24 = vor.u32 %v7099_v14, %v5718_v16  ;;  %v7339_v57 = vld [vmem:[%s11042_s11 + $0xd8c] sm:$0xf]  ;;  %v6678_v2 = vld [vmem:[%s11042_s11 + $0xdb0] sm:$0xf0]  ;;  %v6361_v51 = vor.u32 %v7259_v63, %v6358_v1  ;;  %v5918_v14 = vld [vmem:[%s11042_s11 + $0x7c0] sm:$0xf0] }
 0x2d1   :  { %v6985_v7 = vld [vmem:[%s11042_s11 + $0x274] sm:$0xf0]  ;;  %v6681_v13 = vor.u32 %v7339_v57, %v6678_v2  ;;  %v6318_v16 = vld [vmem:[%s11042_s11 + $0xae0] sm:$0xf0]  ;;  %v6278_v32 = vld [vmem:[%s11042_s11 + $0xa90] sm:$0xf0] }
 0x2d2   :  { %4334 = vmatpush.bf16.msra.mxu0 %v5081_v18  ;;  %4346 = vmatpush.bf16.msra.mxu2 %v5441_v20  ;;  %v6078_v18 = vld [vmem:[%s11042_s11 + $0x900] sm:$0xf0]  ;;  %v7289_v20 = vld [vmem:[%s11042_s11 + $0xbfc] sm:$0xf]  ;;  %v7145_v61 = vld [vmem:[%s11042_s11 + $0x774] sm:$0xf0] }
 0x2d3   :  { %6816 = vmatmul.msk.bf16.vlgmr.msrb.gmra.mxu3 %vm3749_vm15, %v8585_v5  ;;  %4311 = vmatpush.bf16.msra.mxu1 %v6237_v36  ;;  %v6481_v29 = vor.u32 %v7289_v20, %v6478_v9  ;;  %v3776_v36 = vsel %vm3753_vm8, %v6801_v22, 0  ;;  %v6638_v20 = vld [vmem:[%s11042_s11 + $0xd60] sm:$0xf0]  ;;  %v5204_v9 = vld [vmem:[%s11042_s11 + $0x200] sm:$0xf] }
 0x2d4   :  { %4356 = vmatpush.bf16.msra.mxu3 %v5881_v26  ;;  %v6081_v26 = vor.u32 %v7189_v17, %v6078_v18  ;;  %v7329_v18 = vld [vmem:[%s11042_s11 + $0xd3c] sm:$0xf]  ;;  %v6975_v22 = vld [vmem:[%s11042_s11 + $0x224] sm:$0xf0]  ;;  %v7225_v63 = vld [vmem:[%s11042_s11 + $0x9f4] sm:$0xf0] }
 0x2d5   :  { %v6641_v28 = vor.u32 %v7329_v18, %v6638_v20  ;;  %v5205_v35 = vor.u32 %v6975_v22, %v5204_v9  ;;  %v5044_v22 = vld [vmem:[%s11042_s11 + $0xc0] sm:$0xf] }
 0x2d6   :  { %4335 = vmatpush.bf16.msra.mxu0 %v5041_v37  ;;  %4347 = vmatpush.bf16.msra.mxu2 %v5401_v38  ;;  %v7359_v38 = vld [vmem:[%s11042_s11 + $0xe2c] sm:$0xf] }
 0x2d7   :  { %4369 = vmatpush.bf16.msrb.mxu1 %v6201_v42  ;;  %v7079_v42 = vld [vmem:[%s11042_s11 + $0x56c] sm:$0xf]  ;;  %v6761_v45 = vor.u32 %v7359_v38, %v6758_v39  ;;  %v6598_v39 = vld [vmem:[%s11042_s11 + $0xd10] sm:$0xf0] }
 0x2d8   :  { %4357 = vmatpush.bf16.msra.mxu3 %v5841_v41  ;;  %4312 = vmatmul.bf16.vlgmr.msra.gmra.mxu1 %v8577_v60  ;;  %v7319_v38 = vld [vmem:[%s11042_s11 + $0xcec] sm:$0xf] }
 0x2d9   :  { %v10300_v37 = vpop.f32.mrf.mxu1  ;;  %v6601_v46 = vor.u32 %v7319_v38, %v6598_v39 }
 0x2da   :  { %4336 = vmatpush.bf16.msra.mxu0 %v5001_v34  ;;  %4348 = vmatpush.bf16.msra.mxu2 %v5361_v54  ;;  %v10308_v41 = vpop.f32.mrf.mxu3  ;;  %v6718_v34 = vld [vmem:[%s11042_s11 + $0xe00] sm:$0xf0]  ;;  %v5641_v54 = vor.u32 %v7079_v42, %v5638_v43  ;;  %v6965_v42 = vld [vmem:[%s11042_s11 + $0x1d4] sm:$0xf0]  ;;  %v5524_v43 = vld [vmem:[%s11042_s11 + $0x480] sm:$0xf] }
 0x2db   :  { %4370 = vmatpush.bf16.msrb.mxu1 %v6161_v58  ;;  %v6401_v58 = vor.u32 %v7269_v49, %v6398_v50  ;;  %v6721_v59 = vor.u32 %v7349_v52, %v6718_v34  ;;  %v6238_v49 = vld [vmem:[%s11042_s11 + $0xa40] sm:$0xf0]  ;;  %v7309_v50 = vld [vmem:[%s11042_s11 + $0xc9c] sm:$0xf] }
 0x2dc   :  { %4358 = vmatpush.bf16.msra.mxu3 %v5801_v55  ;;  %v5598_v55 = vld [vmem:[%s11042_s11 + $0x540] sm:$0xf0] }
 0x2dd   :  { %v5601_v8 = vor.u32 %v7069_v30, %v5598_v55  ;;  %v6955_v30 = vld [vmem:[%s11042_s11 + $0x184] sm:$0xf0]  ;;  %v4106_v55 = vadd.f32 %v10308_v41, %v1393_v47  ;;  %v6204_v41 = vld [vmem:[%s11042_s11 + $0x9d0] sm:$0xf] }
 0x2de   :  { %4337 = vmatpush.bf16.msra.mxu0 %v4961_v4  ;;  %4349 = vmatpush.bf16.msra.mxu2 %v5321_v6  ;;  %v5244_v6 = vld [vmem:[%s11042_s11 + $0x250] sm:$0xf] }
 0x2df   :  { %4371 = vmatpush.bf16.msrb.mxu1 %v6121_v12  ;;  %v7149_v12 = vld [vmem:[%s11042_s11 + $0x79c] sm:$0xf]  ;;  %v5245_v17 = vor.u32 %v6985_v7, %v5244_v6  ;;  %v5084_v7 = vld [vmem:[%s11042_s11 + $0x110] sm:$0xf] }
 0x2e0   :  { %4359 = vmatpush.bf16.msra.mxu3 %v5761_v33  ;;  %v5404_v47 = vld [vmem:[%s11042_s11 + $0x390] sm:$0xf] }
 0x2e1   :  { %4338 = vmatmul.bf16.vlgmr.msra.gmra.mxu0 %v8404_v3  ;;  %v4120_v0 = vpop.f32.mrf.mxu1 }
 0x2e2   :  { %4382 = vmatpush.bf16.msrb.mxu0 %v6521_v15  ;;  %4350 = vmatpush.bf16.msra.mxu2 %v5281_v23  ;;  %v10359_v4 = vpop.f32.mrf.mxu0  ;;  %v4107_v33 = vpop.f32.mrf.mxu3  ;;  %v7249_v15 = vld [vmem:[%s11042_s11 + $0xabc] sm:$0xf]  ;;  %v5564_v23 = vld [vmem:[%s11042_s11 + $0x4d0] sm:$0xf]  ;;  %v6241_v0 = vor.u32 %v7229_v48, %v6238_v49  ;;  %v7115_v49 = vld [vmem:[%s11042_s11 + $0x684] sm:$0xf0] }
 0x2e3   :  { %4372 = vmatpush.bf16.msrb.mxu1 %v6081_v26  ;;  %v5921_v26 = vor.u32 %v7149_v12, %v5918_v14  ;;  %v6321_v27 = vor.u32 %v7249_v15, %v6318_v16  ;;  %v5885_v33 = vor.u32 %v7145_v61, %v5884_v19  ;;  %v6205_v12 = vor.u32 %v7225_v63, %v6204_v41  ;;  %v5844_v14 = vld [vmem:[%s11042_s11 + $0x700] sm:$0xf]  ;;  %v7135_v16 = vld [vmem:[%s11042_s11 + $0x724] sm:$0xf0]  ;;  %v5724_v41 = vld [vmem:[%s11042_s11 + $0x610] sm:$0xf] }
 0x2e4   :  { %4360 = vmatpush.bf16.msra.mxu3 %v5721_v24  ;;  %v7065_v24 = vld [vmem:[%s11042_s11 + $0x4f4] sm:$0xf0] }
 0x2e5   :  { %4351 = vmatmul.bf16.vlgmr.msra.gmra.mxu2 %v8412_v10  ;;  %v7105_v63 = vld [vmem:[%s11042_s11 + $0x634] sm:$0xf0] }
 0x2e6   :  { %4383 = vmatpush.bf16.msrb.mxu0 %v6481_v29  ;;  %4396 = vmatpush.bf16.msrb.mxu2 %v3776_v36  ;;  %v5565_v36 = vor.u32 %v7065_v24, %v5564_v23  ;;  %v6935_v23 = vld [vmem:[%s11042_s11 + $0xe4] sm:$0xf0]  ;;  %v5845_v24 = vor.u32 %v7135_v16, %v5844_v14  ;;  %v5284_v14 = vld [vmem:[%s11042_s11 + $0x2a0] sm:$0xf] }
 0x2e7   :  { %4373 = vmatpush.bf16.msrb.mxu1 %v6041_v21  ;;  %v5684_v16 = vld [vmem:[%s11042_s11 + $0x5c0] sm:$0xf] }
 0x2e8   :  { %4361 = vmatpush.bf16.msra.mxu3 %v5681_v40  ;;  %v4131_v29 = vpop.f32.mrf.mxu2  ;;  %v5164_v40 = vld [vmem:[%s11042_s11 + $0x1b0] sm:$0xf] }
 0x2e9   :  { %v5165_v52 = vor.u32 %v6965_v42, %v5164_v40  ;;  %v5004_v40 = vld [vmem:[%s11042_s11 + $0x70] sm:$0xf] }
 0x2ea   :  { %4384 = vmatpush.bf16.msrb.mxu0 %v6441_v44  ;;  %4397 = vmatpush.bf16.msrb.mxu2 %v6761_v45  ;;  %v4146_v21 = vpop.f32.mrf.mxu0  ;;  %v7055_v44 = vld [vmem:[%s11042_s11 + $0x4a4] sm:$0xf0]  ;;  %v6281_v45 = vor.u32 %v7239_v31, %v6278_v32  ;;  %v6124_v31 = vld [vmem:[%s11042_s11 + $0x930] sm:$0xf]  ;;  %v7205_v32 = vld [vmem:[%s11042_s11 + $0x954] sm:$0xf0] }
 0x2eb   :  { %4374 = vmatpush.bf16.msrb.mxu1 %v6001_v56  ;;  %v5525_v34 = vor.u32 %v7055_v44, %v5524_v43  ;;  %v5124_v56 = vld [vmem:[%s11042_s11 + $0x160] sm:$0xf]  ;;  %v6925_v21 = vld [vmem:[%s11042_s11 + $0x94] sm:$0xf0]  ;;  %v6125_v44 = vor.u32 %v7205_v32, %v6124_v31  ;;  %v5964_v31 = vld [vmem:[%s11042_s11 + $0x7f0] sm:$0xf] }
 0x2ec   :  { %4362 = vmatpush.bf16.msra.mxu3 %v5641_v54  ;;  %v6558_v54 = vld [vmem:[%s11042_s11 + $0xcc0] sm:$0xf0]  ;;  %v5125_v2 = vor.u32 %v6955_v30, %v5124_v56  ;;  %v5005_v56 = vor.u32 %v6925_v21, %v5004_v40  ;;  %v7285_v40 = vld [vmem:[%s11042_s11 + $0xbd4] sm:$0xf0]  ;;  %v6764_v21 = vld [vmem:[%s11042_s11 + $0xe30] sm:$0xf] }
 0x2ed   :  { %v6561_v1 = vor.u32 %v7309_v50, %v6558_v54  ;;  %v6084_v50 = vld [vmem:[%s11042_s11 + $0x8e0] sm:$0xf] }
 0x2ee   :  { %4385 = vmatpush.bf16.msrb.mxu0 %v6401_v58  ;;  %4398 = vmatpush.bf16.msrb.mxu2 %v6721_v59  ;;  %v5484_v58 = vld [vmem:[%s11042_s11 + $0x430] sm:$0xf]  ;;  %v7045_v59 = vld [vmem:[%s11042_s11 + $0x454] sm:$0xf0]  ;;  %v4964_v54 = vld [vmem:[%s11042_s11 + $0x20] sm:$0xf] }
 0x2ef   :  { %4375 = vmatpush.bf16.msrb.mxu1 %v5961_v11  ;;  %v5485_v6 = vor.u32 %v7045_v59, %v5484_v58  ;;  %v4119_v11 = vadd.f32 %v10300_v37, %v4106_v55  ;;  %v6164_v37 = vld [vmem:[%s11042_s11 + $0x980] sm:$0xf]  ;;  %v6915_v55 = vld [vmem:[%s11042_s11 + $0x44] sm:$0xf0]  ;;  %v5324_v58 = vld [vmem:[%s11042_s11 + $0x2f0] sm:$0xf] }
 0x2f0   :  { %4363 = vmatpush.bf16.msra.mxu3 %v5601_v8  ;;  %v4133_v57 = vpop.f32.mrf.mxu2  ;;  %v6945_v8 = vld [vmem:[%s11042_s11 + $0x134] sm:$0xf0] }
 0x2f1   :  { %v4132_v18 = vadd.f32 %v4131_v29, %v4119_v11  ;;  %v5085_v20 = vor.u32 %v6945_v8, %v5084_v7  ;;  %v7125_v29 = vld [vmem:[%s11042_s11 + $0x6d4] sm:$0xf0]  ;;  %v6524_v57 = vld [vmem:[%s11042_s11 + $0xc50] sm:$0xf]  ;;  %v6804_v7 = vld [vmem:[%s11042_s11 + $0xe80] sm:$0xf]  ;;  %v4965_v11 = vor.u32 %v6915_v55, %v4964_v54 }
 0x2f2   :  { %4386 = vmatpush.bf16.msrb.mxu0 %v6361_v51  ;;  %4399 = vmatpush.bf16.msrb.mxu2 %v6681_v13  ;;  %v5444_v51 = vld [vmem:[%s11042_s11 + $0x3e0] sm:$0xf]  ;;  %v7035_v13 = vld [vmem:[%s11042_s11 + $0x404] sm:$0xf0]  ;;  %v7005_v59 = vld [vmem:[%s11042_s11 + $0x314] sm:$0xf0] }
 0x2f3   :  { %4364 = vmatmul.bf16.vlgmr.msra.gmra.mxu3 %v8473_v53  ;;  %4376 = vmatpush.bf16.msrb.mxu1 %v5921_v26  ;;  %v5445_v9 = vor.u32 %v7035_v13, %v5444_v51  ;;  %v7375_v8 = vld [vmem:[%s11042_s11 + $0xea4] sm:$0x70]  ;;  %v5725_v51 = vor.u32 %v7105_v63, %v5724_v41  ;;  %v6724_v54 = vld [vmem:[%s11042_s11 + $0xde0] sm:$0xf]  ;;  %v5246_v55 = vld [vmem:[%s11042_s11 + $0x278] sm:$0xf0] }
 0x2f4   :  { %4408 = vmatpush.bf16.msrb.mxu3 %v5245_v17  ;;  %v7215_v17 = vld [vmem:[%s11042_s11 + $0x9a4] sm:$0xf0] }
 0x2f5   :  { %v4170_v15 = vpop.f32.mrf.mxu1  ;;  %v6165_v26 = vor.u32 %v7215_v17, %v6164_v37  ;;  %v7095_v17 = vld [vmem:[%s11042_s11 + $0x5e4] sm:$0xf0] }
 0x2f6   :  { %4387 = vmatpush.bf16.msrb.mxu0 %v6321_v27  ;;  %4400 = vmatpush.bf16.msrb.mxu2 %v6641_v28  ;;  %v7025_v27 = vld [vmem:[%s11042_s11 + $0x3b4] sm:$0xf0]  ;;  %v5804_v28 = vld [vmem:[%s11042_s11 + $0x6b0] sm:$0xf] }
 0x2f7   :  { %4421 = vmatpush.bf16.msra.mxu1 %v5565_v36  ;;  %v5045_v36 = vor.u32 %v6935_v23, %v5044_v22  ;;  %v5405_v38 = vor.u32 %v7025_v27, %v5404_v47  ;;  %v5805_v43 = vor.u32 %v7125_v29, %v5804_v28  ;;  %v6484_v22 = vld [vmem:[%s11042_s11 + $0xc00] sm:$0xf]  ;;  %v7295_v23 = vld [vmem:[%s11042_s11 + $0xc24] sm:$0xf0]  ;;  %v5644_v28 = vld [vmem:[%s11042_s11 + $0x570] sm:$0xf] }
 0x2f8   :  { %4409 = vmatpush.bf16.msrb.mxu3 %v5205_v35  ;;  %4377 = vmatmul.bf16.vlgmr.msrb.gmra.mxu1 %v8484_v62  ;;  %v4145_v35 = vadd.f32 %v10359_v4, %v4132_v18  ;;  %v5364_v4 = vld [vmem:[%s11042_s11 + $0x340] sm:$0xf]  ;;  %v7085_v29 = vld [vmem:[%s11042_s11 + $0x594] sm:$0xf0]  ;;  %v6485_v32 = vor.u32 %v7295_v23, %v6484_v22  ;;  %v7335_v22 = vld [vmem:[%s11042_s11 + $0xd64] sm:$0xf0] }
 0x2f9   :  { %v6004_v18 = vld [vmem:[%s11042_s11 + $0x840] sm:$0xf]  ;;  %v6960_v23 = vld [vmem:[%s11042_s11 + $0x1b4] sm:$0xf] }
 0x2fa   :  { %4388 = vmatpush.bf16.msrb.mxu0 %v6281_v45  ;;  %4401 = vmatpush.bf16.msrb.mxu2 %v6601_v46  ;;  %v4157_v39 = vpop.f32.mrf.mxu3  ;;  %v7015_v45 = vld [vmem:[%s11042_s11 + $0x364] sm:$0xf0]  ;;  %v5764_v46 = vld [vmem:[%s11042_s11 + $0x660] sm:$0xf] }
 0x2fb   :  { %4422 = vmatpush.bf16.msra.mxu1 %v5525_v34  ;;  %v4158_v42 = vadd.f32 %v4157_v39, %v4145_v35  ;;  %v5365_v30 = vor.u32 %v7015_v45, %v5364_v4  ;;  %v5765_v19 = vor.u32 %v7115_v49, %v5764_v46  ;;  %v5604_v4 = vld [vmem:[%s11042_s11 + $0x520] sm:$0xf]  ;;  %v7075_v45 = vld [vmem:[%s11042_s11 + $0x544] sm:$0xf0] }
 0x2fc   :  { %4410 = vmatpush.bf16.msrb.mxu3 %v5165_v52  ;;  %v7195_v52 = vld [vmem:[%s11042_s11 + $0x904] sm:$0xf0]  ;;  %v5924_v46 = vld [vmem:[%s11042_s11 + $0x7a0] sm:$0xf] }
 0x2fd   :  { %v4172_v48 = vpop.f32.mrf.mxu1  ;;  %v4171_v34 = vadd.f32 %v4170_v15, %v4158_v42  ;;  %v6085_v61 = vor.u32 %v7195_v52, %v6084_v50  ;;  %v6995_v15 = vld [vmem:[%s11042_s11 + $0x2c4] sm:$0xf0]  ;;  %v7365_v42 = vld [vmem:[%s11042_s11 + $0xe54] sm:$0xf0]  ;;  %v6404_v52 = vld [vmem:[%s11042_s11 + $0xb60] sm:$0xf] }
 0x2fe   :  { %4389 = vmatpush.bf16.msrb.mxu0 %v6241_v0  ;;  %4402 = vmatpush.bf16.msrb.mxu2 %v6561_v1  ;;  %v6044_v0 = vld [vmem:[%s11042_s11 + $0x890] sm:$0xf]  ;;  %v7185_v1 = vld [vmem:[%s11042_s11 + $0x8b4] sm:$0xf0]  ;;  %v6765_v49 = vor.u32 %v7365_v42, %v6764_v21  ;;  %v7155_v50 = vld [vmem:[%s11042_s11 + $0x7c4] sm:$0xf0] }
 0x2ff   :  { %4423 = vmatpush.bf16.msra.mxu1 %v5485_v6  ;;  %4568 = vst [vmem:[%s11045_s13 + $0x20] sm:$0xff] %v4171_v34  ;;  %v7305_v6 = vld [vmem:[%s11042_s11 + $0xc74] sm:$0xf0]  ;;  %v6045_v13 = vor.u32 %v7185_v1, %v6044_v0  ;;  %v7275_v34 = vld [vmem:[%s11042_s11 + $0xb84] sm:$0xf0] }
 0x300   :  { %4411 = vmatpush.bf16.msrb.mxu3 %v5125_v2  ;;  %v6525_v37 = vor.u32 %v7305_v6, %v6524_v57  ;;  %v6405_v63 = vor.u32 %v7275_v34, %v6404_v52  ;;  %v6364_v1 = vld [vmem:[%s11042_s11 + $0xb10] sm:$0xf]  ;;  %v7265_v57 = vld [vmem:[%s11042_s11 + $0xb34] sm:$0xf0]  ;;  %v6950_v21 = vld [vmem:[%s11042_s11 + $0x164] sm:$0xf] }
 0x301   :  { %4390 = vmatmul.bf16.vlgmr.msrb.gmra.mxu0 %v8577_v60  ;;  %6817 = vmatmul.msk.bf16.vlgmr.msrb.gmra.mxu2 %vm3749_vm15, %v8585_v5  ;;  %v7235_v52 = vld [vmem:[%s11042_s11 + $0xa44] sm:$0xf0]  ;;  %v6564_v34 = vld [vmem:[%s11042_s11 + $0xca0] sm:$0xf] }
 0x302   :  { %4434 = vmatpush.bf16.msra.mxu2 %v5885_v33  ;;  %4447 = vmatpush.bf16.msra.mxu0 %v6205_v12  ;;  %v10568_v2 = vpop.f32.mrf.mxu0  ;;  %v5325_v33 = vor.u32 %v7005_v59, %v5324_v58  ;;  %v4159_v12 = vpop.f32.mrf.mxu3  ;;  %v7060_v58 = vld [vmem:[%s11042_s11 + $0x4d4] sm:$0xf]  ;;  %v5566_v59 = vld [vmem:[%s11042_s11 + $0x4f8] sm:$0xf0] }
 0x303   :  { %4424 = vmatpush.bf16.msra.mxu1 %v5445_v9  ;;  %v6805_v9 = vor.u32 %v7375_v8, %v6804_v7  ;;  %v5569_v7 = vor.u32 %v7060_v58, %v5566_v59  ;;  %v6684_v8 = vld [vmem:[%s11042_s11 + $0xd90] sm:$0xf]  ;;  %v7020_v58 = vld [vmem:[%s11042_s11 + $0x394] sm:$0xf]  ;;  %v5406_v59 = vld [vmem:[%s11042_s11 + $0x3b8] sm:$0xf0] }
 0x304   :  { %4412 = vmatpush.bf16.msrb.mxu3 %v5085_v20  ;;  %v7175_v20 = vld [vmem:[%s11042_s11 + $0x864] sm:$0xf0] }
 0x305   :  { %v6005_v47 = vor.u32 %v7175_v20, %v6004_v18  ;;  %v3779_v35 = vsel %vm3753_vm8, %v6805_v9, 0  ;;  %v6644_v9 = vld [vmem:[%s11042_s11 + $0xd40] sm:$0xf] }
 0x306   :  { %4435 = vmatpush.bf16.msra.mxu2 %v5845_v24  ;;  %4448 = vmatpush.bf16.msra.mxu0 %v6165_v26  ;;  %v5285_v24 = vor.u32 %v6995_v15, %v5284_v14  ;;  %v5685_v26 = vor.u32 %v7095_v17, %v5684_v16  ;;  %v5526_v14 = vld [vmem:[%s11042_s11 + $0x4a8] sm:$0xf0]  ;;  %v6365_v15 = vor.u32 %v7265_v57, %v6364_v1  ;;  %v7255_v17 = vld [vmem:[%s11042_s11 + $0xae4] sm:$0xf0] }
 0x307   :  { %4425 = vmatpush.bf16.msra.mxu1 %v5405_v38  ;;  %v6444_v38 = vld [vmem:[%s11042_s11 + $0xbb0] sm:$0xf] }
 0x308   :  { %4413 = vmatpush.bf16.msrb.mxu3 %v5045_v36  ;;  %v10603_v27 = vpop.f32.mrf.mxu2  ;;  %v7165_v36 = vld [vmem:[%s11042_s11 + $0x814] sm:$0xf0]  ;;  %v6445_v48 = vor.u32 %v7285_v40, %v6444_v38 }
 0x309   :  { %v7325_v40 = vld [vmem:[%s11042_s11 + $0xd14] sm:$0xf0] }
 0x30a   :  { %4436 = vmatpush.bf16.msra.mxu2 %v5805_v43  ;;  %4449 = vmatpush.bf16.msra.mxu0 %v6125_v44  ;;  %v4198_v39 = vpop.f32.mrf.mxu0  ;;  %v5645_v43 = vor.u32 %v7085_v29, %v5644_v28  ;;  %v5965_v44 = vor.u32 %v7165_v36, %v5964_v31  ;;  %v1394_v28 = vperm.slane %v10075_v25, 5  ;;  %v6645_v31 = vor.u32 %v7335_v22, %v6644_v9  ;;  %v7245_v36 = vld [vmem:[%s11042_s11 + $0xa94] sm:$0xf0]  ;;  %v6604_v25 = vld [vmem:[%s11042_s11 + $0xcf0] sm:$0xf] }
 0x30b   :  { %4426 = vmatpush.bf16.msra.mxu1 %v5365_v30  ;;  %v6980_v30 = vld [vmem:[%s11042_s11 + $0x254] sm:$0xf] }
 0x30c   :  { %4414 = vmatpush.bf16.msrb.mxu3 %v5005_v56  ;;  %v7355_v56 = vld [vmem:[%s11042_s11 + $0xe04] sm:$0xf0]  ;;  %v5249_v6 = vor.u32 %v6980_v30, %v5246_v55  ;;  %v6940_v30 = vld [vmem:[%s11042_s11 + $0x114] sm:$0xf]  ;;  %v5086_v55 = vld [vmem:[%s11042_s11 + $0x138] sm:$0xf0] }
 0x30d   :  { %v6725_v0 = vor.u32 %v7355_v56, %v6724_v54  ;;  %v7315_v56 = vld [vmem:[%s11042_s11 + $0xcc4] sm:$0xf0] }
 0x30e   :  { %4437 = vmatpush.bf16.msra.mxu2 %v5765_v19  ;;  %4450 = vmatpush.bf16.msra.mxu0 %v6085_v61  ;;  %v5605_v19 = vor.u32 %v7075_v45, %v5604_v4  ;;  %v5925_v61 = vor.u32 %v7155_v50, %v5924_v46  ;;  %v5446_v4 = vld [vmem:[%s11042_s11 + $0x408] sm:$0xf0]  ;;  %v4184_v46 = vadd.f32 %v10603_v27, %v1394_v28  ;;  %v6244_v50 = vld [vmem:[%s11042_s11 + $0xa20] sm:$0xf] }
 0x30f   :  { %4427 = vmatpush.bf16.msra.mxu1 %v5325_v33  ;;  %v6970_v33 = vld [vmem:[%s11042_s11 + $0x204] sm:$0xf]  ;;  %v6245_v1 = vor.u32 %v7235_v52, %v6244_v50  ;;  %v6565_v57 = vor.u32 %v7315_v56, %v6564_v34  ;;  %v5766_v52 = vld [vmem:[%s11042_s11 + $0x688] sm:$0xf0]  ;;  %v7300_v56 = vld [vmem:[%s11042_s11 + $0xc54] sm:$0xf] }
 0x310   :  { %4415 = vmatpush.bf16.msrb.mxu3 %v4965_v11  ;;  %v4185_v41 = vpop.f32.mrf.mxu2  ;;  %v7345_v11 = vld [vmem:[%s11042_s11 + $0xdb4] sm:$0xf0]  ;;  %v7110_v50 = vld [vmem:[%s11042_s11 + $0x664] sm:$0xf] }
 0x311   :  { %v6685_v16 = vor.u32 %v7345_v11, %v6684_v8  ;;  %v7220_v41 = vld [vmem:[%s11042_s11 + $0x9d4] sm:$0xf]  ;;  %v5409_v8 = vor.u32 %v7020_v58, %v5406_v59  ;;  %v6930_v11 = vld [vmem:[%s11042_s11 + $0xc4] sm:$0xf] }
 0x312   :  { %4438 = vmatpush.bf16.msra.mxu2 %v5725_v51  ;;  %4451 = vmatpush.bf16.msra.mxu0 %v6045_v13  ;;  %v5206_v51 = vld [vmem:[%s11042_s11 + $0x228] sm:$0xf0]  ;;  %v7050_v13 = vld [vmem:[%s11042_s11 + $0x484] sm:$0xf] }
 0x313   :  { %4416 = vmatmul.bf16.vlgmr.msrb.gmra.mxu3 %v8404_v3  ;;  %4428 = vmatpush.bf16.msra.mxu1 %v5285_v24  ;;  %v5209_v18 = vor.u32 %v6970_v33, %v5206_v51  ;;  %v5529_v20 = vor.u32 %v7050_v13, %v5526_v14  ;;  %v5166_v24 = vld [vmem:[%s11042_s11 + $0x1d8] sm:$0xf0]  ;;  %v5046_v33 = vld [vmem:[%s11042_s11 + $0xe8] sm:$0xf0]  ;;  %v7010_v14 = vld [vmem:[%s11042_s11 + $0x344] sm:$0xf] }
 0x314   :  { %4460 = vmatpush.bf16.msra.mxu3 %v6525_v37  ;;  %v6324_v37 = vld [vmem:[%s11042_s11 + $0xac0] sm:$0xf]  ;;  %v5169_v38 = vor.u32 %v6960_v23, %v5166_v24  ;;  %v5049_v9 = vor.u32 %v6930_v11, %v5046_v33  ;;  %v6920_v24 = vld [vmem:[%s11042_s11 + $0x74] sm:$0xf]  ;;  %v7190_v34 = vld [vmem:[%s11042_s11 + $0x8e4] sm:$0xf] }
 0x315   :  { %v10683_v12 = vpop.f32.mrf.mxu1  ;;  %v6325_v29 = vor.u32 %v7255_v17, %v6324_v37  ;;  %v5846_v17 = vld [vmem:[%s11042_s11 + $0x728] sm:$0xf0]  ;;  %v7360_v33 = vld [vmem:[%s11042_s11 + $0xe34] sm:$0xf] }
 0x316   :  { %4439 = vmatpush.bf16.msra.mxu2 %v5685_v26  ;;  %4452 = vmatpush.bf16.msra.mxu0 %v6005_v47  ;;  %v7040_v26 = vld [vmem:[%s11042_s11 + $0x434] sm:$0xf]  ;;  %v5486_v47 = vld [vmem:[%s11042_s11 + $0x458] sm:$0xf0]  ;;  %v6486_v11 = vld [vmem:[%s11042_s11 + $0xc28] sm:$0xf0] }
 0x317   :  { %4474 = vmatpush.bf16.msrb.mxu1 %v3779_v35  ;;  %v6284_v35 = vld [vmem:[%s11042_s11 + $0xa70] sm:$0xf]  ;;  %v5489_v39 = vor.u32 %v7040_v26, %v5486_v47  ;;  %v5006_v26 = vld [vmem:[%s11042_s11 + $0x98] sm:$0xf0] }
 0x318   :  { %4461 = vmatpush.bf16.msra.mxu3 %v6485_v32  ;;  %4429 = vmatmul.bf16.vlgmr.msra.gmra.mxu1 %v8412_v10 }
 0x31a   :  { %4440 = vmatpush.bf16.msra.mxu2 %v5645_v43  ;;  %4453 = vmatpush.bf16.msra.mxu0 %v5965_v44  ;;  %v4222_v32 = vpop.f32.mrf.mxu3  ;;  %v5126_v43 = vld [vmem:[%s11042_s11 + $0x188] sm:$0xf0]  ;;  %v7030_v44 = vld [vmem:[%s11042_s11 + $0x3e4] sm:$0xf] }
 0x31b   :  { %4475 = vmatpush.bf16.msrb.mxu1 %v6765_v49  ;;  %v6605_v49 = vor.u32 %v7325_v40, %v6604_v25  ;;  %v5129_v54 = vor.u32 %v6950_v21, %v5126_v43  ;;  %v5449_v27 = vor.u32 %v7030_v44, %v5446_v4  ;;  %v7370_v40 = vld [vmem:[%s11042_s11 + $0xe84] sm:$0xf]  ;;  %v6806_v21 = vld [vmem:[%s11042_s11 + $0xea8] sm:$0x70] }
 0x31c   :  { %4462 = vmatpush.bf16.msra.mxu3 %v6445_v48  ;;  %v6285_v48 = vor.u32 %v7245_v36, %v6284_v35  ;;  %v7120_v35 = vld [vmem:[%s11042_s11 + $0x6b4] sm:$0xf]  ;;  %v5806_v36 = vld [vmem:[%s11042_s11 + $0x6d8] sm:$0xf0]  ;;  %v6910_v44 = vld [vmem:[%s11042_s11 + $0x24] sm:$0xf] }
 0x31d   :  { %v4211_v42 = vpop.f32.mrf.mxu1  ;;  %v4966_v4 = vld [vmem:[%s11042_s11 + $0x48] sm:$0xf0] }
 0x31e   :  { %4441 = vmatpush.bf16.msra.mxu2 %v5605_v19  ;;  %4454 = vmatpush.bf16.msra.mxu0 %v5925_v61  ;;  %v10745_v45 = vpop.f32.mrf.mxu0  ;;  %v7140_v19 = vld [vmem:[%s11042_s11 + $0x754] sm:$0xf]  ;;  %v5886_v61 = vld [vmem:[%s11042_s11 + $0x778] sm:$0xf0]  ;;  %v5009_v42 = vor.u32 %v6920_v24, %v5006_v26 }
 0x31f   :  { %4476 = vmatpush.bf16.msrb.mxu1 %v6725_v0  ;;  %v4197_v0 = vadd.f32 %v10568_v2, %v4184_v46  ;;  %v5889_v2 = vor.u32 %v7140_v19, %v5886_v61  ;;  %v5809_v46 = vor.u32 %v7120_v35, %v5806_v36  ;;  %v5769_v19 = vor.u32 %v7110_v50, %v5766_v52  ;;  %v6406_v36 = vld [vmem:[%s11042_s11 + $0xb88] sm:$0xf0]  ;;  %v7330_v50 = vld [vmem:[%s11042_s11 + $0xd44] sm:$0xf] }
 0x320   :  { %4463 = vmatpush.bf16.msra.mxu3 %v6405_v63  ;;  %v6206_v63 = vld [vmem:[%s11042_s11 + $0x9f8] sm:$0xf0]  ;;  %v6646_v52 = vld [vmem:[%s11042_s11 + $0xd68] sm:$0xf0] }
 0x321   :  { %4442 = vmatmul.bf16.vlgmr.msra.gmra.mxu2 %v8473_v53  ;;  %4455 = vmatmul.bf16.vlgmr.msra.gmra.mxu0 %v8484_v62  ;;  %v4210_v51 = vadd.f32 %v10683_v12, %v4197_v0  ;;  %v6209_v13 = vor.u32 %v7220_v41, %v6206_v63  ;;  %v7210_v12 = vld [vmem:[%s11042_s11 + $0x984] sm:$0xf]  ;;  %v7100_v41 = vld [vmem:[%s11042_s11 + $0x614] sm:$0xf]  ;;  %v5726_v63 = vld [vmem:[%s11042_s11 + $0x638] sm:$0xf0] }
 0x322   :  { %4486 = vmatpush.bf16.msrb.mxu2 %v5249_v6  ;;  %4499 = vmatpush.bf16.msrb.mxu0 %v5569_v7  ;;  %v4224_v6 = vpop.f32.mrf.mxu3  ;;  %v5089_v7 = vor.u32 %v6940_v30, %v5086_v55  ;;  %v6526_v30 = vld [vmem:[%s11042_s11 + $0xc78] sm:$0xf0]  ;;  %v4969_v55 = vor.u32 %v6910_v44, %v4966_v4  ;;  %v7180_v0 = vld [vmem:[%s11042_s11 + $0x894] sm:$0xf] }
 0x323   :  { %4477 = vmatpush.bf16.msrb.mxu1 %v6685_v16  ;;  %v7130_v16 = vld [vmem:[%s11042_s11 + $0x704] sm:$0xf]  ;;  %v6046_v6 = vld [vmem:[%s11042_s11 + $0x8b8] sm:$0xf0] }
 0x324   :  { %4464 = vmatpush.bf16.msra.mxu3 %v6365_v15  ;;  %v5366_v15 = vld [vmem:[%s11042_s11 + $0x368] sm:$0xf0]  ;;  %v5849_v47 = vor.u32 %v7130_v16, %v5846_v17  ;;  %v7170_v17 = vld [vmem:[%s11042_s11 + $0x844] sm:$0xf] }
 0x325   :  { %v5369_v22 = vor.u32 %v7010_v14, %v5366_v15  ;;  %v7090_v14 = vld [vmem:[%s11042_s11 + $0x5c4] sm:$0xf]  ;;  %v5686_v15 = vld [vmem:[%s11042_s11 + $0x5e8] sm:$0xf0] }
 0x326   :  { %4487 = vmatpush.bf16.msrb.mxu2 %v5209_v18  ;;  %4500 = vmatpush.bf16.msrb.mxu0 %v5529_v20  ;;  %v4250_v37 = vpop.f32.mrf.mxu0  ;;  %v6166_v18 = vld [vmem:[%s11042_s11 + $0x9a8] sm:$0xf0]  ;;  %v4223_v20 = vadd.f32 %v4222_v32, %v4210_v51  ;;  %v5326_v32 = vld [vmem:[%s11042_s11 + $0x318] sm:$0xf0] }
 0x327   :  { %4478 = vmatpush.bf16.msrb.mxu1 %v6645_v31  ;;  %v6169_v28 = vor.u32 %v7210_v12, %v6166_v18  ;;  %v7000_v31 = vld [vmem:[%s11042_s11 + $0x2f4] sm:$0xf]  ;;  %v6766_v51 = vld [vmem:[%s11042_s11 + $0xe58] sm:$0xf0]  ;;  %v6006_v12 = vld [vmem:[%s11042_s11 + $0x868] sm:$0xf0] }
 0x328   :  { %4465 = vmatpush.bf16.msra.mxu3 %v6325_v29  ;;  %v4235_v23 = vpop.f32.mrf.mxu2  ;;  %v5329_v43 = vor.u32 %v7000_v31, %v5326_v32  ;;  %v6769_v37 = vor.u32 %v7360_v33, %v6766_v51  ;;  %v7280_v18 = vld [vmem:[%s11042_s11 + $0xbb4] sm:$0xf]  ;;  %v6009_v24 = vor.u32 %v7170_v17, %v6006_v12  ;;  %v5966_v31 = vld [vmem:[%s11042_s11 + $0x818] sm:$0xf0]  ;;  %v7270_v32 = vld [vmem:[%s11042_s11 + $0xb64] sm:$0xf] }
 0x329   :  { %v4236_v29 = vadd.f32 %v4235_v23, %v4223_v20  ;;  %v6446_v20 = vld [vmem:[%s11042_s11 + $0xbd8] sm:$0xf0]  ;;  %v5689_v23 = vor.u32 %v7090_v14, %v5686_v15  ;;  %v6409_v44 = vor.u32 %v7270_v32, %v6406_v36  ;;  %v6566_v33 = vld [vmem:[%s11042_s11 + $0xcc8] sm:$0xf0]  ;;  %v7230_v15 = vld [vmem:[%s11042_s11 + $0xa24] sm:$0xf] }
 0x32a   :  { %4488 = vmatpush.bf16.msrb.mxu2 %v5169_v38  ;;  %4501 = vmatpush.bf16.msrb.mxu0 %v5489_v39  ;;  %v7200_v38 = vld [vmem:[%s11042_s11 + $0x934] sm:$0xf]  ;;  %v6126_v39 = vld [vmem:[%s11042_s11 + $0x958] sm:$0xf0] }
 0x32b   :  { %4479 = vmatpush.bf16.msrb.mxu1 %v6605_v49  ;;  %v4249_v25 = vadd.f32 %v10745_v45, %v4236_v29  ;;  %v6990_v45 = vld [vmem:[%s11042_s11 + $0x2a4] sm:$0xf]  ;;  %v5286_v49 = vld [vmem:[%s11042_s11 + $0x2c8] sm:$0xf0]  ;;  %v7160_v29 = vld [vmem:[%s11042_s11 + $0x7f4] sm:$0xf] }
 0x32c   :  { %4466 = vmatpush.bf16.msra.mxu3 %v6285_v48  ;;  %v6129_v48 = vor.u32 %v7200_v38, %v6126_v39  ;;  %v5289_v58 = vor.u32 %v6990_v45, %v5286_v49  ;;  %v7340_v38 = vld [vmem:[%s11042_s11 + $0xd94] sm:$0xf]  ;;  %v6686_v39 = vld [vmem:[%s11042_s11 + $0xdb8] sm:$0xf0]  ;;  %v7150_v45 = vld [vmem:[%s11042_s11 + $0x7a4] sm:$0xf] }
 0x32d   :  { %4569 = vst [vmem:[%s11045_s13 + $0x28] sm:$0xff] %v4249_v25  ;;  %v6689_v4 = vor.u32 %v7340_v38, %v6686_v39  ;;  %v6366_v49 = vld [vmem:[%s11042_s11 + $0xb38] sm:$0xf0] }
 0x32e   :  { %4489 = vmatpush.bf16.msrb.mxu2 %v5129_v54  ;;  %4502 = vmatpush.bf16.msrb.mxu0 %v5449_v27  ;;  %v6086_v54 = vld [vmem:[%s11042_s11 + $0x908] sm:$0xf0]  ;;  %v6809_v27 = vor.u32 %v7370_v40, %v6806_v21  ;;  %v5969_v21 = vor.u32 %v7160_v29, %v5966_v31 }
 0x32f   :  { %4480 = vmatpush.bf16.msrb.mxu1 %v6565_v57  ;;  %v6089_v61 = vor.u32 %v7190_v34, %v6086_v54 }
 0x330   :  { %4467 = vmatpush.bf16.msra.mxu3 %v6245_v1  ;;  %v4237_v59 = vpop.f32.mrf.mxu2  ;;  %v6529_v1 = vor.u32 %v7300_v56, %v6526_v30  ;;  %v3782_v57 = vsel %vm3753_vm8, %v6809_v27, 0  ;;  %v6649_v30 = vor.u32 %v7330_v50, %v6646_v52 }
 0x331   :  { %v7320_v59 = vld [vmem:[%s11042_s11 + $0xcf4] sm:$0xf] }
 0x332   :  { %4490 = vmatpush.bf16.msrb.mxu2 %v5089_v7  ;;  %4503 = vmatpush.bf16.msrb.mxu0 %v5409_v8  ;;  %v7290_v7 = vld [vmem:[%s11042_s11 + $0xc04] sm:$0xf] }
 0x333   :  { %4512 = vmatpush.bf16.msra.mxu1 %v5889_v2  ;;  %4468 = vmatmul.bf16.vlgmr.msra.gmra.mxu3 %v8577_v60  ;;  %v5729_v2 = vor.u32 %v7100_v41, %v5726_v63  ;;  %v6489_v16 = vor.u32 %v7290_v7, %v6486_v11  ;;  %v6286_v7 = vld [vmem:[%s11042_s11 + $0xa98] sm:$0xf0]  ;;  %v7310_v11 = vld [vmem:[%s11042_s11 + $0xca4] sm:$0xf] }
 0x334   :  { %4525 = vmatpush.bf16.msrb.mxu3 %v6209_v13  ;;  %6818 = vmatmul.msk.bf16.vlgmr.msrb.gmra.mxu1 %vm3749_vm15, %v8585_v5  ;;  %v6049_v13 = vor.u32 %v7180_v0, %v6046_v6  ;;  %v7240_v6 = vld [vmem:[%s11042_s11 + $0xa74] sm:$0xf]  ;;  %v6569_v14 = vor.u32 %v7310_v11, %v6566_v33 }
 0x335   :  { %v10893_v8 = vpop.f32.mrf.mxu1 }
 0x336   :  { %4491 = vmatpush.bf16.msrb.mxu2 %v5049_v9  ;;  %4504 = vmatpush.bf16.msrb.mxu0 %v5369_v22  ;;  %v7350_v9 = vld [vmem:[%s11042_s11 + $0xde4] sm:$0xf]  ;;  %v6726_v22 = vld [vmem:[%s11042_s11 + $0xe08] sm:$0xf0] }
 0x337   :  { %4513 = vmatpush.bf16.msra.mxu1 %v5849_v47  ;;  %v6449_v47 = vor.u32 %v7280_v18, %v6446_v20 }
 0x338   :  { %4526 = vmatpush.bf16.msrb.mxu3 %v6169_v28  ;;  %v6729_v28 = vor.u32 %v7350_v9, %v6726_v22 }
 0x33a   :  { %4492 = vmatpush.bf16.msrb.mxu2 %v5009_v42  ;;  %4505 = vmatpush.bf16.msrb.mxu0 %v5329_v43  ;;  %v4274_v26 = vpop.f32.mrf.mxu3  ;;  %v7070_v42 = vld [vmem:[%s11042_s11 + $0x524] sm:$0xf]  ;;  %v5606_v43 = vld [vmem:[%s11042_s11 + $0x548] sm:$0xf0] }
 0x33b   :  { %4514 = vmatpush.bf16.msra.mxu1 %v5809_v46  ;;  %v5926_v46 = vld [vmem:[%s11042_s11 + $0x7c8] sm:$0xf0]  ;;  %v5609_v34 = vor.u32 %v7070_v42, %v5606_v43 }
 0x33c   :  { %4527 = vmatpush.bf16.msrb.mxu3 %v6129_v48  ;;  %v7260_v48 = vld [vmem:[%s11042_s11 + $0xb14] sm:$0xf]  ;;  %v5929_v54 = vor.u32 %v7150_v45, %v5926_v46  ;;  %v1380_v46 = vld [vmem:[%s11044_s12 + $0x8] sm:$0x3] }
 0x33d   :  { %v4263_v35 = vpop.f32.mrf.mxu1  ;;  %v6369_v56 = vor.u32 %v7260_v48, %v6366_v49  ;;  %v1397_v49 = vperm.slane %v1380_v46, 0 }
 0x33e   :  { %4493 = vmatpush.bf16.msrb.mxu2 %v4969_v55  ;;  %4506 = vmatpush.bf16.msrb.mxu0 %v5289_v58  ;;  %v4287_v25 = vpop.f32.mrf.mxu0  ;;  %v7250_v55 = vld [vmem:[%s11042_s11 + $0xac4] sm:$0xf]  ;;  %v6326_v58 = vld [vmem:[%s11042_s11 + $0xae8] sm:$0xf0] }
 0x33f   :  { %4515 = vmatpush.bf16.msra.mxu1 %v5769_v19  ;;  %v6606_v19 = vld [vmem:[%s11042_s11 + $0xd18] sm:$0xf0]  ;;  %v6329_v0 = vor.u32 %v7250_v55, %v6326_v58 }
 0x340   :  { %4528 = vmatpush.bf16.msrb.mxu3 %v6089_v61  ;;  %v7382_v61 = vld [vmem:[%s11044_s12] sm:$0xff] }
 0x341   :  { %4494 = vmatmul.bf16.vlgmr.msrb.gmra.mxu2 %v8404_v3  ;;  %4507 = vmatmul.bf16.vlgmr.msrb.gmra.mxu0 %v8412_v10  ;;  %v7080_v3 = vld [vmem:[%s11042_s11 + $0x574] sm:$0xf]  ;;  %v5646_v10 = vld [vmem:[%s11042_s11 + $0x598] sm:$0xf0]  ;;  %v1395_v41 = vperm.slane %v7382_v61, 6 }
 0x342   :  { %4538 = vmatpush.bf16.msra.mxu2 %v6529_v1  ;;  %4552 = vmatpush.bf16.msra.mxu0 %v3782_v57  ;;  %v5649_v40 = vor.u32 %v7080_v3, %v5646_v10  ;;  %v4276_v27 = vpop.f32.mrf.mxu3  ;;  %v6609_v1 = vor.u32 %v7320_v59, %v6606_v19  ;;  %v1396_v10 = vperm.slane %v7382_v61, 7 }
 0x343   :  { %4516 = vmatpush.bf16.msra.mxu1 %v5729_v2  ;;  %v4262_v51 = vadd.f32 %v10893_v8, %v1395_v41 }
 0x344   :  { %4529 = vmatpush.bf16.msrb.mxu3 %v6049_v13  ;;  %v6289_v13 = vor.u32 %v7240_v6, %v6286_v7  ;;  %v1398_v6 = vperm.slane %v1380_v46, 1 }
 0x345   :  { %v4275_v2 = vadd.f32 %v4274_v26, %v4262_v51 }
 0x346   :  { %4539 = vmatpush.bf16.msra.mxu2 %v6489_v16  ;;  %4553 = vmatpush.bf16.msra.mxu0 %v6769_v37  ;;  %v4289_v63 = vpop.f32.mrf.mxu0  ;;  %v6246_v16 = vld [vmem:[%s11042_s11 + $0xa48] sm:$0xf0] }
 0x347   :  { %4517 = vmatpush.bf16.msra.mxu1 %v5689_v23  ;;  %v4288_v37 = vadd.f32 %v4287_v25, %v4275_v2  ;;  %v6249_v8 = vor.u32 %v7230_v15, %v6246_v16 }
 0x348   :  { %4530 = vmatpush.bf16.msrb.mxu3 %v6009_v24  ;;  %v4300_v57 = vpop.f32.mrf.mxu2 }
 0x349   :  { %v4301_v17 = vadd.f32 %v4300_v57, %v4288_v37 }
 0x34a   :  { %4540 = vmatpush.bf16.msra.mxu2 %v6449_v47  ;;  %4554 = vmatpush.bf16.msra.mxu0 %v6729_v28 }
 0x34b   :  { %4518 = vmatpush.bf16.msra.mxu1 %v5649_v40 }
 0x34c   :  { %4531 = vmatpush.bf16.msrb.mxu3 %v5969_v21 }
 0x34e   :  { %4541 = vmatpush.bf16.msra.mxu2 %v6409_v44  ;;  %4555 = vmatpush.bf16.msra.mxu0 %v6689_v4 }
 0x34f   :  { %4519 = vmatpush.bf16.msra.mxu1 %v5609_v34 }
 0x350   :  { %4532 = vmatpush.bf16.msrb.mxu3 %v5929_v54 }
 0x352   :  { %4542 = vmatpush.bf16.msra.mxu2 %v6369_v56  ;;  %4556 = vmatpush.bf16.msra.mxu0 %v6649_v30 }
 0x353   :  { %4520 = vmatmul.bf16.vlgmr.msra.gmra.mxu1 %v8473_v53  ;;  %4533 = vmatmul.bf16.vlgmr.msrb.gmra.mxu3 %v8484_v62  ;;  %v4302_v53 = vpop.f32.mrf.mxu2 }
 0x355   :  { %v4313_v62 = vpop.f32.mrf.mxu1 }
 0x356   :  { %4543 = vmatpush.bf16.msra.mxu2 %v6329_v0  ;;  %4557 = vmatpush.bf16.msra.mxu0 %v6609_v1  ;;  %v4314_v12 = vadd.f32 %v4313_v62, %v4301_v17  ;;  %v4326_v18 = vpop.f32.mrf.mxu3 }
 0x358   :  { %v4327_v20 = vadd.f32 %v4326_v18, %v4314_v12 }
 0x35a   :  { %4544 = vmatpush.bf16.msra.mxu2 %v6289_v13  ;;  %4558 = vmatpush.bf16.msra.mxu0 %v6569_v14  ;;  %4570 = vst [vmem:[%s11045_s13 + $0x30] sm:$0xff] %v4327_v20 }
 0x35d   :  { %6819 = vmatmul.msk.bf16.vlgmr.msra.gmra.mxu0 %vm3749_vm15, %v8585_v5  ;;  %v4315_v9 = vpop.f32.mrf.mxu1 }
 0x35e   :  { %4545 = vmatpush.bf16.msra.mxu2 %v6249_v8  ;;  %v4339_v22 = vpop.f32.mrf.mxu0  ;;  %v4328_v23 = vpop.f32.mrf.mxu3 }
 0x35f   :  { %v4340_v28 = vadd.f32 %v4339_v22, %v1396_v10 }
 0x361   :  { %4546 = vmatmul.bf16.vlgmr.msra.gmra.mxu2 %v8577_v60 }
 0x366   :  { %v4341_v24 = vpop.f32.mrf.mxu0 }
 0x368   :  { %v4352_v26 = vpop.f32.mrf.mxu2 }
 0x369   :  { %v4353_v29 = vadd.f32 %v4352_v26, %v4340_v28 }
 0x370   :  { %v4354_v3 = vpop.f32.mrf.mxu2 }
 0x375   :  { %v4378_v47 = vpop.f32.mrf.mxu1 }
 0x376   :  { %v4365_v5 = vpop.f32.mrf.mxu3 }
 0x377   :  { %v4366_v31 = vadd.f32 %v4365_v5, %v4353_v29 }
 0x379   :  { %v4379_v60 = vadd.f32 %v4378_v47, %v4366_v31 }
 0x37d   :  { %v4380_v32 = vpop.f32.mrf.mxu1 }
 0x37e   :  { %v4391_v35 = vpop.f32.mrf.mxu0  ;;  %v4367_v36 = vpop.f32.mrf.mxu3 }
 0x37f   :  { %v4392_v38 = vadd.f32 %v4391_v35, %v4379_v60 }
 0x384   :  { %v4404_v39 = vpop.f32.mrf.mxu2 }
 0x385   :  { %v4405_v25 = vadd.f32 %v4404_v39, %v4392_v38 }
 0x386   :  { %v4393_v40 = vpop.f32.mrf.mxu0 }
 0x387   :  { %4571 = vst [vmem:[%s11045_s13 + $0x38] sm:$0xff] %v4405_v25 }
 0x38c   :  { %v4406_v21 = vpop.f32.mrf.mxu2 }
 0x395   :  { %v4430_v42 = vpop.f32.mrf.mxu1 }
 0x396   :  { %v4417_v43 = vpop.f32.mrf.mxu3 }
 0x397   :  { %v4418_v52 = vadd.f32 %v4417_v43, %v1397_v49 }
 0x399   :  { %v4431_v54 = vadd.f32 %v4430_v42, %v4418_v52 }
 0x39d   :  { %v4432_v44 = vpop.f32.mrf.mxu1 }
 0x39e   :  { %v4456_v4 = vpop.f32.mrf.mxu0  ;;  %v4419_v45 = vpop.f32.mrf.mxu3 }
 0x3a4   :  { %v4443_v48 = vpop.f32.mrf.mxu2 }
 0x3a5   :  { %v4444_v56 = vadd.f32 %v4443_v48, %v4431_v54 }
 0x3a6   :  { %v4458_v50 = vpop.f32.mrf.mxu0 }
 0x3a7   :  { %v4457_v30 = vadd.f32 %v4456_v4, %v4444_v56 }
 0x3ac   :  { %v4445_v34 = vpop.f32.mrf.mxu2 }
 0x3b1   :  { %v4482_v27 = vpop.f32.mrf.mxu1 }
 0x3b6   :  { %v4469_v55 = vpop.f32.mrf.mxu3 }
 0x3b7   :  { %v4470_v58 = vadd.f32 %v4469_v55, %v4457_v30 }
 0x3b9   :  { %v4484_v59 = vpop.f32.mrf.mxu1  ;;  %v4483_v19 = vadd.f32 %v4482_v27, %v4470_v58 }
 0x3bb   :  { %4572 = vst [vmem:[%s11045_s13 + $0x40] sm:$0xff] %v4483_v19 }
 0x3be   :  { %v4508_v61 = vpop.f32.mrf.mxu0  ;;  %v4471_v41 = vpop.f32.mrf.mxu3 }
 0x3c4   :  { %v4495_v63 = vpop.f32.mrf.mxu2 }
 0x3c5   :  { %v4496_v51 = vadd.f32 %v4495_v63, %v1398_v6 }
 0x3c6   :  { %v4510_v0 = vpop.f32.mrf.mxu0 }
 0x3c7   :  { %v4509_v2 = vadd.f32 %v4508_v61, %v4496_v51 }
 0x3cc   :  { %v4497_v1 = vpop.f32.mrf.mxu2 }
 0x3d0   :  { %v4521_v57 = vpop.f32.mrf.mxu1 }
 0x3d1   :  { %v4522_v14 = vadd.f32 %v4521_v57, %v4509_v2 }
 0x3d6   :  { %v4534_v7 = vpop.f32.mrf.mxu3 }
 0x3d7   :  { %v4535_v16 = vadd.f32 %v4534_v7, %v4522_v14 }
 0x3d8   :  { %v4523_v11 = vpop.f32.mrf.mxu1 }
 0x3da   :  { %v4560_v33 = vpop.f32.mrf.mxu0 }
 0x3de   :  { %v4536_v13 = vpop.f32.mrf.mxu3 }
 0x3e2   :  { %v4562_v15 = vpop.f32.mrf.mxu0 }
 0x3e4   :  { %v4547_v37 = vpop.f32.mrf.mxu2 }
 0x3e5   :  { %v4548_v8 = vadd.f32 %v4547_v37, %v4535_v16 }
 0x3e7   :  { %v4561_v53 = vadd.f32 %v4560_v33, %v4548_v8 }
 0x3e9   :  { %4573 = vst [vmem:[%s11045_s13 + $0x48] sm:$0xff] %v4561_v53 }
 0x3ec   :  { %v4549_v17 = vpop.f32.mrf.mxu2 }

</bundles_post_ra>
